<compile_context>
chip_gen: v5e
topology: v5e:2x2
jax: 0.10.0
libtpu: 0.0.40
codegen_flags: <defaults>
</compile_context>

<pallas_src>
import functools

import jax
import jax.numpy as jnp
from jax.experimental import pallas as pl
from jax.experimental.pallas import tpu as pltpu


# ----------------------------------------------------------------------------
# helpers
# ----------------------------------------------------------------------------
def _round_up(x, m):
    return (x + m - 1) // m * m


def _pad2d(a, rows, cols):
    return jnp.pad(a, ((0, rows - a.shape[0]), (0, cols - a.shape[1])))


def _vmem_limit_bytes():
    """~3/4 of physical VMEM (v7x: 48 MiB of 64; v5e/v6e: 96 MiB of 128)."""
    cap = None
    try:
        cap = getattr(pltpu.get_tpu_info(), "vmem_capacity_bytes", None)
    except Exception:  # pragma: no cover - conservative fallback
        cap = None
    if not cap:
        cap = 64 * 1024 * 1024
    return int(min(cap * 3 // 4, 100 * 1024 * 1024))


def _choose_tile_b(B, Q, vmem_limit):
    """Batch tile: output block needs tile_b % 8 == 0 or tile_b == B.

    VMEM is budgeted with the *lane-padded* size of the streamed (tile_b, Q, C)
    block (C occupies a full 128-lane vreg row), per the review."""
    def xbytes(tb):  # double-buffered, bf16, sublanes padded to 16, lanes to 128
        return 2 * tb * (-(-Q // 16) * 16) * 128 * 2

    cands = [d for d in range(1, B + 1) if B % d == 0 and (d % 8 == 0 or d == B)]
    fitting = [d for d in cands if xbytes(d) <= vmem_limit * 2 // 5]
    pool = fitting if fitting else [min(cands)]
    multi = [d for d in pool if d <= 32 and (B // d) >= 2]  # >=2 steps for v7x megacore
    return max(multi if multi else pool)


def _choose_chunk_rows(H, Wp, tile_b, Fp, budget_bytes=1 << 20):
    """Rows of conv output per in-kernel chunk: keep the f32 intermediate
    (tile_b, CH*Wp, Fp) around ~1 MiB; prefer a 16-aligned chunk stride so the
    dynamic-slice path stays aligned for packed dtypes."""
    cap = max(1, budget_bytes // max(1, tile_b * Wp * Fp * 4))
    best = None
    for ch in range(min(H, cap), 0, -1):
        if H % ch:
            continue
        if best is None:
            best = ch
        if (ch * Wp) % 16 == 0:
            return ch
    if best is not None and H // best <= 8:   # few chunks -> static-slice path
        return best
    return H                                  # single chunk fallback (always aligned)


# ----------------------------------------------------------------------------
# fused kernel: in-kernel 3x3 conv (9 shifted matmuls) + ReLU + chunked GAP
#               accumulation + projector epilogue + L2 normalize
#
#   x_ref    : (TB, Q, C)   bf16   flattened zero-padded NHWC image(s),
#                                  Q = (H+2)*(W+2) + 8 tail pad for halo reads
#   wc_ref   : (9, C, Fp)   f32    conv weight, tap-major (tap = di*3 + dj)
#   bc_ref   : (1, Fp)      f32    conv bias
#   mask_ref : (R, 1)       f32    1.0 on valid columns (j < W), 0.0 on pad cols
#   w1/b1    : (Fp, Fp)/(1, Fp)    projector layer 1 (bf16 / f32)
#   w2/b2    : (Fp, Lp)/(1, Lp)    projector layer 2 (bf16 / f32)
#   o_ref    : (TB, Lp)     f32    unit-norm rows (padded lanes are 0)
# ----------------------------------------------------------------------------
def _fused_kernel(cfg, x_ref, wc_ref, bc_ref, mask_ref,
                  w1_ref, b1_ref, w2_ref, b2_ref, o_ref):
    H, W, Wp, CH, n_chunks = cfg
    TB, Q, C = x_ref.shape
    Fp = wc_ref.shape[2]
    R = CH * Wp                      # conv rows computed per chunk (pad cols masked)
    L = (CH + 2) * Wp + 8            # loaded window: chunk + 2 halo rows + tail pad

    # Hoisted once per grid step (broadcast_in_dim is not CSE'd inside loops).
    w_taps = [jnp.broadcast_to(wc_ref[t][None], (TB, C, Fp)) for t in range(9)]
    neg_b = -bc_ref[...].reshape(1, 1, Fp)     # ReLU(x+b) = max(x, -b) + b (b deferred)
    mask = mask_ref[...].reshape(1, R, 1)      # zero out the 2 pad columns per row

    def chunk_contrib(base):
        # Aligned (or static) dynamic slice on the flattened-row dim; upcast the
        # small window to f32 so the 9 statically-shifted sub-slices below are
        # plain 32-bit relayouts (no packed-dtype alignment concerns).
        xs_win = x_ref[:, pl.ds(base, L), :].astype(jnp.float32)      # (TB, L, C)
        conv = None
        for di in range(3):
            for dj in range(3):
                off = di * Wp + dj                                    # static shift
                xs = xs_win[:, off:off + R, :]                        # (TB, R, C)
                t = jnp.einsum("brc,bcf->brf", xs, w_taps[di * 3 + dj],
                               preferred_element_type=jnp.float32)
                conv = t if conv is None else conv + t
        # shifted ReLU + pad-column mask, then this chunk's partial GAP sum
        return (jnp.maximum(conv, neg_b) * mask).sum(axis=1)          # (TB, Fp) f32

    if n_chunks <= 8:
        # static path: every slice offset is a compile-time constant
        acc = chunk_contrib(0)
        for ci in range(1, n_chunks):
            acc = acc + chunk_contrib(ci * CH * Wp)
    else:
        def body(ci, acc):
            base = pl.multiple_of(ci * (CH * Wp), 16)                 # aligned stride
            return acc + chunk_contrib(base)
        acc = jax.lax.fori_loop(0, n_chunks, body,
                                jnp.zeros((TB, Fp), jnp.float32))

    # ---- epilogue: GAP finalize (+ deferred conv bias), projector, normalize ----
    feats = acc * (1.0 / float(H * W)) + bc_ref[...]                  # (TB, Fp) f32
    h = jnp.dot(feats.astype(jnp.bfloat16), w1_ref[...],
                preferred_element_type=jnp.float32) + b1_ref[...]
    h = jnp.maximum(h, 0.0)
    z = jnp.dot(h.astype(jnp.bfloat16), w2_ref[...],
                preferred_element_type=jnp.float32) + b2_ref[...]
    # F.normalize: z / max(||z||, 1e-12) == z * rsqrt(max(||z||^2, 1e-24))
    ss = jnp.maximum(jnp.sum(z * z, axis=-1, keepdims=True), 1e-24)
    o_ref[...] = z * jax.lax.rsqrt(ss)


# ----------------------------------------------------------------------------
# wrapper
# ----------------------------------------------------------------------------
def simclr_forward(x, params, *, tile_b=None, chunk_rows=None):
    """x: (B, C_in, H, W) float32 NCHW. Returns z: (B, latent_dim), unit rows."""
    B, C, H, W = x.shape
    conv_w, conv_b = params["conv_w"], params["conv_b"]
    w1, b1, w2, b2 = params["w1"], params["b1"], params["w2"], params["b2"]
    F_dim, L_dim = conv_w.shape[0], w2.shape[1]
    Hp, Wp = H + 2, W + 2
    Q = Hp * Wp + 8                         # +8 tail zeros for last-chunk halo reads
    Fp = _round_up(F_dim, 128)              # lane-pad feature dim
    Lp = _round_up(L_dim, 128)              # lane-pad latent dim

    vmem_limit = _vmem_limit_bytes()
    if tile_b is None:
        tile_b = _choose_tile_b(B, Q, vmem_limit)
    assert B % tile_b == 0 and (tile_b % 8 == 0 or tile_b == B)
    if chunk_rows is None:
        chunk_rows = _choose_chunk_rows(H, Wp, tile_b, Fp)
    assert H % chunk_rows == 0
    n_chunks = H // chunk_rows
    if n_chunks > 8:
        assert (chunk_rows * Wp) % 16 == 0, "dynamic chunk path needs 16-aligned stride"
    R = chunk_rows * Wp

    # ---- host glue: NO im2col -- only transpose + zero-pad + flatten (~1x traffic) ----
    xq = jnp.transpose(x, (0, 2, 3, 1))                            # NCHW -> NHWC
    xq = jnp.pad(xq, ((0, 0), (1, 1), (1, 1), (0, 0)))             # 3x3 conv, pad=1
    xq = xq.reshape(B, Hp * Wp, C)
    xq = jnp.pad(xq, ((0, 0), (0, 8), (0, 0))).astype(jnp.bfloat16)  # (B, Q, C)

    wc = conv_w.transpose(2, 3, 1, 0).reshape(9, C, F_dim)         # (tap, c, f)
    wc = jnp.pad(wc, ((0, 0), (0, 0), (0, Fp - F_dim))).astype(jnp.float32)
    bc = _pad2d(conv_b.reshape(1, F_dim), 1, Fp).astype(jnp.float32)
    w1p = _pad2d(w1, Fp, Fp).astype(jnp.bfloat16)
    b1p = _pad2d(b1.reshape(1, F_dim), 1, Fp).astype(jnp.float32)
    w2p = _pad2d(w2, Fp, Lp).astype(jnp.bfloat16)
    b2p = _pad2d(b2.reshape(1, L_dim), 1, Lp).astype(jnp.float32)

    col = jnp.arange(R, dtype=jnp.int32) % Wp                      # chunk-row -> column j
    mask = (col < W).astype(jnp.float32).reshape(R, 1)

    grid = (B // tile_b,)
    const2 = lambda b: (0, 0)                                      # resident weights
    const3 = lambda b: (0, 0, 0)
    cfg = (H, W, Wp, chunk_rows, n_chunks)

    z_pad = pl.pallas_call(
        functools.partial(_fused_kernel, cfg),
        out_shape=jax.ShapeDtypeStruct((B, Lp), jnp.float32),
        grid_spec=pltpu.PrefetchScalarGridSpec(
            num_scalar_prefetch=0,
            grid=grid,
            in_specs=[
                pl.BlockSpec((tile_b, Q, C), lambda b: (b, 0, 0)),  # streamed images
                pl.BlockSpec((9, C, Fp), const3),                   # conv weight
                pl.BlockSpec((1, Fp), const2),                      # conv bias
                pl.BlockSpec((R, 1), const2),                       # valid-column mask
                pl.BlockSpec((Fp, Fp), const2),                     # projector w1
                pl.BlockSpec((1, Fp), const2),                      # projector b1
                pl.BlockSpec((Fp, Lp), const2),                     # projector w2
                pl.BlockSpec((1, Lp), const2),                      # projector b2
            ],
            out_specs=pl.BlockSpec((tile_b, Lp), lambda b: (b, 0)),
        ),
        compiler_params=pltpu.CompilerParams(
            dimension_semantics=("parallel",),
            vmem_limit_bytes=vmem_limit,
        ),
    )(xq, wc, bc, mask, w1p, b1p, w2p, b2p)

    return z_pad[:, :L_dim]


def init_params(key, c_in, feature_dim, latent_dim):
    k1, k2, k3 = jax.random.split(key, 3)
    return {
        "conv_w": 0.1 * jax.random.normal(k1, (feature_dim, c_in, 3, 3), jnp.float32),
        "conv_b": jnp.zeros((feature_dim,), jnp.float32),
        "w1": 0.1 * jax.random.normal(k2, (feature_dim, feature_dim), jnp.float32),
        "b1": jnp.zeros((feature_dim,), jnp.float32),
        "w2": 0.1 * jax.random.normal(k3, (feature_dim, latent_dim), jnp.float32),
        "b2": jnp.zeros((latent_dim,), jnp.float32),
    }


def simclr_reference(x, params):
    """Pure-JAX f32 reference (same math as the PyTorch module)."""
    y = jax.lax.conv_general_dilated(
        x, params["conv_w"], window_strides=(1, 1), padding=((1, 1), (1, 1)),
        dimension_numbers=("NCHW", "OIHW", "NCHW"))
    y = jax.nn.relu(y + params["conv_b"][None, :, None, None])
    feats = y.mean(axis=(2, 3))
    h = jax.nn.relu(feats @ params["w1"] + params["b1"])
    z = h @ params["w2"] + params["b2"]
    n = jnp.maximum(jnp.linalg.norm(z, axis=-1, keepdims=True), 1e-12)
    return z / n


if __name__ == "__main__":
    B, C_in, H, W = 2, 4, 16, 16
    feature_dim, latent_dim = 32, 16

    key = jax.random.PRNGKey(0)
    kx, kp = jax.random.split(key)
    x = jax.random.normal(kx, (B, C_in, H, W), jnp.float32)
    params = init_params(kp, C_in, feature_dim, latent_dim)

    # chunk_rows=8 -> 2 in-kernel row chunks, exercising the chunked GAP accumulation.
    fwd = jax.jit(functools.partial(simclr_forward, chunk_rows=8))
    z = jax.block_until_ready(fwd(x, params))

    assert z.shape == (B, latent_dim)
    # rows should be unit-norm (F.normalize semantics)
    norms = jnp.linalg.norm(z, axis=-1)
    assert bool(jnp.all(jnp.abs(norms - 1.0) < 1e-3))
    # compare against the f32 reference (bf16 matmul inputs -> loose tolerance)
    z_ref = simclr_reference(x, params)
    assert bool(jnp.max(jnp.abs(z - z_ref)) < 2e-2), "mismatch vs f32 reference"
    print("KERNEL_OK")
</pallas_src>

<mosaic_0001>
module attributes {stable_mosaic.version = 11 : i64} {
  func.func @_fused_kernel(%arg0: i32, %arg1: memref<2x332x4xbf16, #tpu.memory_space<vmem>>, %arg2: memref<9x4x128xf32, #tpu.memory_space<vmem>>, %arg3: memref<1x128xf32, #tpu.memory_space<vmem>>, %arg4: memref<144x1xf32, #tpu.memory_space<vmem>>, %arg5: memref<128x128xbf16, #tpu.memory_space<vmem>>, %arg6: memref<1x128xf32, #tpu.memory_space<vmem>>, %arg7: memref<128x128xbf16, #tpu.memory_space<vmem>>, %arg8: memref<1x128xf32, #tpu.memory_space<vmem>>, %arg9: memref<2x128xf32, #tpu.memory_space<vmem>>) attributes {dimension_semantics = [#tpu.dimension_semantics<parallel>], iteration_bounds = array<i64: 1>, scalar_prefetch = 0 : i64, scratch_operands = 0 : i64, tpu.core_type = #tpu.core_type<tc>, window_params = [{transform_indices = @transform_0, window_bounds = array<i64: 2, 332, 4>}, {pipeline_mode = #tpu.pipeline_mode<synchronous>, transform_indices = @transform_1, window_bounds = array<i64: 9, 4, 128>}, {pipeline_mode = #tpu.pipeline_mode<synchronous>, transform_indices = @transform_2, window_bounds = array<i64: 1, 128>}, {pipeline_mode = #tpu.pipeline_mode<synchronous>, transform_indices = @transform_3, window_bounds = array<i64: 144, 1>}, {pipeline_mode = #tpu.pipeline_mode<synchronous>, transform_indices = @transform_4, window_bounds = array<i64: 128, 128>}, {pipeline_mode = #tpu.pipeline_mode<synchronous>, transform_indices = @transform_5, window_bounds = array<i64: 1, 128>}, {pipeline_mode = #tpu.pipeline_mode<synchronous>, transform_indices = @transform_6, window_bounds = array<i64: 128, 128>}, {pipeline_mode = #tpu.pipeline_mode<synchronous>, transform_indices = @transform_7, window_bounds = array<i64: 1, 128>}, {transform_indices = @transform_8, window_bounds = array<i64: 2, 128>}]} {
    %c0 = arith.constant 0 : index
    %c0_0 = arith.constant 0 : index
    %c0_1 = arith.constant 0 : index
    %0 = vector.load %arg2[%c0, %c0_0, %c0_1] : memref<9x4x128xf32, #tpu.memory_space<vmem>>, vector<1x4x128xf32>
    %1 = vector.shape_cast %0 : vector<1x4x128xf32> to vector<4x128xf32>
    %2 = vector.shape_cast %1 : vector<4x128xf32> to vector<1x4x128xf32>
    %3 = vector.shape_cast %2 : vector<1x4x128xf32> to vector<1x4x128xf32>
    %4 = vector.broadcast %3 : vector<1x4x128xf32> to vector<2x4x128xf32>
    %c1 = arith.constant 1 : index
    %c0_2 = arith.constant 0 : index
    %c0_3 = arith.constant 0 : index
    %5 = vector.load %arg2[%c1, %c0_2, %c0_3] : memref<9x4x128xf32, #tpu.memory_space<vmem>>, vector<1x4x128xf32>
    %6 = vector.shape_cast %5 : vector<1x4x128xf32> to vector<4x128xf32>
    %7 = vector.shape_cast %6 : vector<4x128xf32> to vector<1x4x128xf32>
    %8 = vector.shape_cast %7 : vector<1x4x128xf32> to vector<1x4x128xf32>
    %9 = vector.broadcast %8 : vector<1x4x128xf32> to vector<2x4x128xf32>
    %c2 = arith.constant 2 : index
    %c0_4 = arith.constant 0 : index
    %c0_5 = arith.constant 0 : index
    %10 = vector.load %arg2[%c2, %c0_4, %c0_5] : memref<9x4x128xf32, #tpu.memory_space<vmem>>, vector<1x4x128xf32>
    %11 = vector.shape_cast %10 : vector<1x4x128xf32> to vector<4x128xf32>
    %12 = vector.shape_cast %11 : vector<4x128xf32> to vector<1x4x128xf32>
    %13 = vector.shape_cast %12 : vector<1x4x128xf32> to vector<1x4x128xf32>
    %14 = vector.broadcast %13 : vector<1x4x128xf32> to vector<2x4x128xf32>
    %c3 = arith.constant 3 : index
    %c0_6 = arith.constant 0 : index
    %c0_7 = arith.constant 0 : index
    %15 = vector.load %arg2[%c3, %c0_6, %c0_7] : memref<9x4x128xf32, #tpu.memory_space<vmem>>, vector<1x4x128xf32>
    %16 = vector.shape_cast %15 : vector<1x4x128xf32> to vector<4x128xf32>
    %17 = vector.shape_cast %16 : vector<4x128xf32> to vector<1x4x128xf32>
    %18 = vector.shape_cast %17 : vector<1x4x128xf32> to vector<1x4x128xf32>
    %19 = vector.broadcast %18 : vector<1x4x128xf32> to vector<2x4x128xf32>
    %c4 = arith.constant 4 : index
    %c0_8 = arith.constant 0 : index
    %c0_9 = arith.constant 0 : index
    %20 = vector.load %arg2[%c4, %c0_8, %c0_9] : memref<9x4x128xf32, #tpu.memory_space<vmem>>, vector<1x4x128xf32>
    %21 = vector.shape_cast %20 : vector<1x4x128xf32> to vector<4x128xf32>
    %22 = vector.shape_cast %21 : vector<4x128xf32> to vector<1x4x128xf32>
    %23 = vector.shape_cast %22 : vector<1x4x128xf32> to vector<1x4x128xf32>
    %24 = vector.broadcast %23 : vector<1x4x128xf32> to vector<2x4x128xf32>
    %c5 = arith.constant 5 : index
    %c0_10 = arith.constant 0 : index
    %c0_11 = arith.constant 0 : index
    %25 = vector.load %arg2[%c5, %c0_10, %c0_11] : memref<9x4x128xf32, #tpu.memory_space<vmem>>, vector<1x4x128xf32>
    %26 = vector.shape_cast %25 : vector<1x4x128xf32> to vector<4x128xf32>
    %27 = vector.shape_cast %26 : vector<4x128xf32> to vector<1x4x128xf32>
    %28 = vector.shape_cast %27 : vector<1x4x128xf32> to vector<1x4x128xf32>
    %29 = vector.broadcast %28 : vector<1x4x128xf32> to vector<2x4x128xf32>
    %c6 = arith.constant 6 : index
    %c0_12 = arith.constant 0 : index
    %c0_13 = arith.constant 0 : index
    %30 = vector.load %arg2[%c6, %c0_12, %c0_13] : memref<9x4x128xf32, #tpu.memory_space<vmem>>, vector<1x4x128xf32>
    %31 = vector.shape_cast %30 : vector<1x4x128xf32> to vector<4x128xf32>
    %32 = vector.shape_cast %31 : vector<4x128xf32> to vector<1x4x128xf32>
    %33 = vector.shape_cast %32 : vector<1x4x128xf32> to vector<1x4x128xf32>
    %34 = vector.broadcast %33 : vector<1x4x128xf32> to vector<2x4x128xf32>
    %c7 = arith.constant 7 : index
    %c0_14 = arith.constant 0 : index
    %c0_15 = arith.constant 0 : index
    %35 = vector.load %arg2[%c7, %c0_14, %c0_15] : memref<9x4x128xf32, #tpu.memory_space<vmem>>, vector<1x4x128xf32>
    %36 = vector.shape_cast %35 : vector<1x4x128xf32> to vector<4x128xf32>
    %37 = vector.shape_cast %36 : vector<4x128xf32> to vector<1x4x128xf32>
    %38 = vector.shape_cast %37 : vector<1x4x128xf32> to vector<1x4x128xf32>
    %39 = vector.broadcast %38 : vector<1x4x128xf32> to vector<2x4x128xf32>
    %c8 = arith.constant 8 : index
    %c0_16 = arith.constant 0 : index
    %c0_17 = arith.constant 0 : index
    %40 = vector.load %arg2[%c8, %c0_16, %c0_17] : memref<9x4x128xf32, #tpu.memory_space<vmem>>, vector<1x4x128xf32>
    %41 = vector.shape_cast %40 : vector<1x4x128xf32> to vector<4x128xf32>
    %42 = vector.shape_cast %41 : vector<4x128xf32> to vector<1x4x128xf32>
    %43 = vector.shape_cast %42 : vector<1x4x128xf32> to vector<1x4x128xf32>
    %44 = vector.broadcast %43 : vector<1x4x128xf32> to vector<2x4x128xf32>
    %c0_18 = arith.constant 0 : index
    %c0_19 = arith.constant 0 : index
    %45 = vector.load %arg3[%c0_18, %c0_19] : memref<1x128xf32, #tpu.memory_space<vmem>>, vector<1x128xf32>
    %46 = vector.shape_cast %45 : vector<1x128xf32> to vector<1x1x128xf32>
    %cst = arith.constant 0.000000e+00 : f32
    %47 = vector.broadcast %cst : f32 to vector<1x1x128xf32>
    %48 = arith.subf %47, %46 : vector<1x1x128xf32>
    %c0_20 = arith.constant 0 : index
    %c0_21 = arith.constant 0 : index
    %49 = vector.load %arg4[%c0_20, %c0_21] : memref<144x1xf32, #tpu.memory_space<vmem>>, vector<144x1xf32>
    %50 = vector.shape_cast %49 : vector<144x1xf32> to vector<1x144x1xf32>
    %c0_22 = arith.constant 0 : index
    %c0_23 = arith.constant 0 : index
    %c0_24 = arith.constant 0 : index
    %51 = vector.load %arg1[%c0_22, %c0_23, %c0_24] : memref<2x332x4xbf16, #tpu.memory_space<vmem>>, vector<2x188x4xbf16>
    %52 = arith.extf %51 : vector<2x188x4xbf16> to vector<2x188x4xf32>
    %53 = vector.extract_strided_slice %52 {offsets = [0, 0, 0], sizes = [2, 144, 4], strides = [1, 1, 1]} : vector<2x188x4xf32> to vector<2x144x4xf32>
    "tpu.trace_start"() <{level = 10 : i32, message = "brc,bcf->brf"}> : () -> ()
    %cst_25 = arith.constant dense<0.000000e+00> : vector<2x144x128xf32>
    %54 = tpu.matmul %53, %4, %cst_25 {dimension_numbers = #tpu.dot_dimension_numbers<[2], [1], [1], [2], [0, 0, 0, 1, 1, 2], [0], [0]>} : vector<2x144x4xf32>, vector<2x4x128xf32>, vector<2x144x128xf32> -> vector<2x144x128xf32>
    "tpu.trace_stop"() : () -> ()
    %55 = vector.extract_strided_slice %52 {offsets = [0, 1, 0], sizes = [2, 144, 4], strides = [1, 1, 1]} : vector<2x188x4xf32> to vector<2x144x4xf32>
    "tpu.trace_start"() <{level = 10 : i32, message = "brc,bcf->brf"}> : () -> ()
    %cst_26 = arith.constant dense<0.000000e+00> : vector<2x144x128xf32>
    %56 = tpu.matmul %55, %9, %cst_26 {dimension_numbers = #tpu.dot_dimension_numbers<[2], [1], [1], [2], [0, 0, 0, 1, 1, 2], [0], [0]>} : vector<2x144x4xf32>, vector<2x4x128xf32>, vector<2x144x128xf32> -> vector<2x144x128xf32>
    "tpu.trace_stop"() : () -> ()
    %57 = arith.addf %54, %56 : vector<2x144x128xf32>
    %58 = vector.extract_strided_slice %52 {offsets = [0, 2, 0], sizes = [2, 144, 4], strides = [1, 1, 1]} : vector<2x188x4xf32> to vector<2x144x4xf32>
    "tpu.trace_start"() <{level = 10 : i32, message = "brc,bcf->brf"}> : () -> ()
    %cst_27 = arith.constant dense<0.000000e+00> : vector<2x144x128xf32>
    %59 = tpu.matmul %58, %14, %cst_27 {dimension_numbers = #tpu.dot_dimension_numbers<[2], [1], [1], [2], [0, 0, 0, 1, 1, 2], [0], [0]>} : vector<2x144x4xf32>, vector<2x4x128xf32>, vector<2x144x128xf32> -> vector<2x144x128xf32>
    "tpu.trace_stop"() : () -> ()
    %60 = arith.addf %57, %59 : vector<2x144x128xf32>
    %61 = vector.extract_strided_slice %52 {offsets = [0, 18, 0], sizes = [2, 144, 4], strides = [1, 1, 1]} : vector<2x188x4xf32> to vector<2x144x4xf32>
    "tpu.trace_start"() <{level = 10 : i32, message = "brc,bcf->brf"}> : () -> ()
    %cst_28 = arith.constant dense<0.000000e+00> : vector<2x144x128xf32>
    %62 = tpu.matmul %61, %19, %cst_28 {dimension_numbers = #tpu.dot_dimension_numbers<[2], [1], [1], [2], [0, 0, 0, 1, 1, 2], [0], [0]>} : vector<2x144x4xf32>, vector<2x4x128xf32>, vector<2x144x128xf32> -> vector<2x144x128xf32>
    "tpu.trace_stop"() : () -> ()
    %63 = arith.addf %60, %62 : vector<2x144x128xf32>
    %64 = vector.extract_strided_slice %52 {offsets = [0, 19, 0], sizes = [2, 144, 4], strides = [1, 1, 1]} : vector<2x188x4xf32> to vector<2x144x4xf32>
    "tpu.trace_start"() <{level = 10 : i32, message = "brc,bcf->brf"}> : () -> ()
    %cst_29 = arith.constant dense<0.000000e+00> : vector<2x144x128xf32>
    %65 = tpu.matmul %64, %24, %cst_29 {dimension_numbers = #tpu.dot_dimension_numbers<[2], [1], [1], [2], [0, 0, 0, 1, 1, 2], [0], [0]>} : vector<2x144x4xf32>, vector<2x4x128xf32>, vector<2x144x128xf32> -> vector<2x144x128xf32>
    "tpu.trace_stop"() : () -> ()
    %66 = arith.addf %63, %65 : vector<2x144x128xf32>
    %67 = vector.extract_strided_slice %52 {offsets = [0, 20, 0], sizes = [2, 144, 4], strides = [1, 1, 1]} : vector<2x188x4xf32> to vector<2x144x4xf32>
    "tpu.trace_start"() <{level = 10 : i32, message = "brc,bcf->brf"}> : () -> ()
    %cst_30 = arith.constant dense<0.000000e+00> : vector<2x144x128xf32>
    %68 = tpu.matmul %67, %29, %cst_30 {dimension_numbers = #tpu.dot_dimension_numbers<[2], [1], [1], [2], [0, 0, 0, 1, 1, 2], [0], [0]>} : vector<2x144x4xf32>, vector<2x4x128xf32>, vector<2x144x128xf32> -> vector<2x144x128xf32>
    "tpu.trace_stop"() : () -> ()
    %69 = arith.addf %66, %68 : vector<2x144x128xf32>
    %70 = vector.extract_strided_slice %52 {offsets = [0, 36, 0], sizes = [2, 144, 4], strides = [1, 1, 1]} : vector<2x188x4xf32> to vector<2x144x4xf32>
    "tpu.trace_start"() <{level = 10 : i32, message = "brc,bcf->brf"}> : () -> ()
    %cst_31 = arith.constant dense<0.000000e+00> : vector<2x144x128xf32>
    %71 = tpu.matmul %70, %34, %cst_31 {dimension_numbers = #tpu.dot_dimension_numbers<[2], [1], [1], [2], [0, 0, 0, 1, 1, 2], [0], [0]>} : vector<2x144x4xf32>, vector<2x4x128xf32>, vector<2x144x128xf32> -> vector<2x144x128xf32>
    "tpu.trace_stop"() : () -> ()
    %72 = arith.addf %69, %71 : vector<2x144x128xf32>
    %73 = vector.extract_strided_slice %52 {offsets = [0, 37, 0], sizes = [2, 144, 4], strides = [1, 1, 1]} : vector<2x188x4xf32> to vector<2x144x4xf32>
    "tpu.trace_start"() <{level = 10 : i32, message = "brc,bcf->brf"}> : () -> ()
    %cst_32 = arith.constant dense<0.000000e+00> : vector<2x144x128xf32>
    %74 = tpu.matmul %73, %39, %cst_32 {dimension_numbers = #tpu.dot_dimension_numbers<[2], [1], [1], [2], [0, 0, 0, 1, 1, 2], [0], [0]>} : vector<2x144x4xf32>, vector<2x4x128xf32>, vector<2x144x128xf32> -> vector<2x144x128xf32>
    "tpu.trace_stop"() : () -> ()
    %75 = arith.addf %72, %74 : vector<2x144x128xf32>
    %76 = vector.extract_strided_slice %52 {offsets = [0, 38, 0], sizes = [2, 144, 4], strides = [1, 1, 1]} : vector<2x188x4xf32> to vector<2x144x4xf32>
    "tpu.trace_start"() <{level = 10 : i32, message = "brc,bcf->brf"}> : () -> ()
    %cst_33 = arith.constant dense<0.000000e+00> : vector<2x144x128xf32>
    %77 = tpu.matmul %76, %44, %cst_33 {dimension_numbers = #tpu.dot_dimension_numbers<[2], [1], [1], [2], [0, 0, 0, 1, 1, 2], [0], [0]>} : vector<2x144x4xf32>, vector<2x4x128xf32>, vector<2x144x128xf32> -> vector<2x144x128xf32>
    "tpu.trace_stop"() : () -> ()
    %78 = arith.addf %75, %77 : vector<2x144x128xf32>
    %79 = vector.broadcast %48 : vector<1x1x128xf32> to vector<2x144x128xf32>
    %80 = arith.maximumf %78, %79 : vector<2x144x128xf32>
    %81 = vector.broadcast %50 : vector<1x144x1xf32> to vector<2x144x128xf32>
    %82 = arith.mulf %80, %81 : vector<2x144x128xf32>
    %cst_34 = arith.constant dense<0.000000e+00> : vector<2x128xf32>
    %83 = vector.multi_reduction <add>, %82, %cst_34 [1] : vector<2x144x128xf32> to vector<2x128xf32>
    %c0_35 = arith.constant 0 : index
    %c144 = arith.constant 144 : index
    %c0_36 = arith.constant 0 : index
    %84 = vector.load %arg1[%c0_35, %c144, %c0_36] : memref<2x332x4xbf16, #tpu.memory_space<vmem>>, vector<2x188x4xbf16>
    %85 = arith.extf %84 : vector<2x188x4xbf16> to vector<2x188x4xf32>
    %86 = vector.extract_strided_slice %85 {offsets = [0, 0, 0], sizes = [2, 144, 4], strides = [1, 1, 1]} : vector<2x188x4xf32> to vector<2x144x4xf32>
    "tpu.trace_start"() <{level = 10 : i32, message = "brc,bcf->brf"}> : () -> ()
    %cst_37 = arith.constant dense<0.000000e+00> : vector<2x144x128xf32>
    %87 = tpu.matmul %86, %4, %cst_37 {dimension_numbers = #tpu.dot_dimension_numbers<[2], [1], [1], [2], [0, 0, 0, 1, 1, 2], [0], [0]>} : vector<2x144x4xf32>, vector<2x4x128xf32>, vector<2x144x128xf32> -> vector<2x144x128xf32>
    "tpu.trace_stop"() : () -> ()
    %88 = vector.extract_strided_slice %85 {offsets = [0, 1, 0], sizes = [2, 144, 4], strides = [1, 1, 1]} : vector<2x188x4xf32> to vector<2x144x4xf32>
    "tpu.trace_start"() <{level = 10 : i32, message = "brc,bcf->brf"}> : () -> ()
    %cst_38 = arith.constant dense<0.000000e+00> : vector<2x144x128xf32>
    %89 = tpu.matmul %88, %9, %cst_38 {dimension_numbers = #tpu.dot_dimension_numbers<[2], [1], [1], [2], [0, 0, 0, 1, 1, 2], [0], [0]>} : vector<2x144x4xf32>, vector<2x4x128xf32>, vector<2x144x128xf32> -> vector<2x144x128xf32>
    "tpu.trace_stop"() : () -> ()
    %90 = arith.addf %87, %89 : vector<2x144x128xf32>
    %91 = vector.extract_strided_slice %85 {offsets = [0, 2, 0], sizes = [2, 144, 4], strides = [1, 1, 1]} : vector<2x188x4xf32> to vector<2x144x4xf32>
    "tpu.trace_start"() <{level = 10 : i32, message = "brc,bcf->brf"}> : () -> ()
    %cst_39 = arith.constant dense<0.000000e+00> : vector<2x144x128xf32>
    %92 = tpu.matmul %91, %14, %cst_39 {dimension_numbers = #tpu.dot_dimension_numbers<[2], [1], [1], [2], [0, 0, 0, 1, 1, 2], [0], [0]>} : vector<2x144x4xf32>, vector<2x4x128xf32>, vector<2x144x128xf32> -> vector<2x144x128xf32>
    "tpu.trace_stop"() : () -> ()
    %93 = arith.addf %90, %92 : vector<2x144x128xf32>
    %94 = vector.extract_strided_slice %85 {offsets = [0, 18, 0], sizes = [2, 144, 4], strides = [1, 1, 1]} : vector<2x188x4xf32> to vector<2x144x4xf32>
    "tpu.trace_start"() <{level = 10 : i32, message = "brc,bcf->brf"}> : () -> ()
    %cst_40 = arith.constant dense<0.000000e+00> : vector<2x144x128xf32>
    %95 = tpu.matmul %94, %19, %cst_40 {dimension_numbers = #tpu.dot_dimension_numbers<[2], [1], [1], [2], [0, 0, 0, 1, 1, 2], [0], [0]>} : vector<2x144x4xf32>, vector<2x4x128xf32>, vector<2x144x128xf32> -> vector<2x144x128xf32>
    "tpu.trace_stop"() : () -> ()
    %96 = arith.addf %93, %95 : vector<2x144x128xf32>
    %97 = vector.extract_strided_slice %85 {offsets = [0, 19, 0], sizes = [2, 144, 4], strides = [1, 1, 1]} : vector<2x188x4xf32> to vector<2x144x4xf32>
    "tpu.trace_start"() <{level = 10 : i32, message = "brc,bcf->brf"}> : () -> ()
    %cst_41 = arith.constant dense<0.000000e+00> : vector<2x144x128xf32>
    %98 = tpu.matmul %97, %24, %cst_41 {dimension_numbers = #tpu.dot_dimension_numbers<[2], [1], [1], [2], [0, 0, 0, 1, 1, 2], [0], [0]>} : vector<2x144x4xf32>, vector<2x4x128xf32>, vector<2x144x128xf32> -> vector<2x144x128xf32>
    "tpu.trace_stop"() : () -> ()
    %99 = arith.addf %96, %98 : vector<2x144x128xf32>
    %100 = vector.extract_strided_slice %85 {offsets = [0, 20, 0], sizes = [2, 144, 4], strides = [1, 1, 1]} : vector<2x188x4xf32> to vector<2x144x4xf32>
    "tpu.trace_start"() <{level = 10 : i32, message = "brc,bcf->brf"}> : () -> ()
    %cst_42 = arith.constant dense<0.000000e+00> : vector<2x144x128xf32>
    %101 = tpu.matmul %100, %29, %cst_42 {dimension_numbers = #tpu.dot_dimension_numbers<[2], [1], [1], [2], [0, 0, 0, 1, 1, 2], [0], [0]>} : vector<2x144x4xf32>, vector<2x4x128xf32>, vector<2x144x128xf32> -> vector<2x144x128xf32>
    "tpu.trace_stop"() : () -> ()
    %102 = arith.addf %99, %101 : vector<2x144x128xf32>
    %103 = vector.extract_strided_slice %85 {offsets = [0, 36, 0], sizes = [2, 144, 4], strides = [1, 1, 1]} : vector<2x188x4xf32> to vector<2x144x4xf32>
    "tpu.trace_start"() <{level = 10 : i32, message = "brc,bcf->brf"}> : () -> ()
    %cst_43 = arith.constant dense<0.000000e+00> : vector<2x144x128xf32>
    %104 = tpu.matmul %103, %34, %cst_43 {dimension_numbers = #tpu.dot_dimension_numbers<[2], [1], [1], [2], [0, 0, 0, 1, 1, 2], [0], [0]>} : vector<2x144x4xf32>, vector<2x4x128xf32>, vector<2x144x128xf32> -> vector<2x144x128xf32>
    "tpu.trace_stop"() : () -> ()
    %105 = arith.addf %102, %104 : vector<2x144x128xf32>
    %106 = vector.extract_strided_slice %85 {offsets = [0, 37, 0], sizes = [2, 144, 4], strides = [1, 1, 1]} : vector<2x188x4xf32> to vector<2x144x4xf32>
    "tpu.trace_start"() <{level = 10 : i32, message = "brc,bcf->brf"}> : () -> ()
    %cst_44 = arith.constant dense<0.000000e+00> : vector<2x144x128xf32>
    %107 = tpu.matmul %106, %39, %cst_44 {dimension_numbers = #tpu.dot_dimension_numbers<[2], [1], [1], [2], [0, 0, 0, 1, 1, 2], [0], [0]>} : vector<2x144x4xf32>, vector<2x4x128xf32>, vector<2x144x128xf32> -> vector<2x144x128xf32>
    "tpu.trace_stop"() : () -> ()
    %108 = arith.addf %105, %107 : vector<2x144x128xf32>
    %109 = vector.extract_strided_slice %85 {offsets = [0, 38, 0], sizes = [2, 144, 4], strides = [1, 1, 1]} : vector<2x188x4xf32> to vector<2x144x4xf32>
    "tpu.trace_start"() <{level = 10 : i32, message = "brc,bcf->brf"}> : () -> ()
    %cst_45 = arith.constant dense<0.000000e+00> : vector<2x144x128xf32>
    %110 = tpu.matmul %109, %44, %cst_45 {dimension_numbers = #tpu.dot_dimension_numbers<[2], [1], [1], [2], [0, 0, 0, 1, 1, 2], [0], [0]>} : vector<2x144x4xf32>, vector<2x4x128xf32>, vector<2x144x128xf32> -> vector<2x144x128xf32>
    "tpu.trace_stop"() : () -> ()
    %111 = arith.addf %108, %110 : vector<2x144x128xf32>
    %112 = vector.broadcast %48 : vector<1x1x128xf32> to vector<2x144x128xf32>
    %113 = arith.maximumf %111, %112 : vector<2x144x128xf32>
    %114 = vector.broadcast %50 : vector<1x144x1xf32> to vector<2x144x128xf32>
    %115 = arith.mulf %113, %114 : vector<2x144x128xf32>
    %cst_46 = arith.constant dense<0.000000e+00> : vector<2x128xf32>
    %116 = vector.multi_reduction <add>, %115, %cst_46 [1] : vector<2x144x128xf32> to vector<2x128xf32>
    %117 = arith.addf %83, %116 : vector<2x128xf32>
    %cst_47 = arith.constant 3.906250e-03 : f32
    %118 = vector.broadcast %cst_47 : f32 to vector<2x128xf32>
    %119 = arith.mulf %117, %118 : vector<2x128xf32>
    %c0_48 = arith.constant 0 : index
    %c0_49 = arith.constant 0 : index
    %120 = vector.load %arg3[%c0_48, %c0_49] : memref<1x128xf32, #tpu.memory_space<vmem>>, vector<1x128xf32>
    %121 = vector.broadcast %120 : vector<1x128xf32> to vector<2x128xf32>
    %122 = arith.addf %119, %121 : vector<2x128xf32>
    %123 = arith.truncf %122 : vector<2x128xf32> to vector<2x128xbf16>
    %c0_50 = arith.constant 0 : index
    %c0_51 = arith.constant 0 : index
    %124 = vector.load %arg5[%c0_50, %c0_51] : memref<128x128xbf16, #tpu.memory_space<vmem>>, vector<128x128xbf16>
    %cst_52 = arith.constant dense<0.000000e+00> : vector<2x128xf32>
    %125 = tpu.matmul %123, %124, %cst_52 {dimension_numbers = #tpu.dot_dimension_numbers<[1], [0], [0], [1], [0, 0, 1, 1], [], []>} : vector<2x128xbf16>, vector<128x128xbf16>, vector<2x128xf32> -> vector<2x128xf32>
    %c0_53 = arith.constant 0 : index
    %c0_54 = arith.constant 0 : index
    %126 = vector.load %arg6[%c0_53, %c0_54] : memref<1x128xf32, #tpu.memory_space<vmem>>, vector<1x128xf32>
    %127 = vector.broadcast %126 : vector<1x128xf32> to vector<2x128xf32>
    %128 = arith.addf %125, %127 : vector<2x128xf32>
    %cst_55 = arith.constant 0.000000e+00 : f32
    %129 = vector.broadcast %cst_55 : f32 to vector<2x128xf32>
    %130 = arith.maximumf %128, %129 : vector<2x128xf32>
    %131 = arith.truncf %130 : vector<2x128xf32> to vector<2x128xbf16>
    %c0_56 = arith.constant 0 : index
    %c0_57 = arith.constant 0 : index
    %132 = vector.load %arg7[%c0_56, %c0_57] : memref<128x128xbf16, #tpu.memory_space<vmem>>, vector<128x128xbf16>
    %cst_58 = arith.constant dense<0.000000e+00> : vector<2x128xf32>
    %133 = tpu.matmul %131, %132, %cst_58 {dimension_numbers = #tpu.dot_dimension_numbers<[1], [0], [0], [1], [0, 0, 1, 1], [], []>} : vector<2x128xbf16>, vector<128x128xbf16>, vector<2x128xf32> -> vector<2x128xf32>
    %c0_59 = arith.constant 0 : index
    %c0_60 = arith.constant 0 : index
    %134 = vector.load %arg8[%c0_59, %c0_60] : memref<1x128xf32, #tpu.memory_space<vmem>>, vector<1x128xf32>
    %135 = vector.broadcast %134 : vector<1x128xf32> to vector<2x128xf32>
    %136 = arith.addf %133, %135 : vector<2x128xf32>
    %137 = arith.mulf %136, %136 : vector<2x128xf32>
    %cst_61 = arith.constant dense<0.000000e+00> : vector<2xf32>
    %138 = vector.multi_reduction <add>, %137, %cst_61 [1] : vector<2x128xf32> to vector<2xf32>
    %139 = vector.shape_cast %138 : vector<2xf32> to vector<2x1xf32>
    %cst_62 = arith.constant 1.000000e-24 : f32
    %140 = vector.broadcast %cst_62 : f32 to vector<2x1xf32>
    %141 = arith.maximumf %139, %140 : vector<2x1xf32>
    %142 = math.rsqrt %141 : vector<2x1xf32>
    %143 = vector.broadcast %142 : vector<2x1xf32> to vector<2x128xf32>
    %144 = arith.mulf %136, %143 : vector<2x128xf32>
    %c0_63 = arith.constant 0 : index
    %c0_64 = arith.constant 0 : index
    %145 = vector.load %arg9[%c0_63, %c0_64] : memref<2x128xf32, #tpu.memory_space<vmem>>, vector<2x128xf32>
    tpu.vector_store %arg9[%c0_63, %c0_64], %144 {strides = array<i32>} : memref<2x128xf32, #tpu.memory_space<vmem>>, vector<2x128xf32>,
    return
  }
  func.func @transform_0(%arg0: i32) -> (i32, i32, i32) {
    %c0_i32 = arith.constant 0 : i32
    %c0_i32_0 = arith.constant 0 : i32
    %c0_i32_1 = arith.constant 0 : i32
    return %arg0, %c0_i32, %c0_i32_0 : i32, i32, i32
  }
  func.func @transform_1(%arg0: i32) -> (i32, i32, i32) {
    %c0_i32 = arith.constant 0 : i32
    %c0_i32_0 = arith.constant 0 : i32
    %c0_i32_1 = arith.constant 0 : i32
    %c0_i32_2 = arith.constant 0 : i32
    return %c0_i32, %c0_i32_0, %c0_i32_1 : i32, i32, i32
  }
  func.func @transform_2(%arg0: i32) -> (i32, i32) {
    %c0_i32 = arith.constant 0 : i32
    %c0_i32_0 = arith.constant 0 : i32
    %c0_i32_1 = arith.constant 0 : i32
    return %c0_i32, %c0_i32_0 : i32, i32
  }
  func.func @transform_3(%arg0: i32) -> (i32, i32) {
    %c0_i32 = arith.constant 0 : i32
    %c0_i32_0 = arith.constant 0 : i32
    %c0_i32_1 = arith.constant 0 : i32
    return %c0_i32, %c0_i32_0 : i32, i32
  }
  func.func @transform_4(%arg0: i32) -> (i32, i32) {
    %c0_i32 = arith.constant 0 : i32
    %c0_i32_0 = arith.constant 0 : i32
    %c0_i32_1 = arith.constant 0 : i32
    return %c0_i32, %c0_i32_0 : i32, i32
  }
  func.func @transform_5(%arg0: i32) -> (i32, i32) {
    %c0_i32 = arith.constant 0 : i32
    %c0_i32_0 = arith.constant 0 : i32
    %c0_i32_1 = arith.constant 0 : i32
    return %c0_i32, %c0_i32_0 : i32, i32
  }
  func.func @transform_6(%arg0: i32) -> (i32, i32) {
    %c0_i32 = arith.constant 0 : i32
    %c0_i32_0 = arith.constant 0 : i32
    %c0_i32_1 = arith.constant 0 : i32
    return %c0_i32, %c0_i32_0 : i32, i32
  }
  func.func @transform_7(%arg0: i32) -> (i32, i32) {
    %c0_i32 = arith.constant 0 : i32
    %c0_i32_0 = arith.constant 0 : i32
    %c0_i32_1 = arith.constant 0 : i32
    return %c0_i32, %c0_i32_0 : i32, i32
  }
  func.func @transform_8(%arg0: i32) -> (i32, i32) {
    %c0_i32 = arith.constant 0 : i32
    %c0_i32_0 = arith.constant 0 : i32
    return %arg0, %c0_i32 : i32, i32
  }
}

</mosaic_0001>

<bundles_post_ra>
// kernel: simclr_forward.1
= control target key start
LH: loop header
LB: loop body
LE: loop exit
PB: predicated region body
PF: predicated region fallthrough
CT: control target
= control target key end

     0   :  { %vm253_vm0 = vcmask 1043456   ;;  %vm178_vm1 = vcmask 1046528   ;;  %vm216_vm2 = vcmask 31744   ;;  %s10821_s0 = inlined_call_operand.vmem [shape: bf16[2,332,4], index: 0, kind: input, shape index: {}]   ;;  %s10822_s1 = inlined_call_operand.vmem [shape: f32[9,4,128], index: 1, kind: input, shape index: {}]   ;;  %s10823_s2 = inlined_call_operand.vmem [shape: f32[1,128], index: 2, kind: input, shape index: {}]   ;;  %s10824_s3 = inlined_call_operand.vmem [shape: f32[144,1], index: 3, kind: input, shape index: {}]   ;;  %s10825_s4 = inlined_call_operand.vmem [shape: bf16[128,128], index: 4, kind: input, shape index: {}]   ;;  %s10826_s5 = inlined_call_operand.vmem [shape: f32[1,128], index: 5, kind: input, shape index: {}]   ;;  %s10827_s6 = inlined_call_operand.vmem [shape: bf16[128,128], index: 6, kind: input, shape index: {}]   ;;  %s10828_s7 = inlined_call_operand.vmem [shape: f32[1,128], index: 7, kind: input, shape index: {}]   ;;  %s10829_s8 = inlined_call_operand.hbm [shape: f32[2,128], index: 8, kind: output, shape index: {}]  }
   0x1   :  { %v5944_v0 = vld [vmem:[%s10822_s1 + $0x4] sm:$0xf]  ;;  %v7053_v5 = vld [vmem:[%s10821_s0 + $0x48] sm:$0xff]   ;;  %v7078_v12 = vld [vmem:[%s10821_s0 + $0xf0] sm:$0xff]  }
   0x2   :  { %v6717_v1 = vld [vmem:[%s10821_s0] sm:$0xff]   ;;  %5952 = vmatpush.msk.msra.mxu0 %vm253_vm0, %v5944_v0  ;;  %6935 = vmatpush.msk.msra.mxu2 %vm253_vm0, %v5944_v0  ;;  %v6902_v6 = vld [vmem:[%s10821_s0 + $0xa8] sm:$0xff]   ;;  %v7064_v8 = vunpack.c.l.bf16 %v7053_v5  ;;  %v7089_v17 = vunpack.c.l.bf16 %v7078_v12  ;;  %v6903_v19 = vld [vmem:[%s10821_s0 + $0xb0] sm:$0xff]  }
   0x3   :  { %v7041_v2 = vunpack.c.l.bf16 %v6717_v1  ;;  %v7043_v3 = vunpack.c.h.bf16 %v6717_v1  ;;  %v7048_v4 = vld [vmem:[%s10821_s0 + $0x40] sm:$0xff]   ;;  %5971 = vmatpush.msk.msra.mxu1 %vm253_vm0, %v5944_v0  ;;  %6936 = vmatpush.msk.msra.mxu3 %vm253_vm0, %v5944_v0  ;;  %v7066_v9 = vunpack.c.l.bf16 %v6902_v6  ;;  %v7068_v10 = vunpack.c.h.bf16 %v6902_v6  ;;  %v7073_v11 = vld [vmem:[%s10821_s0 + $0xe8] sm:$0xff]  }
   0x4   :  { %v7061_v7 = vunpack.c.h.bf16 %v7048_v4  ;;  %11031 = vst [vmem:[#allocation6_spill] sm:$0xff] %v7064_v8  ;;  %v30_v13 = vld [vmem:[%s10822_s1] sm:$0xf]  ;;  %v7086_v16 = vunpack.c.h.bf16 %v7073_v11  ;;  %v6892_v18 = vld [vmem:[%s10821_s0 + $0x8] sm:$0xff]   ;;  %v214_v21 = vrot.slane %v7064_v8, 1  ;;  %v382_v27 = vrot.slane %v7089_v17, 1 }
   0x5   :  { %v179_v14 = vrot.slane %v7041_v2, 1  ;;  %v180_v15 = vrot.slane %v7043_v3, 1  ;;  %11033 = vst [vmem:[#allocation8_spill] sm:$0xff] %v7089_v17  ;;  %6009 = vmatpush.msk.msrb.mxu3 %vm253_vm0, %v30_v13  ;;  %5990 = vmatpush.msk.msrb.mxu2 %vm253_vm0, %v30_v13  ;;  %v347_v22 = vrot.slane %v7066_v9, 1  ;;  %v348_v23 = vrot.slane %v7068_v10, 1 }
   0x6   :  { %11030 = vst [vmem:[#allocation5_spill] sm:$0xff] %v7061_v7  ;;  %v212_v20 = vrot.slane %v7061_v7, 1  ;;  %v5945_v24 = vld [vmem:[%s10822_s1 + $0x8] sm:$0xf]  ;;  %v380_v26 = vrot.slane %v7086_v16, 1  ;;  %v7109_v28 = vunpack.c.l.bf16 %v6892_v18  ;;  %v7121_v32 = vunpack.c.l.bf16 %v6903_v19 }
   0x7   :  { %11032 = vst [vmem:[#allocation7_spill] sm:$0xff] %v7086_v16  ;;  %v181_v25 = vsel %vm178_vm1, %v179_v14, %v180_v15  ;;  %v5946_v29 = vld [vmem:[%s10822_s1 + $0xc] sm:$0xf]  ;;  %6047 = vmatpush.msk.msrb.mxu1 %vm253_vm0, %v5945_v24  ;;  %6028 = vmatpush.msk.msrb.mxu0 %vm253_vm0, %v5945_v24  ;;  %v349_v31 = vsel %vm178_vm1, %v347_v22, %v348_v23 }
   0x8   :  { %5953 = vmatmul.msk.f32.vlgmr.msra.gmra.mxu0 %vm216_vm2, %v181_v25  ;;  %v215_v30 = vsel %vm178_vm1, %v212_v20, %v214_v21 }
   0x9   :  { %13 = vsyncpa [#allocation3], 0  ;;  %5970 = vmatmul.msk.f32.vlgmr.msra.gmra.mxu2 %vm216_vm2, %v215_v30  ;;  %5972 = vmatmul.msk.f32.vlgmr.msra.gmra.mxu1 %vm216_vm2, %v349_v31  ;;  %v383_v33 = vsel %vm178_vm1, %v380_v26, %v382_v27  ;;  %v182_v34 = vrot.slane %v7109_v28, 1  ;;  %v350_v35 = vrot.slane %v7121_v32, 1  ;;  %v7134_v37 = vunpack.c.h.bf16 %v6892_v18  ;;  %v6893_v42 = vld [vmem:[%s10821_s0 + $0x10] sm:$0xff]   ;;  %v6904_v43 = vld [vmem:[%s10821_s0 + $0xb8] sm:$0xff]  }
   0xa   :  { %5989 = vmatmul.msk.f32.vlgmr.msra.gmra.mxu3 %vm216_vm2, %v383_v33  ;;  %6066 = vmatpush.msk.msra.mxu2 %vm253_vm0, %v5946_v29  ;;  %v7137_v39 = vunpack.c.h.bf16 %v6903_v19  ;;  %v7154_v45 = vunpack.c.l.bf16 %v6893_v42  ;;  %v7157_v47 = vunpack.c.l.bf16 %v6904_v43  ;;  %v7168_v51 = vunpack.c.h.bf16 %v6893_v42  ;;  %v6894_v56 = vld [vmem:[%s10821_s0 + $0x18] sm:$0xff]   ;;  %v6905_v57 = vld [vmem:[%s10821_s0 + $0xc0] sm:$0xff]   ;;  %v6906_v19 = vld [vmem:[%s10821_s0 + $0xc8] sm:$0xff]   ;;  %s5935_s15 = sshll.u32 %s10829_s8, 4  ;;  %s5936_s15 = int_to_ptr.hbm [resolvable:$true] %s5935_s15 }
   0xb   :  { %6085 = vmatpush.msk.msra.mxu3 %vm253_vm0, %v5946_v29  ;;  %v183_v36 = vsel %vm178_vm1, %v180_v15, %v182_v34  ;;  %v351_v38 = vsel %vm178_vm1, %v348_v23, %v350_v35  ;;  %v184_v40 = vrot.slane %v7134_v37, 1  ;;  %v7171_v53 = vunpack.c.h.bf16 %v6904_v43  ;;  %v6895_v18 = vld [vmem:[%s10821_s0 + $0x20] sm:$0xff]  }
   0xc   :  { %v352_v41 = vrot.slane %v7137_v39, 1  ;;  %v186_v48 = vrot.slane %v7154_v45, 1  ;;  %v354_v49 = vrot.slane %v7157_v47, 1  ;;  %v188_v54 = vrot.slane %v7168_v51, 1 }
   0xd   :  { %v185_v44 = vsel %vm178_vm1, %v182_v34, %v184_v40  ;;  %v356_v55 = vrot.slane %v7171_v53, 1  ;;  %v7188_v59 = vunpack.c.l.bf16 %v6894_v56  ;;  %v7191_v61 = vunpack.c.l.bf16 %v6905_v57 }
   0xe   :  { %v353_v46 = vsel %vm178_vm1, %v350_v35, %v352_v41  ;;  %v187_v50 = vsel %vm178_vm1, %v184_v40, %v186_v48  ;;  %v355_v52 = vsel %vm178_vm1, %v352_v41, %v354_v49  ;;  %v189_v58 = vsel %vm178_vm1, %v186_v48, %v188_v54 }
   0xf   :  { %v357_v60 = vsel %vm178_vm1, %v354_v49, %v356_v55  ;;  %v190_v62 = vrot.slane %v7188_v59, 1  ;;  %v358_v63 = vrot.slane %v7191_v61, 1  ;;  %v7202_v1 = vunpack.c.h.bf16 %v6894_v56  ;;  %v6897_v56 = vld [vmem:[%s10821_s0 + $0x30] sm:$0xff]  }
  0x10   :  { %5954 = vmatmul.msk.f32.gmra.mxu0 %vm216_vm2, %v183_v36  ;;  %v7205_v13 = vunpack.c.h.bf16 %v6905_v57  ;;  %v7222_v22 = vunpack.c.l.bf16 %v6895_v18  ;;  %v7225_v24 = vunpack.c.l.bf16 %v6906_v19  ;;  %v7236_v30 = vunpack.c.h.bf16 %v6895_v18  ;;  %v6896_v36 = vld [vmem:[%s10821_s0 + $0x28] sm:$0xff]   ;;  %v6908_v57 = vld [vmem:[%s10821_s0 + $0xd8] sm:$0xff]  }
  0x11   :  { %5973 = vmatmul.msk.f32.gmra.mxu1 %vm216_vm2, %v351_v38  ;;  %5991 = vmatmul.msk.f32.vlgmr.msrb.gmra.mxu2 %vm216_vm2, %v7041_v2  ;;  %v191_v0 = vsel %vm178_vm1, %v188_v54, %v190_v62  ;;  %v359_v6 = vsel %vm178_vm1, %v356_v55, %v358_v63  ;;  %v192_v14 = vrot.slane %v7202_v1, 1  ;;  %v7239_v33 = vunpack.c.h.bf16 %v6906_v19  ;;  %v6907_v38 = vld [vmem:[%s10821_s0 + $0xd0] sm:$0xff]  }
  0x12   :  { %6010 = vmatmul.msk.f32.vlgmr.msrb.gmra.mxu3 %vm216_vm2, %v7066_v9  ;;  %v360_v15 = vrot.slane %v7205_v13, 1  ;;  %11034 = vst [vmem:[#allocation9_spill] sm:$0xff] %v7222_v22  ;;  %v194_v25 = vrot.slane %v7222_v22, 1  ;;  %v362_v27 = vrot.slane %v7225_v24, 1  ;;  %v196_v34 = vrot.slane %v7236_v30, 1 }
  0x13   :  { %v193_v21 = vsel %vm178_vm1, %v190_v62, %v192_v14  ;;  %11035 = vst [vmem:[#allocation10_spill] sm:$0xff] %v7225_v24  ;;  %v364_v35 = vrot.slane %v7239_v33, 1  ;;  %v7256_v41 = vunpack.c.l.bf16 %v6896_v36  ;;  %v7259_v43 = vunpack.c.l.bf16 %v6907_v38 }
  0x14   :  { %v361_v23 = vsel %vm178_vm1, %v358_v63, %v360_v15  ;;  %v195_v29 = vsel %vm178_vm1, %v192_v14, %v194_v25  ;;  %11036 = vst [vmem:[#allocation11_spill] sm:$0xff] %v7236_v30  ;;  %v363_v31 = vsel %vm178_vm1, %v360_v15, %v362_v27  ;;  %v197_v40 = vsel %vm178_vm1, %v194_v25, %v196_v34  ;;  %v6898_v25 = vld [vmem:[%s10821_s0 + $0x38] sm:$0xff]  }
  0x15   :  { %11037 = vst [vmem:[#allocation12_spill] sm:$0xff] %v7239_v33  ;;  %v365_v42 = vsel %vm178_vm1, %v362_v27, %v364_v35  ;;  %v7270_v49 = vunpack.c.h.bf16 %v6896_v36  ;;  %v7293_v63 = vunpack.c.l.bf16 %v6908_v57  ;;  %v7304_v15 = vunpack.c.h.bf16 %v6897_v56  ;;  %v6909_v27 = vld [vmem:[%s10821_s0 + $0xe0] sm:$0xff]  }
  0x16   :  { %11038 = vst [vmem:[#allocation13_spill] sm:$0xff] %v7256_v41  ;;  %v7307_v19 = vunpack.c.h.bf16 %v6908_v57  ;;  %v7357_v57 = vunpack.c.l.bf16 %v7073_v11  ;;  %v5948_v11 = vld [vmem:[%s10822_s1 + $0x14] sm:$0xf]  ;;  %vm708_vm3 = vcmask 1045504   ;;  %vm1237_vm4 = vcmask 1044480  }
  0x17   :  { %11039 = vst [vmem:[#allocation14_spill] sm:$0xff] %v7259_v43  ;;  %v200_v54 = vrot.slane %v7270_v49, 1  ;;  %6161 = vmatpush.msk.msrb.mxu3 %vm253_vm0, %v5948_v11  ;;  %6142 = vmatpush.msk.msrb.mxu2 %vm253_vm0, %v5948_v11  ;;  %vm2093_vm5 = vcmask 1042432   ;;  %vm2421_vm6 = vcmask 1041408   ;;  %vm5763_vm7 = vcmask 1041409  }
  0x18   :  { %5955 = vmatmul.msk.f32.gmra.mxu0 %vm216_vm2, %v185_v44  ;;  %v198_v44 = vrot.slane %v7256_v41, 1  ;;  %11040 = vst [vmem:[#allocation15_spill] sm:$0xff] %v7270_v49 }
  0x19   :  { %5974 = vmatmul.msk.f32.gmra.mxu1 %vm216_vm2, %v353_v46  ;;  %5992 = vmatmul.msk.f32.gmra.mxu2 %vm216_vm2, %v7043_v3  ;;  %v366_v46 = vrot.slane %v7259_v43, 1  ;;  %11043 = vst [vmem:[#allocation18_spill] sm:$0xff] %v7293_v63 }
  0x1a   :  { %6011 = vmatmul.msk.f32.gmra.mxu3 %vm216_vm2, %v7068_v10  ;;  %v199_v48 = vsel %vm178_vm1, %v196_v34, %v198_v44  ;;  %11044 = vst [vmem:[#allocation19_spill] sm:$0xff] %v7304_v15 }
  0x1b   :  { %11045 = vst [vmem:[#allocation20_spill] sm:$0xff] %v7307_v19 }
  0x1c   :  { %11051 = vst [vmem:[#allocation26_spill] sm:$0xff] %v7357_v57 }
  0x20   :  { %5956 = vmatmul.msk.f32.gmra.mxu0 %vm216_vm2, %v187_v50  ;;  %v367_v50 = vsel %vm178_vm1, %v364_v35, %v366_v46  ;;  %v7327_v35 = vunpack.c.l.bf16 %v6909_v27 }
  0x21   :  { %5975 = vmatmul.msk.f32.gmra.mxu1 %vm216_vm2, %v355_v52  ;;  %5993 = vmatmul.msk.f32.gmra.mxu2 %vm216_vm2, %v7109_v28  ;;  %v7273_v52 = vunpack.c.h.bf16 %v6907_v38 }
  0x22   :  { %6012 = vmatmul.msk.f32.gmra.mxu3 %vm216_vm2, %v7121_v32  ;;  %11047 = vst [vmem:[#allocation22_spill] sm:$0xff] %v7327_v35  ;;  %v374_v38 = vrot.slane %v7327_v35, 1 }
  0x23   :  { %11041 = vst [vmem:[#allocation16_spill] sm:$0xff] %v7273_v52  ;;  %v368_v55 = vrot.slane %v7273_v52, 1 }
  0x25   :  { %v369_v62 = vsel %vm178_vm1, %v366_v46, %v368_v55  ;;  %v7341_v46 = vunpack.c.h.bf16 %v6909_v27  ;;  %v857_v27 = vrot.slane %v7068_v10, 2 }
  0x27   :  { %11049 = vst [vmem:[#allocation24_spill] sm:$0xff] %v7341_v46 }
  0x28   :  { %5957 = vmatmul.msk.f32.gmra.mxu0 %vm216_vm2, %v189_v58  ;;  %v201_v58 = vsel %vm178_vm1, %v198_v44, %v200_v54 }
  0x29   :  { %5976 = vmatmul.msk.f32.gmra.mxu1 %vm216_vm2, %v357_v60  ;;  %5994 = vmatmul.msk.f32.gmra.mxu2 %vm216_vm2, %v7134_v37  ;;  %v7290_v60 = vunpack.c.l.bf16 %v6897_v56 }
  0x2a   :  { %6013 = vmatmul.msk.f32.gmra.mxu3 %vm216_vm2, %v7137_v39 }
  0x2b   :  { %11042 = vst [vmem:[#allocation17_spill] sm:$0xff] %v7290_v60 }
  0x30   :  { %5958 = vmatmul.msk.f32.gmra.mxu0 %vm216_vm2, %v191_v0  ;;  %v202_v0 = vrot.slane %v7290_v60, 1 }
  0x31   :  { %5977 = vmatmul.msk.f32.gmra.mxu1 %vm216_vm2, %v359_v6  ;;  %5995 = vmatmul.msk.f32.gmra.mxu2 %vm216_vm2, %v7154_v45  ;;  %v370_v6 = vrot.slane %v7293_v63, 1 }
  0x32   :  { %6014 = vmatmul.msk.f32.gmra.mxu3 %vm216_vm2, %v7157_v47  ;;  %v203_v14 = vsel %vm178_vm1, %v200_v54, %v202_v0 }
  0x33   :  { %v371_v18 = vsel %vm178_vm1, %v368_v55, %v370_v6  ;;  %v7353_v55 = vunpack.c.l.bf16 %v7048_v4  ;;  %v378_v4 = vrot.slane %v7357_v57, 1 }
  0x35   :  { %11050 = vst [vmem:[#allocation25_spill] sm:$0xff] %v7353_v55 }
  0x38   :  { %5959 = vmatmul.msk.f32.gmra.mxu0 %vm216_vm2, %v193_v21  ;;  %v204_v21 = vrot.slane %v7304_v15, 1 }
  0x39   :  { %5978 = vmatmul.msk.f32.gmra.mxu1 %vm216_vm2, %v361_v23  ;;  %5996 = vmatmul.msk.f32.gmra.mxu2 %vm216_vm2, %v7168_v51  ;;  %v372_v23 = vrot.slane %v7307_v19, 1 }
  0x3a   :  { %6015 = vmatmul.msk.f32.gmra.mxu3 %vm216_vm2, %v7171_v53 }
  0x3b   :  { %v373_v34 = vsel %vm178_vm1, %v370_v6, %v372_v23  ;;  %v375_v44 = vsel %vm178_vm1, %v372_v23, %v374_v38  ;;  %v5947_v23 = vld [vmem:[%s10822_s1 + $0x10] sm:$0xf] }
  0x3c   :  { %6123 = vmatpush.msk.msra.mxu1 %vm253_vm0, %v5947_v23  ;;  %6104 = vmatpush.msk.msra.mxu0 %vm253_vm0, %v5947_v23 }
  0x40   :  { %5960 = vmatmul.msk.f32.gmra.mxu0 %vm216_vm2, %v195_v29  ;;  %v205_v29 = vsel %vm178_vm1, %v202_v0, %v204_v21 }
  0x41   :  { %5979 = vmatmul.msk.f32.gmra.mxu1 %vm216_vm2, %v363_v31  ;;  %5997 = vmatmul.msk.f32.gmra.mxu2 %vm216_vm2, %v7188_v59  ;;  %v7324_v31 = vunpack.c.l.bf16 %v6898_v25 }
  0x42   :  { %6016 = vmatmul.msk.f32.gmra.mxu3 %vm216_vm2, %v7191_v61 }
  0x43   :  { %11046 = vst [vmem:[#allocation21_spill] sm:$0xff] %v7324_v31  ;;  %v206_v36 = vrot.slane %v7324_v31, 1 }
  0x48   :  { %5961 = vmatmul.msk.f32.gmra.mxu0 %vm216_vm2, %v197_v40  ;;  %v207_v40 = vsel %vm178_vm1, %v204_v21, %v206_v36  ;;  %v381_v21 = vsel %vm178_vm1, %v378_v4, %v380_v26  ;;  %v856_v26 = vrot.slane %v7066_v9, 2  ;;  %v859_v9 = vrot.slane %v7121_v32, 2 }
  0x49   :  { %5980 = vmatmul.msk.f32.gmra.mxu1 %vm216_vm2, %v365_v42  ;;  %5998 = vmatmul.msk.f32.gmra.mxu2 %vm216_vm2, %v7202_v1  ;;  %v7338_v42 = vunpack.c.h.bf16 %v6898_v25  ;;  %v710_v25 = vrot.slane %v7043_v3, 2  ;;  %v712_v3 = vrot.slane %v7109_v28, 2 }
  0x4a   :  { %6017 = vmatmul.msk.f32.gmra.mxu3 %vm216_vm2, %v7205_v13 }
  0x4b   :  { %11048 = vst [vmem:[#allocation23_spill] sm:$0xff] %v7338_v42 }
  0x50   :  { %5962 = vmatmul.msk.f32.gmra.mxu0 %vm216_vm2, %v199_v48  ;;  %v208_v48 = vrot.slane %v7338_v42, 1 }
  0x51   :  { %5981 = vmatmul.msk.f32.gmra.mxu1 %vm216_vm2, %v367_v50  ;;  %5999 = vmatmul.msk.f32.gmra.mxu2 %vm216_vm2, %v7222_v22  ;;  %v376_v50 = vrot.slane %v7341_v46, 1 }
  0x52   :  { %6018 = vmatmul.msk.f32.gmra.mxu3 %vm216_vm2, %v7225_v24  ;;  %v209_v54 = vsel %vm178_vm1, %v206_v36, %v208_v48 }
  0x53   :  { %v377_v56 = vsel %vm178_vm1, %v374_v38, %v376_v50  ;;  %v379_v0 = vsel %vm178_vm1, %v376_v50, %v378_v4  ;;  %v860_v4 = vsel %vm708_vm3, %v857_v27, %v859_v9 }
  0x58   :  { %5963 = vmatmul.msk.f32.gmra.mxu0 %vm216_vm2, %v201_v58  ;;  %v210_v58 = vrot.slane %v7353_v55, 1 }
  0x59   :  { %5982 = vmatmul.msk.f32.gmra.mxu1 %vm216_vm2, %v369_v62  ;;  %6000 = vmatmul.msk.f32.gmra.mxu2 %vm216_vm2, %v7236_v30 }
  0x5a   :  { %6019 = vmatmul.msk.f32.gmra.mxu3 %vm216_vm2, %v7239_v33  ;;  %v211_v62 = vsel %vm178_vm1, %v208_v48, %v210_v58 }
  0x60   :  { %5964 = vmatmul.msk.f32.gmra.mxu0 %vm216_vm2, %v203_v14  ;;  %v213_v14 = vsel %vm178_vm1, %v210_v58, %v212_v20  ;;  %v709_v20 = vrot.slane %v7041_v2, 2  ;;  %v858_v2 = vsel %vm708_vm3, %v856_v26, %v857_v27  ;;  %v716_v26 = vrot.slane %v7154_v45, 2 }
  0x61   :  { %5983 = vmatmul.msk.f32.gmra.mxu1 %vm216_vm2, %v371_v18  ;;  %6001 = vmatmul.msk.f32.gmra.mxu2 %vm216_vm2, %v7256_v41  ;;  %v863_v27 = vrot.slane %v7157_v47, 2 }
  0x62   :  { %6020 = vmatmul.msk.f32.gmra.mxu3 %vm216_vm2, %v7259_v43  ;;  %v711_v38 = vsel %vm708_vm3, %v709_v20, %v710_v25 }
  0x68   :  { %5965 = vmatmul.msk.f32.gmra.mxu0 %vm216_vm2, %v205_v29 }
  0x69   :  { %5984 = vmatmul.msk.f32.gmra.mxu1 %vm216_vm2, %v373_v34  ;;  %6002 = vmatmul.msk.f32.gmra.mxu2 %vm216_vm2, %v7270_v49 }
  0x6a   :  { %6021 = vmatmul.msk.f32.gmra.mxu3 %vm216_vm2, %v7273_v52 }
  0x70   :  { %5966 = vmatmul.msk.f32.gmra.mxu0 %vm216_vm2, %v207_v40 }
  0x71   :  { %5985 = vmatmul.msk.f32.gmra.mxu1 %vm216_vm2, %v375_v44  ;;  %6003 = vmatmul.msk.f32.gmra.mxu2 %vm216_vm2, %v7290_v60 }
  0x72   :  { %6022 = vmatmul.msk.f32.gmra.mxu3 %vm216_vm2, %v7293_v63 }
  0x78   :  { %5967 = vmatmul.msk.f32.gmra.mxu0 %vm216_vm2, %v209_v54  ;;  %v713_v54 = vsel %vm708_vm3, %v710_v25, %v712_v3 }
  0x79   :  { %5986 = vmatmul.msk.f32.gmra.mxu1 %vm216_vm2, %v377_v56  ;;  %6004 = vmatmul.msk.f32.gmra.mxu2 %vm216_vm2, %v7304_v15 }
  0x7a   :  { %6023 = vmatmul.msk.f32.gmra.mxu3 %vm216_vm2, %v7307_v19 }
  0x80   :  { %5968 = vmatmul.msk.f32.gmra.mxu0 %vm216_vm2, %v211_v62  ;;  %v714_v62 = vrot.slane %v7134_v37, 2 }
  0x81   :  { %5987 = vmatmul.msk.f32.gmra.mxu1 %vm216_vm2, %v379_v0  ;;  %6005 = vmatmul.msk.f32.gmra.mxu2 %vm216_vm2, %v7324_v31  ;;  %v861_v0 = vrot.slane %v7137_v39, 2 }
  0x82   :  { %6024 = vmatmul.msk.f32.gmra.mxu3 %vm216_vm2, %v7327_v35 }
  0x83   :  { %v862_v25 = vsel %vm708_vm3, %v859_v9, %v861_v0 }
  0x85   :  { %v274_v6 = vpop.f32.mrf.mxu0 }
  0x86   :  { %v437_v18 = vpop.f32.mrf.mxu1 }
  0x88   :  { %5969 = vmatmul.msk.f32.gmra.mxu0 %vm216_vm2, %v213_v14 }
  0x89   :  { %5988 = vmatmul.msk.f32.gmra.mxu1 %vm216_vm2, %v381_v21  ;;  %6006 = vmatmul.msk.f32.gmra.mxu2 %vm216_vm2, %v7338_v42  ;;  %v715_v21 = vsel %vm708_vm3, %v712_v3, %v714_v62  ;;  %v717_v3 = vsel %vm708_vm3, %v714_v62, %v716_v26 }
  0x8a   :  { %6025 = vmatmul.msk.f32.gmra.mxu3 %vm216_vm2, %v7341_v46 }
  0x8c   :  { %v7401_v29 = vpop.f32.mrf.mxu2 }
  0x8d   :  { %11052 = vst [vmem:[#allocation27_spill] sm:$0xff] %v7401_v29  ;;  %v7403_v34 = vpop.f32.mrf.mxu3  ;;  %v277_v36 = vpop.f32.mrf.mxu0 }
  0x8e   :  { %11053 = vst [vmem:[#allocation28_spill] sm:$0xff] %v7403_v34  ;;  %v440_v40 = vpop.f32.mrf.mxu1 }
  0x90   :  { %6029 = vmatmul.msk.f32.vlgmr.msrb.gmra.mxu0 %vm216_vm2, %v711_v38 }
  0x91   :  { %6007 = vmatmul.msk.f32.gmra.mxu2 %vm216_vm2, %v7353_v55  ;;  %6048 = vmatmul.msk.f32.vlgmr.msrb.gmra.mxu1 %vm216_vm2, %v858_v2 }
  0x92   :  { %6026 = vmatmul.msk.f32.gmra.mxu3 %vm216_vm2, %v7357_v57 }
  0x94   :  { %v547_v10 = vpop.f32.mrf.mxu2 }
  0x95   :  { %v7415_v44 = vadd.f32 %v547_v10, %v274_v6  ;;  %v654_v48 = vpop.f32.mrf.mxu3  ;;  %v280_v50 = vpop.f32.mrf.mxu0 }
  0x96   :  { %v7418_v56 = vadd.f32 %v654_v48, %v437_v18  ;;  %v443_v58 = vpop.f32.mrf.mxu1  ;;  %v864_v48 = vsel %vm708_vm3, %v861_v0, %v863_v27 }
  0x98   :  { %6030 = vmatmul.msk.f32.gmra.mxu0 %vm216_vm2, %v713_v54  ;;  %v718_v54 = vrot.slane %v7168_v51, 2 }
  0x99   :  { %6008 = vmatmul.msk.f32.gmra.mxu2 %vm216_vm2, %v7061_v7  ;;  %6049 = vmatmul.msk.f32.gmra.mxu1 %vm216_vm2, %v860_v4 }
  0x9a   :  { %6027 = vmatmul.msk.f32.gmra.mxu3 %vm216_vm2, %v7086_v16 }
  0x9c   :  { %v550_v11 = vpop.f32.mrf.mxu2 }
  0x9d   :  { %v7429_v6 = vadd.f32 %v550_v11, %v277_v36  ;;  %v657_v14 = vpop.f32.mrf.mxu3  ;;  %v283_v18 = vpop.f32.mrf.mxu0 }
  0x9e   :  { %v7432_v23 = vadd.f32 %v657_v14, %v440_v40  ;;  %v446_v20 = vpop.f32.mrf.mxu1  ;;  %v719_v14 = vsel %vm708_vm3, %v716_v26, %v718_v54 }
  0xa0   :  { %6031 = vmatmul.msk.f32.gmra.mxu0 %vm216_vm2, %v715_v21 }
  0xa1   :  { %6050 = vmatmul.msk.f32.gmra.mxu1 %vm216_vm2, %v862_v25  ;;  %6067 = vmatmul.msk.f32.vlgmr.msra.gmra.mxu2 %vm216_vm2, %v715_v21 }
  0xa2   :  { %6086 = vmatmul.msk.f32.vlgmr.msra.gmra.mxu3 %vm216_vm2, %v862_v25 }
  0xa4   :  { %v553_v36 = vpop.f32.mrf.mxu2 }
  0xa5   :  { %v7441_v38 = vadd.f32 %v553_v36, %v280_v50  ;;  %v660_v40 = vpop.f32.mrf.mxu3  ;;  %v286_v2 = vpop.f32.mrf.mxu0  ;;  %v865_v50 = vrot.slane %v7171_v53, 2  ;;  %v720_v36 = vrot.slane %v7188_v59, 2 }
  0xa6   :  { %v7444_v9 = vadd.f32 %v660_v40, %v443_v58  ;;  %v449_v10 = vpop.f32.mrf.mxu1 }
  0xa7   :  { %v866_v25 = vsel %vm708_vm3, %v863_v27, %v865_v50 }
  0xa8   :  { %6032 = vmatmul.msk.f32.gmra.mxu0 %vm216_vm2, %v717_v3 }
  0xa9   :  { %6051 = vmatmul.msk.f32.gmra.mxu1 %vm216_vm2, %v864_v48  ;;  %6068 = vmatmul.msk.f32.gmra.mxu2 %vm216_vm2, %v717_v3 }
  0xaa   :  { %6087 = vmatmul.msk.f32.gmra.mxu3 %vm216_vm2, %v864_v48  ;;  %v721_v48 = vsel %vm708_vm3, %v718_v54, %v720_v36 }
  0xac   :  { %v556_v4 = vpop.f32.mrf.mxu2 }
  0xad   :  { %v7453_v11 = vadd.f32 %v556_v4, %v283_v18  ;;  %v663_v58 = vpop.f32.mrf.mxu3  ;;  %v289_v62 = vpop.f32.mrf.mxu0  ;;  %v867_v18 = vrot.slane %v7191_v61, 2 }
  0xae   :  { %v7456_v0 = vadd.f32 %v663_v58, %v446_v20  ;;  %v452_v21 = vpop.f32.mrf.mxu1 }
  0xaf   :  { %v868_v58 = vsel %vm708_vm3, %v865_v50, %v867_v18 }
  0xb0   :  { %6033 = vmatmul.msk.f32.gmra.mxu0 %vm216_vm2, %v719_v14 }
  0xb1   :  { %6052 = vmatmul.msk.f32.gmra.mxu1 %vm216_vm2, %v866_v25  ;;  %6069 = vmatmul.msk.f32.gmra.mxu2 %vm216_vm2, %v719_v14  ;;  %v722_v14 = vrot.slane %v7202_v1, 2 }
  0xb2   :  { %6088 = vmatmul.msk.f32.gmra.mxu3 %vm216_vm2, %v866_v25 }
  0xb4   :  { %v559_v40 = vpop.f32.mrf.mxu2 }
  0xb5   :  { %v7465_v3 = vadd.f32 %v559_v40, %v286_v2  ;;  %v666_v20 = vpop.f32.mrf.mxu3  ;;  %v292_v26 = vpop.f32.mrf.mxu0  ;;  %v869_v2 = vrot.slane %v7205_v13, 2 }
  0xb6   :  { %v7468_v27 = vadd.f32 %v666_v20, %v449_v10  ;;  %v455_v4 = vpop.f32.mrf.mxu1  ;;  %v723_v20 = vsel %vm708_vm3, %v720_v36, %v722_v14 }
  0xb7   :  { %v870_v29 = vsel %vm708_vm3, %v867_v18, %v869_v2 }
  0xb8   :  { %6034 = vmatmul.msk.f32.gmra.mxu0 %vm216_vm2, %v721_v48 }
  0xb9   :  { %6053 = vmatmul.msk.f32.gmra.mxu1 %vm216_vm2, %v868_v58  ;;  %6070 = vmatmul.msk.f32.gmra.mxu2 %vm216_vm2, %v721_v48  ;;  %v724_v48 = vrot.slane %v7222_v22, 2 }
  0xba   :  { %6089 = vmatmul.msk.f32.gmra.mxu3 %vm216_vm2, %v868_v58 }
  0xbc   :  { %v562_v25 = vpop.f32.mrf.mxu2 }
  0xbd   :  { %v7477_v40 = vadd.f32 %v562_v25, %v289_v62  ;;  %v669_v10 = vpop.f32.mrf.mxu3  ;;  %v295_v54 = vpop.f32.mrf.mxu0  ;;  %v871_v62 = vrot.slane %v7225_v24, 2 }
  0xbe   :  { %v7480_v50 = vadd.f32 %v669_v10, %v452_v21  ;;  %v458_v34 = vpop.f32.mrf.mxu1  ;;  %v725_v10 = vsel %vm708_vm3, %v722_v14, %v724_v48 }
  0xbf   :  { %11054 = vst [vmem:[#allocation29_spill] sm:$0xff] %v7477_v40  ;;  %v872_v40 = vsel %vm708_vm3, %v869_v2, %v871_v62 }
  0xc0   :  { %11055 = vst [vmem:[#allocation30_spill] sm:$0xff] %v7480_v50  ;;  %6035 = vmatmul.msk.f32.gmra.mxu0 %vm216_vm2, %v723_v20 }
  0xc1   :  { %6054 = vmatmul.msk.f32.gmra.mxu1 %vm216_vm2, %v870_v29  ;;  %6071 = vmatmul.msk.f32.gmra.mxu2 %vm216_vm2, %v723_v20 }
  0xc2   :  { %6090 = vmatmul.msk.f32.gmra.mxu3 %vm216_vm2, %v870_v29  ;;  %v726_v29 = vrot.slane %v7236_v30, 2 }
  0xc4   :  { %v565_v58 = vpop.f32.mrf.mxu2 }
  0xc5   :  { %v7489_v25 = vadd.f32 %v565_v58, %v292_v26  ;;  %v672_v21 = vpop.f32.mrf.mxu3  ;;  %v298_v36 = vpop.f32.mrf.mxu0  ;;  %v873_v26 = vrot.slane %v7239_v33, 2 }
  0xc6   :  { %v7492_v18 = vadd.f32 %v672_v21, %v455_v4  ;;  %v461_v50 = vpop.f32.mrf.mxu1  ;;  %v727_v21 = vsel %vm708_vm3, %v724_v48, %v726_v29 }
  0xc7   :  { %11056 = vst [vmem:[#allocation31_spill] sm:$0xff] %v7489_v25  ;;  %v874_v25 = vsel %vm708_vm3, %v871_v62, %v873_v26 }
  0xc8   :  { %11057 = vst [vmem:[#allocation32_spill] sm:$0xff] %v7492_v18  ;;  %6036 = vmatmul.msk.f32.gmra.mxu0 %vm216_vm2, %v725_v10 }
  0xc9   :  { %6055 = vmatmul.msk.f32.gmra.mxu1 %vm216_vm2, %v872_v40  ;;  %6072 = vmatmul.msk.f32.gmra.mxu2 %vm216_vm2, %v725_v10 }
  0xca   :  { %6091 = vmatmul.msk.f32.gmra.mxu3 %vm216_vm2, %v872_v40  ;;  %v728_v40 = vrot.slane %v7256_v41, 2 }
  0xcc   :  { %v568_v20 = vpop.f32.mrf.mxu2 }
  0xcd   :  { %v7501_v58 = vadd.f32 %v568_v20, %v295_v54  ;;  %v675_v4 = vpop.f32.mrf.mxu3  ;;  %v301_v14 = vpop.f32.mrf.mxu0  ;;  %v875_v54 = vrot.slane %v7259_v43, 2 }
  0xce   :  { %v7504_v2 = vadd.f32 %v675_v4, %v458_v34  ;;  %v464_v18 = vpop.f32.mrf.mxu1  ;;  %v729_v4 = vsel %vm708_vm3, %v726_v29, %v728_v40 }
  0xcf   :  { %11058 = vst [vmem:[#allocation33_spill] sm:$0xff] %v7501_v58  ;;  %v876_v58 = vsel %vm708_vm3, %v873_v26, %v875_v54 }
  0xd0   :  { %11059 = vst [vmem:[#allocation34_spill] sm:$0xff] %v7504_v2  ;;  %6037 = vmatmul.msk.f32.gmra.mxu0 %vm216_vm2, %v727_v21 }
  0xd1   :  { %6056 = vmatmul.msk.f32.gmra.mxu1 %vm216_vm2, %v874_v25  ;;  %6073 = vmatmul.msk.f32.gmra.mxu2 %vm216_vm2, %v727_v21 }
  0xd2   :  { %6092 = vmatmul.msk.f32.gmra.mxu3 %vm216_vm2, %v874_v25  ;;  %v730_v25 = vrot.slane %v7270_v49, 2 }
  0xd4   :  { %v571_v10 = vpop.f32.mrf.mxu2 }
  0xd5   :  { %v7513_v20 = vadd.f32 %v571_v10, %v298_v36  ;;  %v678_v34 = vpop.f32.mrf.mxu3  ;;  %v304_v48 = vpop.f32.mrf.mxu0  ;;  %v877_v36 = vrot.slane %v7273_v52, 2 }
  0xd6   :  { %v7516_v62 = vadd.f32 %v678_v34, %v461_v50  ;;  %v467_v2 = vpop.f32.mrf.mxu1  ;;  %v731_v34 = vsel %vm708_vm3, %v728_v40, %v730_v25 }
  0xd7   :  { %11060 = vst [vmem:[#allocation35_spill] sm:$0xff] %v7513_v20  ;;  %v878_v20 = vsel %vm708_vm3, %v875_v54, %v877_v36 }
  0xd8   :  { %11061 = vst [vmem:[#allocation36_spill] sm:$0xff] %v7516_v62  ;;  %6038 = vmatmul.msk.f32.gmra.mxu0 %vm216_vm2, %v729_v4 }
  0xd9   :  { %6057 = vmatmul.msk.f32.gmra.mxu1 %vm216_vm2, %v876_v58  ;;  %6074 = vmatmul.msk.f32.gmra.mxu2 %vm216_vm2, %v729_v4 }
  0xda   :  { %6093 = vmatmul.msk.f32.gmra.mxu3 %vm216_vm2, %v876_v58  ;;  %v732_v58 = vrot.slane %v7290_v60, 2 }
  0xdc   :  { %v574_v21 = vpop.f32.mrf.mxu2 }
  0xdd   :  { %v7525_v10 = vadd.f32 %v574_v21, %v301_v14  ;;  %v681_v50 = vpop.f32.mrf.mxu3  ;;  %v307_v29 = vpop.f32.mrf.mxu0  ;;  %v879_v14 = vrot.slane %v7293_v63, 2 }
  0xde   :  { %v7528_v26 = vadd.f32 %v681_v50, %v464_v18  ;;  %v470_v62 = vpop.f32.mrf.mxu1  ;;  %v733_v50 = vsel %vm708_vm3, %v730_v25, %v732_v58 }
  0xdf   :  { %11062 = vst [vmem:[#allocation37_spill] sm:$0xff] %v7525_v10  ;;  %v880_v10 = vsel %vm708_vm3, %v877_v36, %v879_v14 }
  0xe0   :  { %11063 = vst [vmem:[#allocation38_spill] sm:$0xff] %v7528_v26  ;;  %6039 = vmatmul.msk.f32.gmra.mxu0 %vm216_vm2, %v731_v34 }
  0xe1   :  { %6058 = vmatmul.msk.f32.gmra.mxu1 %vm216_vm2, %v878_v20  ;;  %6075 = vmatmul.msk.f32.gmra.mxu2 %vm216_vm2, %v731_v34 }
  0xe2   :  { %6094 = vmatmul.msk.f32.gmra.mxu3 %vm216_vm2, %v878_v20  ;;  %v734_v20 = vrot.slane %v7304_v15, 2 }
  0xe4   :  { %v577_v4 = vpop.f32.mrf.mxu2 }
  0xe5   :  { %v7537_v21 = vadd.f32 %v577_v4, %v304_v48  ;;  %v684_v18 = vpop.f32.mrf.mxu3  ;;  %v310_v40 = vpop.f32.mrf.mxu0  ;;  %v881_v48 = vrot.slane %v7307_v19, 2 }
  0xe6   :  { %v7540_v54 = vadd.f32 %v684_v18, %v467_v2  ;;  %v473_v26 = vpop.f32.mrf.mxu1  ;;  %v735_v18 = vsel %vm708_vm3, %v732_v58, %v734_v20 }
  0xe7   :  { %11064 = vst [vmem:[#allocation39_spill] sm:$0xff] %v7537_v21  ;;  %v882_v21 = vsel %vm708_vm3, %v879_v14, %v881_v48 }
  0xe8   :  { %11065 = vst [vmem:[#allocation40_spill] sm:$0xff] %v7540_v54  ;;  %6040 = vmatmul.msk.f32.gmra.mxu0 %vm216_vm2, %v733_v50 }
  0xe9   :  { %6059 = vmatmul.msk.f32.gmra.mxu1 %vm216_vm2, %v880_v10  ;;  %6076 = vmatmul.msk.f32.gmra.mxu2 %vm216_vm2, %v733_v50 }
  0xea   :  { %6095 = vmatmul.msk.f32.gmra.mxu3 %vm216_vm2, %v880_v10  ;;  %v736_v10 = vrot.slane %v7324_v31, 2 }
  0xec   :  { %v580_v34 = vpop.f32.mrf.mxu2 }
  0xed   :  { %v7549_v4 = vadd.f32 %v580_v34, %v307_v29  ;;  %v687_v2 = vpop.f32.mrf.mxu3  ;;  %v313_v25 = vpop.f32.mrf.mxu0  ;;  %v883_v29 = vrot.slane %v7327_v35, 2 }
  0xee   :  { %v7552_v36 = vadd.f32 %v687_v2, %v470_v62  ;;  %v476_v54 = vpop.f32.mrf.mxu1  ;;  %v737_v2 = vsel %vm708_vm3, %v734_v20, %v736_v10 }
  0xef   :  { %11066 = vst [vmem:[#allocation41_spill] sm:$0xff] %v7549_v4  ;;  %v884_v4 = vsel %vm708_vm3, %v881_v48, %v883_v29 }
  0xf0   :  { %11067 = vst [vmem:[#allocation42_spill] sm:$0xff] %v7552_v36  ;;  %6041 = vmatmul.msk.f32.gmra.mxu0 %vm216_vm2, %v735_v18 }
  0xf1   :  { %6060 = vmatmul.msk.f32.gmra.mxu1 %vm216_vm2, %v882_v21  ;;  %6077 = vmatmul.msk.f32.gmra.mxu2 %vm216_vm2, %v735_v18 }
  0xf2   :  { %6096 = vmatmul.msk.f32.gmra.mxu3 %vm216_vm2, %v882_v21  ;;  %v738_v21 = vrot.slane %v7338_v42, 2 }
  0xf4   :  { %v583_v50 = vpop.f32.mrf.mxu2 }
  0xf5   :  { %v7561_v34 = vadd.f32 %v583_v50, %v310_v40  ;;  %v690_v62 = vpop.f32.mrf.mxu3  ;;  %v316_v58 = vpop.f32.mrf.mxu0  ;;  %v885_v40 = vrot.slane %v7341_v46, 2 }
  0xf6   :  { %v7564_v14 = vadd.f32 %v690_v62, %v473_v26  ;;  %v479_v36 = vpop.f32.mrf.mxu1  ;;  %v739_v62 = vsel %vm708_vm3, %v736_v10, %v738_v21 }
  0xf7   :  { %11068 = vst [vmem:[#allocation43_spill] sm:$0xff] %v7561_v34  ;;  %v886_v34 = vsel %vm708_vm3, %v883_v29, %v885_v40 }
  0xf8   :  { %11069 = vst [vmem:[#allocation44_spill] sm:$0xff] %v7564_v14  ;;  %6042 = vmatmul.msk.f32.gmra.mxu0 %vm216_vm2, %v737_v2 }
  0xf9   :  { %6061 = vmatmul.msk.f32.gmra.mxu1 %vm216_vm2, %v884_v4  ;;  %6078 = vmatmul.msk.f32.gmra.mxu2 %vm216_vm2, %v737_v2 }
  0xfa   :  { %6097 = vmatmul.msk.f32.gmra.mxu3 %vm216_vm2, %v884_v4  ;;  %v740_v4 = vrot.slane %v7353_v55, 2 }
  0xfc   :  { %v586_v18 = vpop.f32.mrf.mxu2 }
  0xfd   :  { %v7573_v50 = vadd.f32 %v586_v18, %v313_v25  ;;  %v693_v26 = vpop.f32.mrf.mxu3  ;;  %v319_v20 = vpop.f32.mrf.mxu0  ;;  %v887_v25 = vrot.slane %v7357_v57, 2 }
  0xfe   :  { %v7576_v48 = vadd.f32 %v693_v26, %v476_v54  ;;  %v482_v14 = vpop.f32.mrf.mxu1  ;;  %v741_v26 = vsel %vm708_vm3, %v738_v21, %v740_v4 }
  0xff   :  { %11070 = vst [vmem:[#allocation45_spill] sm:$0xff] %v7573_v50  ;;  %v888_v50 = vsel %vm708_vm3, %v885_v40, %v887_v25 }
 0x100   :  { %11071 = vst [vmem:[#allocation46_spill] sm:$0xff] %v7576_v48  ;;  %6043 = vmatmul.msk.f32.gmra.mxu0 %vm216_vm2, %v739_v62 }
 0x101   :  { %6062 = vmatmul.msk.f32.gmra.mxu1 %vm216_vm2, %v886_v34  ;;  %6079 = vmatmul.msk.f32.gmra.mxu2 %vm216_vm2, %v739_v62 }
 0x102   :  { %6098 = vmatmul.msk.f32.gmra.mxu3 %vm216_vm2, %v886_v34  ;;  %v742_v34 = vrot.slane %v7061_v7, 2 }
 0x104   :  { %v589_v2 = vpop.f32.mrf.mxu2 }
 0x105   :  { %v7585_v18 = vadd.f32 %v589_v2, %v316_v58  ;;  %v696_v54 = vpop.f32.mrf.mxu3  ;;  %v322_v10 = vpop.f32.mrf.mxu0  ;;  %v889_v58 = vrot.slane %v7086_v16, 2 }
 0x106   :  { %v7588_v29 = vadd.f32 %v696_v54, %v479_v36  ;;  %v485_v48 = vpop.f32.mrf.mxu1  ;;  %v743_v54 = vsel %vm708_vm3, %v740_v4, %v742_v34 }
 0x107   :  { %11072 = vst [vmem:[#allocation47_spill] sm:$0xff] %v7585_v18  ;;  %v890_v18 = vsel %vm708_vm3, %v887_v25, %v889_v58 }
 0x108   :  { %11073 = vst [vmem:[#allocation48_spill] sm:$0xff] %v7588_v29  ;;  %6044 = vmatmul.msk.f32.gmra.mxu0 %vm216_vm2, %v741_v26 }
 0x109   :  { %6063 = vmatmul.msk.f32.gmra.mxu1 %vm216_vm2, %v888_v50  ;;  %6080 = vmatmul.msk.f32.gmra.mxu2 %vm216_vm2, %v741_v26 }
 0x10a   :  { %6099 = vmatmul.msk.f32.gmra.mxu3 %vm216_vm2, %v888_v50  ;;  %v744_v50 = vrot.slane %v7064_v8, 2 }
 0x10c   :  { %v592_v62 = vpop.f32.mrf.mxu2 }
 0x10d   :  { %v7597_v2 = vadd.f32 %v592_v62, %v319_v20  ;;  %v699_v36 = vpop.f32.mrf.mxu3  ;;  %v802_v21 = vpop.f32.mrf.mxu0  ;;  %v891_v20 = vrot.slane %v7089_v17, 2  ;;  %v5949_v17 = vld [vmem:[%s10822_s1 + $0x18] sm:$0xf] }
 0x10e   :  { %v7600_v40 = vadd.f32 %v699_v36, %v482_v14  ;;  %v946_v29 = vpop.f32.mrf.mxu1  ;;  %v5950_v14 = vld [vmem:[%s10822_s1 + $0x1c] sm:$0xf]  ;;  %v745_v36 = vsel %vm708_vm3, %v742_v34, %v744_v50  ;;  %6199 = vmatpush.msk.msrb.mxu1 %vm253_vm0, %v5949_v17  ;;  %6180 = vmatpush.msk.msrb.mxu0 %vm253_vm0, %v5949_v17  ;;  %v1386_v34 = vrot.slane %v7137_v39, 3 }
 0x10f   :  { %11074 = vst [vmem:[#allocation49_spill] sm:$0xff] %v7597_v2  ;;  %6237 = vmatpush.msk.msra.mxu3 %vm253_vm0, %v5950_v14  ;;  %6218 = vmatpush.msk.msra.mxu2 %vm253_vm0, %v5950_v14  ;;  %v7621_v2 = vunpack.c.h.bf16 %v7053_v5  ;;  %v7627_v14 = vunpack.c.h.bf16 %v7078_v12  ;;  %v1238_v5 = vrot.slane %v7109_v28, 3  ;;  %v1385_v12 = vrot.slane %v7121_v32, 3 }
 0x110   :  { %11075 = vst [vmem:[#allocation50_spill] sm:$0xff] %v7600_v40  ;;  %6045 = vmatmul.msk.f32.gmra.mxu0 %vm216_vm2, %v743_v54  ;;  %v892_v40 = vsel %vm708_vm3, %v889_v58, %v891_v20  ;;  %v6901_v58 = vld [vmem:[%s10821_s0 + $0x50] sm:$0xff]  }
 0x111   :  { %6064 = vmatmul.msk.f32.gmra.mxu1 %vm216_vm2, %v890_v18  ;;  %6081 = vmatmul.msk.f32.gmra.mxu2 %vm216_vm2, %v743_v54  ;;  %11078 = vst [vmem:[#allocation53_spill] sm:$0xff] %v7621_v2  ;;  %v1122_v17 = vrot.slane %v7627_v14, 2  ;;  %v7654_v8 = vunpack.c.l.bf16 %v6901_v58  ;;  %v1018_v58 = vadd.f32 %v946_v29, %v7418_v56  ;;  %v1243_v56 = vrot.slane %v7168_v51, 3 }
 0x112   :  { %6100 = vmatmul.msk.f32.gmra.mxu3 %vm216_vm2, %v890_v18  ;;  %11079 = vst [vmem:[#allocation54_spill] sm:$0xff] %v7627_v14  ;;  %v1387_v14 = vsel %vm1237_vm4, %v1385_v12, %v1386_v34  ;;  %v1000_v12 = vadd.f32 %v802_v21, %v7415_v44  ;;  %v1390_v29 = vrot.slane %v7171_v53, 3  ;;  %v1565_v21 = vrot.slane %v7109_v28, 4 }
 0x113   :  { %11082 = vst [vmem:[#allocation57_spill] sm:$0xff] %v7654_v8  ;;  %v1123_v16 = vsel %vm708_vm3, %v891_v20, %v1122_v17 }
 0x114   :  { %v595_v4 = vpop.f32.mrf.mxu2 }
 0x115   :  { %v7614_v25 = vadd.f32 %v595_v4, %v322_v10  ;;  %v702_v26 = vpop.f32.mrf.mxu3  ;;  %v805_v62 = vpop.f32.mrf.mxu0  ;;  %v1038_v10 = vrot.slane %v7621_v2, 2 }
 0x116   :  { %v7617_v54 = vadd.f32 %v702_v26, %v485_v48  ;;  %v949_v18 = vpop.f32.mrf.mxu1  ;;  %v1239_v48 = vrot.slane %v7134_v37, 3  ;;  %v6912_v26 = vld [vmem:[%s10821_s0 + $0xf8] sm:$0xff]  }
 0x117   :  { %11076 = vst [vmem:[#allocation51_spill] sm:$0xff] %v7614_v25  ;;  %v1039_v2 = vsel %vm708_vm3, %v744_v50, %v1038_v10  ;;  %v7657_v7 = vunpack.c.l.bf16 %v6912_v26  ;;  %v1040_v50 = vrot.slane %v7654_v8, 2 }
 0x118   :  { %11077 = vst [vmem:[#allocation52_spill] sm:$0xff] %v7617_v54  ;;  %6046 = vmatmul.msk.f32.gmra.mxu0 %vm216_vm2, %v745_v36  ;;  %v1240_v54 = vsel %vm1237_vm4, %v1238_v5, %v1239_v48  ;;  %v1388_v5 = vrot.slane %v7157_v47, 3 }
 0x119   :  { %6065 = vmatmul.msk.f32.gmra.mxu1 %vm216_vm2, %v892_v40  ;;  %6082 = vmatmul.msk.f32.gmra.mxu2 %vm216_vm2, %v745_v36  ;;  %v1124_v20 = vrot.slane %v7657_v7, 2  ;;  %v1041_v8 = vsel %vm708_vm3, %v1038_v10, %v1040_v50  ;;  %v1001_v10 = vadd.f32 %v805_v62, %v7429_v6  ;;  %v1568_v62 = vrot.slane %v7154_v45, 4 }
 0x11a   :  { %6101 = vmatmul.msk.f32.gmra.mxu3 %vm216_vm2, %v892_v40  ;;  %v1389_v55 = vsel %vm1237_vm4, %v1386_v34, %v1388_v5  ;;  %v1712_v34 = vrot.slane %v7121_v32, 4 }
 0x11b   :  { %v1125_v44 = vsel %vm708_vm3, %v1122_v17, %v1124_v20  ;;  %v1713_v17 = vrot.slane %v7137_v39, 4  ;;  %v1245_v39 = vrot.slane %v7188_v59, 3 }
 0x11c   :  { %v7644_v4 = vpop.f32.mrf.mxu2 }
 0x11d   :  { %11080 = vst [vmem:[#allocation55_spill] sm:$0xff] %v7644_v4  ;;  %v7649_v40 = vpop.f32.mrf.mxu3  ;;  %v808_v36 = vpop.f32.mrf.mxu0  ;;  %v1714_v32 = vsel %vm253_vm0, %v1712_v34, %v1713_v17  ;;  %v1246_v34 = vsel %vm1237_vm4, %v1243_v56, %v1245_v39 }
 0x11e   :  { %11081 = vst [vmem:[#allocation56_spill] sm:$0xff] %v7649_v40  ;;  %v952_v25 = vpop.f32.mrf.mxu1  ;;  %v1241_v40 = vrot.slane %v7154_v45, 3 }
 0x120   :  { %6105 = vmatmul.msk.f32.vlgmr.msra.gmra.mxu0 %vm216_vm2, %v1240_v54 }
 0x121   :  { %6083 = vmatmul.msk.f32.gmra.mxu2 %vm216_vm2, %v1039_v2  ;;  %6124 = vmatmul.msk.f32.vlgmr.msra.gmra.mxu1 %vm216_vm2, %v1387_v14  ;;  %v1242_v14 = vsel %vm1237_vm4, %v1239_v48, %v1241_v40  ;;  %v1566_v48 = vrot.slane %v7134_v37, 4  ;;  %v1391_v37 = vsel %vm1237_vm4, %v1388_v5, %v1390_v29  ;;  %v1715_v5 = vrot.slane %v7157_v47, 4 }
 0x122   :  { %6102 = vmatmul.msk.f32.gmra.mxu3 %vm216_vm2, %v1123_v16 }
 0x123   :  { %v1567_v6 = vsel %vm253_vm0, %v1565_v21, %v1566_v48 }
 0x124   :  { %v1066_v26 = vpop.f32.mrf.mxu2 }
 0x125   :  { %v7669_v54 = vadd.f32 %v1066_v26, %v1000_v12  ;;  %v1147_v2 = vpop.f32.mrf.mxu3  ;;  %v811_v4 = vpop.f32.mrf.mxu0 }
 0x126   :  { %v7672_v57 = vadd.f32 %v1147_v2, %v1018_v58  ;;  %v955_v16 = vpop.f32.mrf.mxu1  ;;  %v1244_v58 = vsel %vm1237_vm4, %v1241_v40, %v1243_v56  ;;  %v1002_v40 = vadd.f32 %v808_v36, %v7441_v38  ;;  %v1020_v2 = vadd.f32 %v952_v25, %v7444_v9 }
 0x127   :  { %v1569_v38 = vsel %vm253_vm0, %v1566_v48, %v1568_v62  ;;  %v1716_v36 = vsel %vm253_vm0, %v1713_v17, %v1715_v5  ;;  %v1247_v9 = vrot.slane %v7202_v1, 3  ;;  %v1394_v25 = vrot.slane %v7205_v13, 3 }
 0x128   :  { %6106 = vmatmul.msk.f32.gmra.mxu0 %vm216_vm2, %v1242_v14  ;;  %v1570_v56 = vrot.slane %v7168_v51, 4  ;;  %v1717_v48 = vrot.slane %v7171_v53, 4  ;;  %v1021_v17 = vadd.f32 %v955_v16, %v7456_v0  ;;  %v1249_v0 = vrot.slane %v7222_v22, 3 }
 0x129   :  { %6084 = vmatmul.msk.f32.gmra.mxu2 %vm216_vm2, %v1041_v8  ;;  %6125 = vmatmul.msk.f32.gmra.mxu1 %vm216_vm2, %v1389_v55  ;;  %v1019_v8 = vadd.f32 %v949_v18, %v7432_v23  ;;  %v1392_v23 = vrot.slane %v7191_v61, 3  ;;  %v6947_v18 = vld [vmem:[%s10822_s1 + $0x4] sm:$0xf]  ;;  %v1572_v16 = vrot.slane %v7188_v59, 4 }
 0x12a   :  { %6103 = vmatmul.msk.f32.gmra.mxu3 %vm216_vm2, %v1125_v44 }
 0x12c   :  { %v1069_v50 = vpop.f32.mrf.mxu2 }
 0x12d   :  { %v7689_v55 = vadd.f32 %v1069_v50, %v1001_v10  ;;  %v1150_v12 = vpop.f32.mrf.mxu3  ;;  %v814_v20 = vpop.f32.mrf.mxu0 }
 0x12e   :  { %v7692_v26 = vadd.f32 %v1150_v12, %v1019_v8  ;;  %v958_v28 = vpop.f32.mrf.mxu1  ;;  %v1393_v12 = vsel %vm1237_vm4, %v1390_v29, %v1392_v23  ;;  %v1003_v29 = vadd.f32 %v811_v4, %v7453_v11  ;;  %v7740_v11 = vsel %vm253_vm0, %v1715_v5, %v1717_v48 }
 0x12f   :  { %v1396_v4 = vrot.slane %v7225_v24, 3 }
 0x130   :  { %6107 = vmatmul.msk.f32.gmra.mxu0 %vm216_vm2, %v1244_v58 }
 0x131   :  { %6126 = vmatmul.msk.f32.gmra.mxu1 %vm216_vm2, %v1391_v37  ;;  %6143 = vmatmul.msk.f32.vlgmr.msrb.gmra.mxu2 %vm216_vm2, %v1567_v6 }
 0x132   :  { %6162 = vmatmul.msk.f32.vlgmr.msrb.gmra.mxu3 %vm216_vm2, %v1714_v32  ;;  %6294 = vmatpush.msk.msrb.mxu2 %vm253_vm0, %v6947_v18 }
 0x133   :  { %6313 = vmatpush.msk.msrb.mxu3 %vm253_vm0, %v6947_v18  ;;  %v1248_v18 = vsel %vm1237_vm4, %v1245_v39, %v1247_v9  ;;  %v1004_v39 = vadd.f32 %v814_v20, %v7465_v3  ;;  %v1398_v20 = vrot.slane %v7239_v33, 3 }
 0x134   :  { %v1072_v14 = vpop.f32.mrf.mxu2 }
 0x135   :  { %v7712_v44 = vadd.f32 %v1072_v14, %v1002_v40  ;;  %v1153_v21 = vpop.f32.mrf.mxu3  ;;  %v817_v10 = vpop.f32.mrf.mxu0  ;;  %v1395_v14 = vsel %vm1237_vm4, %v1392_v23, %v1394_v25  ;;  %v1719_v23 = vrot.slane %v7191_v61, 4 }
 0x136   :  { %v7715_v8 = vadd.f32 %v1153_v21, %v1020_v2  ;;  %v961_v50 = vpop.f32.mrf.mxu1  ;;  %v7737_v21 = vsel %vm253_vm0, %v1568_v62, %v1570_v56  ;;  %v1022_v62 = vadd.f32 %v958_v28, %v7468_v27  ;;  %v1251_v27 = vrot.slane %v7236_v30, 3 }
 0x137   :  { %v7764_v3 = vsel %vm253_vm0, %v1717_v48, %v1719_v23  ;;  %v1574_v28 = vrot.slane %v7202_v1, 4  ;;  %v11087_v48 = vld [vmem:[#allocation30_spill] sm:$0xff] }
 0x138   :  { %6108 = vmatmul.msk.f32.gmra.mxu0 %vm216_vm2, %v1246_v34 }
 0x139   :  { %6127 = vmatmul.msk.f32.gmra.mxu1 %vm216_vm2, %v1393_v12  ;;  %6144 = vmatmul.msk.f32.gmra.mxu2 %vm216_vm2, %v1569_v38 }
 0x13a   :  { %6163 = vmatmul.msk.f32.gmra.mxu3 %vm216_vm2, %v1716_v36  ;;  %v1250_v36 = vsel %vm1237_vm4, %v1247_v9, %v1249_v0  ;;  %v11086_v9 = vld [vmem:[#allocation29_spill] sm:$0xff] }
 0x13c   :  { %v1075_v58 = vpop.f32.mrf.mxu2 }
 0x13d   :  { %v7730_v37 = vadd.f32 %v1075_v58, %v1003_v29  ;;  %v1156_v6 = vpop.f32.mrf.mxu3  ;;  %v820_v32 = vpop.f32.mrf.mxu0  ;;  %v1397_v58 = vsel %vm1237_vm4, %v1394_v25, %v1396_v4  ;;  %v1005_v25 = vadd.f32 %v817_v10, %v11086_v9 }
 0x13e   :  { %v7733_v40 = vadd.f32 %v1156_v6, %v1021_v17  ;;  %v964_v2 = vpop.f32.mrf.mxu1  ;;  %v7761_v6 = vsel %vm253_vm0, %v1570_v56, %v1572_v16  ;;  %v1721_v56 = vrot.slane %v7205_v13, 4 }
 0x140   :  { %11083 = vst [vmem:[#allocation58_spill] sm:$0xff] %v7733_v40  ;;  %6109 = vmatmul.msk.f32.gmra.mxu0 %vm216_vm2, %v1248_v18  ;;  %v1023_v18 = vadd.f32 %v961_v50, %v11087_v48  ;;  %v7788_v10 = vsel %vm253_vm0, %v1719_v23, %v1721_v56  ;;  %v1253_v50 = vrot.slane %v7256_v41, 3  ;;  %v1723_v23 = vrot.slane %v7225_v24, 4 }
 0x141   :  { %6128 = vmatmul.msk.f32.gmra.mxu1 %vm216_vm2, %v1395_v14  ;;  %6145 = vmatmul.msk.f32.gmra.mxu2 %vm216_vm2, %v7737_v21 }
 0x142   :  { %6164 = vmatmul.msk.f32.gmra.mxu3 %vm216_vm2, %v7740_v11 }
 0x144   :  { %v1078_v5 = vpop.f32.mrf.mxu2 }
 0x145   :  { %v7754_v34 = vadd.f32 %v1078_v5, %v1004_v39  ;;  %v1159_v12 = vpop.f32.mrf.mxu3  ;;  %v823_v38 = vpop.f32.mrf.mxu0 }
 0x146   :  { %v7757_v29 = vadd.f32 %v1159_v12, %v1022_v62  ;;  %v967_v17 = vpop.f32.mrf.mxu1  ;;  %v1252_v12 = vsel %vm1237_vm4, %v1249_v0, %v1251_v27  ;;  %v1400_v0 = vrot.slane %v7259_v43, 3 }
 0x147   :  { %11084 = vst [vmem:[#allocation59_spill] sm:$0xff] %v7754_v34  ;;  %v7785_v34 = vsel %vm253_vm0, %v1572_v16, %v1574_v28  ;;  %v11090_v16 = vld [vmem:[#allocation31_spill] sm:$0xff] }
 0x148   :  { %11085 = vst [vmem:[#allocation60_spill] sm:$0xff] %v7757_v29  ;;  %6110 = vmatmul.msk.f32.gmra.mxu0 %vm216_vm2, %v1250_v36  ;;  %v1399_v29 = vsel %vm1237_vm4, %v1396_v4, %v1398_v20  ;;  %v1576_v4 = vrot.slane %v7222_v22, 4  ;;  %v1006_v9 = vadd.f32 %v820_v32, %v11090_v16  ;;  %v1401_v40 = vsel %vm1237_vm4, %v1398_v20, %v1400_v0 }
 0x149   :  { %6129 = vmatmul.msk.f32.gmra.mxu1 %vm216_vm2, %v1397_v58  ;;  %6146 = vmatmul.msk.f32.gmra.mxu2 %vm216_vm2, %v7761_v6  ;;  %v7812_v32 = vsel %vm253_vm0, %v1721_v56, %v1723_v23  ;;  %v1578_v20 = vrot.slane %v7236_v30, 4  ;;  %v1725_v56 = vrot.slane %v7239_v33, 4 }
 0x14a   :  { %6165 = vmatmul.msk.f32.gmra.mxu3 %vm216_vm2, %v7764_v3  ;;  %v7809_v22 = vsel %vm253_vm0, %v1574_v28, %v1576_v4  ;;  %v11094_v28 = vld [vmem:[#allocation33_spill] sm:$0xff] }
 0x14b   :  { %v1007_v16 = vadd.f32 %v823_v38, %v11094_v28  ;;  %v7833_v30 = vsel %vm253_vm0, %v1576_v4, %v1578_v20  ;;  %v7836_v38 = vsel %vm253_vm0, %v1723_v23, %v1725_v56  ;;  %v11098_v4 = vld [vmem:[#allocation35_spill] sm:$0xff]  ;;  %v1727_v23 = vrot.slane %v7259_v43, 4 }
 0x14c   :  { %v1081_v14 = vpop.f32.mrf.mxu2 }
 0x14d   :  { %v7778_v39 = vadd.f32 %v1081_v14, %v1005_v25  ;;  %v1162_v62 = vpop.f32.mrf.mxu3  ;;  %v826_v5 = vpop.f32.mrf.mxu0  ;;  %v11091_v25 = vld [vmem:[#allocation32_spill] sm:$0xff] }
 0x14e   :  { %v7781_v36 = vadd.f32 %v1162_v62, %v1023_v18  ;;  %v970_v58 = vpop.f32.mrf.mxu1  ;;  %v1024_v48 = vadd.f32 %v964_v2, %v11091_v25  ;;  %v1255_v2 = vrot.slane %v7270_v49, 3  ;;  %v1008_v28 = vadd.f32 %v826_v5, %v11098_v4 }
 0x14f   :  { %11088 = vst [vmem:[#allocation29_spill] sm:$0xff] %v7778_v39  ;;  %v7860_v5 = vsel %vm253_vm0, %v1725_v56, %v1727_v23  ;;  %v1729_v56 = vrot.slane %v7273_v52, 4 }
 0x150   :  { %11089 = vst [vmem:[#allocation30_spill] sm:$0xff] %v7781_v36  ;;  %6111 = vmatmul.msk.f32.gmra.mxu0 %vm216_vm2, %v1252_v12  ;;  %v1254_v12 = vsel %vm1237_vm4, %v1251_v27, %v1253_v50  ;;  %v1402_v27 = vrot.slane %v7273_v52, 3 }
 0x151   :  { %6130 = vmatmul.msk.f32.gmra.mxu1 %vm216_vm2, %v1399_v29  ;;  %6147 = vmatmul.msk.f32.gmra.mxu2 %vm216_vm2, %v7785_v34 }
 0x152   :  { %6166 = vmatmul.msk.f32.gmra.mxu3 %vm216_vm2, %v7788_v10  ;;  %v1403_v24 = vsel %vm1237_vm4, %v1400_v0, %v1402_v27  ;;  %v1580_v0 = vrot.slane %v7256_v41, 4 }
 0x154   :  { %v1084_v18 = vpop.f32.mrf.mxu2  ;;  %v7857_v41 = vsel %vm253_vm0, %v1578_v20, %v1580_v0  ;;  %v11102_v20 = vld [vmem:[#allocation37_spill] sm:$0xff] }
 0x155   :  { %v7802_v29 = vadd.f32 %v1084_v18, %v1006_v9  ;;  %v1165_v14 = vpop.f32.mrf.mxu3  ;;  %v829_v62 = vpop.f32.mrf.mxu0  ;;  %v11095_v9 = vld [vmem:[#allocation34_spill] sm:$0xff] }
 0x156   :  { %v7805_v36 = vadd.f32 %v1165_v14, %v1024_v48  ;;  %v973_v39 = vpop.f32.mrf.mxu1  ;;  %v1025_v25 = vadd.f32 %v967_v17, %v11095_v9  ;;  %v1257_v17 = vrot.slane %v7290_v60, 3  ;;  %v1009_v4 = vadd.f32 %v829_v62, %v11102_v20 }
 0x157   :  { %11092 = vst [vmem:[#allocation31_spill] sm:$0xff] %v7802_v29  ;;  %v7884_v62 = vsel %vm253_vm0, %v1727_v23, %v1729_v56  ;;  %v1731_v23 = vrot.slane %v7293_v63, 4 }
 0x158   :  { %11093 = vst [vmem:[#allocation32_spill] sm:$0xff] %v7805_v36  ;;  %6112 = vmatmul.msk.f32.gmra.mxu0 %vm216_vm2, %v1254_v12  ;;  %v1256_v12 = vsel %vm1237_vm4, %v1253_v50, %v1255_v2  ;;  %v1404_v50 = vrot.slane %v7293_v63, 3 }
 0x159   :  { %6131 = vmatmul.msk.f32.gmra.mxu1 %vm216_vm2, %v1401_v40  ;;  %6148 = vmatmul.msk.f32.gmra.mxu2 %vm216_vm2, %v7809_v22 }
 0x15a   :  { %6167 = vmatmul.msk.f32.gmra.mxu3 %vm216_vm2, %v7812_v32  ;;  %v1405_v33 = vsel %vm1237_vm4, %v1402_v27, %v1404_v50  ;;  %v1582_v27 = vrot.slane %v7270_v49, 4 }
 0x15c   :  { %v1087_v48 = vpop.f32.mrf.mxu2  ;;  %v7881_v49 = vsel %vm253_vm0, %v1580_v0, %v1582_v27  ;;  %v11106_v0 = vld [vmem:[#allocation39_spill] sm:$0xff] }
 0x15d   :  { %v7826_v40 = vadd.f32 %v1087_v48, %v1007_v16  ;;  %v1168_v18 = vpop.f32.mrf.mxu3  ;;  %v832_v14 = vpop.f32.mrf.mxu0  ;;  %v11099_v16 = vld [vmem:[#allocation36_spill] sm:$0xff] }
 0x15e   :  { %v7829_v36 = vadd.f32 %v1168_v18, %v1025_v25  ;;  %v976_v29 = vpop.f32.mrf.mxu1  ;;  %v1026_v9 = vadd.f32 %v970_v58, %v11099_v16  ;;  %v1259_v58 = vrot.slane %v7304_v15, 3  ;;  %v1010_v20 = vadd.f32 %v832_v14, %v11106_v0 }
 0x15f   :  { %11096 = vst [vmem:[#allocation33_spill] sm:$0xff] %v7826_v40  ;;  %v7908_v14 = vsel %vm253_vm0, %v1729_v56, %v1731_v23  ;;  %v1733_v56 = vrot.slane %v7307_v19, 4 }
 0x160   :  { %11097 = vst [vmem:[#allocation34_spill] sm:$0xff] %v7829_v36  ;;  %6113 = vmatmul.msk.f32.gmra.mxu0 %vm216_vm2, %v1256_v12  ;;  %v1258_v12 = vsel %vm1237_vm4, %v1255_v2, %v1257_v17  ;;  %v1406_v2 = vrot.slane %v7307_v19, 3 }
 0x161   :  { %6132 = vmatmul.msk.f32.gmra.mxu1 %vm216_vm2, %v1403_v24  ;;  %6149 = vmatmul.msk.f32.gmra.mxu2 %vm216_vm2, %v7833_v30 }
 0x162   :  { %6168 = vmatmul.msk.f32.gmra.mxu3 %vm216_vm2, %v7836_v38  ;;  %v1407_v43 = vsel %vm1237_vm4, %v1404_v50, %v1406_v2  ;;  %v1584_v50 = vrot.slane %v7290_v60, 4 }
 0x164   :  { %v1090_v25 = vpop.f32.mrf.mxu2  ;;  %v7905_v60 = vsel %vm253_vm0, %v1582_v27, %v1584_v50  ;;  %v11110_v27 = vld [vmem:[#allocation41_spill] sm:$0xff] }
 0x165   :  { %v7850_v24 = vadd.f32 %v1090_v25, %v1008_v28  ;;  %v1171_v48 = vpop.f32.mrf.mxu3  ;;  %v835_v18 = vpop.f32.mrf.mxu0  ;;  %v11103_v28 = vld [vmem:[#allocation38_spill] sm:$0xff] }
 0x166   :  { %v7853_v36 = vadd.f32 %v1171_v48, %v1026_v9  ;;  %v979_v40 = vpop.f32.mrf.mxu1  ;;  %v1027_v16 = vadd.f32 %v973_v39, %v11103_v28  ;;  %v1261_v39 = vrot.slane %v7324_v31, 3  ;;  %v1011_v0 = vadd.f32 %v835_v18, %v11110_v27  ;;  %v11117_v27 = vld [vmem:[#allocation26_spill] sm:$0xff] }
 0x167   :  { %11100 = vst [vmem:[#allocation35_spill] sm:$0xff] %v7850_v24  ;;  %v7932_v18 = vsel %vm253_vm0, %v1731_v23, %v1733_v56  ;;  %v1735_v23 = vrot.slane %v7327_v35, 4 }
 0x168   :  { %11101 = vst [vmem:[#allocation36_spill] sm:$0xff] %v7853_v36  ;;  %6114 = vmatmul.msk.f32.gmra.mxu0 %vm216_vm2, %v1258_v12  ;;  %v1260_v12 = vsel %vm1237_vm4, %v1257_v17, %v1259_v58  ;;  %v1408_v17 = vrot.slane %v7327_v35, 3 }
 0x169   :  { %6133 = vmatmul.msk.f32.gmra.mxu1 %vm216_vm2, %v1405_v33  ;;  %6150 = vmatmul.msk.f32.gmra.mxu2 %vm216_vm2, %v7857_v41  ;;  %11115 = vst [vmem:[#allocation62_spill] sm:$0xff] %v7932_v18 }
 0x16a   :  { %6169 = vmatmul.msk.f32.gmra.mxu3 %vm216_vm2, %v7860_v5  ;;  %v1409_v52 = vsel %vm1237_vm4, %v1406_v2, %v1408_v17  ;;  %v1586_v2 = vrot.slane %v7304_v15, 4 }
 0x16c   :  { %v1093_v9 = vpop.f32.mrf.mxu2  ;;  %v7929_v15 = vsel %vm253_vm0, %v1584_v50, %v1586_v2  ;;  %v1588_v50 = vrot.slane %v7324_v31, 4 }
 0x16d   :  { %v7874_v33 = vadd.f32 %v1093_v9, %v1009_v4  ;;  %v1174_v25 = vpop.f32.mrf.mxu3  ;;  %v838_v48 = vpop.f32.mrf.mxu0  ;;  %v11107_v4 = vld [vmem:[#allocation40_spill] sm:$0xff]  ;;  %11114 = vst [vmem:[#allocation61_spill] sm:$0xff] %v7929_v15 }
 0x16e   :  { %v7877_v36 = vadd.f32 %v1174_v25, %v1027_v16  ;;  %v982_v24 = vpop.f32.mrf.mxu1  ;;  %v1028_v28 = vadd.f32 %v976_v29, %v11107_v4  ;;  %v1263_v29 = vrot.slane %v7338_v42, 3  ;;  %v7953_v31 = vsel %vm253_vm0, %v1586_v2, %v1588_v50 }
 0x16f   :  { %11104 = vst [vmem:[#allocation37_spill] sm:$0xff] %v7874_v33  ;;  %v1590_v2 = vrot.slane %v7338_v42, 4 }
 0x170   :  { %11105 = vst [vmem:[#allocation38_spill] sm:$0xff] %v7877_v36  ;;  %6115 = vmatmul.msk.f32.gmra.mxu0 %vm216_vm2, %v1260_v12  ;;  %v1262_v12 = vsel %vm1237_vm4, %v1259_v58, %v1261_v39  ;;  %v1410_v58 = vrot.slane %v7341_v46, 3 }
 0x171   :  { %6134 = vmatmul.msk.f32.gmra.mxu1 %vm216_vm2, %v1407_v43  ;;  %6151 = vmatmul.msk.f32.gmra.mxu2 %vm216_vm2, %v7881_v49  ;;  %11122 = vst [vmem:[#allocation63_spill] sm:$0xff] %v7953_v31  ;;  %v7977_v42 = vsel %vm253_vm0, %v1588_v50, %v1590_v2 }
 0x172   :  { %6170 = vmatmul.msk.f32.gmra.mxu3 %vm216_vm2, %v7884_v62  ;;  %v1411_v63 = vsel %vm1237_vm4, %v1408_v17, %v1410_v58  ;;  %v1412_v17 = vrot.slane %v11117_v27, 3  ;;  %11130 = vst [vmem:[#allocation65_spill] sm:$0xff] %v7977_v42 }
 0x174   :  { %v1096_v16 = vpop.f32.mrf.mxu2 }
 0x175   :  { %v7898_v43 = vadd.f32 %v1096_v16, %v1010_v20  ;;  %v1177_v9 = vpop.f32.mrf.mxu3  ;;  %v841_v25 = vpop.f32.mrf.mxu0  ;;  %v11111_v20 = vld [vmem:[#allocation42_spill] sm:$0xff] }
 0x176   :  { %v7901_v36 = vadd.f32 %v1177_v9, %v1028_v28  ;;  %v985_v33 = vpop.f32.mrf.mxu1  ;;  %v1029_v4 = vadd.f32 %v979_v40, %v11111_v20  ;;  %v11116_v40 = vld [vmem:[#allocation25_spill] sm:$0xff] }
 0x177   :  { %11108 = vst [vmem:[#allocation39_spill] sm:$0xff] %v7898_v43  ;;  %v1592_v50 = vrot.slane %v11116_v40, 4 }
 0x178   :  { %11109 = vst [vmem:[#allocation40_spill] sm:$0xff] %v7901_v36  ;;  %6116 = vmatmul.msk.f32.gmra.mxu0 %vm216_vm2, %v1262_v12  ;;  %v1264_v12 = vsel %vm1237_vm4, %v1261_v39, %v1263_v29  ;;  %v1265_v39 = vrot.slane %v11116_v40, 3 }
 0x179   :  { %6135 = vmatmul.msk.f32.gmra.mxu1 %vm216_vm2, %v1409_v52  ;;  %6152 = vmatmul.msk.f32.gmra.mxu2 %vm216_vm2, %v7905_v60  ;;  %v8001_v40 = vsel %vm253_vm0, %v1590_v2, %v1592_v50 }
 0x17a   :  { %6171 = vmatmul.msk.f32.gmra.mxu3 %vm216_vm2, %v7908_v14  ;;  %11138 = vst [vmem:[#allocation67_spill] sm:$0xff] %v8001_v40 }
 0x17c   :  { %v1099_v28 = vpop.f32.mrf.mxu2 }
 0x17d   :  { %v7922_v52 = vadd.f32 %v1099_v28, %v1011_v0  ;;  %v1180_v16 = vpop.f32.mrf.mxu3  ;;  %v844_v9 = vpop.f32.mrf.mxu0  ;;  %v11118_v0 = vld [vmem:[#allocation43_spill] sm:$0xff] }
 0x17e   :  { %v7925_v36 = vadd.f32 %v1180_v16, %v1029_v4  ;;  %v988_v43 = vpop.f32.mrf.mxu1  ;;  %v1012_v20 = vadd.f32 %v838_v48, %v11118_v0  ;;  %v11119_v4 = vld [vmem:[#allocation44_spill] sm:$0xff]  ;;  %v7956_v48 = vsel %vm253_vm0, %v1733_v56, %v1735_v23  ;;  %v11125_v0 = vld [vmem:[#allocation7_spill] sm:$0xff]  ;;  %v1737_v56 = vrot.slane %v7341_v46, 4 }
 0x17f   :  { %11112 = vst [vmem:[#allocation41_spill] sm:$0xff] %v7922_v52  ;;  %v1030_v28 = vadd.f32 %v982_v24, %v11119_v4  ;;  %v1266_v52 = vsel %vm1237_vm4, %v1263_v29, %v1265_v39  ;;  %v11124_v24 = vld [vmem:[#allocation5_spill] sm:$0xff] }
 0x180   :  { %11113 = vst [vmem:[#allocation42_spill] sm:$0xff] %v7925_v36  ;;  %6117 = vmatmul.msk.f32.gmra.mxu0 %vm216_vm2, %v1264_v12  ;;  %v1267_v29 = vrot.slane %v11124_v24, 3  ;;  %v1594_v2 = vrot.slane %v11124_v24, 4 }
 0x181   :  { %6136 = vmatmul.msk.f32.gmra.mxu1 %vm216_vm2, %v1411_v63  ;;  %6153 = vmatmul.msk.f32.gmra.mxu2 %vm216_vm2, %v7929_v15  ;;  %v1413_v15 = vsel %vm1237_vm4, %v1410_v58, %v1412_v17  ;;  %11123 = vst [vmem:[#allocation64_spill] sm:$0xff] %v7956_v48  ;;  %v1414_v58 = vrot.slane %v11125_v0, 3 }
 0x182   :  { %6172 = vmatmul.msk.f32.gmra.mxu3 %vm216_vm2, %v7932_v18  ;;  %v8025_v24 = vsel %vm253_vm0, %v1592_v50, %v1594_v2 }
 0x184   :  { %v1102_v16 = vpop.f32.mrf.mxu2 }
 0x185   :  { %v7946_v63 = vadd.f32 %v1102_v16, %v1012_v20  ;;  %v1183_v12 = vpop.f32.mrf.mxu3  ;;  %v847_v36 = vpop.f32.mrf.mxu0  ;;  %v11126_v20 = vld [vmem:[#allocation45_spill] sm:$0xff] }
 0x186   :  { %v7949_v19 = vadd.f32 %v1183_v12, %v1030_v28  ;;  %v991_v18 = vpop.f32.mrf.mxu1  ;;  %v1013_v4 = vadd.f32 %v841_v25, %v11126_v20  ;;  %v11127_v28 = vld [vmem:[#allocation46_spill] sm:$0xff]  ;;  %v7980_v25 = vsel %vm253_vm0, %v1735_v23, %v1737_v56  ;;  %v11133_v20 = vld [vmem:[#allocation8_spill] sm:$0xff]  ;;  %v1739_v23 = vrot.slane %v11117_v27, 4 }
 0x187   :  { %11120 = vst [vmem:[#allocation43_spill] sm:$0xff] %v7946_v63  ;;  %v1268_v63 = vsel %vm1237_vm4, %v1265_v39, %v1267_v29 }
 0x188   :  { %11121 = vst [vmem:[#allocation44_spill] sm:$0xff] %v7949_v19  ;;  %6118 = vmatmul.msk.f32.gmra.mxu0 %vm216_vm2, %v1266_v52  ;;  %v1031_v52 = vadd.f32 %v985_v33, %v11127_v28  ;;  %v11132_v33 = vld [vmem:[#allocation6_spill] sm:$0xff] }
 0x189   :  { %6137 = vmatmul.msk.f32.gmra.mxu1 %vm216_vm2, %v1413_v15  ;;  %6154 = vmatmul.msk.f32.gmra.mxu2 %vm216_vm2, %v7953_v31  ;;  %v1415_v31 = vsel %vm1237_vm4, %v1412_v17, %v1414_v58  ;;  %11131 = vst [vmem:[#allocation66_spill] sm:$0xff] %v7980_v25  ;;  %v1269_v39 = vrot.slane %v11132_v33, 3  ;;  %v1416_v17 = vrot.slane %v11133_v20, 3  ;;  %v1596_v50 = vrot.slane %v11132_v33, 4 }
 0x18a   :  { %6173 = vmatmul.msk.f32.gmra.mxu3 %vm216_vm2, %v7956_v48 }
 0x18b   :  { %v8049_v33 = vsel %vm253_vm0, %v1594_v2, %v1596_v50  ;;  %v11153_v2 = vld [vmem:[#allocation56_spill] sm:$0xff] }
 0x18c   :  { %v1105_v16 = vpop.f32.mrf.mxu2 }
 0x18d   :  { %v7970_v15 = vadd.f32 %v1105_v16, %v1013_v4  ;;  %v1186_v12 = vpop.f32.mrf.mxu3  ;;  %v850_v19 = vpop.f32.mrf.mxu0  ;;  %v11134_v4 = vld [vmem:[#allocation47_spill] sm:$0xff] }
 0x18e   :  { %v7973_v35 = vadd.f32 %v1186_v12, %v1031_v52  ;;  %v994_v48 = vpop.f32.mrf.mxu1  ;;  %v1014_v28 = vadd.f32 %v844_v9, %v11134_v4  ;;  %v11135_v52 = vld [vmem:[#allocation48_spill] sm:$0xff]  ;;  %v8004_v9 = vsel %vm253_vm0, %v1737_v56, %v1739_v23  ;;  %v11141_v4 = vld [vmem:[#allocation54_spill] sm:$0xff]  ;;  %v1741_v56 = vrot.slane %v11125_v0, 4 }
 0x18f   :  { %11128 = vst [vmem:[#allocation45_spill] sm:$0xff] %v7970_v15  ;;  %v1270_v15 = vsel %vm1237_vm4, %v1267_v29, %v1269_v39 }
 0x190   :  { %11129 = vst [vmem:[#allocation46_spill] sm:$0xff] %v7973_v35  ;;  %6119 = vmatmul.msk.f32.gmra.mxu0 %vm216_vm2, %v1268_v63  ;;  %v1032_v63 = vadd.f32 %v988_v43, %v11135_v52  ;;  %v11140_v43 = vld [vmem:[#allocation53_spill] sm:$0xff] }
 0x191   :  { %6138 = vmatmul.msk.f32.gmra.mxu1 %vm216_vm2, %v1415_v31  ;;  %6155 = vmatmul.msk.f32.gmra.mxu2 %vm216_vm2, %v7977_v42  ;;  %v1417_v42 = vsel %vm1237_vm4, %v1414_v58, %v1416_v17  ;;  %11139 = vst [vmem:[#allocation68_spill] sm:$0xff] %v8004_v9  ;;  %v1271_v29 = vrot.slane %v11140_v43, 3  ;;  %v1418_v58 = vrot.slane %v11141_v4, 3 }
 0x192   :  { %6174 = vmatmul.msk.f32.gmra.mxu3 %vm216_vm2, %v7980_v25 }
 0x194   :  { %v1108_v16 = vpop.f32.mrf.mxu2 }
 0x195   :  { %v7994_v31 = vadd.f32 %v1108_v16, %v1014_v28  ;;  %v1189_v12 = vpop.f32.mrf.mxu3  ;;  %v853_v35 = vpop.f32.mrf.mxu0  ;;  %v11142_v28 = vld [vmem:[#allocation49_spill] sm:$0xff] }
 0x196   :  { %v7997_v46 = vadd.f32 %v1189_v12, %v1032_v63  ;;  %v997_v25 = vpop.f32.mrf.mxu1  ;;  %v1015_v52 = vadd.f32 %v847_v36, %v11142_v28  ;;  %v11143_v63 = vld [vmem:[#allocation50_spill] sm:$0xff]  ;;  %v8028_v36 = vsel %vm253_vm0, %v1739_v23, %v1741_v56  ;;  %v11148_v28 = vld [vmem:[#allocation51_spill] sm:$0xff]  ;;  %v1743_v23 = vrot.slane %v11133_v20, 4 }
 0x197   :  { %11136 = vst [vmem:[#allocation47_spill] sm:$0xff] %v7994_v31  ;;  %v1272_v31 = vsel %vm1237_vm4, %v1269_v39, %v1271_v29 }
 0x198   :  { %11137 = vst [vmem:[#allocation48_spill] sm:$0xff] %v7997_v46  ;;  %6120 = vmatmul.msk.f32.gmra.mxu0 %vm216_vm2, %v1270_v15  ;;  %v1033_v15 = vadd.f32 %v991_v18, %v11143_v63  ;;  %v11147_v18 = vld [vmem:[#allocation57_spill] sm:$0xff]  ;;  %v11149_v63 = vld [vmem:[#allocation52_spill] sm:$0xff] }
 0x199   :  { %6139 = vmatmul.msk.f32.gmra.mxu1 %vm216_vm2, %v1417_v42  ;;  %6156 = vmatmul.msk.f32.gmra.mxu2 %vm216_vm2, %v8001_v40  ;;  %v1419_v40 = vsel %vm1237_vm4, %v1416_v17, %v1418_v58  ;;  %11146 = vst [vmem:[#allocation69_spill] sm:$0xff] %v8028_v36  ;;  %v1273_v39 = vrot.slane %v11147_v18, 3  ;;  %v1420_v17 = vrot.slane %v7657_v7, 3 }
 0x19a   :  { %6175 = vmatmul.msk.f32.gmra.mxu3 %vm216_vm2, %v8004_v9 }
 0x19c   :  { %v1111_v16 = vpop.f32.mrf.mxu2 }
 0x19d   :  { %v8018_v42 = vadd.f32 %v1111_v16, %v1015_v52  ;;  %v1192_v12 = vpop.f32.mrf.mxu3  ;;  %v1331_v46 = vpop.f32.mrf.mxu0  ;;  %v1016_v52 = vadd.f32 %v850_v19, %v11148_v28  ;;  %v5951_v19 = vld [vmem:[%s10822_s1 + $0x20] sm:$0xf] }
 0x19e   :  { %v8021_v27 = vadd.f32 %v1192_v12, %v1033_v15  ;;  %v1475_v9 = vpop.f32.mrf.mxu1  ;;  %6275 = vmatpush.msk.msra.mxu1 %vm253_vm0, %v5951_v19  ;;  %6256 = vmatpush.msk.msra.mxu0 %vm253_vm0, %v5951_v19 }
 0x19f   :  { %11144 = vst [vmem:[#allocation49_spill] sm:$0xff] %v8018_v42 }
 0x1a0   :  { %11145 = vst [vmem:[#allocation50_spill] sm:$0xff] %v8021_v27  ;;  %6121 = vmatmul.msk.f32.gmra.mxu0 %vm216_vm2, %v1272_v31  ;;  %v1034_v31 = vadd.f32 %v994_v48, %v11149_v63  ;;  %v1274_v27 = vsel %vm1237_vm4, %v1271_v29, %v1273_v39  ;;  %v8055_v48 = vsel %vm253_vm0, %v1741_v56, %v1743_v23  ;;  %v11150_v29 = vld [vmem:[#allocation27_spill] sm:$0xff]  ;;  %v1598_v56 = vrot.slane %v11140_v43, 4 }
 0x1a1   :  { %6140 = vmatmul.msk.f32.gmra.mxu1 %vm216_vm2, %v1419_v40  ;;  %6157 = vmatmul.msk.f32.gmra.mxu2 %vm216_vm2, %v8025_v24  ;;  %v11151_v39 = vld [vmem:[#allocation55_spill] sm:$0xff]  ;;  %v1745_v63 = vrot.slane %v11141_v4, 4 }
 0x1a2   :  { %6176 = vmatmul.msk.f32.gmra.mxu3 %vm216_vm2, %v8028_v36  ;;  %v1421_v36 = vsel %vm1237_vm4, %v1418_v58, %v1420_v17  ;;  %v599_v28 = vadd.f32 %v11151_v39, %v11150_v29  ;;  %v11152_v58 = vld [vmem:[#allocation28_spill] sm:$0xff]  ;;  %v8076_v39 = vsel %vm253_vm0, %v1596_v50, %v1598_v56  ;;  %v1529_v50 = vadd.f32 %v1331_v46, %v7669_v54 }
 0x1a3   :  { %v706_v17 = vadd.f32 %v11153_v2, %v11152_v58  ;;  %v8079_v58 = vsel %vm253_vm0, %v1743_v23, %v1745_v63  ;;  %v1547_v23 = vadd.f32 %v1475_v9, %v7672_v57  ;;  %v2094_v57 = vrot.slane %v7154_v45, 5 }
 0x1a4   :  { %v1114_v15 = vpop.f32.mrf.mxu2  ;;  %v2095_v54 = vrot.slane %v7168_v51, 5 }
 0x1a5   :  { %v8042_v40 = vadd.f32 %v1114_v15, %v1016_v52  ;;  %v1195_v16 = vpop.f32.mrf.mxu3  ;;  %v1334_v12 = vpop.f32.mrf.mxu0  ;;  %v1017_v52 = vadd.f32 %v853_v35, %v599_v28  ;;  %v10895_v35 = vrot.slane %v11147_v18, 4 }
 0x1a6   :  { %v8045_v42 = vadd.f32 %v1195_v16, %v1034_v31  ;;  %v1478_v0 = vpop.f32.mrf.mxu1  ;;  %v1530_v9 = vadd.f32 %v1334_v12, %v7689_v55  ;;  %v2097_v55 = vrot.slane %v7188_v59, 5  ;;  %v2244_v12 = vrot.slane %v7191_v61, 5 }
 0x1a8   :  { %6122 = vmatmul.msk.f32.gmra.mxu0 %vm216_vm2, %v1274_v27  ;;  %v1035_v27 = vadd.f32 %v997_v25, %v706_v17  ;;  %v6948_v25 = vld [vmem:[%s10822_s1] sm:$0xf] }
 0x1a9   :  { %6141 = vmatmul.msk.f32.gmra.mxu1 %vm216_vm2, %v1421_v36  ;;  %6158 = vmatmul.msk.f32.gmra.mxu2 %vm216_vm2, %v8049_v33 }
 0x1aa   :  { %6177 = vmatmul.msk.f32.gmra.mxu3 %vm216_vm2, %v8055_v48 }
 0x1ac   :  { %v1117_v31 = vpop.f32.mrf.mxu2 }
 0x1ad   :  { %v8071_v15 = vadd.f32 %v1117_v31, %v1017_v52  ;;  %v1198_v16 = vpop.f32.mrf.mxu3  ;;  %v1337_v36 = vpop.f32.mrf.mxu0  ;;  %v8105_v31 = vsel %vm253_vm0, %v1598_v56, %v10895_v35  ;;  %v2241_v56 = vrot.slane %v7157_v47, 5 }
 0x1ae   :  { %v8073_v19 = vadd.f32 %v1198_v16, %v1035_v27  ;;  %v1481_v29 = vpop.f32.mrf.mxu1 }
 0x1b0   :  { %6181 = vmatmul.msk.f32.vlgmr.msrb.gmra.mxu0 %vm216_vm2, %v7737_v21  ;;  %v10894_v21 = vrot.slane %v7657_v7, 4 }
 0x1b1   :  { %6159 = vmatmul.msk.f32.gmra.mxu2 %vm216_vm2, %v8076_v39  ;;  %6200 = vmatmul.msk.f32.vlgmr.msrb.gmra.mxu1 %vm216_vm2, %v7740_v11 }
 0x1b2   :  { %6178 = vmatmul.msk.f32.gmra.mxu3 %vm216_vm2, %v8079_v58  ;;  %6351 = vmatpush.msk.msrb.mxu1 %vm253_vm0, %v6948_v25  ;;  %v8110_v46 = vsel %vm253_vm0, %v1745_v63, %v10894_v21  ;;  %v1548_v63 = vadd.f32 %v1478_v0, %v7692_v26  ;;  %v6949_v26 = vld [vmem:[%s10822_s1 + $0x8] sm:$0xf]  ;;  %v1531_v0 = vadd.f32 %v1337_v36, %v7712_v44  ;;  %v2099_v44 = vrot.slane %v7202_v1, 5 }
 0x1b3   :  { %6332 = vmatpush.msk.msrb.mxu0 %vm253_vm0, %v6948_v25  ;;  %v2246_v36 = vrot.slane %v7205_v13, 5 }
 0x1b4   :  { %v1658_v11 = vpop.f32.mrf.mxu2 }
 0x1b5   :  { %v8098_v28 = vadd.f32 %v1658_v11, %v1529_v50  ;;  %v1802_v2 = vpop.f32.mrf.mxu3  ;;  %v1340_v17 = vpop.f32.mrf.mxu0 }
 0x1b6   :  { %v8100_v52 = vadd.f32 %v1802_v2, %v1547_v23  ;;  %v1484_v27 = vpop.f32.mrf.mxu1  ;;  %v2096_v2 = vsel %vm2093_vm5, %v2094_v57, %v2095_v54 }
 0x1b8   :  { %6182 = vmatmul.msk.f32.gmra.mxu0 %vm216_vm2, %v7761_v6  ;;  %v2242_v6 = vrot.slane %v7171_v53, 5 }
 0x1b9   :  { %6160 = vmatmul.msk.f32.gmra.mxu2 %vm216_vm2, %v8105_v31  ;;  %6201 = vmatmul.msk.f32.gmra.mxu1 %vm216_vm2, %v7764_v3 }
 0x1ba   :  { %6179 = vmatmul.msk.f32.gmra.mxu3 %vm216_vm2, %v8110_v46  ;;  %v2243_v21 = vsel %vm2093_vm5, %v2241_v56, %v2242_v6 }
 0x1bc   :  { %v1661_v16 = vpop.f32.mrf.mxu2 }
 0x1bd   :  { %v8126_v25 = vadd.f32 %v1661_v16, %v1530_v9  ;;  %v1805_v3 = vpop.f32.mrf.mxu3  ;;  %v1343_v50 = vpop.f32.mrf.mxu0  ;;  %v2098_v16 = vsel %vm2093_vm5, %v2095_v54, %v2097_v55 }
 0x1be   :  { %v8128_v23 = vadd.f32 %v1805_v3, %v1548_v63  ;;  %v1487_v11 = vpop.f32.mrf.mxu1  ;;  %v2245_v3 = vsel %vm2093_vm5, %v2242_v6, %v2244_v12 }
 0x1c0   :  { %6183 = vmatmul.msk.f32.gmra.mxu0 %vm216_vm2, %v7785_v34  ;;  %v1549_v34 = vadd.f32 %v1481_v29, %v7715_v8  ;;  %v1532_v8 = vadd.f32 %v1340_v17, %v7730_v37  ;;  %v11154_v29 = vld [vmem:[#allocation58_spill] sm:$0xff]  ;;  %v11155_v37 = vld [vmem:[#allocation9_spill] sm:$0xff] }
 0x1c1   :  { %6202 = vmatmul.msk.f32.gmra.mxu1 %vm216_vm2, %v7788_v10  ;;  %6219 = vmatmul.msk.f32.vlgmr.msra.gmra.mxu2 %vm216_vm2, %v2096_v2  ;;  %v1550_v54 = vadd.f32 %v1484_v27, %v11154_v29  ;;  %v2101_v17 = vrot.slane %v11155_v37, 5  ;;  %v11156_v27 = vld [vmem:[#allocation59_spill] sm:$0xff] }
 0x1c2   :  { %6238 = vmatmul.msk.f32.vlgmr.msra.gmra.mxu3 %vm216_vm2, %v2243_v21  ;;  %6370 = vmatpush.msk.msra.mxu2 %vm253_vm0, %v6949_v26 }
 0x1c3   :  { %6389 = vmatpush.msk.msra.mxu3 %vm253_vm0, %v6949_v26 }
 0x1c4   :  { %v1664_v10 = vpop.f32.mrf.mxu2 }
 0x1c5   :  { %v8147_v57 = vadd.f32 %v1664_v10, %v1531_v0  ;;  %v1808_v21 = vpop.f32.mrf.mxu3  ;;  %v1346_v9 = vpop.f32.mrf.mxu0  ;;  %v2247_v10 = vsel %vm2093_vm5, %v2244_v12, %v2246_v36 }
 0x1c6   :  { %v8149_v56 = vadd.f32 %v1808_v21, %v1549_v34  ;;  %v1490_v63 = vpop.f32.mrf.mxu1  ;;  %v2100_v34 = vsel %vm2093_vm5, %v2097_v55, %v2099_v44  ;;  %v1533_v21 = vadd.f32 %v1343_v50, %v11156_v27  ;;  %v11160_v50 = vld [vmem:[#allocation11_spill] sm:$0xff] }
 0x1c8   :  { %6184 = vmatmul.msk.f32.gmra.mxu0 %vm216_vm2, %v7809_v22 }
 0x1c9   :  { %6203 = vmatmul.msk.f32.gmra.mxu1 %vm216_vm2, %v7812_v32  ;;  %6220 = vmatmul.msk.f32.gmra.mxu2 %vm216_vm2, %v2098_v16  ;;  %v11157_v16 = vld [vmem:[#allocation10_spill] sm:$0xff] }
 0x1ca   :  { %6239 = vmatmul.msk.f32.gmra.mxu3 %vm216_vm2, %v2245_v3  ;;  %v2248_v3 = vrot.slane %v11157_v16, 5 }
 0x1cc   :  { %v1667_v2 = vpop.f32.mrf.mxu2 }
 0x1cd   :  { %v8163_v6 = vadd.f32 %v1667_v2, %v1532_v8  ;;  %v1811_v26 = vpop.f32.mrf.mxu3  ;;  %v1349_v22 = vpop.f32.mrf.mxu0  ;;  %v11158_v8 = vld [vmem:[#allocation60_spill] sm:$0xff] }
 0x1ce   :  { %v8165_v0 = vadd.f32 %v1811_v26, %v1550_v54  ;;  %v1493_v32 = vpop.f32.mrf.mxu1  ;;  %v1551_v55 = vadd.f32 %v1487_v11, %v11158_v8  ;;  %v2102_v26 = vsel %vm2093_vm5, %v2099_v44, %v2101_v17  ;;  %v2103_v11 = vrot.slane %v11160_v50, 5 }
 0x1d0   :  { %6185 = vmatmul.msk.f32.gmra.mxu0 %vm216_vm2, %v7833_v30 }
 0x1d1   :  { %6204 = vmatmul.msk.f32.gmra.mxu1 %vm216_vm2, %v7836_v38  ;;  %6221 = vmatmul.msk.f32.gmra.mxu2 %vm216_vm2, %v2100_v34  ;;  %v2249_v34 = vsel %vm2093_vm5, %v2246_v36, %v2248_v3 }
 0x1d2   :  { %6240 = vmatmul.msk.f32.gmra.mxu3 %vm216_vm2, %v2247_v10  ;;  %v11161_v10 = vld [vmem:[#allocation29_spill] sm:$0xff] }
 0x1d3   :  { %v1534_v27 = vadd.f32 %v1346_v9, %v11161_v10  ;;  %v11166_v9 = vld [vmem:[#allocation13_spill] sm:$0xff]  ;;  %v11167_v10 = vld [vmem:[#allocation31_spill] sm:$0xff] }
 0x1d4   :  { %v1670_v29 = vpop.f32.mrf.mxu2 }
 0x1d5   :  { %v8179_v12 = vadd.f32 %v1670_v29, %v1533_v21  ;;  %v1814_v54 = vpop.f32.mrf.mxu3  ;;  %v1352_v30 = vpop.f32.mrf.mxu0  ;;  %v11162_v21 = vld [vmem:[#allocation12_spill] sm:$0xff] }
 0x1d6   :  { %v8181_v2 = vadd.f32 %v1814_v54, %v1551_v55  ;;  %v1496_v38 = vpop.f32.mrf.mxu1  ;;  %v2250_v8 = vrot.slane %v11162_v21, 5  ;;  %v11163_v55 = vld [vmem:[#allocation30_spill] sm:$0xff] }
 0x1d7   :  { %v1552_v44 = vadd.f32 %v1490_v63, %v11163_v55  ;;  %v2105_v63 = vrot.slane %v11166_v9, 5  ;;  %v11168_v55 = vld [vmem:[#allocation14_spill] sm:$0xff] }
 0x1d8   :  { %11159 = vst [vmem:[#allocation51_spill] sm:$0xff] %v8181_v2  ;;  %6186 = vmatmul.msk.f32.gmra.mxu0 %vm216_vm2, %v7857_v41  ;;  %v11178_v2 = vld [vmem:[#allocation61_spill] sm:$0xff] }
 0x1d9   :  { %6205 = vmatmul.msk.f32.gmra.mxu1 %vm216_vm2, %v7860_v5  ;;  %6222 = vmatmul.msk.f32.gmra.mxu2 %vm216_vm2, %v2102_v26  ;;  %v2104_v26 = vsel %vm2093_vm5, %v2101_v17, %v2103_v11 }
 0x1da   :  { %6241 = vmatmul.msk.f32.gmra.mxu3 %vm216_vm2, %v2249_v34  ;;  %v2251_v34 = vsel %vm2093_vm5, %v2248_v3, %v2250_v8 }
 0x1dc   :  { %v1673_v29 = vpop.f32.mrf.mxu2 }
 0x1dd   :  { %v8195_v36 = vadd.f32 %v1673_v29, %v1534_v27  ;;  %v1817_v54 = vpop.f32.mrf.mxu3  ;;  %v1355_v41 = vpop.f32.mrf.mxu0  ;;  %v1535_v27 = vadd.f32 %v1349_v22, %v11167_v10  ;;  %v11169_v29 = vld [vmem:[#allocation32_spill] sm:$0xff]  ;;  %v11172_v22 = vld [vmem:[#allocation15_spill] sm:$0xff]  ;;  %v11173_v10 = vld [vmem:[#allocation33_spill] sm:$0xff] }
 0x1de   :  { %v8197_v35 = vadd.f32 %v1817_v54, %v1552_v44  ;;  %v1499_v5 = vpop.f32.mrf.mxu1  ;;  %v2252_v44 = vrot.slane %v11168_v55, 5  ;;  %v1553_v17 = vadd.f32 %v1493_v32, %v11169_v29  ;;  %v2107_v32 = vrot.slane %v11172_v22, 5  ;;  %v11186_v22 = vld [vmem:[#allocation63_spill] sm:$0xff] }
 0x1df   :  { %11164 = vst [vmem:[#allocation52_spill] sm:$0xff] %v8195_v36 }
 0x1e0   :  { %11165 = vst [vmem:[#allocation27_spill] sm:$0xff] %v8197_v35  ;;  %6187 = vmatmul.msk.f32.gmra.mxu0 %vm216_vm2, %v7881_v49 }
 0x1e1   :  { %6206 = vmatmul.msk.f32.gmra.mxu1 %vm216_vm2, %v7884_v62  ;;  %6223 = vmatmul.msk.f32.gmra.mxu2 %vm216_vm2, %v2104_v26  ;;  %v2106_v26 = vsel %vm2093_vm5, %v2103_v11, %v2105_v63 }
 0x1e2   :  { %6242 = vmatmul.msk.f32.gmra.mxu3 %vm216_vm2, %v2251_v34  ;;  %v2253_v34 = vsel %vm2093_vm5, %v2250_v8, %v2252_v44 }
 0x1e4   :  { %v1676_v54 = vpop.f32.mrf.mxu2 }
 0x1e5   :  { %v8211_v3 = vadd.f32 %v1676_v54, %v1535_v27  ;;  %v1820_v35 = vpop.f32.mrf.mxu3  ;;  %v1358_v49 = vpop.f32.mrf.mxu0  ;;  %v11174_v27 = vld [vmem:[#allocation16_spill] sm:$0xff] }
 0x1e6   :  { %v8213_v36 = vadd.f32 %v1820_v35, %v1553_v17  ;;  %v1502_v62 = vpop.f32.mrf.mxu1  ;;  %v1536_v35 = vadd.f32 %v1352_v30, %v11173_v10  ;;  %v2254_v29 = vrot.slane %v11174_v27, 5  ;;  %v11175_v17 = vld [vmem:[#allocation34_spill] sm:$0xff] }
 0x1e7   :  { %11170 = vst [vmem:[#allocation55_spill] sm:$0xff] %v8211_v3  ;;  %v1554_v11 = vadd.f32 %v1496_v38, %v11175_v17  ;;  %v11179_v30 = vld [vmem:[#allocation62_spill] sm:$0xff]  ;;  %v11180_v38 = vld [vmem:[#allocation17_spill] sm:$0xff] }
 0x1e8   :  { %11171 = vst [vmem:[#allocation28_spill] sm:$0xff] %v8213_v36  ;;  %6188 = vmatmul.msk.f32.gmra.mxu0 %vm216_vm2, %v7905_v60  ;;  %v2109_v10 = vrot.slane %v11180_v38, 5  ;;  %v11182_v17 = vld [vmem:[#allocation18_spill] sm:$0xff]  ;;  %v11194_v38 = vld [vmem:[#allocation65_spill] sm:$0xff] }
 0x1e9   :  { %6207 = vmatmul.msk.f32.gmra.mxu1 %vm216_vm2, %v7908_v14  ;;  %6224 = vmatmul.msk.f32.gmra.mxu2 %vm216_vm2, %v2106_v26  ;;  %v2108_v26 = vsel %vm2093_vm5, %v2105_v63, %v2107_v32 }
 0x1ea   :  { %6243 = vmatmul.msk.f32.gmra.mxu3 %vm216_vm2, %v2253_v34  ;;  %v2255_v34 = vsel %vm2093_vm5, %v2252_v44, %v2254_v29 }
 0x1ec   :  { %v1679_v54 = vpop.f32.mrf.mxu2 }
 0x1ed   :  { %v8227_v8 = vadd.f32 %v1679_v54, %v1536_v35  ;;  %v1823_v36 = vpop.f32.mrf.mxu3  ;;  %v1361_v60 = vpop.f32.mrf.mxu0  ;;  %v11181_v35 = vld [vmem:[#allocation35_spill] sm:$0xff]  ;;  %v11183_v54 = vld [vmem:[#allocation36_spill] sm:$0xff] }
 0x1ee   :  { %v8229_v3 = vadd.f32 %v1823_v36, %v1554_v11  ;;  %v1505_v14 = vpop.f32.mrf.mxu1  ;;  %v1537_v36 = vadd.f32 %v1355_v41, %v11181_v35  ;;  %v2256_v11 = vrot.slane %v11182_v17, 5  ;;  %v1555_v63 = vadd.f32 %v1499_v5, %v11183_v54  ;;  %v11187_v41 = vld [vmem:[#allocation64_spill] sm:$0xff]  ;;  %v11188_v5 = vld [vmem:[#allocation19_spill] sm:$0xff]  ;;  %v11189_v35 = vld [vmem:[#allocation37_spill] sm:$0xff] }
 0x1ef   :  { %11176 = vst [vmem:[#allocation56_spill] sm:$0xff] %v8227_v8 }
 0x1f0   :  { %11177 = vst [vmem:[#allocation58_spill] sm:$0xff] %v8229_v3  ;;  %6189 = vmatmul.msk.f32.gmra.mxu0 %vm216_vm2, %v11178_v2 }
 0x1f1   :  { %6208 = vmatmul.msk.f32.gmra.mxu1 %vm216_vm2, %v11179_v30  ;;  %6225 = vmatmul.msk.f32.gmra.mxu2 %vm216_vm2, %v2108_v26  ;;  %v2110_v26 = vsel %vm2093_vm5, %v2107_v32, %v2109_v10 }
 0x1f2   :  { %6244 = vmatmul.msk.f32.gmra.mxu3 %vm216_vm2, %v2255_v34  ;;  %v2257_v34 = vsel %vm2093_vm5, %v2254_v29, %v2256_v11 }
 0x1f4   :  { %v1682_v3 = vpop.f32.mrf.mxu2 }
 0x1f5   :  { %v8243_v44 = vadd.f32 %v1682_v3, %v1537_v36  ;;  %v1826_v8 = vpop.f32.mrf.mxu3  ;;  %v1364_v2 = vpop.f32.mrf.mxu0  ;;  %v2111_v3 = vrot.slane %v11188_v5, 5  ;;  %v11190_v36 = vld [vmem:[#allocation20_spill] sm:$0xff]  ;;  %v11202_v5 = vld [vmem:[#allocation67_spill] sm:$0xff] }
 0x1f6   :  { %v8245_v27 = vadd.f32 %v1826_v8, %v1555_v63  ;;  %v1508_v30 = vpop.f32.mrf.mxu1  ;;  %v1538_v8 = vadd.f32 %v1358_v49, %v11189_v35  ;;  %v2258_v54 = vrot.slane %v11190_v36, 5  ;;  %v11191_v63 = vld [vmem:[#allocation38_spill] sm:$0xff]  ;;  %v11197_v35 = vld [vmem:[#allocation39_spill] sm:$0xff] }
 0x1f7   :  { %11184 = vst [vmem:[#allocation9_spill] sm:$0xff] %v8243_v44  ;;  %v1556_v32 = vadd.f32 %v1502_v62, %v11191_v63  ;;  %v11195_v49 = vld [vmem:[#allocation66_spill] sm:$0xff]  ;;  %v11196_v62 = vld [vmem:[#allocation21_spill] sm:$0xff] }
 0x1f8   :  { %11185 = vst [vmem:[#allocation59_spill] sm:$0xff] %v8245_v27  ;;  %6190 = vmatmul.msk.f32.gmra.mxu0 %vm216_vm2, %v11186_v22 }
 0x1f9   :  { %6209 = vmatmul.msk.f32.gmra.mxu1 %vm216_vm2, %v11187_v41  ;;  %6226 = vmatmul.msk.f32.gmra.mxu2 %vm216_vm2, %v2110_v26  ;;  %v2112_v26 = vsel %vm2093_vm5, %v2109_v10, %v2111_v3 }
 0x1fa   :  { %6245 = vmatmul.msk.f32.gmra.mxu3 %vm216_vm2, %v2257_v34  ;;  %v2259_v34 = vsel %vm2093_vm5, %v2256_v11, %v2258_v54 }
 0x1fc   :  { %v1685_v27 = vpop.f32.mrf.mxu2 }
 0x1fd   :  { %v8259_v29 = vadd.f32 %v1685_v27, %v1538_v8  ;;  %v1829_v44 = vpop.f32.mrf.mxu3  ;;  %v1367_v22 = vpop.f32.mrf.mxu0  ;;  %v2113_v27 = vrot.slane %v11196_v62, 5  ;;  %v11198_v8 = vld [vmem:[#allocation22_spill] sm:$0xff] }
 0x1fe   :  { %v8261_v17 = vadd.f32 %v1829_v44, %v1556_v32  ;;  %v1511_v41 = vpop.f32.mrf.mxu1  ;;  %v1539_v44 = vadd.f32 %v1361_v60, %v11197_v35  ;;  %v2260_v63 = vrot.slane %v11198_v8, 5  ;;  %v11199_v32 = vld [vmem:[#allocation40_spill] sm:$0xff]  ;;  %v11205_v35 = vld [vmem:[#allocation41_spill] sm:$0xff] }
 0x1ff   :  { %11192 = vst [vmem:[#allocation10_spill] sm:$0xff] %v8259_v29  ;;  %v1557_v10 = vadd.f32 %v1505_v14, %v11199_v32  ;;  %v11203_v60 = vld [vmem:[#allocation68_spill] sm:$0xff]  ;;  %v11204_v14 = vld [vmem:[#allocation23_spill] sm:$0xff] }
 0x200   :  { %11193 = vst [vmem:[#allocation60_spill] sm:$0xff] %v8261_v17  ;;  %6191 = vmatmul.msk.f32.gmra.mxu0 %vm216_vm2, %v11194_v38 }
 0x201   :  { %6210 = vmatmul.msk.f32.gmra.mxu1 %vm216_vm2, %v11195_v49  ;;  %6227 = vmatmul.msk.f32.gmra.mxu2 %vm216_vm2, %v2112_v26  ;;  %v2114_v26 = vsel %vm2093_vm5, %v2111_v3, %v2113_v27 }
 0x202   :  { %6246 = vmatmul.msk.f32.gmra.mxu3 %vm216_vm2, %v2259_v34  ;;  %v2261_v34 = vsel %vm2093_vm5, %v2258_v54, %v2260_v63 }
 0x204   :  { %v1688_v17 = vpop.f32.mrf.mxu2 }
 0x205   :  { %v8275_v11 = vadd.f32 %v1688_v17, %v1539_v44  ;;  %v1832_v29 = vpop.f32.mrf.mxu3  ;;  %v1370_v38 = vpop.f32.mrf.mxu0  ;;  %v2115_v17 = vrot.slane %v11204_v14, 5  ;;  %v11206_v44 = vld [vmem:[#allocation24_spill] sm:$0xff] }
 0x206   :  { %v8277_v36 = vadd.f32 %v1832_v29, %v1557_v10  ;;  %v1514_v49 = vpop.f32.mrf.mxu1  ;;  %v1540_v29 = vadd.f32 %v1364_v2, %v11205_v35  ;;  %v2262_v32 = vrot.slane %v11206_v44, 5  ;;  %v11207_v10 = vld [vmem:[#allocation42_spill] sm:$0xff]  ;;  %v11210_v2 = vld [vmem:[#allocation69_spill] sm:$0xff]  ;;  %v11212_v35 = vld [vmem:[#allocation43_spill] sm:$0xff] }
 0x207   :  { %11200 = vst [vmem:[#allocation11_spill] sm:$0xff] %v8275_v11  ;;  %v1558_v3 = vadd.f32 %v1508_v30, %v11207_v10  ;;  %v11211_v30 = vld [vmem:[#allocation25_spill] sm:$0xff] }
 0x208   :  { %11201 = vst [vmem:[#allocation29_spill] sm:$0xff] %v8277_v36  ;;  %6192 = vmatmul.msk.f32.gmra.mxu0 %vm216_vm2, %v11202_v5 }
 0x209   :  { %6211 = vmatmul.msk.f32.gmra.mxu1 %vm216_vm2, %v11203_v60  ;;  %6228 = vmatmul.msk.f32.gmra.mxu2 %vm216_vm2, %v2114_v26  ;;  %v2116_v26 = vsel %vm2093_vm5, %v2113_v27, %v2115_v17 }
 0x20a   :  { %6247 = vmatmul.msk.f32.gmra.mxu3 %vm216_vm2, %v2261_v34  ;;  %v2263_v34 = vsel %vm2093_vm5, %v2260_v63, %v2262_v32 }
 0x20c   :  { %v1691_v36 = vpop.f32.mrf.mxu2 }
 0x20d   :  { %v8291_v54 = vadd.f32 %v1691_v36, %v1540_v29  ;;  %v1835_v11 = vpop.f32.mrf.mxu3  ;;  %v1373_v5 = vpop.f32.mrf.mxu0  ;;  %v2117_v36 = vrot.slane %v11211_v30, 5  ;;  %v11213_v29 = vld [vmem:[#allocation26_spill] sm:$0xff] }
 0x20e   :  { %v8293_v8 = vadd.f32 %v1835_v11, %v1558_v3  ;;  %v1517_v60 = vpop.f32.mrf.mxu1  ;;  %v1541_v11 = vadd.f32 %v1367_v22, %v11212_v35  ;;  %v2264_v10 = vrot.slane %v11213_v29, 5  ;;  %v11214_v3 = vld [vmem:[#allocation44_spill] sm:$0xff]  ;;  %v11217_v22 = vld [vmem:[#allocation5_spill] sm:$0xff]  ;;  %v11219_v35 = vld [vmem:[#allocation7_spill] sm:$0xff] }
 0x20f   :  { %11208 = vst [vmem:[#allocation12_spill] sm:$0xff] %v8291_v54  ;;  %v1559_v27 = vadd.f32 %v1511_v41, %v11214_v3  ;;  %v2119_v41 = vrot.slane %v11217_v22, 5  ;;  %v11220_v3 = vld [vmem:[#allocation46_spill] sm:$0xff] }
 0x210   :  { %11209 = vst [vmem:[#allocation30_spill] sm:$0xff] %v8293_v8  ;;  %6193 = vmatmul.msk.f32.gmra.mxu0 %vm216_vm2, %v8025_v24 }
 0x211   :  { %6212 = vmatmul.msk.f32.gmra.mxu1 %vm216_vm2, %v11210_v2  ;;  %6229 = vmatmul.msk.f32.gmra.mxu2 %vm216_vm2, %v2116_v26  ;;  %v2118_v26 = vsel %vm2093_vm5, %v2115_v17, %v2117_v36  ;;  %v1560_v17 = vadd.f32 %v1514_v49, %v11220_v3  ;;  %v11225_v3 = vld [vmem:[#allocation48_spill] sm:$0xff] }
 0x212   :  { %6248 = vmatmul.msk.f32.gmra.mxu3 %vm216_vm2, %v2263_v34  ;;  %v2265_v34 = vsel %vm2093_vm5, %v2262_v32, %v2264_v10 }
 0x214   :  { %v1694_v8 = vpop.f32.mrf.mxu2 }
 0x215   :  { %v8307_v63 = vadd.f32 %v1694_v8, %v1541_v11  ;;  %v1838_v54 = vpop.f32.mrf.mxu3  ;;  %v1376_v24 = vpop.f32.mrf.mxu0  ;;  %v11218_v8 = vld [vmem:[#allocation45_spill] sm:$0xff]  ;;  %v2266_v11 = vrot.slane %v11219_v35, 5 }
 0x216   :  { %v8309_v44 = vadd.f32 %v1838_v54, %v1559_v27  ;;  %v1520_v2 = vpop.f32.mrf.mxu1  ;;  %v1542_v54 = vadd.f32 %v1370_v38, %v11218_v8  ;;  %v11223_v38 = vld [vmem:[#allocation6_spill] sm:$0xff]  ;;  %v11224_v8 = vld [vmem:[#allocation47_spill] sm:$0xff] }
 0x217   :  { %11215 = vst [vmem:[#allocation13_spill] sm:$0xff] %v8307_v63  ;;  %v2121_v49 = vrot.slane %v11223_v38, 5 }
 0x218   :  { %11216 = vst [vmem:[#allocation31_spill] sm:$0xff] %v8309_v44  ;;  %6194 = vmatmul.msk.f32.gmra.mxu0 %vm216_vm2, %v8049_v33 }
 0x219   :  { %6213 = vmatmul.msk.f32.gmra.mxu1 %vm216_vm2, %v8055_v48  ;;  %6230 = vmatmul.msk.f32.gmra.mxu2 %vm216_vm2, %v2118_v26  ;;  %v2120_v26 = vsel %vm2093_vm5, %v2117_v36, %v2119_v41  ;;  %v1561_v36 = vadd.f32 %v1517_v60, %v11225_v3  ;;  %v6951_v60 = vld [vmem:[%s10821_s0 + $0xf8] sm:$0xff]  }
 0x21a   :  { %6249 = vmatmul.msk.f32.gmra.mxu3 %vm216_vm2, %v2265_v34  ;;  %v2267_v34 = vsel %vm2093_vm5, %v2264_v10, %v2266_v11 }
 0x21c   :  { %v1697_v27 = vpop.f32.mrf.mxu2 }
 0x21d   :  { %v8323_v32 = vadd.f32 %v1697_v27, %v1542_v54  ;;  %v1841_v44 = vpop.f32.mrf.mxu3  ;;  %v1379_v33 = vpop.f32.mrf.mxu0  ;;  %v2268_v54 = vrot.slane %v11133_v20, 5 }
 0x21e   :  { %v8325_v63 = vadd.f32 %v1841_v44, %v1560_v17  ;;  %v1523_v48 = vpop.f32.mrf.mxu1  ;;  %v1543_v44 = vadd.f32 %v1373_v5, %v11224_v8  ;;  %v2122_v5 = vsel %vm2093_vm5, %v2119_v41, %v2121_v49  ;;  %v8356_v8 = vunpack.c.h.bf16 %v6951_v60 }
 0x21f   :  { %11221 = vst [vmem:[#allocation14_spill] sm:$0xff] %v8323_v32  ;;  %v11231_v32 = vrot.slane %v11147_v18, 4 }
 0x220   :  { %11222 = vst [vmem:[#allocation32_spill] sm:$0xff] %v8325_v63  ;;  %6195 = vmatmul.msk.f32.gmra.mxu0 %vm216_vm2, %v8076_v39  ;;  %v1978_v41 = vrot.slane %v8356_v8, 4 }
 0x221   :  { %6214 = vmatmul.msk.f32.gmra.mxu1 %vm216_vm2, %v8079_v58  ;;  %6231 = vmatmul.msk.f32.gmra.mxu2 %vm216_vm2, %v2120_v26  ;;  %v6950_v58 = vld [vmem:[%s10821_s0 + $0x50] sm:$0xff]  }
 0x222   :  { %6250 = vmatmul.msk.f32.gmra.mxu3 %vm216_vm2, %v2267_v34  ;;  %v8346_v26 = vunpack.c.h.bf16 %v6950_v58  ;;  %v11229_v58 = vld [vmem:[#allocation50_spill] sm:$0xff] }
 0x224   :  { %v1700_v17 = vpop.f32.mrf.mxu2  ;;  %v1894_v3 = vrot.slane %v8346_v26, 4 }
 0x225   :  { %v8339_v10 = vadd.f32 %v1700_v17, %v1543_v44  ;;  %v1844_v27 = vpop.f32.mrf.mxu3  ;;  %v8341_v39 = vpop.f32.mrf.mxu0  ;;  %v2269_v44 = vsel %vm2093_vm5, %v2266_v11, %v2268_v54  ;;  %v89_v11 = vld [vmem:[%s10821_s0 + $0x58] sm:$0xf]  ;;  %v11228_v17 = vld [vmem:[#allocation49_spill] sm:$0xff] }
 0x226   :  { %v8348_v34 = vadd.f32 %v1844_v27, %v1561_v36  ;;  %v8350_v63 = vpop.f32.mrf.mxu1  ;;  %v2123_v36 = vrot.slane %v11140_v43, 5  ;;  %v1544_v27 = vadd.f32 %v1376_v24, %v11228_v17  ;;  %v1895_v43 = vsel %vm253_vm0, %v11231_v32, %v1894_v3  ;;  %v49_v32 = vld [vmem:[%s10824_s3] sm:$0xff] }
 0x227   :  { %11226 = vst [vmem:[#allocation33_spill] sm:$0xff] %v8339_v10  ;;  %v8384_v20 = vunpack.c.l.bf16 %v89_v11  ;;  %v1545_v11 = vadd.f32 %v1379_v33, %v8042_v40 }
 0x228   :  { %11227 = vst [vmem:[#allocation34_spill] sm:$0xff] %v8348_v34  ;;  %6196 = vmatmul.msk.f32.gmra.mxu0 %vm216_vm2, %v8105_v31  ;;  %v2270_v31 = vrot.slane %v11141_v4, 5  ;;  %v11233_v4 = vrot.slane %v7657_v7, 4 }
 0x229   :  { %6215 = vmatmul.msk.f32.gmra.mxu1 %vm216_vm2, %v8110_v46  ;;  %6232 = vmatmul.msk.f32.gmra.mxu2 %vm216_vm2, %v2122_v5  ;;  %v112_v46 = vld [vmem:[%s10821_s0 + $0x100] sm:$0xf]  ;;  %v1562_v5 = vadd.f32 %v1520_v2, %v11229_v58 }
 0x22a   :  { %6251 = vmatmul.msk.f32.gmra.mxu3 %vm216_vm2, %v2269_v44  ;;  %v1979_v2 = vsel %vm253_vm0, %v11233_v4, %v1978_v41  ;;  %v8394_v58 = vunpack.c.l.bf16 %v112_v46  ;;  %v1896_v4 = vrot.slane %v8384_v20, 4  ;;  %v2272_v46 = vrot.slane %v7657_v7, 5 }
 0x22c   :  { %v1703_v60 = vpop.f32.mrf.mxu2 }
 0x22d   :  { %v8377_v44 = vadd.f32 %v1703_v60, %v1544_v27  ;;  %v1847_v34 = vpop.f32.mrf.mxu3  ;;  %v8379_v10 = vpop.f32.mrf.mxu0  ;;  %v2124_v27 = vsel %vm2093_vm5, %v2121_v49, %v2123_v36  ;;  %v2271_v60 = vsel %vm2093_vm5, %v2268_v54, %v2270_v31  ;;  %v1980_v49 = vrot.slane %v8394_v58, 4 }
 0x22e   :  { %v8386_v24 = vadd.f32 %v1847_v34, %v1562_v5  ;;  %v8388_v17 = vpop.f32.mrf.mxu1  ;;  %v6986_v34 = vmov 0   ;;  %v2125_v54 = vrot.slane %v11147_v18, 5 }
 0x22f   :  { %11230 = vst [vmem:[#allocation61_spill] sm:$0xff] %v8377_v44  ;;  %6939 = vset.pattern.permute.xlu0 %v6986_v34  ;;  %6940 = vset.pattern.permute.xlu1 %v6986_v34  ;;  %v1981_v40 = vsel %vm253_vm0, %v1978_v41, %v1980_v49  ;;  %v2127_v41 = vrot.slane %v8346_v26, 5 }
 0x230   :  { %11232 = vst [vmem:[#allocation62_spill] sm:$0xff] %v8386_v24  ;;  %6197 = vmatmul.msk.f32.gmra.mxu0 %vm216_vm2, %v1895_v43  ;;  %2790 = vperm.xlu0 %6939, %v49_v32   ;;  %v1563_v43 = vadd.f32 %v1523_v48, %v8045_v42  ;;  %v2126_v33 = vsel %vm2093_vm5, %v2123_v36, %v2125_v54  ;;  %v50_v42 = vld [vmem:[%s10824_s3 + $0x8] sm:$0xff]  ;;  %v2422_v48 = vrot.slane %v7154_v45, 6  ;;  %v2569_v36 = vrot.slane %v7157_v47, 6 }
 0x231   :  { %6216 = vmatmul.msk.f32.gmra.mxu1 %vm216_vm2, %v1979_v2  ;;  %6233 = vmatmul.msk.f32.gmra.mxu2 %vm216_vm2, %v2124_v27  ;;  %v2273_v32 = vsel %vm2093_vm5, %v2270_v31, %v2272_v46  ;;  %v2570_v31 = vrot.slane %v7171_v53, 6  ;;  %v1564_v45 = vadd.f32 %v8350_v63, %v8073_v19  ;;  %v51_v19 = vld [vmem:[%s10824_s3 + $0x10] sm:$0xff]  ;;  %v2129_v63 = vrot.slane %v8384_v20, 5 }
 0x232   :  { %6252 = vmatmul.msk.f32.gmra.mxu3 %vm216_vm2, %v2271_v60  ;;  %6941 = vset.pattern.permute.xlu2 %v6986_v34  ;;  %v1897_v60 = vsel %vm253_vm0, %v1894_v3, %v1896_v4  ;;  %v2423_v3 = vrot.slane %v7168_v51, 6  ;;  %v1546_v34 = vadd.f32 %v8341_v39, %v8071_v15  ;;  %v2274_v4 = vrot.slane %v8356_v8, 5 }
 0x233   :  { %v2571_v15 = vsel %vm2421_vm6, %v2569_v36, %v2570_v31  ;;  %2800 = vperm.xlu1 %6940, %v51_v19  }
 0x234   :  { %v1706_v5 = vpop.f32.mrf.mxu2  ;;  %v2275_v39 = vsel %vm2093_vm5, %v2272_v46, %v2274_v4  ;;  %v6952_v46 = vld [vmem:[%s10822_s1 + $0xc] sm:$0xf] }
 0x235   :  { %v8410_v2 = vadd.f32 %v1706_v5, %v1545_v11  ;;  %v1850_v27 = vpop.f32.mrf.mxu3  ;;  %v8412_v24 = vpop.f32.mrf.mxu0  ;;  %v2424_v5 = vsel %vm2421_vm6, %v2422_v48, %v2423_v3 }
 0x236   :  { %v8415_v44 = vadd.f32 %v1850_v27, %v1563_v43  ;;  %v8417_v18 = vpop.f32.mrf.mxu1  ;;  %v2128_v27 = vsel %vm2093_vm5, %v2125_v54, %v2127_v41  ;;  %v2572_v54 = vrot.slane %v7191_v61, 6  ;;  %v2058_v19 = vadd.f32 %v8412_v24, %v8126_v25 }
 0x238   :  { %6198 = vmatmul.msk.f32.gmra.mxu0 %vm216_vm2, %v1897_v60  ;;  %2795 = vperm.xlu0 %6939, %v50_v42   ;;  %v2425_v60 = vrot.slane %v7188_v59, 6  ;;  %v2075_v59 = vadd.f32 %v8388_v17, %v8100_v52  ;;  %v6924_v42 = vld [vmem:[%s10821_s0 + $0xf0] sm:$0xff]   ;;  %v2573_v52 = vsel %vm2421_vm6, %v2570_v31, %v2572_v54  ;;  %v2574_v31 = vrot.slane %v7205_v13, 6  ;;  %v6925_v13 = vld [vmem:[%s10821_s0 + $0xf8] sm:$0xff]  }
 0x239   :  { %6217 = vmatmul.msk.f32.gmra.mxu1 %vm216_vm2, %v1981_v40  ;;  %6234 = vmatmul.msk.f32.gmra.mxu2 %vm216_vm2, %v2126_v33  ;;  %v2057_v40 = vadd.f32 %v8379_v10, %v8098_v28  ;;  %v2276_v33 = vrot.slane %v8394_v58, 5  ;;  %v2130_v10 = vsel %vm2093_vm5, %v2127_v41, %v2129_v63  ;;  %v2427_v41 = vrot.slane %v7202_v1, 6 }
 0x23a   :  { %6253 = vmatmul.msk.f32.gmra.mxu3 %vm216_vm2, %v2273_v32  ;;  %v6913_v32 = vld [vmem:[%s10821_s0 + $0x48] sm:$0xff]   ;;  %v2076_v1 = vadd.f32 %v8417_v18, %v8128_v23 }
 0x23b   :  { %v8488_v17 = vunpack.c.l.bf16 %v6913_v32  ;;  %v2428_v24 = vsel %vm2421_vm6, %v2425_v60, %v2427_v41 }
 0x23c   :  { %v1709_v49 = vpop.f32.mrf.mxu2 }
 0x23d   :  { %v8439_v51 = vadd.f32 %v1709_v49, %v1546_v34  ;;  %v1853_v11 = vpop.f32.mrf.mxu3  ;;  %v8441_v43 = vpop.f32.mrf.mxu0  ;;  %v2426_v34 = vsel %vm2421_vm6, %v2423_v3, %v2425_v60  ;;  %v52_v3 = vld [vmem:[%s10824_s3 + $0x18] sm:$0xff]  ;;  %v2429_v60 = vrot.slane %v11155_v37, 6 }
 0x23e   :  { %v8444_v47 = vadd.f32 %v1853_v11, %v1564_v45  ;;  %v8446_v53 = vpop.f32.mrf.mxu1  ;;  %v8490_v11 = vunpack.c.h.bf16 %v6913_v32  ;;  %2805 = vperm.xlu1 %6940, %v52_v3   ;;  %v2059_v3 = vadd.f32 %v8441_v43, %v8147_v57 }
 0x23f   :  { %v2077_v37 = vadd.f32 %v8446_v53, %v8149_v56  ;;  %v8567_v53 = vunpack.c.h.bf16 %v6925_v13 }
 0x240   :  { %6257 = vmatmul.msk.f32.vlgmr.msra.gmra.mxu0 %vm216_vm2, %v2424_v5  ;;  %v2277_v5 = vsel %vm2093_vm5, %v2274_v4, %v2276_v33  ;;  %v3071_v4 = vrot.slane %v8488_v17, 1 }
 0x241   :  { %6235 = vmatmul.msk.f32.gmra.mxu2 %vm216_vm2, %v2128_v27  ;;  %6276 = vmatmul.msk.f32.vlgmr.msra.gmra.mxu1 %vm216_vm2, %v2571_v15  ;;  %v8493_v27 = vunpack.c.l.bf16 %v6924_v42  ;;  %v8495_v15 = vunpack.c.h.bf16 %v6924_v42  ;;  %11234 = vst [vmem:[#allocation35_spill] sm:$0xff] %v8567_v53 }
 0x242   :  { %6254 = vmatmul.msk.f32.gmra.mxu3 %vm216_vm2, %v2275_v39  ;;  %6427 = vmatpush.msk.msra.mxu1 %vm253_vm0, %v6952_v46  ;;  %v3072_v39 = vrot.slane %v8490_v11, 1 }
 0x243   :  { %6408 = vmatpush.msk.msra.mxu0 %vm253_vm0, %v6952_v46  ;;  %v3234_v63 = vrot.slane %v8493_v27, 1  ;;  %v3235_v46 = vrot.slane %v8495_v15, 1 }
 0x244   :  { %v2187_v61 = vpop.f32.mrf.mxu2  ;;  %v3073_v18 = vsel %vm178_vm1, %v3071_v4, %v3072_v39 }
 0x245   :  { %v8477_v48 = vadd.f32 %v2187_v61, %v2057_v40  ;;  %v2331_v36 = vpop.f32.mrf.mxu3  ;;  %v8479_v28 = vpop.f32.mrf.mxu0  ;;  %v6914_v40 = vld [vmem:[%s10821_s0 + $0x50] sm:$0xff]  }
 0x246   :  { %v8483_v45 = vadd.f32 %v2331_v36, %v2075_v59  ;;  %v8485_v49 = vpop.f32.mrf.mxu1  ;;  %v2575_v36 = vsel %vm2421_vm6, %v2572_v54, %v2574_v31  ;;  %v8531_v23 = vunpack.c.l.bf16 %v6914_v40  ;;  %v2576_v54 = vrot.slane %v11157_v16, 6 }
 0x248   :  { %6258 = vmatmul.msk.f32.gmra.mxu0 %vm216_vm2, %v2426_v34  ;;  %v8534_v34 = vunpack.c.l.bf16 %v6925_v13  ;;  %v2577_v57 = vsel %vm2421_vm6, %v2574_v31, %v2576_v54  ;;  %v2578_v31 = vrot.slane %v11162_v21, 6  ;;  %v6915_v13 = vld [vmem:[%s10821_s0 + $0x58] sm:$0xff]  }
 0x249   :  { %6236 = vmatmul.msk.f32.gmra.mxu2 %vm216_vm2, %v2130_v10  ;;  %6277 = vmatmul.msk.f32.gmra.mxu1 %vm216_vm2, %v2573_v52  ;;  %v3236_v10 = vsel %vm178_vm1, %v3234_v63, %v3235_v46  ;;  %v3074_v52 = vrot.slane %v8531_v23, 1 }
 0x24a   :  { %6255 = vmatmul.msk.f32.gmra.mxu3 %vm216_vm2, %v2277_v5  ;;  %v6953_v5 = vld [vmem:[%s10822_s1 + $0x10] sm:$0xf]  ;;  %v3237_v4 = vrot.slane %v8534_v34, 1 }
 0x24b   :  { %v3075_v43 = vsel %vm178_vm1, %v3072_v39, %v3074_v52 }
 0x24c   :  { %v2190_v33 = vpop.f32.mrf.mxu2  ;;  %v3238_v56 = vsel %vm178_vm1, %v3235_v46, %v3237_v4  ;;  %v3239_v46 = vrot.slane %v8567_v53, 1 }
 0x24d   :  { %v8520_v32 = vadd.f32 %v2190_v33, %v2058_v19  ;;  %v2334_v59 = vpop.f32.mrf.mxu3  ;;  %v8522_v25 = vpop.f32.mrf.mxu0  ;;  %v2430_v33 = vsel %vm2421_vm6, %v2427_v41, %v2429_v60  ;;  %v2431_v41 = vrot.slane %v11160_v50, 6  ;;  %v6926_v50 = vld [vmem:[%s10821_s0 + $0x100] sm:$0xff]  }
 0x24e   :  { %v8525_v61 = vadd.f32 %v2334_v59, %v2076_v1  ;;  %v8527_v42 = vpop.f32.mrf.mxu1 }
 0x250   :  { %6259 = vmatmul.msk.f32.gmra.mxu0 %vm216_vm2, %v2428_v24 }
 0x251   :  { %6278 = vmatmul.msk.f32.gmra.mxu1 %vm216_vm2, %v2575_v36  ;;  %6295 = vmatmul.msk.f32.vlgmr.msrb.gmra.mxu2 %vm216_vm2, %v3073_v18  ;;  %v8564_v36 = vunpack.c.h.bf16 %v6914_v40  ;;  %v2060_v40 = vadd.f32 %v8479_v28, %v8163_v6  ;;  %v2078_v18 = vadd.f32 %v8485_v49, %v8165_v0  ;;  %v2432_v6 = vsel %vm2421_vm6, %v2429_v60, %v2431_v41 }
 0x252   :  { %6314 = vmatmul.msk.f32.vlgmr.msrb.gmra.mxu3 %vm216_vm2, %v3236_v10  ;;  %6446 = vmatpush.msk.msrb.mxu2 %vm253_vm0, %v6953_v5  ;;  %v8598_v49 = vunpack.c.l.bf16 %v6915_v13  ;;  %v2433_v60 = vrot.slane %v11166_v9, 6 }
 0x253   :  { %6465 = vmatpush.msk.msrb.mxu3 %vm253_vm0, %v6953_v5  ;;  %v3076_v39 = vrot.slane %v8564_v36, 1 }
 0x254   :  { %v2193_v19 = vpop.f32.mrf.mxu2  ;;  %11235 = vst [vmem:[#allocation36_spill] sm:$0xff] %v8598_v49  ;;  %v2434_v9 = vsel %vm2421_vm6, %v2431_v41, %v2433_v60  ;;  %v56_v41 = vld [vmem:[%s10824_s3 + $0x38] sm:$0xff] }
 0x255   :  { %v8553_v16 = vadd.f32 %v2193_v19, %v2059_v3  ;;  %v2337_v63 = vpop.f32.mrf.mxu3  ;;  %v8555_v1 = vpop.f32.mrf.mxu0  ;;  %v2579_v19 = vsel %vm2421_vm6, %v2576_v54, %v2578_v31  ;;  %v3077_v0 = vsel %vm178_vm1, %v3074_v52, %v3076_v39  ;;  %v2580_v54 = vrot.slane %v11168_v55, 6  ;;  %2825 = vperm.xlu1 %6940, %v56_v41  }
 0x256   :  { %v8558_v59 = vadd.f32 %v2337_v63, %v2077_v37  ;;  %v8560_v24 = vpop.f32.mrf.mxu1  ;;  %v3240_v63 = vsel %vm178_vm1, %v3237_v4, %v3239_v46  ;;  %v3078_v52 = vrot.slane %v8598_v49, 1  ;;  %v2061_v4 = vadd.f32 %v8522_v25, %v8179_v12  ;;  %v11249_v49 = vld [vmem:[#allocation28_spill] sm:$0xff] }
 0x257   :  { %v8629_v25 = vunpack.c.h.bf16 %v6915_v13 }
 0x258   :  { %6260 = vmatmul.msk.f32.gmra.mxu0 %vm216_vm2, %v2430_v33  ;;  %v8601_v33 = vunpack.c.l.bf16 %v6926_v50  ;;  %v3079_v12 = vsel %vm178_vm1, %v3076_v39, %v3078_v52 }
 0x259   :  { %6279 = vmatmul.msk.f32.gmra.mxu1 %vm216_vm2, %v2577_v57  ;;  %6296 = vmatmul.msk.f32.gmra.mxu2 %vm216_vm2, %v3075_v43  ;;  %v55_v57 = vld [vmem:[%s10824_s3 + $0x30] sm:$0xff]  ;;  %11238 = vst [vmem:[#allocation64_spill] sm:$0xff] %v8629_v25 }
 0x25a   :  { %6315 = vmatmul.msk.f32.gmra.mxu3 %vm216_vm2, %v3238_v56  ;;  %11236 = vst [vmem:[#allocation63_spill] sm:$0xff] %v8601_v33  ;;  %2820 = vperm.xlu0 %6939, %v55_v57   ;;  %v3241_v43 = vrot.slane %v8601_v33, 1  ;;  %v11237_v56 = vld [vmem:[#allocation51_spill] sm:$0xff]  ;;  %v53_v57 = vld [vmem:[%s10824_s3 + $0x20] sm:$0xff] }
 0x25b   :  { %2810 = vperm.xlu2 %6941, %v53_v57  }
 0x25c   :  { %v2196_v10 = vpop.f32.mrf.mxu2 }
 0x25d   :  { %v8587_v21 = vadd.f32 %v2196_v10, %v2060_v40  ;;  %v2340_v5 = vpop.f32.mrf.mxu3  ;;  %v8589_v3 = vpop.f32.mrf.mxu0  ;;  %v2079_v40 = vadd.f32 %v8527_v42, %v11237_v56  ;;  %v3242_v42 = vsel %vm178_vm1, %v3239_v46, %v3241_v43  ;;  %v11241_v46 = vld [vmem:[#allocation16_spill] sm:$0xff] }
 0x25e   :  { %v8592_v28 = vadd.f32 %v2340_v5, %v2078_v18  ;;  %v8594_v37 = vpop.f32.mrf.mxu1  ;;  %v2582_v13 = vrot.slane %v11241_v46, 6 }
 0x260   :  { %6261 = vmatmul.msk.f32.gmra.mxu0 %vm216_vm2, %v2432_v6 }
 0x261   :  { %6280 = vmatmul.msk.f32.gmra.mxu1 %vm216_vm2, %v2579_v19  ;;  %6297 = vmatmul.msk.f32.gmra.mxu2 %vm216_vm2, %v3077_v0  ;;  %v2581_v0 = vsel %vm2421_vm6, %v2578_v31, %v2580_v54  ;;  %v11240_v31 = vld [vmem:[#allocation15_spill] sm:$0xff] }
 0x262   :  { %6316 = vmatmul.msk.f32.gmra.mxu3 %vm216_vm2, %v3240_v63  ;;  %v8632_v63 = vunpack.c.h.bf16 %v6926_v50  ;;  %v2435_v39 = vrot.slane %v11240_v31, 6  ;;  %v3080_v50 = vrot.slane %v8629_v25, 1 }
 0x264   :  { %v2199_v18 = vpop.f32.mrf.mxu2  ;;  %11239 = vst [vmem:[#allocation37_spill] sm:$0xff] %v8632_v63 }
 0x265   :  { %v8618_v10 = vadd.f32 %v2199_v18, %v2061_v4  ;;  %v2343_v5 = vpop.f32.mrf.mxu3  ;;  %v8620_v6 = vpop.f32.mrf.mxu0  ;;  %v11242_v4 = vld [vmem:[#allocation52_spill] sm:$0xff] }
 0x266   :  { %v8623_v19 = vadd.f32 %v2343_v5, %v2079_v40  ;;  %v8625_v55 = vpop.f32.mrf.mxu1  ;;  %v2062_v56 = vadd.f32 %v8555_v1, %v11242_v4  ;;  %v3243_v40 = vrot.slane %v8632_v63, 1  ;;  %v6916_v18 = vld [vmem:[%s10821_s0 + $0x60] sm:$0xff]   ;;  %v11243_v5 = vld [vmem:[#allocation27_spill] sm:$0xff]  ;;  %v2436_v1 = vsel %vm2421_vm6, %v2433_v60, %v2435_v39 }
 0x267   :  { %v2583_v4 = vsel %vm2421_vm6, %v2580_v54, %v2582_v13  ;;  %v11246_v60 = vld [vmem:[#allocation17_spill] sm:$0xff] }
 0x268   :  { %6262 = vmatmul.msk.f32.gmra.mxu0 %vm216_vm2, %v2434_v9  ;;  %v2080_v9 = vadd.f32 %v8560_v24, %v11243_v5  ;;  %v3081_v24 = vsel %vm178_vm1, %v3078_v52, %v3080_v50  ;;  %v8669_v5 = vunpack.c.l.bf16 %v6916_v18  ;;  %v3244_v63 = vsel %vm178_vm1, %v3241_v43, %v3243_v40  ;;  %v11247_v52 = vld [vmem:[#allocation18_spill] sm:$0xff] }
 0x269   :  { %6281 = vmatmul.msk.f32.gmra.mxu1 %vm216_vm2, %v2581_v0  ;;  %6298 = vmatmul.msk.f32.gmra.mxu2 %vm216_vm2, %v3079_v12  ;;  %v6927_v12 = vld [vmem:[%s10821_s0 + $0x108] sm:$0xff]   ;;  %v2437_v54 = vrot.slane %v11246_v60, 6 }
 0x26a   :  { %6317 = vmatmul.msk.f32.gmra.mxu3 %vm216_vm2, %v3242_v42  ;;  %11244 = vst [vmem:[#allocation38_spill] sm:$0xff] %v8669_v5  ;;  %v8672_v25 = vunpack.c.l.bf16 %v6927_v12  ;;  %v3082_v43 = vrot.slane %v8669_v5, 1 }
 0x26c   :  { %v2202_v0 = vpop.f32.mrf.mxu2  ;;  %11245 = vst [vmem:[#allocation65_spill] sm:$0xff] %v8672_v25  ;;  %v3245_v33 = vrot.slane %v8672_v25, 1 }
 0x26d   :  { %v8658_v42 = vadd.f32 %v2202_v0, %v2062_v56  ;;  %v2346_v57 = vpop.f32.mrf.mxu3  ;;  %v8660_v41 = vpop.f32.mrf.mxu0  ;;  %v54_v56 = vld [vmem:[%s10824_s3 + $0x28] sm:$0xff]  ;;  %v11248_v0 = vld [vmem:[#allocation55_spill] sm:$0xff] }
 0x26e   :  { %v8663_v31 = vadd.f32 %v2346_v57, %v2080_v9  ;;  %v8665_v46 = vpop.f32.mrf.mxu1  ;;  %2815 = vperm.xlu2 %6941, %v54_v56   ;;  %v2584_v9 = vrot.slane %v11247_v52, 6  ;;  %v2063_v57 = vadd.f32 %v8589_v3, %v11248_v0  ;;  %v3083_v3 = vsel %vm178_vm1, %v3080_v50, %v3082_v43  ;;  %v11254_v50 = vld [vmem:[#allocation20_spill] sm:$0xff] }
 0x26f   :  { %v8700_v0 = vunpack.c.h.bf16 %v6916_v18  ;;  %v2586_v18 = vrot.slane %v11254_v50, 6 }
 0x270   :  { %6263 = vmatmul.msk.f32.gmra.mxu0 %vm216_vm2, %v2436_v1  ;;  %v2081_v1 = vadd.f32 %v8594_v37, %v11249_v49  ;;  %v2585_v5 = vsel %vm2421_vm6, %v2582_v13, %v2584_v9  ;;  %v3246_v37 = vsel %vm178_vm1, %v3243_v40, %v3245_v33  ;;  %v8703_v49 = vunpack.c.h.bf16 %v6927_v12  ;;  %v11255_v12 = vld [vmem:[#allocation56_spill] sm:$0xff] }
 0x271   :  { %6282 = vmatmul.msk.f32.gmra.mxu1 %vm216_vm2, %v2583_v4  ;;  %6299 = vmatmul.msk.f32.gmra.mxu2 %vm216_vm2, %v3081_v24  ;;  %11251 = vst [vmem:[#allocation21_spill] sm:$0xff] %v8700_v0  ;;  %v3084_v40 = vrot.slane %v8700_v0, 1  ;;  %v2587_v0 = vsel %vm2421_vm6, %v2584_v9, %v2586_v18  ;;  %v11261_v9 = vld [vmem:[#allocation22_spill] sm:$0xff] }
 0x272   :  { %6318 = vmatmul.msk.f32.gmra.mxu3 %vm216_vm2, %v3244_v63  ;;  %v2438_v63 = vsel %vm2421_vm6, %v2435_v39, %v2437_v54  ;;  %11252 = vst [vmem:[#allocation39_spill] sm:$0xff] %v8703_v49  ;;  %v11253_v39 = vld [vmem:[#allocation19_spill] sm:$0xff] }
 0x273   :  { %v2439_v13 = vrot.slane %v11253_v39, 6 }
 0x274   :  { %v2205_v56 = vpop.f32.mrf.mxu2 }
 0x275   :  { %v8689_v4 = vadd.f32 %v2205_v56, %v2063_v57  ;;  %v2349_v24 = vpop.f32.mrf.mxu3  ;;  %v8691_v53 = vpop.f32.mrf.mxu0  ;;  %v58_v57 = vld [vmem:[%s10824_s3 + $0x48] sm:$0xff]  ;;  %v3247_v56 = vrot.slane %v8703_v49, 1 }
 0x276   :  { %v8694_v60 = vadd.f32 %v2349_v24, %v2081_v1  ;;  %v8696_v52 = vpop.f32.mrf.mxu1  ;;  %2835 = vperm.xlu0 %6939, %v58_v57   ;;  %v2064_v1 = vadd.f32 %v8620_v6, %v11255_v12  ;;  %v6917_v24 = vld [vmem:[%s10821_s0 + $0x68] sm:$0xff]   ;;  %v2440_v6 = vsel %vm2421_vm6, %v2437_v54, %v2439_v13  ;;  %v2441_v54 = vrot.slane %v11196_v62, 6 }
 0x277   :  { %v3248_v25 = vsel %vm178_vm1, %v3245_v33, %v3247_v56 }
 0x278   :  { %11250 = vst [vmem:[#allocation66_spill] sm:$0xff] %v8694_v60  ;;  %6264 = vmatmul.msk.f32.gmra.mxu0 %vm216_vm2, %v2438_v63  ;;  %v2442_v62 = vsel %vm2421_vm6, %v2439_v13, %v2441_v54  ;;  %v2443_v13 = vrot.slane %v11204_v14, 6  ;;  %v6929_v14 = vld [vmem:[%s10821_s0 + $0x118] sm:$0xff]  }
 0x279   :  { %6283 = vmatmul.msk.f32.gmra.mxu1 %vm216_vm2, %v2585_v5  ;;  %6300 = vmatmul.msk.f32.gmra.mxu2 %vm216_vm2, %v3083_v3  ;;  %v11256_v5 = vld [vmem:[#allocation58_spill] sm:$0xff] }
 0x27a   :  { %6319 = vmatmul.msk.f32.gmra.mxu3 %vm216_vm2, %v3246_v37  ;;  %v2082_v63 = vadd.f32 %v8625_v55, %v11256_v5  ;;  %v6928_v37 = vld [vmem:[%s10821_s0 + $0x110] sm:$0xff]   ;;  %v3085_v55 = vsel %vm178_vm1, %v3082_v43, %v3084_v40  ;;  %v8737_v5 = vunpack.c.l.bf16 %v6917_v24  ;;  %v2588_v43 = vrot.slane %v11261_v9, 6 }
 0x27b   :  { %v8740_v60 = vunpack.c.l.bf16 %v6928_v37 }
 0x27c   :  { %v2208_v3 = vpop.f32.mrf.mxu2  ;;  %11259 = vst [vmem:[#allocation68_spill] sm:$0xff] %v8737_v5  ;;  %v3086_v33 = vrot.slane %v8737_v5, 1  ;;  %v2589_v5 = vsel %vm2421_vm6, %v2586_v18, %v2588_v43  ;;  %v11266_v18 = vld [vmem:[#allocation24_spill] sm:$0xff] }
 0x27d   :  { %v8726_v57 = vadd.f32 %v2208_v3, %v2064_v1  ;;  %v2352_v39 = vpop.f32.mrf.mxu3  ;;  %v8728_v50 = vpop.f32.mrf.mxu0  ;;  %11260 = vst [vmem:[#allocation23_spill] sm:$0xff] %v8740_v60  ;;  %v59_v1 = vld [vmem:[%s10824_s3 + $0x50] sm:$0xff] }
 0x27e   :  { %v8731_v12 = vadd.f32 %v2352_v39, %v2082_v63  ;;  %v8733_v49 = vpop.f32.mrf.mxu1  ;;  %2840 = vperm.xlu1 %6940, %v59_v1   ;;  %v11262_v63 = vld [vmem:[#allocation9_spill] sm:$0xff]  ;;  %v3249_v39 = vrot.slane %v8740_v60, 1  ;;  %v8808_v60 = vunpack.c.l.bf16 %v6929_v14 }
 0x27f   :  { %11257 = vst [vmem:[#allocation40_spill] sm:$0xff] %v8726_v57  ;;  %v2065_v3 = vadd.f32 %v8660_v41, %v11262_v63  ;;  %v3087_v41 = vsel %vm178_vm1, %v3084_v40, %v3086_v33  ;;  %v8768_v63 = vunpack.c.h.bf16 %v6917_v24  ;;  %v2590_v40 = vrot.slane %v11266_v18, 6  ;;  %v11267_v24 = vld [vmem:[#allocation10_spill] sm:$0xff] }
 0x280   :  { %11258 = vst [vmem:[#allocation67_spill] sm:$0xff] %v8731_v12  ;;  %6265 = vmatmul.msk.f32.gmra.mxu0 %vm216_vm2, %v2440_v6  ;;  %v11263_v12 = vld [vmem:[#allocation59_spill] sm:$0xff] }
 0x281   :  { %6284 = vmatmul.msk.f32.gmra.mxu1 %vm216_vm2, %v2587_v0  ;;  %6301 = vmatmul.msk.f32.gmra.mxu2 %vm216_vm2, %v3085_v55  ;;  %v2083_v6 = vadd.f32 %v8665_v46, %v11263_v12  ;;  %11264 = vst [vmem:[#allocation41_spill] sm:$0xff] %v8768_v63  ;;  %v3250_v46 = vsel %vm178_vm1, %v3247_v56, %v3249_v39  ;;  %v8771_v12 = vunpack.c.h.bf16 %v6928_v37  ;;  %v3088_v56 = vrot.slane %v8768_v63, 1 }
 0x282   :  { %6320 = vmatmul.msk.f32.gmra.mxu3 %vm216_vm2, %v3248_v25  ;;  %v2066_v37 = vadd.f32 %v8691_v53, %v11267_v24  ;;  %v2444_v53 = vsel %vm2421_vm6, %v2441_v54, %v2443_v13  ;;  %11271 = vst [vmem:[#allocation43_spill] sm:$0xff] %v8808_v60  ;;  %v2445_v54 = vrot.slane %v11211_v30, 6 }
 0x283   :  { %11265 = vst [vmem:[#allocation42_spill] sm:$0xff] %v8771_v12 }
 0x284   :  { %v2211_v1 = vpop.f32.mrf.mxu2  ;;  %v2446_v30 = vsel %vm2421_vm6, %v2443_v13, %v2445_v54  ;;  %v2447_v13 = vrot.slane %v11217_v22, 6  ;;  %v6930_v22 = vld [vmem:[%s10821_s0 + $0x120] sm:$0xff]  }
 0x285   :  { %v8757_v0 = vadd.f32 %v2211_v1, %v2065_v3  ;;  %v2355_v55 = vpop.f32.mrf.mxu3  ;;  %v8759_v57 = vpop.f32.mrf.mxu0  ;;  %v57_v3 = vld [vmem:[%s10824_s3 + $0x40] sm:$0xff]  ;;  %v6918_v1 = vld [vmem:[%s10821_s0 + $0x70] sm:$0xff]  }
 0x286   :  { %v8762_v25 = vadd.f32 %v2355_v55, %v2083_v6  ;;  %v8764_v9 = vpop.f32.mrf.mxu1  ;;  %2830 = vperm.xlu2 %6941, %v57_v3   ;;  %v3251_v6 = vrot.slane %v8771_v12, 1  ;;  %v2591_v12 = vsel %vm2421_vm6, %v2588_v43, %v2590_v40  ;;  %v2592_v43 = vrot.slane %v11213_v29, 6 }
 0x288   :  { %6266 = vmatmul.msk.f32.gmra.mxu0 %vm216_vm2, %v2442_v62  ;;  %v3252_v63 = vsel %vm178_vm1, %v3249_v39, %v3251_v6  ;;  %v11272_v39 = vld [vmem:[#allocation11_spill] sm:$0xff] }
 0x289   :  { %6285 = vmatmul.msk.f32.gmra.mxu1 %vm216_vm2, %v2589_v5  ;;  %6302 = vmatmul.msk.f32.gmra.mxu2 %vm216_vm2, %v3087_v41  ;;  %v11268_v5 = vld [vmem:[#allocation60_spill] sm:$0xff] }
 0x28a   :  { %6321 = vmatmul.msk.f32.gmra.mxu3 %vm216_vm2, %v3250_v46  ;;  %v2084_v55 = vadd.f32 %v8696_v52, %v11268_v5  ;;  %v3089_v52 = vsel %vm178_vm1, %v3086_v33, %v3088_v56  ;;  %v8805_v5 = vunpack.c.l.bf16 %v6918_v1 }
 0x28c   :  { %v2214_v62 = vpop.f32.mrf.mxu2  ;;  %11270 = vst [vmem:[#allocation25_spill] sm:$0xff] %v8805_v5  ;;  %v3090_v33 = vrot.slane %v8805_v5, 1  ;;  %v2593_v5 = vsel %vm2421_vm6, %v2590_v40, %v2592_v43  ;;  %v2594_v40 = vrot.slane %v11219_v35, 6 }
 0x28d   :  { %v8794_v41 = vadd.f32 %v2214_v62, %v2066_v37  ;;  %v2358_v46 = vpop.f32.mrf.mxu3  ;;  %v8796_v3 = vpop.f32.mrf.mxu0  ;;  %v61_v37 = vld [vmem:[%s10824_s3 + $0x60] sm:$0xff]  ;;  %v3253_v62 = vrot.slane %v8808_v60, 1 }
 0x28e   :  { %v8799_v18 = vadd.f32 %v2358_v46, %v2084_v55  ;;  %v8801_v24 = vpop.f32.mrf.mxu1  ;;  %2850 = vperm.xlu0 %6939, %v61_v37   ;;  %v2067_v55 = vadd.f32 %v8728_v50, %v11272_v39  ;;  %v11273_v46 = vld [vmem:[#allocation29_spill] sm:$0xff]  ;;  %v3091_v50 = vsel %vm178_vm1, %v3088_v56, %v3090_v33  ;;  %v8836_v39 = vunpack.c.h.bf16 %v6918_v1 }
 0x290   :  { %11269 = vst [vmem:[#allocation69_spill] sm:$0xff] %v8799_v18  ;;  %6267 = vmatmul.msk.f32.gmra.mxu0 %vm216_vm2, %v2444_v53  ;;  %v2085_v53 = vadd.f32 %v8733_v49, %v11273_v46  ;;  %v3254_v49 = vsel %vm178_vm1, %v3251_v6, %v3253_v62  ;;  %v8839_v46 = vunpack.c.h.bf16 %v6929_v14  ;;  %v3092_v56 = vrot.slane %v8836_v39, 1  ;;  %v11276_v6 = vld [vmem:[#allocation12_spill] sm:$0xff] }
 0x291   :  { %6286 = vmatmul.msk.f32.gmra.mxu1 %vm216_vm2, %v2591_v12  ;;  %6303 = vmatmul.msk.f32.gmra.mxu2 %vm216_vm2, %v3089_v52  ;;  %11274 = vst [vmem:[#allocation26_spill] sm:$0xff] %v8836_v39  ;;  %v2068_v1 = vadd.f32 %v8759_v57, %v11276_v6  ;;  %v2448_v57 = vsel %vm2421_vm6, %v2445_v54, %v2447_v13  ;;  %v8876_v39 = vunpack.c.l.bf16 %v6930_v22  ;;  %v60_v54 = vld [vmem:[%s10824_s3 + $0x58] sm:$0xff] }
 0x292   :  { %6322 = vmatmul.msk.f32.gmra.mxu3 %vm216_vm2, %v3252_v63  ;;  %11275 = vst [vmem:[#allocation44_spill] sm:$0xff] %v8839_v46  ;;  %v3255_v14 = vrot.slane %v8839_v46, 1  ;;  %v2595_v6 = vsel %vm2421_vm6, %v2592_v43, %v2594_v40  ;;  %v2449_v43 = vrot.slane %v11223_v38, 6  ;;  %2845 = vperm.xlu2 %6941, %v60_v54  }
 0x293   :  { %11280 = vst [vmem:[#allocation7_spill] sm:$0xff] %v8876_v39 }
 0x294   :  { %v2217_v37 = vpop.f32.mrf.mxu2  ;;  %v3256_v46 = vsel %vm178_vm1, %v3253_v62, %v3255_v14 }
 0x295   :  { %v8825_v12 = vadd.f32 %v2217_v37, %v2067_v55  ;;  %v2361_v52 = vpop.f32.mrf.mxu3  ;;  %v8827_v18 = vpop.f32.mrf.mxu0  ;;  %v62_v55 = vld [vmem:[%s10824_s3 + $0x68] sm:$0xff] }
 0x296   :  { %v8830_v63 = vadd.f32 %v2361_v52, %v2085_v53  ;;  %v8832_v29 = vpop.f32.mrf.mxu1  ;;  %2855 = vperm.xlu1 %6940, %v62_v55   ;;  %v6919_v53 = vld [vmem:[%s10821_s0 + $0x78] sm:$0xff]  }
 0x298   :  { %6268 = vmatmul.msk.f32.gmra.mxu0 %vm216_vm2, %v2446_v30 }
 0x299   :  { %6287 = vmatmul.msk.f32.gmra.mxu1 %vm216_vm2, %v2593_v5  ;;  %6304 = vmatmul.msk.f32.gmra.mxu2 %vm216_vm2, %v3091_v50  ;;  %v11277_v5 = vld [vmem:[#allocation30_spill] sm:$0xff] }
 0x29a   :  { %6323 = vmatmul.msk.f32.gmra.mxu3 %vm216_vm2, %v3254_v49  ;;  %v2086_v37 = vadd.f32 %v8764_v9, %v11277_v5  ;;  %v3093_v9 = vsel %vm178_vm1, %v3090_v33, %v3092_v56  ;;  %v8873_v5 = vunpack.c.l.bf16 %v6919_v53  ;;  %v11281_v33 = vld [vmem:[#allocation8_spill] sm:$0xff] }
 0x29c   :  { %v2220_v52 = vpop.f32.mrf.mxu2  ;;  %11279 = vst [vmem:[#allocation45_spill] sm:$0xff] %v8873_v5  ;;  %v3094_v62 = vrot.slane %v8873_v5, 1 }
 0x29d   :  { %v8862_v35 = vadd.f32 %v2220_v52, %v2068_v1  ;;  %v2364_v30 = vpop.f32.mrf.mxu3  ;;  %v8864_v50 = vpop.f32.mrf.mxu0  ;;  %v2596_v1 = vrot.slane %v11281_v33, 6 }
 0x29e   :  { %v8867_v49 = vadd.f32 %v2364_v30, %v2086_v37  ;;  %v8869_v55 = vpop.f32.mrf.mxu1  ;;  %v11282_v37 = vld [vmem:[#allocation13_spill] sm:$0xff]  ;;  %v3257_v30 = vrot.slane %v8876_v39, 1 }
 0x29f   :  { %v2069_v52 = vadd.f32 %v8796_v3, %v11282_v37  ;;  %v2597_v54 = vsel %vm2421_vm6, %v2594_v40, %v2596_v1  ;;  %v3095_v3 = vsel %vm178_vm1, %v3092_v56, %v3094_v62  ;;  %v8904_v37 = vunpack.c.h.bf16 %v6919_v53  ;;  %v11288_v56 = vld [vmem:[#allocation54_spill] sm:$0xff] }
 0x2a0   :  { %11278 = vst [vmem:[#allocation5_spill] sm:$0xff] %v8867_v49  ;;  %6269 = vmatmul.msk.f32.gmra.mxu0 %vm216_vm2, %v2448_v57  ;;  %v11283_v57 = vld [vmem:[#allocation31_spill] sm:$0xff]  ;;  %v2598_v53 = vrot.slane %v11288_v56, 6 }
 0x2a1   :  { %6288 = vmatmul.msk.f32.gmra.mxu1 %vm216_vm2, %v2595_v6  ;;  %6305 = vmatmul.msk.f32.gmra.mxu2 %vm216_vm2, %v3093_v9  ;;  %v2087_v60 = vadd.f32 %v8801_v24, %v11283_v57  ;;  %11285 = vst [vmem:[#allocation6_spill] sm:$0xff] %v8904_v37  ;;  %v3258_v24 = vsel %vm178_vm1, %v3255_v14, %v3257_v30  ;;  %v8907_v57 = vunpack.c.h.bf16 %v6930_v22  ;;  %v3096_v14 = vrot.slane %v8904_v37, 1  ;;  %v11289_v22 = vld [vmem:[#allocation14_spill] sm:$0xff] }
 0x2a2   :  { %6324 = vmatmul.msk.f32.gmra.mxu3 %vm216_vm2, %v3256_v46  ;;  %v2450_v46 = vsel %vm2421_vm6, %v2447_v13, %v2449_v43  ;;  %v64_v13 = vld [vmem:[%s10824_s3 + $0x78] sm:$0xff]  ;;  %v2599_v37 = vsel %vm2421_vm6, %v2596_v1, %v2598_v53 }
 0x2a3   :  { %11286 = vst [vmem:[#allocation47_spill] sm:$0xff] %v8907_v57  ;;  %2865 = vperm.xlu0 %6939, %v64_v13  }
 0x2a4   :  { %v2223_v6 = vpop.f32.mrf.mxu2 }
 0x2a5   :  { %v8893_v49 = vadd.f32 %v2223_v6, %v2069_v52  ;;  %v2367_v9 = vpop.f32.mrf.mxu3  ;;  %v8895_v38 = vpop.f32.mrf.mxu0  ;;  %v2070_v52 = vadd.f32 %v8827_v18, %v11289_v22  ;;  %v3259_v6 = vrot.slane %v8907_v57, 1 }
 0x2a6   :  { %v8898_v33 = vadd.f32 %v2367_v9, %v2087_v60  ;;  %v8900_v5 = vpop.f32.mrf.mxu1  ;;  %v11287_v60 = vld [vmem:[#allocation53_spill] sm:$0xff] }
 0x2a7   :  { %v2451_v40 = vrot.slane %v11287_v60, 6  ;;  %v6920_v9 = vld [vmem:[%s10821_s0 + $0x80] sm:$0xff]   ;;  %v3260_v39 = vsel %vm178_vm1, %v3257_v30, %v3259_v6 }
 0x2a8   :  { %11284 = vst [vmem:[#allocation46_spill] sm:$0xff] %v8898_v33  ;;  %6270 = vmatmul.msk.f32.gmra.mxu0 %vm216_vm2, %v2450_v46  ;;  %v11290_v46 = vld [vmem:[#allocation32_spill] sm:$0xff] }
 0x2a9   :  { %6289 = vmatmul.msk.f32.gmra.mxu1 %vm216_vm2, %v2597_v54  ;;  %6306 = vmatmul.msk.f32.gmra.mxu2 %vm216_vm2, %v3095_v3  ;;  %v2088_v54 = vadd.f32 %v8832_v29, %v11290_v46  ;;  %v2452_v18 = vsel %vm2421_vm6, %v2449_v43, %v2451_v40  ;;  %v3097_v29 = vsel %vm178_vm1, %v3094_v62, %v3096_v14  ;;  %v8941_v46 = vunpack.c.l.bf16 %v6920_v9  ;;  %v65_v43 = vld [vmem:[%s10824_s3 + $0x80] sm:$0xff] }
 0x2aa   :  { %6325 = vmatmul.msk.f32.gmra.mxu3 %vm216_vm2, %v3258_v24  ;;  %v6931_v24 = vld [vmem:[%s10821_s0 + $0x128] sm:$0xff]   ;;  %v2600_v62 = vrot.slane %v7657_v7, 6  ;;  %2870 = vperm.xlu1 %6940, %v65_v43  }
 0x2ab   :  { %11293 = vst [vmem:[#allocation50_spill] sm:$0xff] %v8941_v46  ;;  %v8944_v33 = vunpack.c.l.bf16 %v6931_v24  ;;  %v3098_v30 = vrot.slane %v8941_v46, 1 }
 0x2ac   :  { %v2226_v3 = vpop.f32.mrf.mxu2  ;;  %v2601_v43 = vsel %vm2421_vm6, %v2598_v53, %v2600_v62  ;;  %v2455_v53 = vrot.slane %v8346_v26, 6 }
 0x2ad   :  { %v8930_v60 = vadd.f32 %v2226_v3, %v2070_v52  ;;  %v2370_v13 = vpop.f32.mrf.mxu3  ;;  %v8932_v56 = vpop.f32.mrf.mxu0  ;;  %11294 = vst [vmem:[#allocation51_spill] sm:$0xff] %v8944_v33  ;;  %v11295_v52 = vld [vmem:[#allocation57_spill] sm:$0xff] }
 0x2ae   :  { %v8935_v22 = vadd.f32 %v2370_v13, %v2088_v54  ;;  %v8937_v57 = vpop.f32.mrf.mxu1  ;;  %v2453_v1 = vrot.slane %v11295_v52, 6  ;;  %v11296_v54 = vld [vmem:[#allocation33_spill] sm:$0xff]  ;;  %v3261_v13 = vrot.slane %v8944_v33, 1 }
 0x2af   :  { %11291 = vst [vmem:[#allocation48_spill] sm:$0xff] %v8930_v60  ;;  %v2071_v3 = vadd.f32 %v8864_v50, %v11296_v54  ;;  %v3099_v50 = vsel %vm178_vm1, %v3096_v14, %v3098_v30  ;;  %v8972_v54 = vunpack.c.h.bf16 %v6920_v9  ;;  %v2602_v14 = vrot.slane %v8356_v8, 6  ;;  %v6921_v9 = vld [vmem:[%s10821_s0 + $0x88] sm:$0xff]  }
 0x2b0   :  { %11292 = vst [vmem:[#allocation49_spill] sm:$0xff] %v8935_v22  ;;  %6271 = vmatmul.msk.f32.gmra.mxu0 %vm216_vm2, %v2452_v18  ;;  %v11297_v18 = vld [vmem:[#allocation34_spill] sm:$0xff] }
 0x2b1   :  { %6290 = vmatmul.msk.f32.gmra.mxu1 %vm216_vm2, %v2599_v37  ;;  %6307 = vmatmul.msk.f32.gmra.mxu2 %vm216_vm2, %v3097_v29  ;;  %v2089_v22 = vadd.f32 %v8869_v55, %v11297_v18  ;;  %11300 = vst [vmem:[#allocation52_spill] sm:$0xff] %v8972_v54  ;;  %v3262_v55 = vsel %vm178_vm1, %v3259_v6, %v3261_v13  ;;  %v8975_v18 = vunpack.c.h.bf16 %v6931_v24  ;;  %v3100_v6 = vrot.slane %v8972_v54, 1  ;;  %v11302_v24 = vld [vmem:[#allocation61_spill] sm:$0xff] }
 0x2b2   :  { %6326 = vmatmul.msk.f32.gmra.mxu3 %vm216_vm2, %v3260_v39  ;;  %v2454_v39 = vsel %vm2421_vm6, %v2451_v40, %v2453_v1  ;;  %v63_v40 = vld [vmem:[%s10824_s3 + $0x70] sm:$0xff] }
 0x2b3   :  { %11301 = vst [vmem:[#allocation27_spill] sm:$0xff] %v8975_v18  ;;  %2860 = vperm.xlu2 %6941, %v63_v40   ;;  %v3263_v26 = vrot.slane %v8975_v18, 1  ;;  %v2456_v40 = vsel %vm2421_vm6, %v2453_v1, %v2455_v53  ;;  %v2457_v1 = vrot.slane %v8384_v20, 6  ;;  %v2091_v20 = vadd.f32 %v8937_v57, %v8415_v44 }
 0x2b4   :  { %v2229_v37 = vpop.f32.mrf.mxu2 }
 0x2b5   :  { %v8961_v60 = vadd.f32 %v2229_v37, %v2071_v3  ;;  %v2373_v29 = vpop.f32.mrf.mxu3  ;;  %v8963_v52 = vpop.f32.mrf.mxu0  ;;  %v47_v3 = vld [vmem:[%s10823_s2] sm:$0x1]  ;;  %v11303_v37 = vld [vmem:[#allocation62_spill] sm:$0xff] }
 0x2b6   :  { %v8966_v7 = vadd.f32 %v2373_v29, %v2089_v22  ;;  %v8968_v46 = vpop.f32.mrf.mxu1  ;;  %v2072_v22 = vadd.f32 %v8895_v38, %v11302_v24  ;;  %v2090_v29 = vadd.f32 %v8900_v5, %v11303_v37  ;;  %v9006_v24 = vunpack.c.l.bf16 %v6921_v9 }
 0x2b7   :  { %11298 = vst [vmem:[#allocation15_spill] sm:$0xff] %v8961_v60  ;;  %v48_v18 = vsub.f32 0.0, %v47_v3  ;;  %v2603_v5 = vsel %vm2421_vm6, %v2600_v62, %v2602_v14  ;;  %v3101_v37 = vsel %vm178_vm1, %v3098_v30, %v3100_v6  ;;  %v2073_v30 = vadd.f32 %v8932_v56, %v8410_v2 }
 0x2b8   :  { %11299 = vst [vmem:[#allocation16_spill] sm:$0xff] %v8966_v7  ;;  %6272 = vmatmul.msk.f32.gmra.mxu0 %vm216_vm2, %v2454_v39  ;;  %v8998_v39 = vpop.permute.xlu0 %2790  ;;  %v3264_v7 = vsel %vm178_vm1, %v3261_v13, %v3263_v26  ;;  %v3102_v3 = vrot.slane %v9006_v24, 1 }
 0x2b9   :  { %6291 = vmatmul.msk.f32.gmra.mxu1 %vm216_vm2, %v2601_v43  ;;  %6308 = vmatmul.msk.f32.gmra.mxu2 %vm216_vm2, %v3099_v50  ;;  %11304 = vst [vmem:[#allocation17_spill] sm:$0xff] %v8998_v39  ;;  %v6932_v43 = vld [vmem:[%s10821_s0 + $0x130] sm:$0xff]  }
 0x2ba   :  { %6327 = vmatmul.msk.f32.gmra.mxu3 %vm216_vm2, %v3262_v55  ;;  %11305 = vst [vmem:[#allocation18_spill] sm:$0xff] %v9006_v24  ;;  %v9013_v60 = vunpack.c.l.bf16 %v6932_v43 }
 0x2bc   :  { %v2232_v8 = vpop.f32.mrf.mxu2  ;;  %11306 = vst [vmem:[#allocation55_spill] sm:$0xff] %v9013_v60 }
 0x2bd   :  { %v9003_v50 = vadd.f32 %v2232_v8, %v2072_v22  ;;  %v2376_v55 = vpop.f32.mrf.mxu3  ;;  %v2515_v38 = vpop.f32.mrf.mxu0  ;;  %v2604_v22 = vrot.slane %v8394_v58, 6  ;;  %v3265_v8 = vrot.slane %v9013_v60, 1 }
 0x2be   :  { %v9008_v54 = vadd.f32 %v2376_v55, %v2090_v29  ;;  %v2659_v33 = vpop.f32.mrf.mxu1  ;;  %v2713_v62 = vadd.f32 %v2515_v38, %v8477_v48  ;;  %v9022_v29 = vperm.slane %v48_v18, 0  ;;  %v2458_v48 = vsel %vm2421_vm6, %v2455_v53, %v2457_v1 }
 0x2bf   :  { %v2731_v13 = vadd.f32 %v2659_v33, %v8483_v45  ;;  %v2605_v18 = vsel %vm2421_vm6, %v2602_v14, %v2604_v22  ;;  %v9040_v38 = vunpack.c.h.bf16 %v6921_v9  ;;  %v9047_v14 = vunpack.c.h.bf16 %v6932_v43 }
 0x2c0   :  { %6273 = vmatmul.msk.f32.gmra.mxu0 %vm216_vm2, %v2456_v40  ;;  %11307 = vst [vmem:[#allocation28_spill] sm:$0xff] %v9022_v29  ;;  %v2752_v2 = vmax.f32 %v2713_v62, %v9022_v29  ;;  %v9045_v53 = vpop.permute.xlu0 %2795 }
 0x2c1   :  { %6292 = vmatmul.msk.f32.gmra.mxu1 %vm216_vm2, %v2603_v5  ;;  %6309 = vmatmul.msk.f32.gmra.mxu2 %vm216_vm2, %v3101_v37  ;;  %11308 = vst [vmem:[#allocation19_spill] sm:$0xff] %v9040_v38  ;;  %v2770_v44 = vmax.f32 %v2731_v13, %v9022_v29  ;;  %v3266_v37 = vsel %vm178_vm1, %v3263_v26, %v3265_v8  ;;  %v3104_v9 = vrot.slane %v9040_v38, 1  ;;  %v3267_v62 = vrot.slane %v9047_v14, 1 }
 0x2c2   :  { %6328 = vmatmul.msk.f32.gmra.mxu3 %vm216_vm2, %v3264_v7  ;;  %v3103_v7 = vsel %vm178_vm1, %v3100_v6, %v3102_v3  ;;  %11309 = vst [vmem:[#allocation20_spill] sm:$0xff] %v9045_v53  ;;  %v2074_v26 = vadd.f32 %v8963_v52, %v8439_v51  ;;  %v2092_v13 = vadd.f32 %v8968_v46, %v8444_v47  ;;  %v6933_v51 = vld [vmem:[%s10821_s0 + $0x138] sm:$0xff]  }
 0x2c3   :  { %11310 = vst [vmem:[#allocation56_spill] sm:$0xff] %v9047_v14  ;;  %v2896_v43 = vmul.f32 %v8998_v39, %v2770_v44  ;;  %v3105_v47 = vsel %vm178_vm1, %v3102_v3, %v3104_v9  ;;  %v3268_v44 = vsel %vm178_vm1, %v3265_v8, %v3267_v62 }
 0x2c4   :  { %v2235_v55 = vpop.f32.mrf.mxu2 }
 0x2c5   :  { %v9031_v58 = vadd.f32 %v2235_v55, %v2073_v30  ;;  %v2379_v40 = vpop.f32.mrf.mxu3  ;;  %v2518_v5 = vpop.f32.mrf.mxu0  ;;  %v6922_v30 = vld [vmem:[%s10821_s0 + $0x90] sm:$0xff]  }
 0x2c6   :  { %v9037_v56 = vadd.f32 %v2379_v40, %v2091_v20  ;;  %v2714_v45 = vadd.f32 %v2518_v5, %v8520_v32  ;;  %v2662_v33 = vpop.f32.mrf.mxu1  ;;  %v2878_v32 = vmul.f32 %v8998_v39, %v2752_v2  ;;  %v9068_v40 = vpop.permute.xlu1 %2800  ;;  %v9079_v46 = vunpack.c.l.bf16 %v6922_v30 }
 0x2c7   :  { %v2732_v57 = vadd.f32 %v2662_v33, %v8525_v61  ;;  %11311 = vst [vmem:[#allocation58_spill] sm:$0xff] %v9068_v40 }
 0x2c8   :  { %v2753_v6 = vmax.f32 %v2714_v45, %v9022_v29  ;;  %6274 = vmatmul.msk.f32.gmra.mxu0 %vm216_vm2, %v2458_v48  ;;  %v3106_v3 = vrot.slane %v9079_v46, 1 }
 0x2c9   :  { %v2771_v1 = vmax.f32 %v2732_v57, %v9022_v29  ;;  %6293 = vmatmul.msk.f32.gmra.mxu1 %vm216_vm2, %v2605_v18  ;;  %6310 = vmatmul.msk.f32.gmra.mxu2 %vm216_vm2, %v3103_v7  ;;  %v9083_v57 = vunpack.c.l.bf16 %v6933_v51 }
 0x2ca   :  { %6329 = vmatmul.msk.f32.gmra.mxu3 %vm216_vm2, %v3266_v37  ;;  %v2879_v61 = vmul.f32 %v9045_v53, %v2753_v6  ;;  %v3107_v51 = vsel %vm178_vm1, %v3104_v9, %v3106_v3  ;;  %v3593_v9 = vrot.slane %v8490_v11, 2 }
 0x2cb   :  { %v2897_v22 = vmul.f32 %v9045_v53, %v2771_v1  ;;  %v3269_v1 = vrot.slane %v9083_v57, 1 }
 0x2cc   :  { %v2914_v20 = vadd.f32 %v2879_v61, %v2878_v32  ;;  %v2238_v55 = vpop.f32.mrf.mxu2  ;;  %v6954_v32 = vld [vmem:[%s10822_s1 + $0x14] sm:$0xf] }
 0x2cd   :  { %v2937_v52 = vadd.f32 %v2897_v22, %v2896_v43  ;;  %v9073_v5 = vadd.f32 %v2238_v55, %v2074_v26  ;;  %v2382_v48 = vpop.f32.mrf.mxu3  ;;  %v2521_v18 = vpop.f32.mrf.mxu0 }
 0x2ce   :  { %v9075_v7 = vadd.f32 %v2382_v48, %v2092_v13  ;;  %v2715_v2 = vadd.f32 %v2521_v18, %v8553_v16  ;;  %v2665_v45 = vpop.f32.mrf.mxu1  ;;  %v66_v16 = vld [vmem:[%s10824_s3 + $0x88] sm:$0xff]  ;;  %v3270_v18 = vsel %vm178_vm1, %v3267_v62, %v3269_v1 }
 0x2cf   :  { %v2733_v33 = vadd.f32 %v2665_v45, %v8558_v59  ;;  %2875 = vperm.xlu2 %6941, %v66_v16  }
 0x2d0   :  { %v2754_v37 = vmax.f32 %v2715_v2, %v9022_v29  ;;  %6333 = vmatmul.msk.f32.vlgmr.msrb.gmra.mxu0 %vm216_vm2, %v8488_v17  ;;  %v9113_v2 = vpop.permute.xlu1 %2805 }
 0x2d1   :  { %v2772_v6 = vmax.f32 %v2733_v33, %v9022_v29  ;;  %6311 = vmatmul.msk.f32.gmra.mxu2 %vm216_vm2, %v3105_v47  ;;  %6352 = vmatmul.msk.f32.vlgmr.msrb.gmra.mxu1 %vm216_vm2, %v8493_v27  ;;  %11314 = vst [vmem:[#allocation59_spill] sm:$0xff] %v9113_v2  ;;  %v3737_v47 = vrot.slane %v8495_v15, 2 }
 0x2d2   :  { %6330 = vmatmul.msk.f32.gmra.mxu3 %vm216_vm2, %v3268_v44  ;;  %v2880_v59 = vmul.f32 %v9068_v40, %v2754_v37  ;;  %6503 = vmatpush.msk.msrb.mxu1 %vm253_vm0, %v6954_v32  ;;  %v9131_v37 = vpop.permute.xlu2 %2810 }
 0x2d3   :  { %v2898_v8 = vmul.f32 %v9068_v40, %v2772_v6  ;;  %6484 = vmatpush.msk.msrb.mxu0 %vm253_vm0, %v6954_v32  ;;  %11316 = vst [vmem:[#allocation10_spill] sm:$0xff] %v9131_v37  ;;  %v6955_v32 = vld [vmem:[%s10822_s1 + $0x18] sm:$0xf] }
 0x2d4   :  { %v2915_v61 = vadd.f32 %v2914_v20, %v2880_v59  ;;  %v9105_v26 = vpop.f32.mrf.mxu2 }
 0x2d5   :  { %11312 = vst [vmem:[#allocation22_spill] sm:$0xff] %v9105_v26  ;;  %v2938_v43 = vadd.f32 %v2937_v52, %v2898_v8  ;;  %v9107_v22 = vpop.f32.mrf.mxu3  ;;  %v2524_v30 = vpop.f32.mrf.mxu0  ;;  %v3736_v52 = vrot.slane %v8493_v27, 2 }
 0x2d6   :  { %11313 = vst [vmem:[#allocation9_spill] sm:$0xff] %v9107_v22  ;;  %v2716_v13 = vadd.f32 %v2524_v30, %v8587_v21  ;;  %v2668_v55 = vpop.f32.mrf.mxu1 }
 0x2d7   :  { %v2734_v48 = vadd.f32 %v2668_v55, %v8592_v28  ;;  %v3592_v28 = vrot.slane %v8488_v17, 2  ;;  %v3738_v27 = vsel %vm708_vm3, %v3736_v52, %v3737_v47 }
 0x2d8   :  { %v2755_v45 = vmax.f32 %v2716_v13, %v9022_v29  ;;  %6334 = vmatmul.msk.f32.gmra.mxu0 %vm216_vm2, %v8490_v11 }
 0x2d9   :  { %v2773_v20 = vmax.f32 %v2734_v48, %v9022_v29  ;;  %6312 = vmatmul.msk.f32.gmra.mxu2 %vm216_vm2, %v3107_v51  ;;  %6353 = vmatmul.msk.f32.gmra.mxu1 %vm216_vm2, %v8495_v15  ;;  %v3594_v11 = vsel %vm708_vm3, %v3592_v28, %v3593_v9 }
 0x2da   :  { %6331 = vmatmul.msk.f32.gmra.mxu3 %vm216_vm2, %v3270_v18  ;;  %v2881_v21 = vmul.f32 %v9113_v2, %v2755_v45 }
 0x2db   :  { %v2899_v62 = vmul.f32 %v9113_v2, %v2773_v20 }
 0x2dc   :  { %v2916_v33 = vadd.f32 %v2915_v61, %v2881_v21  ;;  %v9129_v44 = vpop.f32.mrf.mxu2 }
 0x2dd   :  { %11315 = vst [vmem:[#allocation24_spill] sm:$0xff] %v9129_v44  ;;  %v2939_v16 = vadd.f32 %v2938_v43, %v2899_v62  ;;  %v9133_v6 = vpop.f32.mrf.mxu3  ;;  %v2527_v59 = vpop.f32.mrf.mxu0  ;;  %v3739_v43 = vrot.slane %v8534_v34, 2 }
 0x2de   :  { %11317 = vst [vmem:[#allocation60_spill] sm:$0xff] %v9133_v6  ;;  %v2717_v3 = vadd.f32 %v2527_v59, %v8618_v10  ;;  %v2671_v17 = vpop.f32.mrf.mxu1  ;;  %v9164_v62 = vpop.permute.xlu2 %2815 }
 0x2df   :  { %v2735_v8 = vadd.f32 %v2671_v17, %v8623_v19  ;;  %v3595_v19 = vrot.slane %v8531_v23, 2  ;;  %v3740_v28 = vsel %vm708_vm3, %v3737_v47, %v3739_v43  ;;  %11320 = vst [vmem:[#allocation12_spill] sm:$0xff] %v9164_v62 }
 0x2e0   :  { %v2756_v15 = vmax.f32 %v2717_v3, %v9022_v29  ;;  %6335 = vmatmul.msk.f32.gmra.mxu0 %vm216_vm2, %v8531_v23 }
 0x2e1   :  { %v2774_v1 = vmax.f32 %v2735_v8, %v9022_v29  ;;  %6354 = vmatmul.msk.f32.gmra.mxu1 %vm216_vm2, %v8534_v34  ;;  %6371 = vmatmul.msk.f32.vlgmr.msra.gmra.mxu2 %vm216_vm2, %v3594_v11  ;;  %v3596_v20 = vsel %vm708_vm3, %v3593_v9, %v3595_v19 }
 0x2e2   :  { %6390 = vmatmul.msk.f32.vlgmr.msra.gmra.mxu3 %vm216_vm2, %v3738_v27  ;;  %v2882_v10 = vmul.f32 %v9131_v37, %v2756_v15  ;;  %6522 = vmatpush.msk.msra.mxu2 %vm253_vm0, %v6955_v32 }
 0x2e3   :  { %v2900_v61 = vmul.f32 %v9131_v37, %v2774_v1  ;;  %6541 = vmatpush.msk.msra.mxu3 %vm253_vm0, %v6955_v32 }
 0x2e4   :  { %v2917_v30 = vadd.f32 %v2916_v33, %v2882_v10  ;;  %v9156_v13 = vpop.f32.mrf.mxu2  ;;  %v11324_v10 = vld [vmem:[#allocation66_spill] sm:$0xff] }
 0x2e5   :  { %11318 = vst [vmem:[#allocation11_spill] sm:$0xff] %v9156_v13  ;;  %v2940_v55 = vadd.f32 %v2939_v16, %v2900_v61  ;;  %v9158_v51 = vpop.f32.mrf.mxu3  ;;  %v2530_v48 = vpop.f32.mrf.mxu0  ;;  %v11321_v16 = vld [vmem:[#allocation35_spill] sm:$0xff] }
 0x2e6   :  { %11319 = vst [vmem:[#allocation29_spill] sm:$0xff] %v9158_v51  ;;  %v2718_v18 = vadd.f32 %v2530_v48, %v8658_v42  ;;  %v2674_v45 = vpop.f32.mrf.mxu1  ;;  %v3741_v47 = vrot.slane %v11321_v16, 2  ;;  %v9190_v48 = vpop.permute.xlu0 %2820 }
 0x2e7   :  { %v2736_v21 = vadd.f32 %v2674_v45, %v8663_v31  ;;  %v3597_v31 = vrot.slane %v8564_v36, 2  ;;  %11325 = vst [vmem:[#allocation13_spill] sm:$0xff] %v9190_v48  ;;  %v11327_v45 = vld [vmem:[#allocation63_spill] sm:$0xff] }
 0x2e8   :  { %v2757_v52 = vmax.f32 %v2718_v18, %v9022_v29  ;;  %6336 = vmatmul.msk.f32.gmra.mxu0 %vm216_vm2, %v8564_v36  ;;  %v9188_v61 = vsel %vm708_vm3, %v3739_v43, %v3741_v47  ;;  %v11326_v18 = vld [vmem:[#allocation36_spill] sm:$0xff] }
 0x2e9   :  { %v2775_v33 = vmax.f32 %v2736_v21, %v9022_v29  ;;  %6355 = vmatmul.msk.f32.gmra.mxu1 %vm216_vm2, %v11321_v16  ;;  %6372 = vmatmul.msk.f32.gmra.mxu2 %vm216_vm2, %v3596_v20  ;;  %v9184_v1 = vsel %vm708_vm3, %v3595_v19, %v3597_v31  ;;  %v3599_v19 = vrot.slane %v11326_v18, 2  ;;  %v3743_v20 = vrot.slane %v11327_v45, 2 }
 0x2ea   :  { %6391 = vmatmul.msk.f32.gmra.mxu3 %vm216_vm2, %v3740_v28  ;;  %v2883_v42 = vmul.f32 %v9164_v62, %v2757_v52 }
 0x2eb   :  { %v2901_v9 = vmul.f32 %v9164_v62, %v2775_v33 }
 0x2ec   :  { %v2918_v59 = vadd.f32 %v2917_v30, %v2883_v42  ;;  %v9178_v3 = vpop.f32.mrf.mxu2 }
 0x2ed   :  { %11322 = vst [vmem:[#allocation30_spill] sm:$0xff] %v9178_v3  ;;  %v2941_v17 = vadd.f32 %v2940_v55, %v2901_v9  ;;  %v9180_v11 = vpop.f32.mrf.mxu3  ;;  %v2533_v8 = vpop.f32.mrf.mxu0  ;;  %v11330_v9 = vld [vmem:[#allocation40_spill] sm:$0xff] }
 0x2ee   :  { %11323 = vst [vmem:[#allocation8_spill] sm:$0xff] %v9180_v11  ;;  %v2719_v27 = vadd.f32 %v2533_v8, %v8689_v4  ;;  %v2677_v15 = vpop.f32.mrf.mxu1 }
 0x2ef   :  { %v2737_v32 = vadd.f32 %v2677_v15, %v11324_v10  ;;  %v9212_v15 = vsel %vm708_vm3, %v3597_v31, %v3599_v19  ;;  %v11331_v10 = vld [vmem:[#allocation67_spill] sm:$0xff] }
 0x2f0   :  { %v2758_v30 = vmax.f32 %v2719_v27, %v9022_v29  ;;  %6337 = vmatmul.msk.f32.gmra.mxu0 %vm216_vm2, %v11326_v18 }
 0x2f1   :  { %v2776_v55 = vmax.f32 %v2737_v32, %v9022_v29  ;;  %6356 = vmatmul.msk.f32.gmra.mxu1 %vm216_vm2, %v11327_v45  ;;  %6373 = vmatmul.msk.f32.gmra.mxu2 %vm216_vm2, %v9184_v1 }
 0x2f2   :  { %6392 = vmatmul.msk.f32.gmra.mxu3 %vm216_vm2, %v9188_v61  ;;  %v2884_v4 = vmul.f32 %v9190_v48, %v2758_v30  ;;  %v9216_v30 = vsel %vm708_vm3, %v3741_v47, %v3743_v20 }
 0x2f3   :  { %v2902_v43 = vmul.f32 %v9190_v48, %v2776_v55  ;;  %v9218_v55 = vpop.permute.xlu1 %2825 }
 0x2f4   :  { %v2919_v21 = vadd.f32 %v2918_v59, %v2884_v4  ;;  %v9206_v28 = vpop.f32.mrf.mxu2  ;;  %11332 = vst [vmem:[#allocation54_spill] sm:$0xff] %v9218_v55  ;;  %v11333_v4 = vld [vmem:[#allocation64_spill] sm:$0xff] }
 0x2f5   :  { %11328 = vst [vmem:[#allocation31_spill] sm:$0xff] %v9206_v28  ;;  %v2942_v52 = vadd.f32 %v2941_v17, %v2902_v43  ;;  %v9208_v33 = vpop.f32.mrf.mxu3  ;;  %v2536_v42 = vpop.f32.mrf.mxu0  ;;  %v11334_v43 = vld [vmem:[#allocation37_spill] sm:$0xff]  ;;  %v3601_v47 = vrot.slane %v11333_v4, 2 }
 0x2f6   :  { %11329 = vst [vmem:[#allocation53_spill] sm:$0xff] %v9208_v33  ;;  %v2720_v8 = vadd.f32 %v2536_v42, %v11330_v9  ;;  %v2680_v27 = vpop.f32.mrf.mxu1  ;;  %v3745_v9 = vrot.slane %v11334_v43, 2 }
 0x2f7   :  { %v2738_v32 = vadd.f32 %v2680_v27, %v11331_v10  ;;  %v9240_v2 = vsel %vm708_vm3, %v3599_v19, %v3601_v47 }
 0x2f8   :  { %v2759_v59 = vmax.f32 %v2720_v8, %v9022_v29  ;;  %6338 = vmatmul.msk.f32.gmra.mxu0 %vm216_vm2, %v11333_v4  ;;  %v9244_v40 = vsel %vm708_vm3, %v3743_v20, %v3745_v9 }
 0x2f9   :  { %v2777_v17 = vmax.f32 %v2738_v32, %v9022_v29  ;;  %6357 = vmatmul.msk.f32.gmra.mxu1 %vm216_vm2, %v11334_v43  ;;  %6374 = vmatmul.msk.f32.gmra.mxu2 %vm216_vm2, %v9212_v15 }
 0x2fa   :  { %6393 = vmatmul.msk.f32.gmra.mxu3 %vm216_vm2, %v9216_v30  ;;  %v2885_v31 = vmul.f32 %v9218_v55, %v2759_v59 }
 0x2fb   :  { %v2903_v42 = vmul.f32 %v9218_v55, %v2777_v17  ;;  %v9246_v17 = vpop.permute.xlu2 %2830 }
 0x2fc   :  { %v2920_v8 = vadd.f32 %v2919_v21, %v2885_v31  ;;  %v9234_v27 = vpop.f32.mrf.mxu2  ;;  %11337 = vst [vmem:[#allocation57_spill] sm:$0xff] %v9246_v17  ;;  %v11338_v31 = vld [vmem:[#allocation38_spill] sm:$0xff] }
 0x2fd   :  { %11335 = vst [vmem:[#allocation14_spill] sm:$0xff] %v9234_v27  ;;  %v2943_v10 = vadd.f32 %v2942_v52, %v2903_v42  ;;  %v9236_v32 = vpop.f32.mrf.mxu3  ;;  %v2539_v48 = vpop.f32.mrf.mxu0  ;;  %v11339_v42 = vld [vmem:[#allocation65_spill] sm:$0xff] }
 0x2fe   :  { %11336 = vst [vmem:[#allocation32_spill] sm:$0xff] %v9236_v32  ;;  %v2721_v62 = vadd.f32 %v2539_v48, %v8757_v0  ;;  %v2683_v37 = vpop.f32.mrf.mxu1 }
 0x2ff   :  { %v2739_v59 = vadd.f32 %v2683_v37, %v8762_v25  ;;  %v3603_v25 = vrot.slane %v11338_v31, 2 }
 0x300   :  { %v2760_v21 = vmax.f32 %v2721_v62, %v9022_v29  ;;  %6339 = vmatmul.msk.f32.gmra.mxu0 %vm216_vm2, %v11338_v31  ;;  %v3747_v62 = vrot.slane %v11339_v42, 2 }
 0x301   :  { %v2778_v52 = vmax.f32 %v2739_v59, %v9022_v29  ;;  %6358 = vmatmul.msk.f32.gmra.mxu1 %vm216_vm2, %v11339_v42  ;;  %6375 = vmatmul.msk.f32.gmra.mxu2 %vm216_vm2, %v9240_v2  ;;  %v9268_v32 = vsel %vm708_vm3, %v3601_v47, %v3603_v25 }
 0x302   :  { %6394 = vmatmul.msk.f32.gmra.mxu3 %vm216_vm2, %v9244_v40  ;;  %v2886_v0 = vmul.f32 %v9246_v17, %v2760_v21  ;;  %v11342_v21 = vld [vmem:[#allocation69_spill] sm:$0xff]  ;;  %v9272_v33 = vsel %vm708_vm3, %v3745_v9, %v3747_v62 }
 0x303   :  { %v2904_v37 = vmul.f32 %v9246_v17, %v2778_v52  ;;  %v9274_v52 = vpop.permute.xlu0 %2835 }
 0x304   :  { %v2921_v48 = vadd.f32 %v2920_v8, %v2886_v0  ;;  %v9262_v19 = vpop.f32.mrf.mxu2  ;;  %11343 = vst [vmem:[#allocation61_spill] sm:$0xff] %v9274_v52  ;;  %v11344_v0 = vld [vmem:[#allocation21_spill] sm:$0xff] }
 0x305   :  { %11340 = vst [vmem:[#allocation33_spill] sm:$0xff] %v9262_v19  ;;  %v2944_v20 = vadd.f32 %v2943_v10, %v2904_v37  ;;  %v9264_v59 = vpop.f32.mrf.mxu3  ;;  %v2542_v55 = vpop.f32.mrf.mxu0  ;;  %v11345_v37 = vld [vmem:[#allocation39_spill] sm:$0xff] }
 0x306   :  { %11341 = vst [vmem:[#allocation34_spill] sm:$0xff] %v9264_v59  ;;  %v2722_v53 = vadd.f32 %v2542_v55, %v8794_v41  ;;  %v2686_v39 = vpop.f32.mrf.mxu1  ;;  %v3749_v55 = vrot.slane %v11345_v37, 2 }
 0x307   :  { %v2740_v27 = vadd.f32 %v2686_v39, %v11342_v21  ;;  %v3605_v39 = vrot.slane %v11344_v0, 2 }
 0x308   :  { %v2761_v8 = vmax.f32 %v2722_v53, %v9022_v29  ;;  %6340 = vmatmul.msk.f32.gmra.mxu0 %vm216_vm2, %v11344_v0  ;;  %v9300_v11 = vsel %vm708_vm3, %v3747_v62, %v3749_v55 }
 0x309   :  { %v2779_v10 = vmax.f32 %v2740_v27, %v9022_v29  ;;  %6359 = vmatmul.msk.f32.gmra.mxu1 %vm216_vm2, %v11345_v37  ;;  %6376 = vmatmul.msk.f32.gmra.mxu2 %vm216_vm2, %v9268_v32  ;;  %v9296_v28 = vsel %vm708_vm3, %v3603_v25, %v3605_v39 }
 0x30a   :  { %6395 = vmatmul.msk.f32.gmra.mxu3 %vm216_vm2, %v9272_v33  ;;  %v2887_v41 = vmul.f32 %v9274_v52, %v2761_v8 }
 0x30b   :  { %v2905_v53 = vmul.f32 %v9274_v52, %v2779_v10  ;;  %v9302_v10 = vpop.permute.xlu1 %2840 }
 0x30c   :  { %v2922_v47 = vadd.f32 %v2921_v48, %v2887_v41  ;;  %v9290_v9 = vpop.f32.mrf.mxu2  ;;  %11348 = vst [vmem:[#allocation66_spill] sm:$0xff] %v9302_v10  ;;  %v11349_v41 = vld [vmem:[#allocation68_spill] sm:$0xff] }
 0x30d   :  { %11346 = vst [vmem:[#allocation62_spill] sm:$0xff] %v9290_v9  ;;  %v2945_v27 = vadd.f32 %v2944_v20, %v2905_v53  ;;  %v9292_v21 = vpop.f32.mrf.mxu3  ;;  %v2545_v17 = vpop.f32.mrf.mxu0  ;;  %v11350_v53 = vld [vmem:[#allocation23_spill] sm:$0xff] }
 0x30e   :  { %11347 = vst [vmem:[#allocation35_spill] sm:$0xff] %v9292_v21  ;;  %v2723_v59 = vadd.f32 %v2545_v17, %v8825_v12  ;;  %v2689_v19 = vpop.f32.mrf.mxu1  ;;  %v3751_v25 = vrot.slane %v11350_v53, 2 }
 0x30f   :  { %v2741_v8 = vadd.f32 %v2689_v19, %v8830_v63  ;;  %v3607_v63 = vrot.slane %v11349_v41, 2 }
 0x310   :  { %v2762_v48 = vmax.f32 %v2723_v59, %v9022_v29  ;;  %6341 = vmatmul.msk.f32.gmra.mxu0 %vm216_vm2, %v11349_v41  ;;  %v9328_v13 = vsel %vm708_vm3, %v3749_v55, %v3751_v25 }
 0x311   :  { %v2780_v20 = vmax.f32 %v2741_v8, %v9022_v29  ;;  %6360 = vmatmul.msk.f32.gmra.mxu1 %vm216_vm2, %v11350_v53  ;;  %6377 = vmatmul.msk.f32.gmra.mxu2 %vm216_vm2, %v9296_v28  ;;  %v9324_v3 = vsel %vm708_vm3, %v3605_v39, %v3607_v63 }
 0x312   :  { %6396 = vmatmul.msk.f32.gmra.mxu3 %vm216_vm2, %v9300_v11  ;;  %v2888_v12 = vmul.f32 %v9302_v10, %v2762_v48  ;;  %v11353_v48 = vld [vmem:[#allocation5_spill] sm:$0xff] }
 0x313   :  { %v2906_v17 = vmul.f32 %v9302_v10, %v2780_v20  ;;  %v9330_v20 = vpop.permute.xlu2 %2845 }
 0x314   :  { %v2923_v62 = vadd.f32 %v2922_v47, %v2888_v12  ;;  %v9318_v19 = vpop.f32.mrf.mxu2  ;;  %11354 = vst [vmem:[#allocation67_spill] sm:$0xff] %v9330_v20  ;;  %v11355_v12 = vld [vmem:[#allocation41_spill] sm:$0xff] }
 0x315   :  { %11351 = vst [vmem:[#allocation63_spill] sm:$0xff] %v9318_v19  ;;  %v2946_v59 = vadd.f32 %v2945_v27, %v2906_v17  ;;  %v9320_v8 = vpop.f32.mrf.mxu3  ;;  %v2548_v52 = vpop.f32.mrf.mxu0  ;;  %v11356_v17 = vld [vmem:[#allocation42_spill] sm:$0xff] }
 0x316   :  { %11352 = vst [vmem:[#allocation40_spill] sm:$0xff] %v9320_v8  ;;  %v2724_v21 = vadd.f32 %v2548_v52, %v8862_v35  ;;  %v2692_v9 = vpop.f32.mrf.mxu1  ;;  %v3609_v52 = vrot.slane %v11355_v12, 2  ;;  %v3753_v55 = vrot.slane %v11356_v17, 2 }
 0x317   :  { %v2742_v51 = vadd.f32 %v2692_v9, %v11353_v48 }
 0x318   :  { %v2763_v47 = vmax.f32 %v2724_v21, %v9022_v29  ;;  %6342 = vmatmul.msk.f32.gmra.mxu0 %vm216_vm2, %v11355_v12  ;;  %v9352_v6 = vsel %vm708_vm3, %v3607_v63, %v3609_v52  ;;  %v9356_v22 = vsel %vm708_vm3, %v3751_v25, %v3753_v55 }
 0x319   :  { %v2781_v27 = vmax.f32 %v2742_v51, %v9022_v29  ;;  %6361 = vmatmul.msk.f32.gmra.mxu1 %vm216_vm2, %v11356_v17  ;;  %6378 = vmatmul.msk.f32.gmra.mxu2 %vm216_vm2, %v9324_v3 }
 0x31a   :  { %6397 = vmatmul.msk.f32.gmra.mxu3 %vm216_vm2, %v9328_v13  ;;  %v2889_v35 = vmul.f32 %v9330_v20, %v2763_v47  ;;  %v11359_v47 = vld [vmem:[#allocation46_spill] sm:$0xff] }
 0x31b   :  { %v2907_v39 = vmul.f32 %v9330_v20, %v2781_v27  ;;  %v9358_v27 = vpop.permute.xlu0 %2850 }
 0x31c   :  { %v2924_v9 = vadd.f32 %v2923_v62, %v2889_v35  ;;  %v9346_v21 = vpop.f32.mrf.mxu2  ;;  %11360 = vst [vmem:[#allocation38_spill] sm:$0xff] %v9358_v27  ;;  %v11361_v35 = vld [vmem:[#allocation25_spill] sm:$0xff] }
 0x31d   :  { %11357 = vst [vmem:[#allocation64_spill] sm:$0xff] %v9346_v21  ;;  %v2947_v51 = vadd.f32 %v2946_v59, %v2907_v39  ;;  %v9348_v48 = vpop.f32.mrf.mxu3  ;;  %v2551_v10 = vpop.f32.mrf.mxu0  ;;  %v11362_v39 = vld [vmem:[#allocation43_spill] sm:$0xff] }
 0x31e   :  { %11358 = vst [vmem:[#allocation37_spill] sm:$0xff] %v9348_v48  ;;  %v2725_v8 = vadd.f32 %v2551_v10, %v8893_v49  ;;  %v2695_v19 = vpop.f32.mrf.mxu1  ;;  %v3611_v10 = vrot.slane %v11361_v35, 2  ;;  %v3755_v25 = vrot.slane %v11362_v39, 2  ;;  %v11365_v48 = vld [vmem:[#allocation48_spill] sm:$0xff] }
 0x31f   :  { %v2743_v44 = vadd.f32 %v2695_v19, %v11359_v47 }
 0x320   :  { %v2764_v62 = vmax.f32 %v2725_v8, %v9022_v29  ;;  %6343 = vmatmul.msk.f32.gmra.mxu0 %vm216_vm2, %v11361_v35  ;;  %v9380_v17 = vsel %vm708_vm3, %v3609_v52, %v3611_v10  ;;  %v9384_v35 = vsel %vm708_vm3, %v3753_v55, %v3755_v25 }
 0x321   :  { %v2782_v59 = vmax.f32 %v2743_v44, %v9022_v29  ;;  %6362 = vmatmul.msk.f32.gmra.mxu1 %vm216_vm2, %v11362_v39  ;;  %6379 = vmatmul.msk.f32.gmra.mxu2 %vm216_vm2, %v9352_v6  ;;  %11366 = vst [vmem:[#allocation21_spill] sm:$0xff] %v9380_v17 }
 0x322   :  { %6398 = vmatmul.msk.f32.gmra.mxu3 %vm216_vm2, %v9356_v22  ;;  %v2890_v49 = vmul.f32 %v9358_v27, %v2764_v62  ;;  %v11367_v62 = vld [vmem:[#allocation49_spill] sm:$0xff]  ;;  %11368 = vst [vmem:[#allocation39_spill] sm:$0xff] %v9384_v35 }
 0x323   :  { %v2908_v63 = vmul.f32 %v9358_v27, %v2782_v59  ;;  %v9386_v59 = vpop.permute.xlu1 %2855 }
 0x324   :  { %v2925_v19 = vadd.f32 %v2924_v9, %v2890_v49  ;;  %v9374_v8 = vpop.f32.mrf.mxu2  ;;  %11369 = vst [vmem:[#allocation68_spill] sm:$0xff] %v9386_v59  ;;  %v11370_v49 = vld [vmem:[#allocation26_spill] sm:$0xff] }
 0x325   :  { %11363 = vst [vmem:[#allocation65_spill] sm:$0xff] %v9374_v8  ;;  %v2948_v44 = vadd.f32 %v2947_v51, %v2908_v63  ;;  %v9376_v47 = vpop.f32.mrf.mxu3  ;;  %v2554_v20 = vpop.f32.mrf.mxu0  ;;  %v11371_v63 = vld [vmem:[#allocation44_spill] sm:$0xff] }
 0x326   :  { %11364 = vst [vmem:[#allocation69_spill] sm:$0xff] %v9376_v47  ;;  %v2726_v21 = vadd.f32 %v2554_v20, %v11365_v48  ;;  %v2698_v26 = vpop.f32.mrf.mxu1  ;;  %v3613_v20 = vrot.slane %v11370_v49, 2  ;;  %v3757_v55 = vrot.slane %v11371_v63, 2  ;;  %v11374_v47 = vld [vmem:[#allocation15_spill] sm:$0xff] }
 0x327   :  { %v2744_v12 = vadd.f32 %v2698_v26, %v11367_v62 }
 0x328   :  { %v2765_v9 = vmax.f32 %v2726_v21, %v9022_v29  ;;  %6344 = vmatmul.msk.f32.gmra.mxu0 %vm216_vm2, %v11370_v49  ;;  %v9412_v49 = vsel %vm708_vm3, %v3755_v25, %v3757_v55 }
 0x329   :  { %v2783_v51 = vmax.f32 %v2744_v12, %v9022_v29  ;;  %6363 = vmatmul.msk.f32.gmra.mxu1 %vm216_vm2, %v11371_v63  ;;  %6380 = vmatmul.msk.f32.gmra.mxu2 %vm216_vm2, %v9380_v17 }
 0x32a   :  { %6399 = vmatmul.msk.f32.gmra.mxu3 %vm216_vm2, %v9384_v35  ;;  %v2891_v26 = vmul.f32 %v9386_v59, %v2765_v9  ;;  %v9408_v35 = vsel %vm708_vm3, %v3611_v10, %v3613_v20  ;;  %v11375_v9 = vld [vmem:[#allocation16_spill] sm:$0xff] }
 0x32b   :  { %v2909_v52 = vmul.f32 %v9386_v59, %v2783_v51  ;;  %v9414_v51 = vpop.permute.xlu2 %2860 }
 0x32c   :  { %v2926_v21 = vadd.f32 %v2925_v19, %v2891_v26  ;;  %v9402_v48 = vpop.f32.mrf.mxu2  ;;  %11376 = vst [vmem:[#allocation46_spill] sm:$0xff] %v9414_v51  ;;  %v11377_v26 = vld [vmem:[#allocation45_spill] sm:$0xff] }
 0x32d   :  { %11372 = vst [vmem:[#allocation23_spill] sm:$0xff] %v9402_v48  ;;  %v2949_v12 = vadd.f32 %v2948_v44, %v2909_v52  ;;  %v9404_v62 = vpop.f32.mrf.mxu3  ;;  %v2557_v27 = vpop.f32.mrf.mxu0  ;;  %v11378_v52 = vld [vmem:[#allocation7_spill] sm:$0xff] }
 0x32e   :  { %11373 = vst [vmem:[#allocation5_spill] sm:$0xff] %v9404_v62  ;;  %v2727_v8 = vadd.f32 %v2557_v27, %v11374_v47  ;;  %v2701_v39 = vpop.f32.mrf.mxu1  ;;  %v3759_v25 = vrot.slane %v11378_v52, 2 }
 0x32f   :  { %v2745_v17 = vadd.f32 %v2701_v39, %v11375_v9  ;;  %v3615_v39 = vrot.slane %v11377_v26, 2 }
 0x330   :  { %v2766_v19 = vmax.f32 %v2727_v8, %v9022_v29  ;;  %6345 = vmatmul.msk.f32.gmra.mxu0 %vm216_vm2, %v11377_v26  ;;  %v9440_v26 = vsel %vm708_vm3, %v3757_v55, %v3759_v25 }
 0x331   :  { %v2784_v44 = vmax.f32 %v2745_v17, %v9022_v29  ;;  %6364 = vmatmul.msk.f32.gmra.mxu1 %vm216_vm2, %v11378_v52  ;;  %6381 = vmatmul.msk.f32.gmra.mxu2 %vm216_vm2, %v9408_v35  ;;  %v9436_v63 = vsel %vm708_vm3, %v3613_v20, %v3615_v39 }
 0x332   :  { %6400 = vmatmul.msk.f32.gmra.mxu3 %vm216_vm2, %v9412_v49  ;;  %v2892_v27 = vmul.f32 %v9414_v51, %v2766_v19 }
 0x333   :  { %v2910_v10 = vmul.f32 %v9414_v51, %v2784_v44  ;;  %v9442_v44 = vpop.permute.xlu0 %2865 }
 0x334   :  { %v2927_v8 = vadd.f32 %v2926_v21, %v2892_v27  ;;  %v9430_v47 = vpop.f32.mrf.mxu2  ;;  %11381 = vst [vmem:[#allocation15_spill] sm:$0xff] %v9442_v44  ;;  %v11382_v27 = vld [vmem:[#allocation6_spill] sm:$0xff] }
 0x335   :  { %11379 = vst [vmem:[#allocation48_spill] sm:$0xff] %v9430_v47  ;;  %v2950_v17 = vadd.f32 %v2949_v12, %v2910_v10  ;;  %v9432_v9 = vpop.f32.mrf.mxu3  ;;  %v2560_v59 = vpop.f32.mrf.mxu0  ;;  %v11383_v10 = vld [vmem:[#allocation47_spill] sm:$0xff] }
 0x336   :  { %11380 = vst [vmem:[#allocation49_spill] sm:$0xff] %v9432_v9  ;;  %v2728_v62 = vadd.f32 %v2560_v59, %v9003_v50  ;;  %v2704_v48 = vpop.f32.mrf.mxu1  ;;  %v3617_v50 = vrot.slane %v11382_v27, 2  ;;  %v3761_v20 = vrot.slane %v11383_v10, 2 }
 0x337   :  { %v2746_v19 = vadd.f32 %v2704_v48, %v9008_v54 }
 0x338   :  { %v2767_v21 = vmax.f32 %v2728_v62, %v9022_v29  ;;  %6346 = vmatmul.msk.f32.gmra.mxu0 %vm216_vm2, %v11382_v27  ;;  %v9464_v52 = vsel %vm708_vm3, %v3615_v39, %v3617_v50  ;;  %v9468_v27 = vsel %vm708_vm3, %v3759_v25, %v3761_v20 }
 0x339   :  { %v2785_v12 = vmax.f32 %v2746_v19, %v9022_v29  ;;  %6365 = vmatmul.msk.f32.gmra.mxu1 %vm216_vm2, %v11383_v10  ;;  %6382 = vmatmul.msk.f32.gmra.mxu2 %vm216_vm2, %v9436_v63 }
 0x33a   :  { %6401 = vmatmul.msk.f32.gmra.mxu3 %vm216_vm2, %v9440_v26  ;;  %v2893_v54 = vmul.f32 %v9442_v44, %v2767_v21 }
 0x33b   :  { %v2911_v59 = vmul.f32 %v9442_v44, %v2785_v12  ;;  %v9470_v12 = vpop.permute.xlu1 %2870 }
 0x33c   :  { %v9458_v55 = vpop.f32.mrf.mxu2  ;;  %v2928_v48 = vadd.f32 %v2927_v8, %v2893_v54  ;;  %11386 = vst [vmem:[#allocation71_spill] sm:$0xff] %v9470_v12  ;;  %v11387_v8 = vld [vmem:[#allocation50_spill] sm:$0xff]  ;;  %v11388_v54 = vld [vmem:[#allocation51_spill] sm:$0xff] }
 0x33d   :  { %11384 = vst [vmem:[#allocation16_spill] sm:$0xff] %v9458_v55  ;;  %v9460_v62 = vpop.f32.mrf.mxu3  ;;  %v2563_v19 = vpop.f32.mrf.mxu0  ;;  %v2951_v51 = vadd.f32 %v2950_v17, %v2911_v59  ;;  %v3763_v25 = vrot.slane %v11388_v54, 2 }
 0x33e   :  { %11385 = vst [vmem:[#allocation70_spill] sm:$0xff] %v9460_v62  ;;  %v2729_v9 = vadd.f32 %v2563_v19, %v9031_v58  ;;  %v2707_v47 = vpop.f32.mrf.mxu1 }
 0x33f   :  { %v2747_v21 = vadd.f32 %v2707_v47, %v9037_v56  ;;  %v3619_v56 = vrot.slane %v11387_v8, 2 }
 0x340   :  { %v2768_v44 = vmax.f32 %v2729_v9, %v9022_v29  ;;  %6347 = vmatmul.msk.f32.gmra.mxu0 %vm216_vm2, %v11387_v8  ;;  %v9496_v8 = vsel %vm708_vm3, %v3761_v20, %v3763_v25 }
 0x341   :  { %v2786_v17 = vmax.f32 %v2747_v21, %v9022_v29  ;;  %6366 = vmatmul.msk.f32.gmra.mxu1 %vm216_vm2, %v11388_v54  ;;  %6383 = vmatmul.msk.f32.gmra.mxu2 %vm216_vm2, %v9464_v52  ;;  %v9492_v10 = vsel %vm708_vm3, %v3617_v50, %v3619_v56 }
 0x342   :  { %6402 = vmatmul.msk.f32.gmra.mxu3 %vm216_vm2, %v9468_v27  ;;  %v2894_v58 = vmul.f32 %v9470_v12, %v2768_v44 }
 0x343   :  { %v2912_v39 = vmul.f32 %v9470_v12, %v2786_v17  ;;  %v9498_v17 = vpop.permute.xlu2 %2875 }
 0x344   :  { %v2929_v47 = vadd.f32 %v2928_v48, %v2894_v58  ;;  %v9486_v9 = vpop.f32.mrf.mxu2  ;;  %11391 = vst [vmem:[#allocation73_spill] sm:$0xff] %v9498_v17  ;;  %v11392_v58 = vld [vmem:[#allocation52_spill] sm:$0xff] }
 0x345   :  { %11389 = vst [vmem:[#allocation51_spill] sm:$0xff] %v9486_v9  ;;  %v2952_v59 = vadd.f32 %v2951_v51, %v2912_v39  ;;  %v9488_v19 = vpop.f32.mrf.mxu3  ;;  %v2566_v21 = vpop.f32.mrf.mxu0  ;;  %v11393_v39 = vld [vmem:[#allocation27_spill] sm:$0xff] }
 0x346   :  { %11390 = vst [vmem:[#allocation72_spill] sm:$0xff] %v9488_v19  ;;  %v2730_v62 = vadd.f32 %v2566_v21, %v9073_v5  ;;  %v2710_v55 = vpop.f32.mrf.mxu1  ;;  %v3765_v20 = vrot.slane %v11393_v39, 2 }
 0x347   :  { %v2748_v44 = vadd.f32 %v2710_v55, %v9075_v7  ;;  %v3621_v7 = vrot.slane %v11392_v58, 2 }
 0x348   :  { %v2769_v48 = vmax.f32 %v2730_v62, %v9022_v29  ;;  %6348 = vmatmul.msk.f32.gmra.mxu0 %vm216_vm2, %v11392_v58  ;;  %v9530_v19 = vsel %vm708_vm3, %v3763_v25, %v3765_v20 }
 0x349   :  { %v2787_v51 = vmax.f32 %v2748_v44, %v9022_v29  ;;  %6367 = vmatmul.msk.f32.gmra.mxu1 %vm216_vm2, %v11393_v39  ;;  %6384 = vmatmul.msk.f32.gmra.mxu2 %vm216_vm2, %v9492_v10 }
 0x34a   :  { %6403 = vmatmul.msk.f32.gmra.mxu3 %vm216_vm2, %v9496_v8  ;;  %v2895_v5 = vmul.f32 %v9498_v17, %v2769_v48  ;;  %v9527_v48 = vsel %vm708_vm3, %v3619_v56, %v3621_v7  ;;  %v3767_v56 = vrot.slane %v9013_v60, 2 }
 0x34b   :  { %v2913_v50 = vmul.f32 %v9498_v17, %v2787_v51 }
 0x34c   :  { %v9514_v55 = vadd.f32 %v2929_v47, %v2895_v5  ;;  %v9516_v62 = vpop.f32.mrf.mxu2  ;;  %v3623_v47 = vrot.slane %v9006_v24, 2  ;;  %v9554_v17 = vsel %vm708_vm3, %v3765_v20, %v3767_v56 }
 0x34d   :  { %11395 = vst [vmem:[#allocation27_spill] sm:$0xff] %v9516_v62  ;;  %v9518_v21 = vadd.f32 %v2952_v59, %v2913_v50  ;;  %v9520_v44 = vpop.f32.mrf.mxu3  ;;  %v9522_v12 = vpop.f32.mrf.mxu0 }
 0x34e   :  { %11394 = vst [vmem:[#allocation52_spill] sm:$0xff] %v9514_v55  ;;  %v9524_v29 = vpop.f32.mrf.mxu1  ;;  %v9551_v50 = vsel %vm708_vm3, %v3621_v7, %v3623_v47  ;;  %v3769_v7 = vrot.slane %v9047_v14, 2 }
 0x34f   :  { %11396 = vst [vmem:[#allocation74_spill] sm:$0xff] %v9518_v21  ;;  %v3625_v21 = vrot.slane %v9040_v38, 2 }
 0x350   :  { %11397 = vst [vmem:[#allocation75_spill] sm:$0xff] %v9520_v44  ;;  %6349 = vmatmul.msk.f32.gmra.mxu0 %vm216_vm2, %v9006_v24  ;;  %v9578_v62 = vsel %vm708_vm3, %v3767_v56, %v3769_v7  ;;  %v11004_v56 = vrot.slane %v9083_v57, 2 }
 0x351   :  { %6368 = vmatmul.msk.f32.gmra.mxu1 %vm216_vm2, %v9013_v60  ;;  %6385 = vmatmul.msk.f32.gmra.mxu2 %vm216_vm2, %v9527_v48  ;;  %v9575_v44 = vsel %vm708_vm3, %v3623_v47, %v3625_v21  ;;  %v6956_v47 = vld [vmem:[%s10822_s1 + $0x1c] sm:$0xf] }
 0x352   :  { %6404 = vmatmul.msk.f32.gmra.mxu3 %vm216_vm2, %v9530_v19 }
 0x354   :  { %v9542_v59 = vpop.f32.mrf.mxu2 }
 0x355   :  { %11398 = vst [vmem:[#allocation76_spill] sm:$0xff] %v9542_v59  ;;  %v9544_v25 = vpop.f32.mrf.mxu3  ;;  %v9546_v51 = vpop.f32.mrf.mxu0 }
 0x356   :  { %11399 = vst [vmem:[#allocation77_spill] sm:$0xff] %v9544_v25  ;;  %v9548_v5 = vpop.f32.mrf.mxu1 }
 0x357   :  { %11400 = vst [vmem:[#allocation78_spill] sm:$0xff] %v9548_v5 }
 0x358   :  { %6350 = vmatmul.msk.f32.gmra.mxu0 %vm216_vm2, %v9040_v38 }
 0x359   :  { %6369 = vmatmul.msk.f32.gmra.mxu1 %vm216_vm2, %v9047_v14  ;;  %6386 = vmatmul.msk.f32.gmra.mxu2 %vm216_vm2, %v9551_v50 }
 0x35a   :  { %6405 = vmatmul.msk.f32.gmra.mxu3 %vm216_vm2, %v9554_v17 }
 0x35c   :  { %v9566_v55 = vpop.f32.mrf.mxu2 }
 0x35d   :  { %11401 = vst [vmem:[#allocation79_spill] sm:$0xff] %v9566_v55  ;;  %v9568_v20 = vpop.f32.mrf.mxu3  ;;  %v9570_v25 = vpop.f32.mrf.mxu0 }
 0x35e   :  { %11402 = vst [vmem:[#allocation80_spill] sm:$0xff] %v9568_v20  ;;  %v9572_v59 = vpop.f32.mrf.mxu1  ;;  %v11003_v20 = vrot.slane %v9079_v46, 2 }
 0x35f   :  { %11403 = vst [vmem:[#allocation81_spill] sm:$0xff] %v9570_v25  ;;  %v9611_v25 = vsel %vm708_vm3, %v3769_v7, %v11004_v56  ;;  %v4259_v7 = vrot.slane %v11321_v16, 3 }
 0x360   :  { %11404 = vst [vmem:[#allocation82_spill] sm:$0xff] %v9572_v59  ;;  %6409 = vmatmul.msk.f32.vlgmr.msra.gmra.mxu0 %vm216_vm2, %v9184_v1  ;;  %v9606_v59 = vsel %vm708_vm3, %v3625_v21, %v11003_v20  ;;  %v4114_v21 = vrot.slane %v8531_v23, 3  ;;  %v4258_v20 = vrot.slane %v8534_v34, 3 }
 0x361   :  { %6387 = vmatmul.msk.f32.gmra.mxu2 %vm216_vm2, %v9575_v44  ;;  %6428 = vmatmul.msk.f32.vlgmr.msra.gmra.mxu1 %vm216_vm2, %v9188_v61 }
 0x362   :  { %6406 = vmatmul.msk.f32.gmra.mxu3 %vm216_vm2, %v9578_v62  ;;  %6579 = vmatpush.msk.msra.mxu1 %vm253_vm0, %v6956_v47  ;;  %v4260_v5 = vsel %vm1237_vm4, %v4258_v20, %v4259_v7  ;;  %v4261_v20 = vrot.slane %v11327_v45, 3 }
 0x363   :  { %6560 = vmatpush.msk.msra.mxu0 %vm253_vm0, %v6956_v47  ;;  %v4115_v47 = vrot.slane %v8564_v36, 3 }
 0x364   :  { %v9595_v1 = vpop.f32.mrf.mxu2 }
 0x365   :  { %v9597_v55 = vpop.f32.mrf.mxu3  ;;  %v9599_v61 = vpop.f32.mrf.mxu0 }
 0x366   :  { %11405 = vst [vmem:[#allocation83_spill] sm:$0xff] %v9599_v61  ;;  %v9601_v9 = vpop.f32.mrf.mxu1 }
 0x367   :  { %11406 = vst [vmem:[#allocation84_spill] sm:$0xff] %v9601_v9 }
 0x368   :  { %6410 = vmatmul.msk.f32.gmra.mxu0 %vm216_vm2, %v9212_v15 }
 0x369   :  { %6388 = vmatmul.msk.f32.gmra.mxu2 %vm216_vm2, %v9606_v59  ;;  %6429 = vmatmul.msk.f32.gmra.mxu1 %vm216_vm2, %v9216_v30  ;;  %v4116_v30 = vsel %vm1237_vm4, %v4114_v21, %v4115_v47 }
 0x36a   :  { %6407 = vmatmul.msk.f32.gmra.mxu3 %vm216_vm2, %v9611_v25 }
 0x36c   :  { %v9625_v56 = vpop.f32.mrf.mxu2 }
 0x36d   :  { %v9627_v15 = vpop.f32.mrf.mxu3  ;;  %v9629_v9 = vpop.f32.mrf.mxu0 }
 0x36e   :  { %11407 = vst [vmem:[#allocation85_spill] sm:$0xff] %v9627_v15  ;;  %v9631_v61 = vpop.f32.mrf.mxu1  ;;  %v4117_v15 = vrot.slane %v11326_v18, 3 }
 0x36f   :  { %11408 = vst [vmem:[#allocation86_spill] sm:$0xff] %v9629_v9  ;;  %v4262_v9 = vsel %vm1237_vm4, %v4259_v7, %v4261_v20 }
 0x370   :  { %11409 = vst [vmem:[#allocation87_spill] sm:$0xff] %v9631_v61  ;;  %6411 = vmatmul.msk.f32.gmra.mxu0 %vm216_vm2, %v9240_v2  ;;  %v6957_v61 = vld [vmem:[%s10822_s1 + $0x20] sm:$0xf] }
 0x371   :  { %6430 = vmatmul.msk.f32.gmra.mxu1 %vm216_vm2, %v9244_v40  ;;  %6447 = vmatmul.msk.f32.vlgmr.msrb.gmra.mxu2 %vm216_vm2, %v4116_v30 }
 0x372   :  { %6466 = vmatmul.msk.f32.vlgmr.msrb.gmra.mxu3 %vm216_vm2, %v4260_v5  ;;  %6598 = vmatpush.msk.msrb.mxu2 %vm253_vm0, %v6957_v61  ;;  %v4118_v5 = vsel %vm1237_vm4, %v4115_v47, %v4117_v15 }
 0x373   :  { %6617 = vmatpush.msk.msrb.mxu3 %vm253_vm0, %v6957_v61  ;;  %v4119_v61 = vrot.slane %v11333_v4, 3 }
 0x374   :  { %v9648_v2 = vpop.f32.mrf.mxu2 }
 0x375   :  { %v9650_v21 = vpop.f32.mrf.mxu3  ;;  %v9652_v40 = vpop.f32.mrf.mxu0 }
 0x376   :  { %11410 = vst [vmem:[#allocation88_spill] sm:$0xff] %v9650_v21  ;;  %v9654_v30 = vpop.f32.mrf.mxu1 }
 0x377   :  { %11411 = vst [vmem:[#allocation89_spill] sm:$0xff] %v9652_v40  ;;  %v4263_v40 = vrot.slane %v11334_v43, 3 }
 0x378   :  { %11412 = vst [vmem:[#allocation90_spill] sm:$0xff] %v9654_v30  ;;  %6412 = vmatmul.msk.f32.gmra.mxu0 %vm216_vm2, %v9268_v32  ;;  %v4120_v32 = vsel %vm1237_vm4, %v4117_v15, %v4119_v61 }
 0x379   :  { %6431 = vmatmul.msk.f32.gmra.mxu1 %vm216_vm2, %v9272_v33  ;;  %6448 = vmatmul.msk.f32.gmra.mxu2 %vm216_vm2, %v4118_v5  ;;  %v4264_v33 = vsel %vm1237_vm4, %v4261_v20, %v4263_v40  ;;  %v4265_v5 = vrot.slane %v11339_v42, 3 }
 0x37a   :  { %6467 = vmatmul.msk.f32.gmra.mxu3 %vm216_vm2, %v4262_v9  ;;  %v4121_v9 = vrot.slane %v11338_v31, 3 }
 0x37c   :  { %v9666_v21 = vpop.f32.mrf.mxu2 }
 0x37d   :  { %v9668_v30 = vpop.f32.mrf.mxu3  ;;  %v9670_v47 = vpop.f32.mrf.mxu0 }
 0x37e   :  { %11413 = vst [vmem:[#allocation91_spill] sm:$0xff] %v9670_v47  ;;  %v9672_v7 = vpop.f32.mrf.mxu1 }
 0x37f   :  { %11414 = vst [vmem:[#allocation92_spill] sm:$0xff] %v9672_v7 }
 0x380   :  { %6413 = vmatmul.msk.f32.gmra.mxu0 %vm216_vm2, %v9296_v28  ;;  %v4122_v28 = vsel %vm1237_vm4, %v4119_v61, %v4121_v9 }
 0x381   :  { %6432 = vmatmul.msk.f32.gmra.mxu1 %vm216_vm2, %v9300_v11  ;;  %6449 = vmatmul.msk.f32.gmra.mxu2 %vm216_vm2, %v4120_v32  ;;  %v4266_v11 = vsel %vm1237_vm4, %v4263_v40, %v4265_v5  ;;  %v4123_v32 = vrot.slane %v11344_v0, 3 }
 0x382   :  { %6468 = vmatmul.msk.f32.gmra.mxu3 %vm216_vm2, %v4264_v33  ;;  %v4267_v33 = vrot.slane %v11345_v37, 3 }
 0x384   :  { %v9684_v47 = vpop.f32.mrf.mxu2 }
 0x385   :  { %v9686_v7 = vpop.f32.mrf.mxu3  ;;  %v9688_v15 = vpop.f32.mrf.mxu0 }
 0x386   :  { %11415 = vst [vmem:[#allocation93_spill] sm:$0xff] %v9688_v15  ;;  %v9690_v20 = vpop.f32.mrf.mxu1 }
 0x387   :  { %11416 = vst [vmem:[#allocation94_spill] sm:$0xff] %v9690_v20 }
 0x388   :  { %6414 = vmatmul.msk.f32.gmra.mxu0 %vm216_vm2, %v9324_v3  ;;  %v4124_v3 = vsel %vm1237_vm4, %v4121_v9, %v4123_v32 }
 0x389   :  { %6433 = vmatmul.msk.f32.gmra.mxu1 %vm216_vm2, %v9328_v13  ;;  %6450 = vmatmul.msk.f32.gmra.mxu2 %vm216_vm2, %v4122_v28  ;;  %v4268_v13 = vsel %vm1237_vm4, %v4265_v5, %v4267_v33  ;;  %v4125_v28 = vrot.slane %v11349_v41, 3 }
 0x38a   :  { %6469 = vmatmul.msk.f32.gmra.mxu3 %vm216_vm2, %v4266_v11  ;;  %v4269_v11 = vrot.slane %v11350_v53, 3 }
 0x38c   :  { %v9702_v15 = vpop.f32.mrf.mxu2 }
 0x38d   :  { %11417 = vst [vmem:[#allocation95_spill] sm:$0xff] %v9702_v15  ;;  %v9704_v20 = vpop.f32.mrf.mxu3  ;;  %v9706_v61 = vpop.f32.mrf.mxu0 }
 0x38e   :  { %11418 = vst [vmem:[#allocation96_spill] sm:$0xff] %v9704_v20  ;;  %v9708_v40 = vpop.f32.mrf.mxu1  ;;  %v11425_v20 = vld [vmem:[#allocation21_spill] sm:$0xff] }
 0x38f   :  { %11419 = vst [vmem:[#allocation97_spill] sm:$0xff] %v9706_v61 }
 0x390   :  { %11420 = vst [vmem:[#allocation98_spill] sm:$0xff] %v9708_v40  ;;  %6415 = vmatmul.msk.f32.gmra.mxu0 %vm216_vm2, %v9352_v6  ;;  %v4126_v6 = vsel %vm1237_vm4, %v4123_v32, %v4125_v28 }
 0x391   :  { %6434 = vmatmul.msk.f32.gmra.mxu1 %vm216_vm2, %v9356_v22  ;;  %6451 = vmatmul.msk.f32.gmra.mxu2 %vm216_vm2, %v4124_v3  ;;  %v4270_v22 = vsel %vm1237_vm4, %v4267_v33, %v4269_v11  ;;  %v11426_v3 = vld [vmem:[#allocation39_spill] sm:$0xff] }
 0x392   :  { %6470 = vmatmul.msk.f32.gmra.mxu3 %vm216_vm2, %v4268_v13  ;;  %v11427_v13 = vld [vmem:[#allocation41_spill] sm:$0xff] }
 0x394   :  { %v9720_v61 = vpop.f32.mrf.mxu2 }
 0x395   :  { %11421 = vst [vmem:[#allocation99_spill] sm:$0xff] %v9720_v61  ;;  %v9722_v40 = vpop.f32.mrf.mxu3  ;;  %v9724_v9 = vpop.f32.mrf.mxu0  ;;  %v11428_v61 = vld [vmem:[#allocation42_spill] sm:$0xff] }
 0x396   :  { %11422 = vst [vmem:[#allocation100_spill] sm:$0xff] %v9722_v40  ;;  %v9726_v5 = vpop.f32.mrf.mxu1  ;;  %v4127_v40 = vrot.slane %v11427_v13, 3 }
 0x397   :  { %11423 = vst [vmem:[#allocation101_spill] sm:$0xff] %v9724_v9  ;;  %v4271_v9 = vrot.slane %v11428_v61, 3 }
 0x398   :  { %11424 = vst [vmem:[#allocation102_spill] sm:$0xff] %v9726_v5  ;;  %6416 = vmatmul.msk.f32.gmra.mxu0 %vm216_vm2, %v11425_v20  ;;  %v4128_v20 = vsel %vm1237_vm4, %v4125_v28, %v4127_v40 }
 0x399   :  { %6435 = vmatmul.msk.f32.gmra.mxu1 %vm216_vm2, %v11426_v3  ;;  %6452 = vmatmul.msk.f32.gmra.mxu2 %vm216_vm2, %v4126_v6  ;;  %v4272_v3 = vsel %vm1237_vm4, %v4269_v11, %v4271_v9  ;;  %v11433_v6 = vld [vmem:[#allocation25_spill] sm:$0xff] }
 0x39a   :  { %6471 = vmatmul.msk.f32.gmra.mxu3 %vm216_vm2, %v4270_v22  ;;  %v4129_v22 = vrot.slane %v11433_v6, 3 }
 0x39c   :  { %v9738_v15 = vpop.f32.mrf.mxu2 }
 0x39d   :  { %11429 = vst [vmem:[#allocation21_spill] sm:$0xff] %v9738_v15  ;;  %v9740_v5 = vpop.f32.mrf.mxu3  ;;  %v9742_v32 = vpop.f32.mrf.mxu0 }
 0x39e   :  { %11430 = vst [vmem:[#allocation39_spill] sm:$0xff] %v9740_v5  ;;  %v9744_v33 = vpop.f32.mrf.mxu1  ;;  %v11434_v5 = vld [vmem:[#allocation43_spill] sm:$0xff] }
 0x39f   :  { %11431 = vst [vmem:[#allocation41_spill] sm:$0xff] %v9742_v32  ;;  %v4273_v32 = vrot.slane %v11434_v5, 3 }
 0x3a0   :  { %11432 = vst [vmem:[#allocation42_spill] sm:$0xff] %v9744_v33  ;;  %6417 = vmatmul.msk.f32.gmra.mxu0 %vm216_vm2, %v9408_v35  ;;  %v4130_v35 = vsel %vm1237_vm4, %v4127_v40, %v4129_v22 }
 0x3a1   :  { %6436 = vmatmul.msk.f32.gmra.mxu1 %vm216_vm2, %v9412_v49  ;;  %6453 = vmatmul.msk.f32.gmra.mxu2 %vm216_vm2, %v4128_v20  ;;  %v4274_v49 = vsel %vm1237_vm4, %v4271_v9, %v4273_v32  ;;  %v11439_v20 = vld [vmem:[#allocation26_spill] sm:$0xff] }
 0x3a2   :  { %6472 = vmatmul.msk.f32.gmra.mxu3 %vm216_vm2, %v4272_v3  ;;  %v4131_v3 = vrot.slane %v11439_v20, 3 }
 0x3a4   :  { %v9756_v15 = vpop.f32.mrf.mxu2 }
 0x3a5   :  { %11435 = vst [vmem:[#allocation25_spill] sm:$0xff] %v9756_v15  ;;  %v9758_v33 = vpop.f32.mrf.mxu3  ;;  %v9760_v28 = vpop.f32.mrf.mxu0 }
 0x3a6   :  { %11436 = vst [vmem:[#allocation43_spill] sm:$0xff] %v9758_v33  ;;  %v9762_v11 = vpop.f32.mrf.mxu1  ;;  %v11440_v33 = vld [vmem:[#allocation44_spill] sm:$0xff] }
 0x3a7   :  { %11437 = vst [vmem:[#allocation103_spill] sm:$0xff] %v9760_v28  ;;  %v4275_v28 = vrot.slane %v11440_v33, 3 }
 0x3a8   :  { %11438 = vst [vmem:[#allocation104_spill] sm:$0xff] %v9762_v11  ;;  %6418 = vmatmul.msk.f32.gmra.mxu0 %vm216_vm2, %v9436_v63  ;;  %v4132_v63 = vsel %vm1237_vm4, %v4129_v22, %v4131_v3 }
 0x3a9   :  { %6437 = vmatmul.msk.f32.gmra.mxu1 %vm216_vm2, %v9440_v26  ;;  %6454 = vmatmul.msk.f32.gmra.mxu2 %vm216_vm2, %v4130_v35  ;;  %v4276_v26 = vsel %vm1237_vm4, %v4273_v32, %v4275_v28  ;;  %v11445_v35 = vld [vmem:[#allocation45_spill] sm:$0xff] }
 0x3aa   :  { %6473 = vmatmul.msk.f32.gmra.mxu3 %vm216_vm2, %v4274_v49  ;;  %v4133_v49 = vrot.slane %v11445_v35, 3 }
 0x3ac   :  { %v9774_v15 = vpop.f32.mrf.mxu2 }
 0x3ad   :  { %11441 = vst [vmem:[#allocation26_spill] sm:$0xff] %v9774_v15  ;;  %v9776_v11 = vpop.f32.mrf.mxu3  ;;  %v9778_v40 = vpop.f32.mrf.mxu0 }
 0x3ae   :  { %11442 = vst [vmem:[#allocation44_spill] sm:$0xff] %v9776_v11  ;;  %v9780_v9 = vpop.f32.mrf.mxu1  ;;  %v11446_v11 = vld [vmem:[#allocation7_spill] sm:$0xff] }
 0x3af   :  { %11443 = vst [vmem:[#allocation105_spill] sm:$0xff] %v9778_v40  ;;  %v4277_v40 = vrot.slane %v11446_v11, 3 }
 0x3b0   :  { %11444 = vst [vmem:[#allocation106_spill] sm:$0xff] %v9780_v9  ;;  %6419 = vmatmul.msk.f32.gmra.mxu0 %vm216_vm2, %v9464_v52  ;;  %v4134_v52 = vsel %vm1237_vm4, %v4131_v3, %v4133_v49 }
 0x3b1   :  { %6438 = vmatmul.msk.f32.gmra.mxu1 %vm216_vm2, %v9468_v27  ;;  %6455 = vmatmul.msk.f32.gmra.mxu2 %vm216_vm2, %v4132_v63  ;;  %v4278_v27 = vsel %vm1237_vm4, %v4275_v28, %v4277_v40  ;;  %v11451_v63 = vld [vmem:[#allocation6_spill] sm:$0xff] }
 0x3b2   :  { %6474 = vmatmul.msk.f32.gmra.mxu3 %vm216_vm2, %v4276_v26  ;;  %v4135_v26 = vrot.slane %v11451_v63, 3 }
 0x3b4   :  { %v9792_v15 = vpop.f32.mrf.mxu2 }
 0x3b5   :  { %11447 = vst [vmem:[#allocation45_spill] sm:$0xff] %v9792_v15  ;;  %v9794_v9 = vpop.f32.mrf.mxu3  ;;  %v9796_v22 = vpop.f32.mrf.mxu0 }
 0x3b6   :  { %11448 = vst [vmem:[#allocation7_spill] sm:$0xff] %v9794_v9  ;;  %v9798_v32 = vpop.f32.mrf.mxu1  ;;  %v11452_v9 = vld [vmem:[#allocation47_spill] sm:$0xff] }
 0x3b7   :  { %11449 = vst [vmem:[#allocation107_spill] sm:$0xff] %v9796_v22  ;;  %v4279_v22 = vrot.slane %v11452_v9, 3 }
 0x3b8   :  { %11450 = vst [vmem:[#allocation108_spill] sm:$0xff] %v9798_v32  ;;  %6420 = vmatmul.msk.f32.gmra.mxu0 %vm216_vm2, %v9492_v10  ;;  %v4136_v10 = vsel %vm1237_vm4, %v4133_v49, %v4135_v26 }
 0x3b9   :  { %6439 = vmatmul.msk.f32.gmra.mxu1 %vm216_vm2, %v9496_v8  ;;  %6456 = vmatmul.msk.f32.gmra.mxu2 %vm216_vm2, %v4134_v52  ;;  %v4280_v8 = vsel %vm1237_vm4, %v4277_v40, %v4279_v22  ;;  %v11456_v52 = vld [vmem:[#allocation50_spill] sm:$0xff] }
 0x3ba   :  { %6475 = vmatmul.msk.f32.gmra.mxu3 %vm216_vm2, %v4278_v27  ;;  %v4137_v27 = vrot.slane %v11456_v52, 3 }
 0x3bc   :  { %v9810_v15 = vpop.f32.mrf.mxu2 }
 0x3bd   :  { %v9812_v32 = vpop.f32.mrf.mxu3  ;;  %v9814_v3 = vpop.f32.mrf.mxu0 }
 0x3be   :  { %11453 = vst [vmem:[#allocation6_spill] sm:$0xff] %v9812_v32  ;;  %v9816_v28 = vpop.f32.mrf.mxu1 }
 0x3bf   :  { %11454 = vst [vmem:[#allocation47_spill] sm:$0xff] %v9814_v3  ;;  %v4281_v3 = vrot.slane %v11388_v54, 3 }
 0x3c0   :  { %11455 = vst [vmem:[#allocation109_spill] sm:$0xff] %v9816_v28  ;;  %6421 = vmatmul.msk.f32.gmra.mxu0 %vm216_vm2, %v9527_v48  ;;  %v4138_v48 = vsel %vm1237_vm4, %v4135_v26, %v4137_v27 }
 0x3c1   :  { %6440 = vmatmul.msk.f32.gmra.mxu1 %vm216_vm2, %v9530_v19  ;;  %6457 = vmatmul.msk.f32.gmra.mxu2 %vm216_vm2, %v4136_v10  ;;  %v4282_v19 = vsel %vm1237_vm4, %v4279_v22, %v4281_v3  ;;  %v4139_v10 = vrot.slane %v11392_v58, 3 }
 0x3c2   :  { %6476 = vmatmul.msk.f32.gmra.mxu3 %vm216_vm2, %v4280_v8  ;;  %v4283_v8 = vrot.slane %v11393_v39, 3 }
 0x3c4   :  { %v9828_v32 = vpop.f32.mrf.mxu2 }
 0x3c5   :  { %11457 = vst [vmem:[#allocation50_spill] sm:$0xff] %v9828_v32  ;;  %v9830_v28 = vpop.f32.mrf.mxu3  ;;  %v9832_v49 = vpop.f32.mrf.mxu0 }
 0x3c6   :  { %11458 = vst [vmem:[#allocation110_spill] sm:$0xff] %v9830_v28  ;;  %v9834_v40 = vpop.f32.mrf.mxu1 }
 0x3c7   :  { %11459 = vst [vmem:[#allocation111_spill] sm:$0xff] %v9832_v49 }
 0x3c8   :  { %11460 = vst [vmem:[#allocation112_spill] sm:$0xff] %v9834_v40  ;;  %6422 = vmatmul.msk.f32.gmra.mxu0 %vm216_vm2, %v9551_v50  ;;  %v4140_v50 = vsel %vm1237_vm4, %v4137_v27, %v4139_v10 }
 0x3c9   :  { %6441 = vmatmul.msk.f32.gmra.mxu1 %vm216_vm2, %v9554_v17  ;;  %6458 = vmatmul.msk.f32.gmra.mxu2 %vm216_vm2, %v4138_v48  ;;  %v4284_v17 = vsel %vm1237_vm4, %v4281_v3, %v4283_v8  ;;  %v4141_v48 = vrot.slane %v9006_v24, 3 }
 0x3ca   :  { %6477 = vmatmul.msk.f32.gmra.mxu3 %vm216_vm2, %v4282_v19  ;;  %v4285_v19 = vrot.slane %v9013_v60, 3 }
 0x3cc   :  { %v9846_v49 = vpop.f32.mrf.mxu2 }
 0x3cd   :  { %11461 = vst [vmem:[#allocation113_spill] sm:$0xff] %v9846_v49  ;;  %v9848_v40 = vpop.f32.mrf.mxu3  ;;  %v9850_v26 = vpop.f32.mrf.mxu0 }
 0x3ce   :  { %11462 = vst [vmem:[#allocation114_spill] sm:$0xff] %v9848_v40  ;;  %v9852_v22 = vpop.f32.mrf.mxu1 }
 0x3cf   :  { %11463 = vst [vmem:[#allocation115_spill] sm:$0xff] %v9850_v26 }
 0x3d0   :  { %11464 = vst [vmem:[#allocation116_spill] sm:$0xff] %v9852_v22  ;;  %6423 = vmatmul.msk.f32.gmra.mxu0 %vm216_vm2, %v9575_v44  ;;  %v6958_v44 = vld [vmem:[%s10821_s0 + $0x90] sm:$0xff]  }
 0x3d1   :  { %6442 = vmatmul.msk.f32.gmra.mxu1 %vm216_vm2, %v9578_v62  ;;  %6459 = vmatmul.msk.f32.gmra.mxu2 %vm216_vm2, %v4140_v50  ;;  %v9873_v3 = vunpack.c.h.bf16 %v6958_v44  ;;  %v4142_v50 = vsel %vm1237_vm4, %v4139_v10, %v4141_v48 }
 0x3d2   :  { %6478 = vmatmul.msk.f32.gmra.mxu3 %vm216_vm2, %v4284_v17  ;;  %v6959_v17 = vld [vmem:[%s10821_s0 + $0x138] sm:$0xff]  }
 0x3d3   :  { %11468 = vst [vmem:[#allocation120_spill] sm:$0xff] %v9873_v3  ;;  %v9881_v40 = vunpack.c.h.bf16 %v6959_v17  ;;  %v3918_v44 = vrot.slane %v9873_v3, 2 }
 0x3d4   :  { %v9864_v26 = vpop.f32.mrf.mxu2 }
 0x3d5   :  { %11465 = vst [vmem:[#allocation117_spill] sm:$0xff] %v9864_v26  ;;  %v9866_v22 = vpop.f32.mrf.mxu3  ;;  %v9868_v27 = vpop.f32.mrf.mxu0  ;;  %v3999_v10 = vrot.slane %v9881_v40, 2 }
 0x3d6   :  { %11466 = vst [vmem:[#allocation118_spill] sm:$0xff] %v9866_v22  ;;  %v9875_v62 = vpop.f32.mrf.mxu1  ;;  %v4286_v22 = vsel %vm1237_vm4, %v4283_v8, %v4285_v19  ;;  %v9896_v8 = vld [vmem:[%s10821_s0 + $0x98] sm:$0xff]  }
 0x3d7   :  { %11467 = vst [vmem:[#allocation119_spill] sm:$0xff] %v9868_v27  ;;  %v11475_v27 = vrot.slane %v9079_v46, 2 }
 0x3d8   :  { %11469 = vst [vmem:[#allocation121_spill] sm:$0xff] %v9875_v62  ;;  %6424 = vmatmul.msk.f32.gmra.mxu0 %vm216_vm2, %v9606_v59  ;;  %v4143_v62 = vrot.slane %v9040_v38, 3  ;;  %v4287_v59 = vrot.slane %v9047_v14, 3  ;;  %v9912_v38 = vunpack.c.l.bf16 %v9896_v8  ;;  %v11477_v14 = vrot.slane %v9083_v57, 2 }
 0x3d9   :  { %11470 = vst [vmem:[#allocation122_spill] sm:$0xff] %v9881_v40  ;;  %6443 = vmatmul.msk.f32.gmra.mxu1 %vm216_vm2, %v9611_v25  ;;  %6460 = vmatmul.msk.f32.gmra.mxu2 %vm216_vm2, %v4142_v50  ;;  %v9902_v25 = vld [vmem:[%s10821_s0 + $0x140] sm:$0xff]   ;;  %v3919_v26 = vsel %vm708_vm3, %v11475_v27, %v3918_v44 }
 0x3da   :  { %6479 = vmatmul.msk.f32.gmra.mxu3 %vm216_vm2, %v4286_v22  ;;  %11471 = vst [vmem:[#allocation123_spill] sm:$0xff] %v9896_v8  ;;  %v4000_v60 = vsel %vm708_vm3, %v11477_v14, %v3999_v10  ;;  %v4144_v28 = vsel %vm1237_vm4, %v4141_v48, %v4143_v62  ;;  %v9919_v24 = vunpack.c.l.bf16 %v9902_v25  ;;  %v3920_v27 = vrot.slane %v9912_v38, 2 }
 0x3db   :  { %11472 = vst [vmem:[#allocation124_spill] sm:$0xff] %v9902_v25  ;;  %v4145_v14 = vrot.slane %v9079_v46, 3  ;;  %v4289_v48 = vrot.slane %v9083_v57, 3 }
 0x3dc   :  { %v9904_v50 = vpop.f32.mrf.mxu2  ;;  %11476 = vst [vmem:[#allocation127_spill] sm:$0xff] %v9912_v38  ;;  %v4001_v8 = vrot.slane %v9919_v24, 2 }
 0x3dd   :  { %11473 = vst [vmem:[#allocation125_spill] sm:$0xff] %v9904_v50  ;;  %v9906_v17 = vpop.f32.mrf.mxu3  ;;  %v3943_v22 = vpop.f32.mrf.mxu0  ;;  %v4146_v32 = vsel %vm1237_vm4, %v4143_v62, %v4145_v14  ;;  %v4583_v62 = vrot.slane %v11321_v16, 4  ;;  %v11483_v16 = vld [vmem:[#allocation9_spill] sm:$0xff] }
 0x3de   :  { %11474 = vst [vmem:[#allocation126_spill] sm:$0xff] %v9906_v17  ;;  %v4024_v49 = vpop.f32.mrf.mxu1  ;;  %v4288_v17 = vsel %vm1237_vm4, %v4285_v19, %v4287_v59 }
 0x3df   :  { %11478 = vst [vmem:[#allocation128_spill] sm:$0xff] %v9919_v24 }
 0x3e0   :  { %6425 = vmatmul.msk.f32.gmra.mxu0 %vm216_vm2, %v3919_v26  ;;  %v3921_v26 = vsel %vm708_vm3, %v3918_v44, %v3920_v27  ;;  %v4147_v44 = vrot.slane %v9873_v3, 3 }
 0x3e1   :  { %6444 = vmatmul.msk.f32.gmra.mxu1 %vm216_vm2, %v4000_v60  ;;  %6461 = vmatmul.msk.f32.gmra.mxu2 %vm216_vm2, %v4144_v28  ;;  %v4002_v28 = vsel %vm708_vm3, %v3999_v10, %v4001_v8  ;;  %v4582_v10 = vrot.slane %v8534_v34, 4  ;;  %v4291_v8 = vrot.slane %v9881_v40, 3  ;;  %v3539_v40 = vadd.f32 %v9524_v29, %v11483_v16 }
 0x3e2   :  { %6480 = vmatmul.msk.f32.gmra.mxu3 %vm216_vm2, %v4288_v17  ;;  %v4290_v17 = vsel %vm1237_vm4, %v4287_v59, %v4289_v48  ;;  %v4293_v29 = vrot.slane %v9919_v24, 3 }
 0x3e3   :  { %v4292_v34 = vsel %vm1237_vm4, %v4289_v48, %v4291_v8  ;;  %v4585_v48 = vrot.slane %v11327_v45, 4 }
 0x3e4   :  { %v9930_v25 = vpop.f32.mrf.mxu2 }
 0x3e5   :  { %11479 = vst [vmem:[#allocation129_spill] sm:$0xff] %v9930_v25  ;;  %v9932_v50 = vpop.f32.mrf.mxu3  ;;  %v3946_v19 = vpop.f32.mrf.mxu0  ;;  %v4438_v25 = vrot.slane %v8531_v23, 4 }
 0x3e6   :  { %11480 = vst [vmem:[#allocation130_spill] sm:$0xff] %v9932_v50  ;;  %v4027_v60 = vpop.f32.mrf.mxu1  ;;  %v4439_v50 = vrot.slane %v8564_v36, 4  ;;  %v4148_v36 = vsel %vm1237_vm4, %v4145_v14, %v4147_v44  ;;  %v3898_v14 = vadd.f32 %v9597_v55, %v3539_v40 }
 0x3e8   :  { %6426 = vmatmul.msk.f32.gmra.mxu0 %vm216_vm2, %v3921_v26 }
 0x3e9   :  { %6445 = vmatmul.msk.f32.gmra.mxu1 %vm216_vm2, %v4002_v28  ;;  %6462 = vmatmul.msk.f32.gmra.mxu2 %vm216_vm2, %v4146_v32  ;;  %v4440_v32 = vsel %vm253_vm0, %v4438_v25, %v4439_v50  ;;  %v4584_v28 = vsel %vm253_vm0, %v4582_v10, %v4583_v62  ;;  %v4441_v25 = vrot.slane %v11326_v18, 4  ;;  %v11484_v18 = vld [vmem:[#allocation24_spill] sm:$0xff] }
 0x3ea   :  { %6481 = vmatmul.msk.f32.gmra.mxu3 %vm216_vm2, %v4290_v17  ;;  %v11482_v17 = vld [vmem:[#allocation22_spill] sm:$0xff] }
 0x3eb   :  { %v3432_v3 = vadd.f32 %v9522_v12, %v11482_v17  ;;  %v4149_v12 = vrot.slane %v9912_v38, 3 }
 0x3ec   :  { %v9948_v59 = vpop.f32.mrf.mxu2 }
 0x3ed   :  { %v9950_v27 = vpop.f32.mrf.mxu3  ;;  %v3949_v26 = vpop.f32.mrf.mxu0  ;;  %v4150_v40 = vsel %vm1237_vm4, %v4147_v44, %v4149_v12  ;;  %v11487_v44 = vld [vmem:[#allocation85_spill] sm:$0xff] }
 0x3ee   :  { %11481 = vst [vmem:[#allocation131_spill] sm:$0xff] %v9950_v27  ;;  %v4030_v23 = vpop.f32.mrf.mxu1  ;;  %v3880_v27 = vadd.f32 %v9595_v1, %v3432_v3 }
 0x3f0   :  { %6485 = vmatmul.msk.f32.vlgmr.msrb.gmra.mxu0 %vm216_vm2, %v4440_v32  ;;  %v4078_v10 = vadd.f32 %v3943_v22, %v3880_v27  ;;  %v4096_v32 = vadd.f32 %v4024_v49, %v3898_v14  ;;  %v3435_v22 = vadd.f32 %v9546_v51, %v11484_v18  ;;  %v4294_v27 = vsel %vm1237_vm4, %v4291_v8, %v4293_v29  ;;  %v11485_v49 = vld [vmem:[#allocation60_spill] sm:$0xff]  ;;  %v11486_v14 = vld [vmem:[#allocation78_spill] sm:$0xff] }
 0x3f1   :  { %6463 = vmatmul.msk.f32.gmra.mxu2 %vm216_vm2, %v4148_v36  ;;  %6504 = vmatmul.msk.f32.vlgmr.msrb.gmra.mxu1 %vm216_vm2, %v4584_v28  ;;  %v4442_v28 = vsel %vm253_vm0, %v4439_v50, %v4441_v25  ;;  %v4443_v50 = vrot.slane %v11333_v4, 4  ;;  %v4587_v18 = vrot.slane %v11334_v43, 4 }
 0x3f2   :  { %6482 = vmatmul.msk.f32.gmra.mxu3 %vm216_vm2, %v4292_v34  ;;  %v4586_v34 = vsel %vm253_vm0, %v4583_v62, %v4585_v48 }
 0x3f4   :  { %v4204_v17 = vpop.f32.mrf.mxu2 }
 0x3f5   :  { %v9970_v1 = vadd.f32 %v4204_v17, %v4078_v10  ;;  %v4348_v3 = vpop.f32.mrf.mxu3  ;;  %v3952_v36 = vpop.f32.mrf.mxu0  ;;  %v3542_v10 = vadd.f32 %v11486_v14, %v11485_v49  ;;  %v3881_v17 = vadd.f32 %v9625_v56, %v3435_v22  ;;  %v4444_v56 = vsel %vm253_vm0, %v4441_v25, %v4443_v50  ;;  %v11489_v22 = vld [vmem:[#allocation11_spill] sm:$0xff]  ;;  %v11490_v49 = vld [vmem:[#allocation81_spill] sm:$0xff]  ;;  %v11493_v25 = vld [vmem:[#allocation88_spill] sm:$0xff] }
 0x3f6   :  { %v9973_v16 = vadd.f32 %v4348_v3, %v4096_v32  ;;  %v4033_v55 = vpop.f32.mrf.mxu1  ;;  %v3438_v14 = vadd.f32 %v11490_v49, %v11489_v22 }
 0x3f7   :  { %v3899_v62 = vadd.f32 %v11487_v44, %v3542_v10  ;;  %v4079_v51 = vadd.f32 %v3946_v19, %v3881_v17  ;;  %v11492_v10 = vld [vmem:[#allocation82_spill] sm:$0xff] }
 0x3f8   :  { %6486 = vmatmul.msk.f32.gmra.mxu0 %vm216_vm2, %v4442_v28  ;;  %v3882_v19 = vadd.f32 %v9648_v2, %v3438_v14 }
 0x3f9   :  { %6464 = vmatmul.msk.f32.gmra.mxu2 %vm216_vm2, %v4150_v40  ;;  %6505 = vmatmul.msk.f32.gmra.mxu1 %vm216_vm2, %v4586_v34  ;;  %v4097_v8 = vadd.f32 %v4027_v60, %v3899_v62  ;;  %v4588_v34 = vsel %vm253_vm0, %v4585_v48, %v4587_v18  ;;  %v4445_v60 = vrot.slane %v11338_v31, 4  ;;  %v4589_v48 = vrot.slane %v11339_v42, 4 }
 0x3fa   :  { %6483 = vmatmul.msk.f32.gmra.mxu3 %vm216_vm2, %v4294_v27  ;;  %v11491_v27 = vld [vmem:[#allocation29_spill] sm:$0xff]  ;;  %v4080_v62 = vadd.f32 %v3949_v26, %v3882_v19 }
 0x3fb   :  { %v3545_v44 = vadd.f32 %v11492_v10, %v11491_v27  ;;  %v4446_v2 = vsel %vm253_vm0, %v4443_v50, %v4445_v60  ;;  %v4590_v14 = vsel %vm253_vm0, %v4587_v18, %v4589_v48  ;;  %v11494_v27 = vld [vmem:[#allocation30_spill] sm:$0xff]  ;;  %v11495_v10 = vld [vmem:[#allocation83_spill] sm:$0xff]  ;;  %v4591_v18 = vrot.slane %v11345_v37, 4 }
 0x3fc   :  { %v4207_v12 = vpop.f32.mrf.mxu2 }
 0x3fd   :  { %v9990_v29 = vadd.f32 %v4207_v12, %v4079_v51  ;;  %v4351_v32 = vpop.f32.mrf.mxu3  ;;  %v3955_v3 = vpop.f32.mrf.mxu0  ;;  %v3900_v17 = vadd.f32 %v11493_v25, %v3545_v44  ;;  %v3441_v44 = vadd.f32 %v11495_v10, %v11494_v27  ;;  %v11497_v25 = vld [vmem:[#allocation84_spill] sm:$0xff]  ;;  %v4592_v10 = vsel %vm253_vm0, %v4589_v48, %v4591_v18 }
 0x3fe   :  { %v9993_v28 = vadd.f32 %v4351_v32, %v4097_v8  ;;  %v4036_v40 = vpop.f32.mrf.mxu1  ;;  %v4593_v48 = vrot.slane %v11350_v53, 4 }
 0x3ff   :  { %v4098_v51 = vadd.f32 %v4030_v23, %v3900_v17  ;;  %v3883_v26 = vadd.f32 %v9666_v21, %v3441_v44  ;;  %v4447_v23 = vrot.slane %v11344_v0, 4  ;;  %v11498_v44 = vld [vmem:[#allocation31_spill] sm:$0xff] }
 0x400   :  { %11488 = vst [vmem:[#allocation22_spill] sm:$0xff] %v9993_v28  ;;  %6487 = vmatmul.msk.f32.gmra.mxu0 %vm216_vm2, %v4444_v56 }
 0x401   :  { %6506 = vmatmul.msk.f32.gmra.mxu1 %vm216_vm2, %v4588_v34  ;;  %6523 = vmatmul.msk.f32.vlgmr.msra.gmra.mxu2 %vm216_vm2, %v4444_v56  ;;  %v4081_v19 = vadd.f32 %v3952_v36, %v3883_v26  ;;  %v4448_v21 = vsel %vm253_vm0, %v4445_v60, %v4447_v23 }
 0x402   :  { %6542 = vmatmul.msk.f32.vlgmr.msra.gmra.mxu3 %vm216_vm2, %v4588_v34  ;;  %v11496_v34 = vld [vmem:[#allocation8_spill] sm:$0xff] }
 0x403   :  { %v3548_v28 = vadd.f32 %v11497_v25, %v11496_v34  ;;  %v11501_v34 = vld [vmem:[#allocation87_spill] sm:$0xff] }
 0x404   :  { %v4210_v8 = vpop.f32.mrf.mxu2 }
 0x405   :  { %v10008_v12 = vadd.f32 %v4210_v8, %v4080_v62  ;;  %v4354_v32 = vpop.f32.mrf.mxu3  ;;  %v3958_v22 = vpop.f32.mrf.mxu0  ;;  %v3901_v50 = vadd.f32 %v9668_v30, %v3548_v28  ;;  %v11499_v30 = vld [vmem:[#allocation86_spill] sm:$0xff] }
 0x406   :  { %v10011_v49 = vadd.f32 %v4354_v32, %v4098_v51  ;;  %v4039_v56 = vpop.f32.mrf.mxu1  ;;  %v3444_v28 = vadd.f32 %v11499_v30, %v11498_v44  ;;  %v4594_v30 = vsel %vm253_vm0, %v4591_v18, %v4593_v48  ;;  %v4595_v18 = vrot.slane %v11428_v61, 4 }
 0x407   :  { %v4099_v17 = vadd.f32 %v4033_v55, %v3901_v50  ;;  %v4449_v55 = vrot.slane %v11349_v41, 4 }
 0x408   :  { %6488 = vmatmul.msk.f32.gmra.mxu0 %vm216_vm2, %v4446_v2  ;;  %v3884_v36 = vadd.f32 %v9684_v47, %v3444_v28  ;;  %v11504_v28 = vld [vmem:[#allocation14_spill] sm:$0xff] }
 0x409   :  { %6507 = vmatmul.msk.f32.gmra.mxu1 %vm216_vm2, %v4590_v14  ;;  %6524 = vmatmul.msk.f32.gmra.mxu2 %vm216_vm2, %v4446_v2  ;;  %v4450_v47 = vsel %vm253_vm0, %v4447_v23, %v4449_v55  ;;  %v4451_v23 = vrot.slane %v11427_v13, 4 }
 0x40a   :  { %6543 = vmatmul.msk.f32.gmra.mxu3 %vm216_vm2, %v4590_v14  ;;  %v11500_v14 = vld [vmem:[#allocation53_spill] sm:$0xff]  ;;  %v4082_v26 = vadd.f32 %v3955_v3, %v3884_v36  ;;  %v11508_v3 = vld [vmem:[#allocation95_spill] sm:$0xff]  ;;  %v11509_v36 = vld [vmem:[#allocation96_spill] sm:$0xff] }
 0x40b   :  { %v3551_v25 = vadd.f32 %v11501_v34, %v11500_v14  ;;  %v11507_v34 = vld [vmem:[#allocation90_spill] sm:$0xff] }
 0x40c   :  { %v4213_v62 = vpop.f32.mrf.mxu2 }
 0x40d   :  { %v10026_v51 = vadd.f32 %v4213_v62, %v4081_v19  ;;  %v4357_v8 = vpop.f32.mrf.mxu3  ;;  %v3961_v32 = vpop.f32.mrf.mxu0  ;;  %v3902_v60 = vadd.f32 %v9686_v7, %v3551_v25  ;;  %v11505_v7 = vld [vmem:[#allocation89_spill] sm:$0xff] }
 0x40e   :  { %v10029_v27 = vadd.f32 %v4357_v8, %v4099_v17  ;;  %v4042_v2 = vpop.f32.mrf.mxu1  ;;  %v3447_v14 = vadd.f32 %v11505_v7, %v11504_v28 }
 0x40f   :  { %v4100_v50 = vadd.f32 %v4036_v40, %v3902_v60 }
 0x410   :  { %6489 = vmatmul.msk.f32.gmra.mxu0 %vm216_vm2, %v4448_v21  ;;  %v3885_v40 = vadd.f32 %v11508_v3, %v3447_v14  ;;  %v4452_v14 = vsel %vm253_vm0, %v4449_v55, %v4451_v23  ;;  %v11512_v3 = vld [vmem:[#allocation33_spill] sm:$0xff]  ;;  %v4453_v55 = vrot.slane %v11433_v6, 4 }
 0x411   :  { %6508 = vmatmul.msk.f32.gmra.mxu1 %vm216_vm2, %v4592_v10  ;;  %6525 = vmatmul.msk.f32.gmra.mxu2 %vm216_vm2, %v4448_v21 }
 0x412   :  { %6544 = vmatmul.msk.f32.gmra.mxu3 %vm216_vm2, %v4592_v10  ;;  %v11506_v10 = vld [vmem:[#allocation32_spill] sm:$0xff] }
 0x413   :  { %v3554_v25 = vadd.f32 %v11507_v34, %v11506_v10  ;;  %v4596_v34 = vsel %vm253_vm0, %v4593_v48, %v4595_v18  ;;  %v4597_v48 = vrot.slane %v11434_v5, 4 }
 0x414   :  { %v4216_v19 = vpop.f32.mrf.mxu2 }
 0x415   :  { %v10044_v17 = vadd.f32 %v4216_v19, %v4082_v26  ;;  %v4360_v62 = vpop.f32.mrf.mxu3  ;;  %v3964_v8 = vpop.f32.mrf.mxu0  ;;  %v3903_v60 = vadd.f32 %v11509_v36, %v3554_v25  ;;  %v4083_v26 = vadd.f32 %v3958_v22, %v3885_v40  ;;  %v11513_v25 = vld [vmem:[#allocation91_spill] sm:$0xff]  ;;  %v11517_v40 = vld [vmem:[#allocation100_spill] sm:$0xff] }
 0x416   :  { %v10047_v44 = vadd.f32 %v4360_v62, %v4100_v50  ;;  %v4045_v21 = vpop.f32.mrf.mxu1  ;;  %v3450_v36 = vadd.f32 %v11513_v25, %v11512_v3  ;;  %v11516_v22 = vld [vmem:[#allocation99_spill] sm:$0xff]  ;;  %v4454_v25 = vsel %vm253_vm0, %v4451_v23, %v4453_v55  ;;  %v4455_v23 = vrot.slane %v11439_v20, 4 }
 0x417   :  { %11502 = vst [vmem:[#allocation9_spill] sm:$0xff] %v10044_v17  ;;  %v4101_v50 = vadd.f32 %v4039_v56, %v3903_v60 }
 0x418   :  { %11503 = vst [vmem:[#allocation24_spill] sm:$0xff] %v10047_v44  ;;  %6490 = vmatmul.msk.f32.gmra.mxu0 %vm216_vm2, %v4450_v47  ;;  %v11515_v44 = vld [vmem:[#allocation92_spill] sm:$0xff]  ;;  %v3886_v56 = vadd.f32 %v11516_v22, %v3450_v36  ;;  %v11520_v22 = vld [vmem:[#allocation62_spill] sm:$0xff] }
 0x419   :  { %6509 = vmatmul.msk.f32.gmra.mxu1 %vm216_vm2, %v4594_v30  ;;  %6526 = vmatmul.msk.f32.gmra.mxu2 %vm216_vm2, %v4450_v47 }
 0x41a   :  { %6545 = vmatmul.msk.f32.gmra.mxu3 %vm216_vm2, %v4594_v30  ;;  %v11514_v30 = vld [vmem:[#allocation34_spill] sm:$0xff] }
 0x41b   :  { %v3557_v17 = vadd.f32 %v11515_v44, %v11514_v30  ;;  %v4598_v30 = vsel %vm253_vm0, %v4595_v18, %v4597_v48  ;;  %v4599_v18 = vrot.slane %v11440_v33, 4 }
 0x41c   :  { %v4219_v19 = vpop.f32.mrf.mxu2 }
 0x41d   :  { %v10062_v62 = vadd.f32 %v4219_v19, %v4083_v26  ;;  %v4363_v28 = vpop.f32.mrf.mxu3  ;;  %v3967_v7 = vpop.f32.mrf.mxu0  ;;  %v3904_v60 = vadd.f32 %v11517_v40, %v3557_v17  ;;  %v4084_v26 = vadd.f32 %v3961_v32, %v3886_v56  ;;  %v11521_v17 = vld [vmem:[#allocation93_spill] sm:$0xff]  ;;  %v11525_v56 = vld [vmem:[#allocation39_spill] sm:$0xff] }
 0x41e   :  { %v10065_v10 = vadd.f32 %v4363_v28, %v4101_v50  ;;  %v4048_v47 = vpop.f32.mrf.mxu1  ;;  %v3453_v40 = vadd.f32 %v11521_v17, %v11520_v22  ;;  %v11524_v32 = vld [vmem:[#allocation21_spill] sm:$0xff]  ;;  %v4456_v17 = vsel %vm253_vm0, %v4453_v55, %v4455_v23  ;;  %v4457_v55 = vrot.slane %v11445_v35, 4 }
 0x41f   :  { %11510 = vst [vmem:[#allocation60_spill] sm:$0xff] %v10062_v62  ;;  %v4102_v50 = vadd.f32 %v4042_v2, %v3904_v60 }
 0x420   :  { %11511 = vst [vmem:[#allocation78_spill] sm:$0xff] %v10065_v10  ;;  %6491 = vmatmul.msk.f32.gmra.mxu0 %vm216_vm2, %v4452_v14  ;;  %v11523_v10 = vld [vmem:[#allocation94_spill] sm:$0xff]  ;;  %v3887_v2 = vadd.f32 %v11524_v32, %v3453_v40  ;;  %v11528_v32 = vld [vmem:[#allocation63_spill] sm:$0xff] }
 0x421   :  { %6510 = vmatmul.msk.f32.gmra.mxu1 %vm216_vm2, %v4596_v34  ;;  %6527 = vmatmul.msk.f32.gmra.mxu2 %vm216_vm2, %v4452_v14 }
 0x422   :  { %6546 = vmatmul.msk.f32.gmra.mxu3 %vm216_vm2, %v4596_v34  ;;  %v11522_v34 = vld [vmem:[#allocation35_spill] sm:$0xff] }
 0x423   :  { %v3560_v62 = vadd.f32 %v11523_v10, %v11522_v34  ;;  %v4600_v34 = vsel %vm253_vm0, %v4597_v48, %v4599_v18  ;;  %v4601_v48 = vrot.slane %v11446_v11, 4 }
 0x424   :  { %v4222_v19 = vpop.f32.mrf.mxu2 }
 0x425   :  { %v10080_v44 = vadd.f32 %v4222_v19, %v4084_v26  ;;  %v4366_v28 = vpop.f32.mrf.mxu3  ;;  %v3970_v3 = vpop.f32.mrf.mxu0  ;;  %v3905_v60 = vadd.f32 %v11525_v56, %v3560_v62  ;;  %v4085_v26 = vadd.f32 %v3964_v8, %v3887_v2  ;;  %v11529_v62 = vld [vmem:[#allocation97_spill] sm:$0xff]  ;;  %v11533_v2 = vld [vmem:[#allocation43_spill] sm:$0xff] }
 0x426   :  { %v10083_v36 = vadd.f32 %v4366_v28, %v4102_v50  ;;  %v4051_v14 = vpop.f32.mrf.mxu1  ;;  %v3456_v56 = vadd.f32 %v11529_v62, %v11528_v32  ;;  %v11532_v8 = vld [vmem:[#allocation25_spill] sm:$0xff]  ;;  %v4458_v62 = vsel %vm253_vm0, %v4455_v23, %v4457_v55  ;;  %v4459_v23 = vrot.slane %v11451_v63, 4 }
 0x427   :  { %11518 = vst [vmem:[#allocation85_spill] sm:$0xff] %v10080_v44  ;;  %v4103_v50 = vadd.f32 %v4045_v21, %v3905_v60 }
 0x428   :  { %11519 = vst [vmem:[#allocation11_spill] sm:$0xff] %v10083_v36  ;;  %6492 = vmatmul.msk.f32.gmra.mxu0 %vm216_vm2, %v4454_v25  ;;  %v11531_v36 = vld [vmem:[#allocation98_spill] sm:$0xff]  ;;  %v3888_v21 = vadd.f32 %v11532_v8, %v3456_v56  ;;  %v11536_v8 = vld [vmem:[#allocation64_spill] sm:$0xff] }
 0x429   :  { %6511 = vmatmul.msk.f32.gmra.mxu1 %vm216_vm2, %v4598_v30  ;;  %6528 = vmatmul.msk.f32.gmra.mxu2 %vm216_vm2, %v4454_v25 }
 0x42a   :  { %6547 = vmatmul.msk.f32.gmra.mxu3 %vm216_vm2, %v4598_v30  ;;  %v11530_v30 = vld [vmem:[#allocation40_spill] sm:$0xff] }
 0x42b   :  { %v3563_v44 = vadd.f32 %v11531_v36, %v11530_v30  ;;  %v4602_v30 = vsel %vm253_vm0, %v4599_v18, %v4601_v48  ;;  %v4603_v18 = vrot.slane %v11452_v9, 4 }
 0x42c   :  { %v4225_v19 = vpop.f32.mrf.mxu2 }
 0x42d   :  { %v10098_v10 = vadd.f32 %v4225_v19, %v4085_v26  ;;  %v4369_v28 = vpop.f32.mrf.mxu3  ;;  %v3973_v22 = vpop.f32.mrf.mxu0  ;;  %v3906_v60 = vadd.f32 %v11533_v2, %v3563_v44  ;;  %v4086_v26 = vadd.f32 %v3967_v7, %v3888_v21  ;;  %v11537_v44 = vld [vmem:[#allocation101_spill] sm:$0xff]  ;;  %v11540_v7 = vld [vmem:[#allocation26_spill] sm:$0xff]  ;;  %v11541_v21 = vld [vmem:[#allocation44_spill] sm:$0xff] }
 0x42e   :  { %v10101_v40 = vadd.f32 %v4369_v28, %v4103_v50  ;;  %v4054_v25 = vpop.f32.mrf.mxu1  ;;  %v3459_v2 = vadd.f32 %v11537_v44, %v11536_v8  ;;  %v4460_v44 = vsel %vm253_vm0, %v4457_v55, %v4459_v23  ;;  %v4461_v55 = vrot.slane %v11456_v52, 4 }
 0x42f   :  { %11526 = vst [vmem:[#allocation81_spill] sm:$0xff] %v10098_v10  ;;  %v4104_v50 = vadd.f32 %v4048_v47, %v3906_v60 }
 0x430   :  { %11527 = vst [vmem:[#allocation29_spill] sm:$0xff] %v10101_v40  ;;  %6493 = vmatmul.msk.f32.gmra.mxu0 %vm216_vm2, %v4456_v17  ;;  %v11539_v40 = vld [vmem:[#allocation102_spill] sm:$0xff]  ;;  %v3889_v47 = vadd.f32 %v11540_v7, %v3459_v2  ;;  %v11544_v7 = vld [vmem:[#allocation65_spill] sm:$0xff] }
 0x431   :  { %6512 = vmatmul.msk.f32.gmra.mxu1 %vm216_vm2, %v4600_v34  ;;  %6529 = vmatmul.msk.f32.gmra.mxu2 %vm216_vm2, %v4456_v17 }
 0x432   :  { %6548 = vmatmul.msk.f32.gmra.mxu3 %vm216_vm2, %v4600_v34  ;;  %v11538_v34 = vld [vmem:[#allocation37_spill] sm:$0xff] }
 0x433   :  { %v3566_v10 = vadd.f32 %v11539_v40, %v11538_v34  ;;  %v4604_v34 = vsel %vm253_vm0, %v4601_v48, %v4603_v18  ;;  %v4605_v48 = vrot.slane %v11388_v54, 4 }
 0x434   :  { %v4228_v19 = vpop.f32.mrf.mxu2 }
 0x435   :  { %v10116_v36 = vadd.f32 %v4228_v19, %v4086_v26  ;;  %v4372_v28 = vpop.f32.mrf.mxu3  ;;  %v3976_v32 = vpop.f32.mrf.mxu0  ;;  %v3907_v60 = vadd.f32 %v11541_v21, %v3566_v10  ;;  %v4087_v26 = vadd.f32 %v3970_v3, %v3889_v47  ;;  %v11545_v10 = vld [vmem:[#allocation41_spill] sm:$0xff]  ;;  %v11549_v47 = vld [vmem:[#allocation7_spill] sm:$0xff] }
 0x436   :  { %v10119_v56 = vadd.f32 %v4372_v28, %v4104_v50  ;;  %v4057_v17 = vpop.f32.mrf.mxu1  ;;  %v3462_v21 = vadd.f32 %v11545_v10, %v11544_v7  ;;  %v11548_v3 = vld [vmem:[#allocation45_spill] sm:$0xff]  ;;  %v4462_v10 = vsel %vm253_vm0, %v4459_v23, %v4461_v55  ;;  %v11556_v23 = vld [vmem:[#allocation6_spill] sm:$0xff] }
 0x437   :  { %11534 = vst [vmem:[#allocation82_spill] sm:$0xff] %v10116_v36  ;;  %v4105_v50 = vadd.f32 %v4051_v14, %v3907_v60 }
 0x438   :  { %11535 = vst [vmem:[#allocation88_spill] sm:$0xff] %v10119_v56  ;;  %6494 = vmatmul.msk.f32.gmra.mxu0 %vm216_vm2, %v4458_v62  ;;  %v11547_v56 = vld [vmem:[#allocation42_spill] sm:$0xff]  ;;  %v3890_v14 = vadd.f32 %v11548_v3, %v3462_v21  ;;  %v11552_v3 = vld [vmem:[#allocation23_spill] sm:$0xff] }
 0x439   :  { %6513 = vmatmul.msk.f32.gmra.mxu1 %vm216_vm2, %v4602_v30  ;;  %6530 = vmatmul.msk.f32.gmra.mxu2 %vm216_vm2, %v4458_v62 }
 0x43a   :  { %6549 = vmatmul.msk.f32.gmra.mxu3 %vm216_vm2, %v4602_v30  ;;  %v11546_v30 = vld [vmem:[#allocation69_spill] sm:$0xff] }
 0x43b   :  { %v3569_v36 = vadd.f32 %v11547_v56, %v11546_v30  ;;  %v4606_v30 = vsel %vm253_vm0, %v4603_v18, %v4605_v48  ;;  %v4607_v18 = vrot.slane %v11393_v39, 4 }
 0x43c   :  { %v4231_v19 = vpop.f32.mrf.mxu2 }
 0x43d   :  { %v10134_v40 = vadd.f32 %v4231_v19, %v4087_v26  ;;  %v4375_v28 = vpop.f32.mrf.mxu3  ;;  %v3979_v8 = vpop.f32.mrf.mxu0  ;;  %v3908_v60 = vadd.f32 %v11549_v47, %v3569_v36  ;;  %v4088_v26 = vadd.f32 %v3973_v22, %v3890_v14  ;;  %v11553_v36 = vld [vmem:[#allocation103_spill] sm:$0xff] }
 0x43e   :  { %v10137_v2 = vadd.f32 %v4375_v28, %v4105_v50  ;;  %v4060_v62 = vpop.f32.mrf.mxu1  ;;  %v3465_v47 = vadd.f32 %v11553_v36, %v11552_v3  ;;  %v4608_v36 = vsel %vm253_vm0, %v4605_v48, %v4607_v18  ;;  %v11566_v48 = vld [vmem:[#allocation55_spill] sm:$0xff] }
 0x43f   :  { %11542 = vst [vmem:[#allocation30_spill] sm:$0xff] %v10134_v40  ;;  %v4106_v50 = vadd.f32 %v4054_v25, %v3908_v60  ;;  %v4463_v25 = vrot.slane %v11392_v58, 4 }
 0x440   :  { %11543 = vst [vmem:[#allocation83_spill] sm:$0xff] %v10137_v2  ;;  %6495 = vmatmul.msk.f32.gmra.mxu0 %vm216_vm2, %v4460_v44  ;;  %v11555_v2 = vld [vmem:[#allocation104_spill] sm:$0xff]  ;;  %v3891_v22 = vadd.f32 %v9810_v15, %v3465_v47 }
 0x441   :  { %6514 = vmatmul.msk.f32.gmra.mxu1 %vm216_vm2, %v4604_v34  ;;  %6531 = vmatmul.msk.f32.gmra.mxu2 %vm216_vm2, %v4460_v44  ;;  %v4464_v15 = vsel %vm253_vm0, %v4461_v55, %v4463_v25  ;;  %v11559_v47 = vld [vmem:[#allocation48_spill] sm:$0xff]  ;;  %v11564_v55 = vld [vmem:[#allocation18_spill] sm:$0xff] }
 0x442   :  { %6550 = vmatmul.msk.f32.gmra.mxu3 %vm216_vm2, %v4604_v34  ;;  %v11554_v34 = vld [vmem:[#allocation5_spill] sm:$0xff]  ;;  %v4089_v60 = vadd.f32 %v3976_v32, %v3891_v22  ;;  %v11563_v32 = vld [vmem:[#allocation50_spill] sm:$0xff]  ;;  %v4465_v22 = vrot.slane %v11564_v55, 4  ;;  %v11578_v55 = vld [vmem:[#allocation51_spill] sm:$0xff] }
 0x443   :  { %v3572_v40 = vadd.f32 %v11555_v2, %v11554_v34 }
 0x444   :  { %v4234_v19 = vpop.f32.mrf.mxu2 }
 0x445   :  { %v10152_v56 = vadd.f32 %v4234_v19, %v4088_v26  ;;  %v4378_v28 = vpop.f32.mrf.mxu3  ;;  %v3982_v7 = vpop.f32.mrf.mxu0  ;;  %v3909_v14 = vadd.f32 %v11556_v23, %v3572_v40  ;;  %v11560_v40 = vld [vmem:[#allocation105_spill] sm:$0xff]  ;;  %v11562_v23 = vld [vmem:[#allocation106_spill] sm:$0xff] }
 0x446   :  { %v10155_v21 = vadd.f32 %v4378_v28, %v4106_v50  ;;  %v4063_v44 = vpop.f32.mrf.mxu1  ;;  %v3468_v34 = vadd.f32 %v11560_v40, %v11559_v47 }
 0x447   :  { %11550 = vst [vmem:[#allocation8_spill] sm:$0xff] %v10152_v56  ;;  %v4107_v26 = vadd.f32 %v4057_v17, %v3909_v14  ;;  %v11565_v14 = vld [vmem:[#allocation110_spill] sm:$0xff]  ;;  %v11571_v56 = vld [vmem:[#allocation108_spill] sm:$0xff] }
 0x448   :  { %11551 = vst [vmem:[#allocation84_spill] sm:$0xff] %v10155_v21  ;;  %6496 = vmatmul.msk.f32.gmra.mxu0 %vm216_vm2, %v4462_v10  ;;  %v3892_v17 = vadd.f32 %v11563_v32, %v3468_v34  ;;  %v4466_v34 = vsel %vm253_vm0, %v4463_v25, %v4465_v22  ;;  %v11573_v25 = vld [vmem:[#allocation19_spill] sm:$0xff] }
 0x449   :  { %6515 = vmatmul.msk.f32.gmra.mxu1 %vm216_vm2, %v4606_v30  ;;  %6532 = vmatmul.msk.f32.gmra.mxu2 %vm216_vm2, %v4462_v10 }
 0x44a   :  { %6551 = vmatmul.msk.f32.gmra.mxu3 %vm216_vm2, %v4606_v30  ;;  %v11561_v30 = vld [vmem:[#allocation49_spill] sm:$0xff] }
 0x44b   :  { %v3575_v21 = vadd.f32 %v11562_v23, %v11561_v30 }
 0x44c   :  { %v4237_v50 = vpop.f32.mrf.mxu2 }
 0x44d   :  { %v10170_v2 = vadd.f32 %v4237_v50, %v4089_v60  ;;  %v4381_v19 = vpop.f32.mrf.mxu3  ;;  %v3985_v28 = vpop.f32.mrf.mxu0  ;;  %v3910_v60 = vadd.f32 %v11565_v14, %v3575_v21  ;;  %v4090_v50 = vadd.f32 %v3979_v8, %v3892_v17  ;;  %v11569_v21 = vld [vmem:[#allocation107_spill] sm:$0xff]  ;;  %v11572_v8 = vld [vmem:[#allocation113_spill] sm:$0xff]  ;;  %v4467_v17 = vrot.slane %v11573_v25, 4 }
 0x44e   :  { %v10173_v3 = vadd.f32 %v4381_v19, %v4107_v26  ;;  %v4066_v10 = vpop.f32.mrf.mxu1  ;;  %v4609_v26 = vrot.slane %v11566_v48, 4 }
 0x44f   :  { %11557 = vst [vmem:[#allocation31_spill] sm:$0xff] %v10170_v2  ;;  %v4108_v19 = vadd.f32 %v4060_v62, %v3910_v60  ;;  %v11568_v2 = vld [vmem:[#allocation16_spill] sm:$0xff]  ;;  %v11574_v60 = vld [vmem:[#allocation114_spill] sm:$0xff] }
 0x450   :  { %11558 = vst [vmem:[#allocation86_spill] sm:$0xff] %v10173_v3  ;;  %6497 = vmatmul.msk.f32.gmra.mxu0 %vm216_vm2, %v4464_v15  ;;  %v4610_v3 = vsel %vm253_vm0, %v4607_v18, %v4609_v26  ;;  %v3471_v14 = vadd.f32 %v11569_v21, %v11568_v2  ;;  %v11575_v18 = vld [vmem:[#allocation56_spill] sm:$0xff] }
 0x451   :  { %6516 = vmatmul.msk.f32.gmra.mxu1 %vm216_vm2, %v4608_v36  ;;  %6533 = vmatmul.msk.f32.gmra.mxu2 %vm216_vm2, %v4464_v15 }
 0x452   :  { %6552 = vmatmul.msk.f32.gmra.mxu3 %vm216_vm2, %v4608_v36  ;;  %v11570_v36 = vld [vmem:[#allocation70_spill] sm:$0xff]  ;;  %v3893_v62 = vadd.f32 %v11572_v8, %v3471_v14  ;;  %v4468_v14 = vsel %vm253_vm0, %v4465_v22, %v4467_v17  ;;  %v4469_v22 = vrot.slane %v9079_v46, 4 }
 0x453   :  { %v3578_v48 = vadd.f32 %v11571_v56, %v11570_v36 }
 0x454   :  { %v4240_v47 = vpop.f32.mrf.mxu2  ;;  %v4091_v2 = vadd.f32 %v3982_v7, %v3893_v62  ;;  %v11582_v7 = vld [vmem:[#allocation117_spill] sm:$0xff]  ;;  %v11583_v62 = vld [vmem:[#allocation118_spill] sm:$0xff] }
 0x455   :  { %v10188_v40 = vadd.f32 %v4240_v47, %v4090_v50  ;;  %v4384_v30 = vpop.f32.mrf.mxu3  ;;  %v3988_v23 = vpop.f32.mrf.mxu0  ;;  %v3911_v50 = vadd.f32 %v11574_v60, %v3578_v48  ;;  %v11579_v48 = vld [vmem:[#allocation47_spill] sm:$0xff] }
 0x456   :  { %v10191_v32 = vadd.f32 %v4384_v30, %v4108_v19  ;;  %v4069_v15 = vpop.f32.mrf.mxu1  ;;  %v4611_v19 = vrot.slane %v11575_v18, 4  ;;  %v3474_v60 = vadd.f32 %v11579_v48, %v11578_v55  ;;  %v4470_v48 = vsel %vm253_vm0, %v4467_v17, %v4469_v22  ;;  %v11589_v17 = vld [vmem:[#allocation120_spill] sm:$0xff] }
 0x457   :  { %v4109_v47 = vadd.f32 %v4063_v44, %v3911_v50 }
 0x458   :  { %11567 = vst [vmem:[#allocation53_spill] sm:$0xff] %v10191_v32  ;;  %6498 = vmatmul.msk.f32.gmra.mxu0 %vm216_vm2, %v4466_v34  ;;  %v4612_v25 = vsel %vm253_vm0, %v4609_v26, %v4611_v19  ;;  %v11581_v32 = vld [vmem:[#allocation109_spill] sm:$0xff]  ;;  %v3894_v44 = vadd.f32 %v11582_v7, %v3474_v60  ;;  %v4613_v26 = vrot.slane %v9083_v57, 4  ;;  %v11584_v7 = vld [vmem:[#allocation27_spill] sm:$0xff] }
 0x459   :  { %6517 = vmatmul.msk.f32.gmra.mxu1 %vm216_vm2, %v4610_v3  ;;  %6534 = vmatmul.msk.f32.gmra.mxu2 %vm216_vm2, %v4466_v34 }
 0x45a   :  { %6553 = vmatmul.msk.f32.gmra.mxu3 %vm216_vm2, %v4610_v3  ;;  %v11580_v3 = vld [vmem:[#allocation72_spill] sm:$0xff]  ;;  %v4092_v55 = vadd.f32 %v3985_v28, %v3894_v44  ;;  %v11588_v28 = vld [vmem:[#allocation125_spill] sm:$0xff]  ;;  %v4471_v44 = vrot.slane %v11589_v17, 4 }
 0x45b   :  { %v3581_v18 = vadd.f32 %v11581_v32, %v11580_v3  ;;  %v4614_v3 = vsel %vm253_vm0, %v4611_v19, %v4613_v26  ;;  %v11591_v19 = vld [vmem:[#allocation122_spill] sm:$0xff] }
 0x45c   :  { %v4243_v30 = vpop.f32.mrf.mxu2 }
 0x45d   :  { %v10206_v56 = vadd.f32 %v4243_v30, %v4091_v2  ;;  %v4387_v21 = vpop.f32.mrf.mxu3  ;;  %v3991_v36 = vpop.f32.mrf.mxu0  ;;  %v3912_v50 = vadd.f32 %v11583_v62, %v3581_v18  ;;  %v11585_v18 = vld [vmem:[#allocation111_spill] sm:$0xff] }
 0x45e   :  { %v10209_v8 = vadd.f32 %v4387_v21, %v4109_v47  ;;  %v4072_v34 = vpop.f32.mrf.mxu1  ;;  %v3477_v62 = vadd.f32 %v11585_v18, %v11584_v7 }
 0x45f   :  { %11576 = vst [vmem:[#allocation87_spill] sm:$0xff] %v10206_v56  ;;  %v4110_v2 = vadd.f32 %v4066_v10, %v3912_v50  ;;  %v11590_v50 = vld [vmem:[#allocation126_spill] sm:$0xff] }
 0x460   :  { %11577 = vst [vmem:[#allocation14_spill] sm:$0xff] %v10209_v8  ;;  %6499 = vmatmul.msk.f32.gmra.mxu0 %vm216_vm2, %v4468_v14  ;;  %v11587_v8 = vld [vmem:[#allocation112_spill] sm:$0xff]  ;;  %v3895_v10 = vadd.f32 %v11588_v28, %v3477_v62  ;;  %v4472_v62 = vsel %vm253_vm0, %v4469_v22, %v4471_v44  ;;  %v4473_v22 = vrot.slane %v9912_v38, 4 }
 0x461   :  { %6518 = vmatmul.msk.f32.gmra.mxu1 %vm216_vm2, %v4612_v25  ;;  %6535 = vmatmul.msk.f32.gmra.mxu2 %vm216_vm2, %v4468_v14 }
 0x462   :  { %6554 = vmatmul.msk.f32.gmra.mxu3 %vm216_vm2, %v4612_v25  ;;  %v11586_v25 = vld [vmem:[#allocation75_spill] sm:$0xff] }
 0x463   :  { %v3584_v56 = vadd.f32 %v11587_v8, %v11586_v25 }
 0x464   :  { %v4246_v47 = vpop.f32.mrf.mxu2 }
 0x465   :  { %v10224_v32 = vadd.f32 %v4246_v47, %v4092_v55  ;;  %v4390_v30 = vpop.f32.mrf.mxu3  ;;  %v3994_v21 = vpop.f32.mrf.mxu0  ;;  %v3913_v55 = vadd.f32 %v11590_v50, %v3584_v56  ;;  %v4093_v47 = vadd.f32 %v3988_v23, %v3895_v10  ;;  %v11594_v50 = vld [vmem:[#allocation76_spill] sm:$0xff]  ;;  %v11598_v10 = vld [vmem:[#allocation129_spill] sm:$0xff] }
 0x466   :  { %v10227_v60 = vadd.f32 %v4390_v30, %v4110_v2  ;;  %v4075_v14 = vpop.f32.mrf.mxu1  ;;  %v4615_v2 = vrot.slane %v11591_v19, 4  ;;  %v11596_v19 = vld [vmem:[#allocation77_spill] sm:$0xff]  ;;  %v11597_v23 = vld [vmem:[#allocation116_spill] sm:$0xff] }
 0x467   :  { %v4111_v30 = vadd.f32 %v4069_v15, %v3913_v55  ;;  %v3587_v15 = vadd.f32 %v11597_v23, %v11596_v19 }
 0x468   :  { %6500 = vmatmul.msk.f32.gmra.mxu0 %vm216_vm2, %v4470_v48  ;;  %v4616_v56 = vsel %vm253_vm0, %v4613_v26, %v4615_v2  ;;  %v4617_v26 = vrot.slane %v9919_v24, 4  ;;  %v11604_v24 = vld [vmem:[#allocation79_spill] sm:$0xff] }
 0x469   :  { %6519 = vmatmul.msk.f32.gmra.mxu1 %vm216_vm2, %v4614_v3  ;;  %6536 = vmatmul.msk.f32.gmra.mxu2 %vm216_vm2, %v4470_v48 }
 0x46a   :  { %6555 = vmatmul.msk.f32.gmra.mxu3 %vm216_vm2, %v4614_v3  ;;  %v11595_v3 = vld [vmem:[#allocation115_spill] sm:$0xff] }
 0x46b   :  { %v3480_v17 = vadd.f32 %v11595_v3, %v11594_v50 }
 0x46c   :  { %v4249_v7 = vpop.f32.mrf.mxu2 }
 0x46d   :  { %v10242_v8 = vadd.f32 %v4249_v7, %v4093_v47  ;;  %v4393_v18 = vpop.f32.mrf.mxu3  ;;  %v10244_v25 = vpop.f32.mrf.mxu0  ;;  %v3896_v55 = vadd.f32 %v11598_v10, %v3480_v17  ;;  %v11599_v47 = vld [vmem:[#allocation130_spill] sm:$0xff]  ;;  %v4474_v17 = vsel %vm253_vm0, %v4471_v44, %v4473_v22 }
 0x46e   :  { %v10247_v28 = vadd.f32 %v4393_v18, %v4111_v30  ;;  %v10249_v48 = vpop.f32.mrf.mxu1  ;;  %v3914_v30 = vadd.f32 %v11599_v47, %v3587_v15  ;;  %v4618_v15 = vsel %vm253_vm0, %v4615_v2, %v4617_v26  ;;  %v11602_v47 = vld [vmem:[#allocation123_spill] sm:$0xff]  ;;  %v11610_v2 = vld [vmem:[#allocation36_spill] sm:$0xff] }
 0x46f   :  { %11592 = vst [vmem:[#allocation89_spill] sm:$0xff] %v10242_v8  ;;  %v4094_v7 = vadd.f32 %v3991_v36, %v3896_v55  ;;  %v11605_v36 = vld [vmem:[#allocation119_spill] sm:$0xff]  ;;  %v11606_v55 = vld [vmem:[#allocation124_spill] sm:$0xff] }
 0x470   :  { %11593 = vst [vmem:[#allocation32_spill] sm:$0xff] %v10247_v28  ;;  %6501 = vmatmul.msk.f32.gmra.mxu0 %vm216_vm2, %v4472_v62  ;;  %v4112_v18 = vadd.f32 %v4072_v34, %v3914_v30  ;;  %v3483_v34 = vadd.f32 %v11605_v36, %v11604_v24  ;;  %v10280_v30 = vunpack.c.h.bf16 %v11606_v55  ;;  %v5104_v55 = vrot.slane %v11327_v45, 5 }
 0x471   :  { %6520 = vmatmul.msk.f32.gmra.mxu1 %vm216_vm2, %v4616_v56  ;;  %6537 = vmatmul.msk.f32.gmra.mxu2 %vm216_vm2, %v4472_v62 }
 0x472   :  { %6556 = vmatmul.msk.f32.gmra.mxu3 %vm216_vm2, %v4616_v56  ;;  %v10275_v56 = vunpack.c.h.bf16 %v11602_v47  ;;  %11607 = vst [vmem:[#allocation33_spill] sm:$0xff] %v10280_v30  ;;  %v3897_v44 = vadd.f32 %v9948_v59, %v3483_v34  ;;  %v11611_v47 = vld [vmem:[#allocation131_spill] sm:$0xff]  ;;  %v4845_v59 = vrot.slane %v10280_v30, 4 }
 0x474   :  { %v4252_v50 = vpop.f32.mrf.mxu2  ;;  %11603 = vst [vmem:[#allocation96_spill] sm:$0xff] %v10275_v56  ;;  %v4764_v36 = vrot.slane %v10275_v56, 4 }
 0x475   :  { %v10264_v19 = vadd.f32 %v4252_v50, %v4094_v7  ;;  %v4396_v3 = vpop.f32.mrf.mxu3  ;;  %v10266_v23 = vpop.f32.mrf.mxu0  ;;  %v11608_v7 = vld [vmem:[#allocation80_spill] sm:$0xff]  ;;  %v11609_v50 = vld [vmem:[#allocation121_spill] sm:$0xff] }
 0x476   :  { %v10269_v10 = vadd.f32 %v4396_v3, %v4112_v18  ;;  %v10271_v62 = vpop.f32.mrf.mxu1  ;;  %v3590_v38 = vadd.f32 %v11609_v50, %v11608_v7  ;;  %v4960_v18 = vrot.slane %v11610_v2, 5  ;;  %v4961_v3 = vrot.slane %v11333_v4, 5 }
 0x477   :  { %11600 = vst [vmem:[#allocation90_spill] sm:$0xff] %v10264_v19  ;;  %v5105_v7 = vrot.slane %v11334_v43, 5  ;;  %v4095_v50 = vadd.f32 %v3994_v21, %v3897_v44  ;;  %v4765_v44 = vsel %vm253_vm0, %v4473_v22, %v4764_v36 }
 0x478   :  { %11601 = vst [vmem:[#allocation95_spill] sm:$0xff] %v10269_v10  ;;  %6502 = vmatmul.msk.f32.gmra.mxu0 %vm216_vm2, %v4474_v17  ;;  %v3915_v24 = vadd.f32 %v11611_v47, %v3590_v38  ;;  %v3005_v38 = vld [vmem:[%s10821_s0 + $0x148] sm:$0xf]  ;;  %v4962_v19 = vsel %vm2093_vm5, %v4960_v18, %v4961_v3  ;;  %v5107_v18 = vrot.slane %v11339_v42, 5 }
 0x479   :  { %6521 = vmatmul.msk.f32.gmra.mxu1 %vm216_vm2, %v4618_v15  ;;  %6538 = vmatmul.msk.f32.gmra.mxu2 %vm216_vm2, %v4474_v17  ;;  %v2982_v17 = vld [vmem:[%s10821_s0 + $0xa0] sm:$0xf]  ;;  %v5106_v30 = vsel %vm2093_vm5, %v5104_v55, %v5105_v7  ;;  %v4726_v55 = vadd.f32 %v10244_v25, %v9970_v1  ;;  %v5109_v25 = vrot.slane %v11345_v37, 5 }
 0x47a   :  { %6557 = vmatmul.msk.f32.gmra.mxu3 %vm216_vm2, %v4618_v15  ;;  %v4113_v34 = vadd.f32 %v4075_v14, %v3915_v24  ;;  %v10309_v8 = vunpack.c.l.bf16 %v2982_v17  ;;  %v4846_v14 = vsel %vm253_vm0, %v4617_v26, %v4845_v59  ;;  %v10312_v24 = vunpack.c.l.bf16 %v3005_v38 }
 0x47c   :  { %v4255_v10 = vpop.f32.mrf.mxu2  ;;  %11612 = vst [vmem:[#allocation91_spill] sm:$0xff] %v10309_v8  ;;  %v4766_v22 = vrot.slane %v10309_v8, 4  ;;  %v4847_v26 = vrot.slane %v10312_v24, 4  ;;  %v5108_v8 = vsel %vm2093_vm5, %v5105_v7, %v5107_v18  ;;  %v5428_v7 = vrot.slane %v11327_v45, 6 }
 0x47d   :  { %v10302_v15 = vadd.f32 %v4255_v10, %v4095_v50  ;;  %v4399_v47 = vpop.f32.mrf.mxu3  ;;  %v4534_v56 = vpop.f32.mrf.mxu0  ;;  %v4963_v10 = vrot.slane %v11338_v31, 5 }
 0x47e   :  { %v10305_v28 = vadd.f32 %v4399_v47, %v4113_v34  ;;  %v4678_v21 = vpop.f32.mrf.mxu1  ;;  %v4848_v1 = vsel %vm253_vm0, %v4845_v59, %v4847_v26  ;;  %v5429_v59 = vrot.slane %v11334_v43, 6  ;;  %v4967_v43 = vrot.slane %v11349_v41, 5 }
 0x47f   :  { %v4964_v38 = vsel %vm2093_vm5, %v4961_v3, %v4963_v10  ;;  %v5285_v3 = vrot.slane %v11333_v4, 6 }
 0x480   :  { %6561 = vmatmul.msk.f32.vlgmr.msra.gmra.mxu0 %vm216_vm2, %v4962_v19  ;;  %v4744_v19 = vadd.f32 %v10249_v48, %v9973_v16  ;;  %v4965_v16 = vrot.slane %v11344_v0, 5  ;;  %v5284_v48 = vrot.slane %v11610_v2, 6  ;;  %v5430_v45 = vsel %vm2421_vm6, %v5428_v7, %v5429_v59 }
 0x481   :  { %6539 = vmatmul.msk.f32.gmra.mxu2 %vm216_vm2, %v4765_v44  ;;  %6580 = vmatmul.msk.f32.vlgmr.msra.gmra.mxu1 %vm216_vm2, %v5106_v30 }
 0x482   :  { %6558 = vmatmul.msk.f32.gmra.mxu3 %vm216_vm2, %v4846_v14  ;;  %v4767_v14 = vsel %vm253_vm0, %v4764_v36, %v4766_v22  ;;  %v4727_v36 = vadd.f32 %v10266_v23, %v9990_v29  ;;  %v11613_v22 = vld [vmem:[#allocation22_spill] sm:$0xff]  ;;  %v5286_v29 = vsel %vm2421_vm6, %v5284_v48, %v5285_v3  ;;  %v5111_v23 = vrot.slane %v11350_v53, 5 }
 0x484   :  { %v4789_v50 = vpop.f32.mrf.mxu2 }
 0x485   :  { %v10326_v17 = vadd.f32 %v4789_v50, %v4726_v55  ;;  %v4870_v30 = vpop.f32.mrf.mxu3  ;;  %v4537_v34 = vpop.f32.mrf.mxu0 }
 0x486   :  { %v10329_v47 = vadd.f32 %v4870_v30, %v4744_v19  ;;  %v4681_v44 = vpop.f32.mrf.mxu1  ;;  %v4966_v30 = vsel %vm2093_vm5, %v4963_v10, %v4965_v16  ;;  %v4728_v10 = vadd.f32 %v4534_v56, %v10008_v12  ;;  %v5289_v56 = vrot.slane %v11344_v0, 6 }
 0x488   :  { %6562 = vmatmul.msk.f32.gmra.mxu0 %vm216_vm2, %v4964_v38  ;;  %v5110_v38 = vsel %vm2093_vm5, %v5107_v18, %v5109_v25  ;;  %v5431_v18 = vrot.slane %v11339_v42, 6  ;;  %v4969_v42 = vrot.slane %v11427_v13, 5 }
 0x489   :  { %6540 = vmatmul.msk.f32.gmra.mxu2 %vm216_vm2, %v4767_v14  ;;  %6581 = vmatmul.msk.f32.gmra.mxu1 %vm216_vm2, %v5108_v8  ;;  %v4745_v8 = vadd.f32 %v10271_v62, %v11613_v22  ;;  %v5287_v62 = vrot.slane %v11338_v31, 6  ;;  %v4746_v14 = vadd.f32 %v4678_v21, %v10011_v49  ;;  %v4968_v22 = vsel %vm2093_vm5, %v4965_v16, %v4967_v43 }
 0x48a   :  { %6559 = vmatmul.msk.f32.gmra.mxu3 %vm216_vm2, %v4848_v1  ;;  %v5432_v12 = vsel %vm2421_vm6, %v5429_v59, %v5431_v18  ;;  %v5113_v49 = vrot.slane %v11428_v61, 5  ;;  %v4729_v21 = vadd.f32 %v4537_v34, %v10026_v51  ;;  %v5433_v16 = vrot.slane %v11345_v37, 6 }
 0x48b   :  { %v5288_v31 = vsel %vm2421_vm6, %v5285_v3, %v5287_v62  ;;  %v5290_v0 = vsel %vm2421_vm6, %v5287_v62, %v5289_v56  ;;  %v4971_v37 = vrot.slane %v11433_v6, 5  ;;  %v5291_v34 = vrot.slane %v11349_v41, 6  ;;  %v11615_v62 = vld [vmem:[#allocation24_spill] sm:$0xff] }
 0x48c   :  { %v4792_v55 = vpop.f32.mrf.mxu2  ;;  %v5434_v51 = vsel %vm2421_vm6, %v5431_v18, %v5433_v16 }
 0x48d   :  { %v10348_v26 = vadd.f32 %v4792_v55, %v4727_v36  ;;  %v4873_v19 = vpop.f32.mrf.mxu3  ;;  %v4540_v50 = vpop.f32.mrf.mxu0  ;;  %v5292_v41 = vsel %vm2421_vm6, %v5289_v56, %v5291_v34  ;;  %v5437_v56 = vrot.slane %v11428_v61, 6  ;;  %v4975_v61 = vrot.slane %v11445_v35, 5 }
 0x48e   :  { %v10351_v2 = vadd.f32 %v4873_v19, %v4745_v8  ;;  %v4684_v4 = vpop.f32.mrf.mxu1  ;;  %v5112_v19 = vsel %vm2093_vm5, %v5109_v25, %v5111_v23  ;;  %v4747_v25 = vadd.f32 %v4681_v44, %v10029_v27  ;;  %v5115_v27 = vrot.slane %v11434_v5, 5  ;;  %v11614_v44 = vld [vmem:[#allocation9_spill] sm:$0xff] }
 0x48f   :  { %v4748_v18 = vadd.f32 %v4684_v4, %v11615_v62  ;;  %v5117_v4 = vrot.slane %v11440_v33, 5 }
 0x490   :  { %6563 = vmatmul.msk.f32.gmra.mxu0 %vm216_vm2, %v4966_v30 }
 0x491   :  { %6582 = vmatmul.msk.f32.gmra.mxu1 %vm216_vm2, %v5110_v38  ;;  %6599 = vmatmul.msk.f32.vlgmr.msrb.gmra.mxu2 %vm216_vm2, %v5286_v29  ;;  %v4970_v29 = vsel %vm2093_vm5, %v4967_v43, %v4969_v42  ;;  %v4730_v43 = vadd.f32 %v4540_v50, %v11614_v44 }
 0x492   :  { %6618 = vmatmul.msk.f32.vlgmr.msrb.gmra.mxu3 %vm216_vm2, %v5430_v45 }
 0x494   :  { %v4795_v1 = vpop.f32.mrf.mxu2 }
 0x495   :  { %v10366_v48 = vadd.f32 %v4795_v1, %v4728_v10  ;;  %v4876_v36 = vpop.f32.mrf.mxu3  ;;  %v4543_v7 = vpop.f32.mrf.mxu0 }
 0x496   :  { %v10369_v8 = vadd.f32 %v4876_v36, %v4746_v14  ;;  %v4687_v55 = vpop.f32.mrf.mxu1  ;;  %v5114_v14 = vsel %vm2093_vm5, %v5111_v23, %v5113_v49  ;;  %v5435_v23 = vrot.slane %v11350_v53, 6  ;;  %v4973_v53 = vrot.slane %v11439_v20, 5 }
 0x498   :  { %6564 = vmatmul.msk.f32.gmra.mxu0 %vm216_vm2, %v4968_v22  ;;  %v5436_v50 = vsel %vm2421_vm6, %v5433_v16, %v5435_v23  ;;  %v4974_v44 = vsel %vm2093_vm5, %v4971_v37, %v4973_v53 }
 0x499   :  { %6583 = vmatmul.msk.f32.gmra.mxu1 %vm216_vm2, %v5112_v19  ;;  %6600 = vmatmul.msk.f32.gmra.mxu2 %vm216_vm2, %v5288_v31  ;;  %v4972_v31 = vsel %vm2093_vm5, %v4969_v42, %v4971_v37  ;;  %v5293_v42 = vrot.slane %v11427_v13, 6  ;;  %v5295_v37 = vrot.slane %v11433_v6, 6 }
 0x49a   :  { %6619 = vmatmul.msk.f32.gmra.mxu3 %vm216_vm2, %v5432_v12 }
 0x49b   :  { %v5294_v13 = vsel %vm2421_vm6, %v5291_v34, %v5293_v42  ;;  %v5439_v34 = vrot.slane %v11434_v5, 6  ;;  %v5296_v6 = vsel %vm2421_vm6, %v5293_v42, %v5295_v37  ;;  %v4977_v5 = vrot.slane %v11451_v63, 5 }
 0x49c   :  { %v4798_v3 = vpop.f32.mrf.mxu2  ;;  %v5441_v42 = vrot.slane %v11440_v33, 6  ;;  %v4979_v33 = vrot.slane %v11456_v52, 5 }
 0x49d   :  { %v10384_v59 = vadd.f32 %v4798_v3, %v4729_v21  ;;  %v4879_v30 = vpop.f32.mrf.mxu3  ;;  %v4546_v38 = vpop.f32.mrf.mxu0  ;;  %v11616_v3 = vld [vmem:[#allocation60_spill] sm:$0xff] }
 0x49e   :  { %v10387_v45 = vadd.f32 %v4879_v30, %v4747_v25  ;;  %v4690_v10 = vpop.f32.mrf.mxu1  ;;  %v5116_v25 = vsel %vm2093_vm5, %v5113_v49, %v5115_v27  ;;  %v4731_v49 = vadd.f32 %v4543_v7, %v11616_v3  ;;  %v11617_v30 = vld [vmem:[#allocation78_spill] sm:$0xff]  ;;  %v5438_v7 = vsel %vm2421_vm6, %v5435_v23, %v5437_v56 }
 0x49f   :  { %v4749_v16 = vadd.f32 %v4687_v55, %v11617_v30  ;;  %v5119_v55 = vrot.slane %v11446_v11, 5  ;;  %v4976_v3 = vsel %vm2093_vm5, %v4973_v53, %v4975_v61  ;;  %v5297_v53 = vrot.slane %v11439_v20, 6 }
 0x4a0   :  { %6565 = vmatmul.msk.f32.gmra.mxu0 %vm216_vm2, %v4970_v29 }
 0x4a1   :  { %6584 = vmatmul.msk.f32.gmra.mxu1 %vm216_vm2, %v5114_v14  ;;  %6601 = vmatmul.msk.f32.gmra.mxu2 %vm216_vm2, %v5290_v0  ;;  %v5298_v20 = vsel %vm2421_vm6, %v5295_v37, %v5297_v53  ;;  %v5443_v37 = vrot.slane %v11446_v11, 6  ;;  %v4981_v11 = vrot.slane %v11392_v58, 5 }
 0x4a2   :  { %6620 = vmatmul.msk.f32.gmra.mxu3 %vm216_vm2, %v5434_v51 }
 0x4a4   :  { %v4801_v1 = vpop.f32.mrf.mxu2 }
 0x4a5   :  { %v10402_v36 = vadd.f32 %v4801_v1, %v4730_v43  ;;  %v4882_v22 = vpop.f32.mrf.mxu3  ;;  %v4549_v19 = vpop.f32.mrf.mxu0  ;;  %v11618_v1 = vld [vmem:[#allocation85_spill] sm:$0xff] }
 0x4a6   :  { %v10405_v12 = vadd.f32 %v4882_v22, %v4748_v18  ;;  %v4693_v21 = vpop.f32.mrf.mxu1  ;;  %v5118_v18 = vsel %vm2093_vm5, %v5115_v27, %v5117_v4  ;;  %v4732_v27 = vadd.f32 %v4546_v38, %v11618_v1  ;;  %v11619_v22 = vld [vmem:[#allocation11_spill] sm:$0xff]  ;;  %v5440_v38 = vsel %vm2421_vm6, %v5437_v56, %v5439_v34 }
 0x4a7   :  { %v4750_v23 = vadd.f32 %v4690_v10, %v11619_v22  ;;  %v5121_v10 = vrot.slane %v11452_v9, 5  ;;  %v4978_v1 = vsel %vm2093_vm5, %v4975_v61, %v4977_v5  ;;  %v5299_v61 = vrot.slane %v11445_v35, 6 }
 0x4a8   :  { %6566 = vmatmul.msk.f32.gmra.mxu0 %vm216_vm2, %v4972_v31 }
 0x4a9   :  { %6585 = vmatmul.msk.f32.gmra.mxu1 %vm216_vm2, %v5116_v25  ;;  %6602 = vmatmul.msk.f32.gmra.mxu2 %vm216_vm2, %v5292_v41  ;;  %v5300_v35 = vsel %vm2421_vm6, %v5297_v53, %v5299_v61  ;;  %v5445_v53 = vrot.slane %v11452_v9, 6 }
 0x4aa   :  { %6621 = vmatmul.msk.f32.gmra.mxu3 %vm216_vm2, %v5436_v50 }
 0x4ac   :  { %v4804_v29 = vpop.f32.mrf.mxu2 }
 0x4ad   :  { %v10420_v14 = vadd.f32 %v4804_v29, %v4731_v49  ;;  %v4885_v0 = vpop.f32.mrf.mxu3  ;;  %v4552_v51 = vpop.f32.mrf.mxu0  ;;  %v11620_v29 = vld [vmem:[#allocation81_spill] sm:$0xff] }
 0x4ae   :  { %v10423_v43 = vadd.f32 %v4885_v0, %v4749_v16  ;;  %v4696_v62 = vpop.f32.mrf.mxu1  ;;  %v5120_v16 = vsel %vm2093_vm5, %v5117_v4, %v5119_v55  ;;  %v4733_v4 = vadd.f32 %v4549_v19, %v11620_v29  ;;  %v11621_v0 = vld [vmem:[#allocation29_spill] sm:$0xff]  ;;  %v5442_v19 = vsel %vm2421_vm6, %v5439_v34, %v5441_v42 }
 0x4af   :  { %v4751_v56 = vadd.f32 %v4693_v21, %v11621_v0  ;;  %v5123_v21 = vrot.slane %v11388_v54, 5  ;;  %v4980_v29 = vsel %vm2093_vm5, %v4977_v5, %v4979_v33  ;;  %v5301_v5 = vrot.slane %v11451_v63, 6 }
 0x4b0   :  { %6567 = vmatmul.msk.f32.gmra.mxu0 %vm216_vm2, %v4974_v44 }
 0x4b1   :  { %6586 = vmatmul.msk.f32.gmra.mxu1 %vm216_vm2, %v5118_v18  ;;  %6603 = vmatmul.msk.f32.gmra.mxu2 %vm216_vm2, %v5294_v13 }
 0x4b2   :  { %6622 = vmatmul.msk.f32.gmra.mxu3 %vm216_vm2, %v5438_v7 }
 0x4b4   :  { %v4807_v31 = vpop.f32.mrf.mxu2 }
 0x4b5   :  { %v10438_v25 = vadd.f32 %v4807_v31, %v4732_v27  ;;  %v4888_v41 = vpop.f32.mrf.mxu3  ;;  %v4555_v50 = vpop.f32.mrf.mxu0  ;;  %v11622_v31 = vld [vmem:[#allocation82_spill] sm:$0xff] }
 0x4b6   :  { %v10441_v49 = vadd.f32 %v4888_v41, %v4750_v23  ;;  %v4699_v30 = vpop.f32.mrf.mxu1  ;;  %v5122_v23 = vsel %vm2093_vm5, %v5119_v55, %v5121_v10  ;;  %v4734_v55 = vadd.f32 %v4552_v51, %v11622_v31  ;;  %v11623_v41 = vld [vmem:[#allocation88_spill] sm:$0xff]  ;;  %v5444_v51 = vsel %vm2421_vm6, %v5441_v42, %v5443_v37 }
 0x4b7   :  { %v4752_v34 = vadd.f32 %v4696_v62, %v11623_v41  ;;  %v5125_v62 = vrot.slane %v11393_v39, 5  ;;  %v4982_v31 = vsel %vm2093_vm5, %v4979_v33, %v4981_v11  ;;  %v11627_v33 = vld [vmem:[#allocation18_spill] sm:$0xff] }
 0x4b8   :  { %6568 = vmatmul.msk.f32.gmra.mxu0 %vm216_vm2, %v4976_v3 }
 0x4b9   :  { %6587 = vmatmul.msk.f32.gmra.mxu1 %vm216_vm2, %v5120_v16  ;;  %6604 = vmatmul.msk.f32.gmra.mxu2 %vm216_vm2, %v5296_v6  ;;  %v5126_v63 = vsel %vm2093_vm5, %v5123_v21, %v5125_v62 }
 0x4ba   :  { %6623 = vmatmul.msk.f32.gmra.mxu3 %vm216_vm2, %v5440_v38 }
 0x4bc   :  { %v4810_v44 = vpop.f32.mrf.mxu2 }
 0x4bd   :  { %v10456_v18 = vadd.f32 %v4810_v44, %v4733_v4  ;;  %v4891_v13 = vpop.f32.mrf.mxu3  ;;  %v4558_v7 = vpop.f32.mrf.mxu0  ;;  %v11624_v44 = vld [vmem:[#allocation30_spill] sm:$0xff] }
 0x4be   :  { %v10459_v27 = vadd.f32 %v4891_v13, %v4751_v56  ;;  %v4702_v22 = vpop.f32.mrf.mxu1  ;;  %v5124_v56 = vsel %vm2093_vm5, %v5121_v10, %v5123_v21  ;;  %v4735_v10 = vadd.f32 %v4555_v50, %v11624_v44  ;;  %v11625_v13 = vld [vmem:[#allocation83_spill] sm:$0xff]  ;;  %v5302_v50 = vsel %vm2421_vm6, %v5299_v61, %v5301_v5 }
 0x4bf   :  { %v4753_v42 = vadd.f32 %v4699_v30, %v11625_v13  ;;  %v5446_v30 = vsel %vm2421_vm6, %v5443_v37, %v5445_v53  ;;  %v5303_v21 = vrot.slane %v11456_v52, 6 }
 0x4c0   :  { %6569 = vmatmul.msk.f32.gmra.mxu0 %vm216_vm2, %v4978_v1 }
 0x4c1   :  { %6588 = vmatmul.msk.f32.gmra.mxu1 %vm216_vm2, %v5122_v23  ;;  %6605 = vmatmul.msk.f32.gmra.mxu2 %vm216_vm2, %v5298_v20  ;;  %v5304_v52 = vsel %vm2421_vm6, %v5301_v5, %v5303_v21  ;;  %v5449_v5 = vrot.slane %v11393_v39, 6 }
 0x4c2   :  { %6624 = vmatmul.msk.f32.gmra.mxu3 %vm216_vm2, %v5442_v19 }
 0x4c4   :  { %v4813_v3 = vpop.f32.mrf.mxu2 }
 0x4c5   :  { %v10474_v16 = vadd.f32 %v4813_v3, %v4734_v55  ;;  %v4894_v6 = vpop.f32.mrf.mxu3  ;;  %v4561_v38 = vpop.f32.mrf.mxu0  ;;  %v11626_v3 = vld [vmem:[#allocation53_spill] sm:$0xff] }
 0x4c6   :  { %v10477_v4 = vadd.f32 %v4894_v6, %v4752_v34  ;;  %v4705_v0 = vpop.f32.mrf.mxu1  ;;  %v4983_v6 = vrot.slane %v11627_v33, 5 }
 0x4c8   :  { %6570 = vmatmul.msk.f32.gmra.mxu0 %vm216_vm2, %v4980_v29 }
 0x4c9   :  { %6589 = vmatmul.msk.f32.gmra.mxu1 %vm216_vm2, %v5124_v56  ;;  %6606 = vmatmul.msk.f32.gmra.mxu2 %vm216_vm2, %v5300_v35  ;;  %v11629_v56 = vld [vmem:[#allocation8_spill] sm:$0xff]  ;;  %v5447_v35 = vrot.slane %v11388_v54, 6  ;;  %v11631_v54 = vld [vmem:[#allocation19_spill] sm:$0xff] }
 0x4ca   :  { %6625 = vmatmul.msk.f32.gmra.mxu3 %vm216_vm2, %v5444_v51  ;;  %v4736_v61 = vadd.f32 %v4558_v7, %v11629_v56  ;;  %v11630_v51 = vld [vmem:[#allocation84_spill] sm:$0xff] }
 0x4cb   :  { %v4754_v37 = vadd.f32 %v4702_v22, %v11630_v51  ;;  %v5448_v7 = vsel %vm2421_vm6, %v5445_v53, %v5447_v35  ;;  %v4985_v22 = vrot.slane %v11631_v54, 5 }
 0x4cc   :  { %v4816_v1 = vpop.f32.mrf.mxu2 }
 0x4cd   :  { %v10492_v23 = vadd.f32 %v4816_v1, %v4735_v10  ;;  %v4897_v20 = vpop.f32.mrf.mxu3  ;;  %v4564_v19 = vpop.f32.mrf.mxu0  ;;  %v4984_v1 = vsel %vm2093_vm5, %v4981_v11, %v4983_v6  ;;  %v11632_v11 = vld [vmem:[#allocation56_spill] sm:$0xff] }
 0x4ce   :  { %v10495_v55 = vadd.f32 %v4897_v20, %v4753_v42  ;;  %v4738_v41 = vadd.f32 %v4564_v19, %v10188_v40  ;;  %v4708_v34 = vpop.f32.mrf.mxu1  ;;  %v11628_v40 = vld [vmem:[#allocation55_spill] sm:$0xff] }
 0x4cf   :  { %v4756_v9 = vadd.f32 %v4708_v34, %v11626_v3  ;;  %v5127_v29 = vrot.slane %v11628_v40, 5  ;;  %v5129_v34 = vrot.slane %v11632_v11, 5  ;;  %v11634_v3 = vld [vmem:[#allocation86_spill] sm:$0xff] }
 0x4d0   :  { %6571 = vmatmul.msk.f32.gmra.mxu0 %vm216_vm2, %v4982_v31  ;;  %v4755_v53 = vadd.f32 %v4705_v0, %v11634_v3  ;;  %v5450_v0 = vsel %vm2421_vm6, %v5447_v35, %v5449_v5 }
 0x4d1   :  { %6590 = vmatmul.msk.f32.gmra.mxu1 %vm216_vm2, %v5126_v63  ;;  %6607 = vmatmul.msk.f32.gmra.mxu2 %vm216_vm2, %v5302_v50  ;;  %v5128_v31 = vsel %vm2093_vm5, %v5125_v62, %v5127_v29  ;;  %v5305_v63 = vrot.slane %v11392_v58, 6  ;;  %v11633_v50 = vld [vmem:[#allocation31_spill] sm:$0xff]  ;;  %v5130_v58 = vsel %vm2093_vm5, %v5127_v29, %v5129_v34  ;;  %v5307_v29 = vrot.slane %v11627_v33, 6 }
 0x4d2   :  { %6626 = vmatmul.msk.f32.gmra.mxu3 %vm216_vm2, %v5446_v30  ;;  %v4737_v62 = vadd.f32 %v4561_v38, %v11633_v50 }
 0x4d3   :  { %v5306_v38 = vsel %vm2421_vm6, %v5303_v21, %v5305_v63  ;;  %v5451_v21 = vrot.slane %v11628_v40, 6 }
 0x4d4   :  { %v4819_v44 = vpop.f32.mrf.mxu2 }
 0x4d5   :  { %v10512_v10 = vadd.f32 %v4819_v44, %v4736_v61  ;;  %v4900_v13 = vpop.f32.mrf.mxu3  ;;  %v4567_v42 = vpop.f32.mrf.mxu0  ;;  %v5452_v40 = vsel %vm2421_vm6, %v5449_v5, %v5451_v21 }
 0x4d6   :  { %v10515_v20 = vadd.f32 %v4900_v13, %v4754_v37  ;;  %v4711_v19 = vpop.f32.mrf.mxu1  ;;  %v4986_v37 = vsel %vm2093_vm5, %v4983_v6, %v4985_v22  ;;  %v4987_v6 = vrot.slane %v9079_v46, 5 }
 0x4d8   :  { %6572 = vmatmul.msk.f32.gmra.mxu0 %vm216_vm2, %v4984_v1 }
 0x4d9   :  { %6591 = vmatmul.msk.f32.gmra.mxu1 %vm216_vm2, %v5128_v31  ;;  %6608 = vmatmul.msk.f32.gmra.mxu2 %vm216_vm2, %v5304_v52 }
 0x4da   :  { %6627 = vmatmul.msk.f32.gmra.mxu3 %vm216_vm2, %v5448_v7  ;;  %v4988_v7 = vsel %vm2093_vm5, %v4985_v22, %v4987_v6  ;;  %v11638_v22 = vld [vmem:[#allocation122_spill] sm:$0xff] }
 0x4dc   :  { %v4822_v30 = vpop.f32.mrf.mxu2 }
 0x4dd   :  { %v10530_v56 = vadd.f32 %v4822_v30, %v4737_v62  ;;  %v4903_v61 = vpop.f32.mrf.mxu3  ;;  %v4570_v51 = vpop.f32.mrf.mxu0  ;;  %v11635_v62 = vld [vmem:[#allocation89_spill] sm:$0xff] }
 0x4de   :  { %v10533_v44 = vadd.f32 %v4903_v61, %v4755_v53  ;;  %v4740_v13 = vadd.f32 %v4570_v51, %v10224_v32  ;;  %v4714_v1 = vpop.f32.mrf.mxu1  ;;  %v5131_v32 = vrot.slane %v9083_v57, 5  ;;  %v5308_v61 = vsel %vm2421_vm6, %v5305_v63, %v5307_v29  ;;  %v11636_v51 = vld [vmem:[#allocation32_spill] sm:$0xff] }
 0x4df   :  { %v4758_v39 = vadd.f32 %v4714_v1, %v10227_v60  ;;  %v11639_v1 = vld [vmem:[#allocation87_spill] sm:$0xff] }
 0x4e0   :  { %6573 = vmatmul.msk.f32.gmra.mxu0 %vm216_vm2, %v4986_v37  ;;  %v5132_v30 = vsel %vm2093_vm5, %v5129_v34, %v5131_v32  ;;  %v5133_v37 = vrot.slane %v11638_v22, 5  ;;  %v5309_v34 = vrot.slane %v11631_v54, 6  ;;  %v4739_v63 = vadd.f32 %v4567_v42, %v11639_v1  ;;  %v11644_v1 = vld [vmem:[#allocation128_spill] sm:$0xff] }
 0x4e1   :  { %6592 = vmatmul.msk.f32.gmra.mxu1 %vm216_vm2, %v5130_v58  ;;  %6609 = vmatmul.msk.f32.gmra.mxu2 %vm216_vm2, %v5306_v38  ;;  %v5453_v58 = vrot.slane %v11632_v11, 6  ;;  %v11640_v38 = vld [vmem:[#allocation14_spill] sm:$0xff] }
 0x4e2   :  { %6628 = vmatmul.msk.f32.gmra.mxu3 %vm216_vm2, %v5450_v0  ;;  %v4757_v5 = vadd.f32 %v4711_v19, %v11640_v38  ;;  %v5134_v54 = vsel %vm2093_vm5, %v5131_v32, %v5133_v37  ;;  %v5310_v42 = vsel %vm2421_vm6, %v5307_v29, %v5309_v34  ;;  %v5311_v32 = vrot.slane %v9079_v46, 6 }
 0x4e3   :  { %v5454_v19 = vsel %vm2421_vm6, %v5451_v21, %v5453_v58  ;;  %v5455_v29 = vrot.slane %v9083_v57, 6 }
 0x4e4   :  { %v4825_v31 = vpop.f32.mrf.mxu2 }
 0x4e5   :  { %v10548_v60 = vadd.f32 %v4825_v31, %v4738_v41  ;;  %v4906_v35 = vpop.f32.mrf.mxu3  ;;  %v4573_v52 = vpop.f32.mrf.mxu0  ;;  %v11637_v41 = vld [vmem:[#allocation120_spill] sm:$0xff]  ;;  %v5456_v57 = vsel %vm2421_vm6, %v5453_v58, %v5455_v29 }
 0x4e6   :  { %v10551_v50 = vadd.f32 %v4906_v35, %v4756_v9  ;;  %v4741_v3 = vadd.f32 %v4573_v52, %v11635_v62  ;;  %v4717_v53 = vpop.f32.mrf.mxu1  ;;  %v4989_v9 = vrot.slane %v11637_v41, 5 }
 0x4e7   :  { %v4759_v33 = vadd.f32 %v4717_v53, %v11636_v51  ;;  %v11641_v53 = vld [vmem:[#allocation90_spill] sm:$0xff]  ;;  %v11642_v51 = vld [vmem:[#allocation95_spill] sm:$0xff] }
 0x4e8   :  { %6574 = vmatmul.msk.f32.gmra.mxu0 %vm216_vm2, %v4988_v7  ;;  %v4990_v7 = vsel %vm2093_vm5, %v4987_v6, %v4989_v9  ;;  %v11643_v6 = vld [vmem:[#allocation127_spill] sm:$0xff] }
 0x4e9   :  { %6593 = vmatmul.msk.f32.gmra.mxu1 %vm216_vm2, %v5132_v30  ;;  %6610 = vmatmul.msk.f32.gmra.mxu2 %vm216_vm2, %v5308_v61 }
 0x4ea   :  { %6629 = vmatmul.msk.f32.gmra.mxu3 %vm216_vm2, %v5452_v40  ;;  %v4991_v40 = vrot.slane %v11643_v6, 5 }
 0x4ec   :  { %v4828_v0 = vpop.f32.mrf.mxu2 }
 0x4ed   :  { %v10568_v31 = vadd.f32 %v4828_v0, %v4739_v63  ;;  %v4909_v35 = vpop.f32.mrf.mxu3  ;;  %v4576_v52 = vpop.f32.mrf.mxu0  ;;  %v5135_v63 = vrot.slane %v11644_v1, 5 }
 0x4ee   :  { %v10571_v62 = vadd.f32 %v4909_v35, %v4757_v5  ;;  %v4742_v30 = vadd.f32 %v4576_v52, %v11641_v53  ;;  %v4720_v61 = vpop.f32.mrf.mxu1  ;;  %v4992_v35 = vsel %vm2093_vm5, %v4989_v9, %v4991_v40 }
 0x4ef   :  { %v4760_v11 = vadd.f32 %v4720_v61, %v11642_v51  ;;  %v5136_v61 = vsel %vm2093_vm5, %v5133_v37, %v5135_v63  ;;  %v5313_v37 = vrot.slane %v11637_v41, 6 }
 0x4f0   :  { %6575 = vmatmul.msk.f32.gmra.mxu0 %vm216_vm2, %v4990_v7 }
 0x4f1   :  { %6594 = vmatmul.msk.f32.gmra.mxu1 %vm216_vm2, %v5134_v54  ;;  %6611 = vmatmul.msk.f32.gmra.mxu2 %vm216_vm2, %v5310_v42  ;;  %v5312_v54 = vsel %vm2421_vm6, %v5309_v34, %v5311_v32  ;;  %v5457_v34 = vrot.slane %v11638_v22, 6 }
 0x4f2   :  { %6630 = vmatmul.msk.f32.gmra.mxu3 %vm216_vm2, %v5454_v19 }
 0x4f3   :  { %v5458_v22 = vsel %vm2421_vm6, %v5455_v29, %v5457_v34 }
 0x4f4   :  { %v4831_v38 = vpop.f32.mrf.mxu2 }
 0x4f5   :  { %v10586_v5 = vadd.f32 %v4831_v38, %v4740_v13  ;;  %v4912_v21 = vpop.f32.mrf.mxu3  ;;  %v4579_v0 = vpop.f32.mrf.mxu0  ;;  %v11645_v13 = vld [vmem:[#allocation96_spill] sm:$0xff] }
 0x4f6   :  { %v10589_v52 = vadd.f32 %v4912_v21, %v4758_v39  ;;  %v4743_v7 = vadd.f32 %v4579_v0, %v10302_v15  ;;  %v4723_v53 = vpop.f32.mrf.mxu1  ;;  %v4993_v39 = vrot.slane %v11645_v13, 5  ;;  %v11646_v15 = vld [vmem:[#allocation33_spill] sm:$0xff] }
 0x4f7   :  { %v4761_v46 = vadd.f32 %v4723_v53, %v10305_v28  ;;  %v5137_v9 = vrot.slane %v11646_v15, 5  ;;  %v5314_v53 = vsel %vm2421_vm6, %v5311_v32, %v5313_v37 }
 0x4f8   :  { %6576 = vmatmul.msk.f32.gmra.mxu0 %vm216_vm2, %v4992_v35  ;;  %v4994_v19 = vsel %vm2093_vm5, %v4991_v40, %v4993_v39  ;;  %v5315_v40 = vrot.slane %v11643_v6, 6 }
 0x4f9   :  { %6595 = vmatmul.msk.f32.gmra.mxu1 %vm216_vm2, %v5136_v61  ;;  %6612 = vmatmul.msk.f32.gmra.mxu2 %vm216_vm2, %v5312_v54  ;;  %v5138_v35 = vsel %vm2093_vm5, %v5135_v63, %v5137_v9  ;;  %v5459_v63 = vrot.slane %v11644_v1, 6 }
 0x4fa   :  { %6631 = vmatmul.msk.f32.gmra.mxu3 %vm216_vm2, %v5456_v57 }
 0x4fb   :  { %v5460_v1 = vsel %vm2421_vm6, %v5457_v34, %v5459_v63 }
 0x4fc   :  { %v4834_v42 = vpop.f32.mrf.mxu2 }
 0x4fd   :  { %v10604_v28 = vadd.f32 %v4834_v42, %v4741_v3  ;;  %v4915_v58 = vpop.f32.mrf.mxu3  ;;  %v5050_v51 = vpop.f32.mrf.mxu0  ;;  %v11647_v3 = vld [vmem:[#allocation91_spill] sm:$0xff] }
 0x4fe   :  { %v10607_v38 = vadd.f32 %v4915_v58, %v4759_v33  ;;  %v5248_v21 = vadd.f32 %v5050_v51, %v10326_v17  ;;  %v5194_v0 = vpop.f32.mrf.mxu1  ;;  %v4995_v33 = vrot.slane %v11647_v3, 5  ;;  %v5139_v17 = vrot.slane %v10312_v24, 5 }
 0x4ff   :  { %v5266_v41 = vadd.f32 %v5194_v0, %v10329_v47 }
 0x500   :  { %6577 = vmatmul.msk.f32.gmra.mxu0 %vm216_vm2, %v4994_v19  ;;  %v4996_v54 = vsel %vm2093_vm5, %v4993_v39, %v4995_v33  ;;  %v5140_v51 = vsel %vm2093_vm5, %v5137_v9, %v5139_v17  ;;  %v5316_v19 = vsel %vm2421_vm6, %v5313_v37, %v5315_v40 }
 0x501   :  { %6596 = vmatmul.msk.f32.gmra.mxu1 %vm216_vm2, %v5138_v35  ;;  %6613 = vmatmul.msk.f32.gmra.mxu2 %vm216_vm2, %v5314_v53 }
 0x502   :  { %6632 = vmatmul.msk.f32.gmra.mxu3 %vm216_vm2, %v5458_v22 }
 0x504   :  { %v4837_v32 = vpop.f32.mrf.mxu2 }
 0x505   :  { %v10622_v47 = vadd.f32 %v4837_v32, %v4742_v30  ;;  %v4918_v29 = vpop.f32.mrf.mxu3  ;;  %v5053_v61 = vpop.f32.mrf.mxu0  ;;  %v5317_v30 = vrot.slane %v11645_v13, 6  ;;  %v5463_v13 = vrot.slane %v10312_v24, 6 }
 0x506   :  { %v10625_v57 = vadd.f32 %v4918_v29, %v4760_v11  ;;  %v5249_v42 = vadd.f32 %v5053_v61, %v10348_v26  ;;  %v5197_v58 = vpop.f32.mrf.mxu1  ;;  %v5461_v26 = vrot.slane %v11646_v15, 6  ;;  %v11648_v61 = vld [vmem:[#allocation28_spill] sm:$0xff] }
 0x507   :  { %v5267_v6 = vadd.f32 %v5197_v58, %v10351_v2  ;;  %v5318_v35 = vsel %vm2421_vm6, %v5315_v40, %v5317_v30 }
 0x508   :  { %6578 = vmatmul.msk.f32.gmra.mxu0 %vm216_vm2, %v4996_v54  ;;  %v5462_v22 = vsel %vm2421_vm6, %v5459_v63, %v5461_v26 }
 0x509   :  { %6597 = vmatmul.msk.f32.gmra.mxu1 %vm216_vm2, %v5140_v51  ;;  %6614 = vmatmul.msk.f32.gmra.mxu2 %vm216_vm2, %v5316_v19 }
 0x50a   :  { %6633 = vmatmul.msk.f32.gmra.mxu3 %vm216_vm2, %v5460_v1 }
 0x50c   :  { %v4840_v11 = vpop.f32.mrf.mxu2 }
 0x50d   :  { %v10638_v39 = vadd.f32 %v4840_v11, %v4743_v7  ;;  %v4921_v9 = vpop.f32.mrf.mxu3  ;;  %v5056_v37 = vpop.f32.mrf.mxu0  ;;  %v5319_v7 = vrot.slane %v11647_v3, 6  ;;  %v5464_v3 = vsel %vm2421_vm6, %v5461_v26, %v5463_v13  ;;  %v11649_v11 = vld [vmem:[#allocation17_spill] sm:$0xff] }
 0x50e   :  { %v10640_v2 = vadd.f32 %v4921_v9, %v4761_v46  ;;  %v5250_v34 = vadd.f32 %v5056_v37, %v10366_v48  ;;  %v5200_v0 = vpop.f32.mrf.mxu1  ;;  %v6707_v48 = vld [vmem:[%s10825_s4 + $0x38] sm:$0xff] }
 0x50f   :  { %v5268_v53 = vadd.f32 %v5200_v0, %v10369_v8  ;;  %v5320_v32 = vsel %vm2421_vm6, %v5317_v30, %v5319_v7  ;;  %5815 = vmatpush.bf16.msrb.mxu0 %v6707_v48  ;;  %v11650_v37 = vld [vmem:[#allocation20_spill] sm:$0xff] }
 0x511   :  { %6615 = vmatmul.msk.f32.gmra.mxu2 %vm216_vm2, %v5318_v35 }
 0x512   :  { %6634 = vmatmul.msk.f32.gmra.mxu3 %vm216_vm2, %v5462_v22 }
 0x514   :  { %v5374_v15 = vpop.f32.mrf.mxu2 }
 0x515   :  { %v5572_v46 = vadd.f32 %v5374_v15, %v5248_v21  ;;  %v5518_v33 = vpop.f32.mrf.mxu3  ;;  %v5059_v17 = vpop.f32.mrf.mxu0 }
 0x516   :  { %v5590_v40 = vadd.f32 %v5518_v33, %v5266_v41  ;;  %v5251_v8 = vadd.f32 %v5059_v17, %v10384_v59  ;;  %v5203_v63 = vpop.f32.mrf.mxu1 }
 0x517   :  { %v5269_v29 = vadd.f32 %v5203_v63, %v10387_v45  ;;  %v5608_v21 = vmax.f32 %v5572_v46, %v11648_v61 }
 0x518   :  { %v5626_v59 = vmax.f32 %v5590_v40, %v11648_v61 }
 0x519   :  { %6616 = vmatmul.msk.f32.gmra.mxu2 %vm216_vm2, %v5320_v32  ;;  %v5644_v9 = vmul.f32 %v5608_v21, %v11649_v11  ;;  %v11651_v32 = vld [vmem:[#allocation58_spill] sm:$0xff] }
 0x51a   :  { %6635 = vmatmul.msk.f32.gmra.mxu3 %vm216_vm2, %v5464_v3 }
 0x51c   :  { %v5377_v24 = vpop.f32.mrf.mxu2 }
 0x51d   :  { %v5573_v54 = vadd.f32 %v5377_v24, %v5249_v42  ;;  %v5521_v58 = vpop.f32.mrf.mxu3  ;;  %v5062_v41 = vpop.f32.mrf.mxu0  ;;  %v5662_v42 = vmul.f32 %v5626_v59, %v11649_v11 }
 0x51e   :  { %v5591_v51 = vadd.f32 %v5521_v58, %v5267_v6  ;;  %v5252_v19 = vadd.f32 %v5062_v41, %v10402_v36  ;;  %v5206_v1 = vpop.f32.mrf.mxu1  ;;  %v6706_v36 = vld [vmem:[%s10825_s4 + $0x30] sm:$0xff] }
 0x51f   :  { %v5609_v45 = vmax.f32 %v5573_v54, %v11648_v61  ;;  %v5270_v30 = vadd.f32 %v5206_v1, %v10405_v12  ;;  %5816 = vmatpush.bf16.msrb.mxu0 %v6706_v36  ;;  %v11653_v36 = vld [vmem:[#allocation10_spill] sm:$0xff] }
 0x520   :  { %v5627_v26 = vmax.f32 %v5591_v51, %v11648_v61 }
 0x521   :  { %v5645_v0 = vmul.f32 %v5609_v45, %v11650_v37 }
 0x522   :  { %v5663_v35 = vmul.f32 %v5627_v26, %v11650_v37  ;;  %v11652_v26 = vld [vmem:[#allocation59_spill] sm:$0xff] }
 0x523   :  { %v5680_v22 = vadd.f32 %v5645_v0, %v5644_v9 }
 0x524   :  { %v5703_v7 = vadd.f32 %v5663_v35, %v5662_v42  ;;  %v5380_v6 = vpop.f32.mrf.mxu2 }
 0x525   :  { %v5574_v13 = vadd.f32 %v5380_v6, %v5250_v34  ;;  %v5524_v15 = vpop.f32.mrf.mxu3  ;;  %v5065_v12 = vpop.f32.mrf.mxu0 }
 0x526   :  { %v5592_v48 = vadd.f32 %v5524_v15, %v5268_v53  ;;  %v5253_v46 = vadd.f32 %v5065_v12, %v10420_v14  ;;  %v5209_v33 = vpop.f32.mrf.mxu1 }
 0x527   :  { %v5610_v17 = vmax.f32 %v5574_v13, %v11648_v61  ;;  %v5271_v40 = vadd.f32 %v5209_v33, %v10423_v43  ;;  %v6705_v33 = vld [vmem:[%s10825_s4 + $0x28] sm:$0xff] }
 0x528   :  { %v5628_v63 = vmax.f32 %v5592_v48, %v11648_v61  ;;  %5817 = vmatpush.bf16.msrb.mxu0 %v6705_v33 }
 0x529   :  { %v5646_v3 = vmul.f32 %v5610_v17, %v11651_v32 }
 0x52a   :  { %v5664_v24 = vmul.f32 %v5628_v63, %v11651_v32 }
 0x52b   :  { %v5681_v21 = vadd.f32 %v5680_v22, %v5646_v3 }
 0x52c   :  { %v5704_v54 = vadd.f32 %v5703_v7, %v5664_v24  ;;  %v5383_v34 = vpop.f32.mrf.mxu2 }
 0x52d   :  { %v5575_v58 = vadd.f32 %v5383_v34, %v5251_v8  ;;  %v5527_v41 = vpop.f32.mrf.mxu3  ;;  %v5068_v53 = vpop.f32.mrf.mxu0 }
 0x52e   :  { %v5593_v59 = vadd.f32 %v5527_v41, %v5269_v29  ;;  %v5254_v14 = vadd.f32 %v5068_v53, %v10438_v25  ;;  %v5212_v51 = vpop.f32.mrf.mxu1 }
 0x52f   :  { %v5611_v1 = vmax.f32 %v5575_v58, %v11648_v61  ;;  %v5272_v43 = vadd.f32 %v5212_v51, %v10441_v49 }
 0x530   :  { %v5629_v45 = vmax.f32 %v5593_v59, %v11648_v61 }
 0x531   :  { %v5647_v11 = vmul.f32 %v5611_v1, %v11652_v26 }
 0x532   :  { %v5665_v9 = vmul.f32 %v5629_v45, %v11652_v26  ;;  %v11655_v26 = vld [vmem:[#allocation13_spill] sm:$0xff] }
 0x533   :  { %v5682_v37 = vadd.f32 %v5681_v21, %v5647_v11  ;;  %v11654_v21 = vld [vmem:[#allocation12_spill] sm:$0xff] }
 0x534   :  { %v5705_v0 = vadd.f32 %v5704_v54, %v5665_v9  ;;  %v5386_v42 = vpop.f32.mrf.mxu2 }
 0x535   :  { %v5576_v8 = vadd.f32 %v5386_v42, %v5252_v19  ;;  %v5530_v35 = vpop.f32.mrf.mxu3  ;;  %v5071_v22 = vpop.f32.mrf.mxu0 }
 0x536   :  { %v5594_v29 = vadd.f32 %v5530_v35, %v5270_v30  ;;  %v5215_v7 = vpop.f32.mrf.mxu1 }
 0x537   :  { %v5612_v25 = vmax.f32 %v5576_v8, %v11648_v61  ;;  %v5273_v8 = vadd.f32 %v5215_v7, %v10459_v27 }
 0x538   :  { %v5630_v6 = vmax.f32 %v5594_v29, %v11648_v61 }
 0x539   :  { %v5648_v49 = vmul.f32 %v5612_v25, %v11653_v36 }
 0x53a   :  { %v5666_v13 = vmul.f32 %v5630_v6, %v11653_v36 }
 0x53b   :  { %v5683_v15 = vadd.f32 %v5682_v37, %v5648_v49 }
 0x53c   :  { %v5706_v12 = vadd.f32 %v5705_v0, %v5666_v13  ;;  %v5389_v48 = vpop.f32.mrf.mxu2  ;;  %v5255_v0 = vadd.f32 %v5071_v22, %v10456_v18  ;;  %v11656_v13 = vld [vmem:[#allocation54_spill] sm:$0xff] }
 0x53d   :  { %v5577_v19 = vadd.f32 %v5389_v48, %v5253_v46  ;;  %v5533_v17 = vpop.f32.mrf.mxu3  ;;  %v5074_v30 = vpop.f32.mrf.mxu0 }
 0x53e   :  { %v5595_v63 = vadd.f32 %v5533_v17, %v5271_v40  ;;  %v5218_v3 = vpop.f32.mrf.mxu1  ;;  %v5256_v27 = vadd.f32 %v5074_v30, %v10474_v16 }
 0x53f   :  { %v5613_v32 = vmax.f32 %v5577_v19, %v11648_v61  ;;  %v5274_v48 = vadd.f32 %v5218_v3, %v10477_v4 }
 0x540   :  { %v5631_v24 = vmax.f32 %v5595_v63, %v11648_v61 }
 0x541   :  { %v5649_v54 = vmul.f32 %v5613_v32, %v11654_v21 }
 0x542   :  { %v5667_v34 = vmul.f32 %v5631_v24, %v11654_v21 }
 0x543   :  { %v5684_v58 = vadd.f32 %v5683_v15, %v5649_v54  ;;  %v11657_v54 = vld [vmem:[#allocation57_spill] sm:$0xff] }
 0x544   :  { %v5707_v41 = vadd.f32 %v5706_v12, %v5667_v34  ;;  %v5392_v53 = vpop.f32.mrf.mxu2 }
 0x545   :  { %v5578_v59 = vadd.f32 %v5392_v53, %v5254_v14  ;;  %v5536_v51 = vpop.f32.mrf.mxu3  ;;  %v5077_v45 = vpop.f32.mrf.mxu0  ;;  %v6704_v14 = vld [vmem:[%s10825_s4 + $0x20] sm:$0xff] }
 0x546   :  { %v5596_v1 = vadd.f32 %v5536_v51, %v5272_v43  ;;  %v5221_v9 = vpop.f32.mrf.mxu1  ;;  %5818 = vmatpush.bf16.msrb.mxu0 %v6704_v14 }
 0x547   :  { %v5614_v46 = vmax.f32 %v5578_v59, %v11648_v61  ;;  %v5275_v30 = vadd.f32 %v5221_v9, %v10495_v55  ;;  %v6703_v59 = vld [vmem:[%s10825_s4 + $0x18] sm:$0xff] }
 0x548   :  { %v5632_v40 = vmax.f32 %v5596_v1, %v11648_v61 }
 0x549   :  { %v5650_v11 = vmul.f32 %v5614_v46, %v11655_v26 }
 0x54a   :  { %v5668_v37 = vmul.f32 %v5632_v40, %v11655_v26  ;;  %5819 = vmatpush.bf16.msrb.mxu0 %v6703_v59  ;;  %v11661_v59 = vld [vmem:[#allocation38_spill] sm:$0xff] }
 0x54b   :  { %v5685_v42 = vadd.f32 %v5684_v58, %v5650_v11 }
 0x54c   :  { %v5708_v35 = vadd.f32 %v5707_v41, %v5668_v37  ;;  %v5395_v29 = vpop.f32.mrf.mxu2  ;;  %v5257_v41 = vadd.f32 %v5077_v45, %v10492_v23  ;;  %v11658_v23 = vld [vmem:[#allocation61_spill] sm:$0xff] }
 0x54d   :  { %v5579_v43 = vadd.f32 %v5395_v29, %v5255_v0  ;;  %v5539_v25 = vpop.f32.mrf.mxu3  ;;  %v5080_v22 = vpop.f32.mrf.mxu0 }
 0x54e   :  { %v5597_v6 = vadd.f32 %v5539_v25, %v5273_v8  ;;  %v5224_v12 = vpop.f32.mrf.mxu1  ;;  %v5258_v9 = vadd.f32 %v5080_v22, %v10512_v10 }
 0x54f   :  { %v5615_v36 = vmax.f32 %v5579_v43, %v11648_v61  ;;  %v5276_v0 = vadd.f32 %v5224_v12, %v10515_v20 }
 0x550   :  { %v5633_v49 = vmax.f32 %v5597_v6, %v11648_v61 }
 0x551   :  { %v5651_v15 = vmul.f32 %v5615_v36, %v11656_v13 }
 0x552   :  { %v5669_v18 = vmul.f32 %v5633_v49, %v11656_v13  ;;  %v11659_v49 = vld [vmem:[#allocation66_spill] sm:$0xff] }
 0x553   :  { %v5686_v7 = vadd.f32 %v5685_v42, %v5651_v15 }
 0x554   :  { %v5709_v33 = vadd.f32 %v5708_v35, %v5669_v18  ;;  %v5398_v19 = vpop.f32.mrf.mxu2 }
 0x555   :  { %v5580_v17 = vadd.f32 %v5398_v19, %v5256_v27  ;;  %v5542_v63 = vpop.f32.mrf.mxu3  ;;  %v5083_v4 = vpop.f32.mrf.mxu0 }
 0x556   :  { %v5598_v32 = vadd.f32 %v5542_v63, %v5274_v48  ;;  %v5227_v51 = vpop.f32.mrf.mxu1  ;;  %v5259_v10 = vadd.f32 %v5083_v4, %v10530_v56  ;;  %v11660_v56 = vld [vmem:[#allocation67_spill] sm:$0xff] }
 0x557   :  { %v5616_v24 = vmax.f32 %v5580_v17, %v11648_v61  ;;  %v5277_v20 = vadd.f32 %v5227_v51, %v10533_v44 }
 0x558   :  { %v5634_v21 = vmax.f32 %v5598_v32, %v11648_v61 }
 0x559   :  { %v5652_v34 = vmul.f32 %v5616_v24, %v11657_v54 }
 0x55a   :  { %v5670_v58 = vmul.f32 %v5634_v21, %v11657_v54 }
 0x55b   :  { %v5687_v16 = vadd.f32 %v5686_v7, %v5652_v34  ;;  %v6702_v7 = vld [vmem:[%s10825_s4 + $0x10] sm:$0xff] }
 0x55c   :  { %v5710_v53 = vadd.f32 %v5709_v33, %v5670_v58  ;;  %v5401_v3 = vpop.f32.mrf.mxu2  ;;  %5820 = vmatpush.bf16.msrb.mxu0 %v6702_v7 }
 0x55d   :  { %v5581_v1 = vadd.f32 %v5401_v3, %v5257_v41  ;;  %v5545_v46 = vpop.f32.mrf.mxu3  ;;  %v5086_v14 = vpop.f32.mrf.mxu0 }
 0x55e   :  { %v5599_v40 = vadd.f32 %v5545_v46, %v5275_v30  ;;  %v5230_v25 = vpop.f32.mrf.mxu1  ;;  %v5260_v21 = vadd.f32 %v5086_v14, %v10548_v60 }
 0x55f   :  { %v5617_v26 = vmax.f32 %v5581_v1, %v11648_v61  ;;  %v5278_v34 = vadd.f32 %v5230_v25, %v10551_v50 }
 0x560   :  { %v5635_v11 = vmax.f32 %v5599_v40, %v11648_v61 }
 0x561   :  { %v5653_v45 = vmul.f32 %v5617_v26, %v11658_v23 }
 0x562   :  { %v5671_v55 = vmul.f32 %v5635_v11, %v11658_v23 }
 0x563   :  { %v5688_v37 = vadd.f32 %v5687_v16, %v5653_v45 }
 0x564   :  { %v5711_v42 = vadd.f32 %v5710_v53, %v5671_v55  ;;  %v5404_v8 = vpop.f32.mrf.mxu2 }
 0x565   :  { %v5582_v35 = vadd.f32 %v5404_v8, %v5258_v9  ;;  %v5548_v29 = vpop.f32.mrf.mxu3  ;;  %v5089_v17 = vpop.f32.mrf.mxu0 }
 0x566   :  { %v5600_v43 = vadd.f32 %v5548_v29, %v5276_v0  ;;  %v5233_v32 = vpop.f32.mrf.mxu1  ;;  %v5261_v40 = vadd.f32 %v5089_v17, %v10568_v31 }
 0x567   :  { %v5618_v6 = vmax.f32 %v5582_v35, %v11648_v61  ;;  %v5279_v50 = vadd.f32 %v5233_v32, %v10571_v62 }
 0x568   :  { %v5636_v36 = vmax.f32 %v5600_v43, %v11648_v61 }
 0x569   :  { %v5654_v13 = vmul.f32 %v5618_v6, %v11659_v49 }
 0x56a   :  { %v5672_v15 = vmul.f32 %v5636_v36, %v11659_v49 }
 0x56b   :  { %v5689_v18 = vadd.f32 %v5688_v37, %v5654_v13 }
 0x56c   :  { %v5712_v22 = vadd.f32 %v5711_v42, %v5672_v15  ;;  %v5407_v27 = vpop.f32.mrf.mxu2  ;;  %v11662_v42 = vld [vmem:[#allocation68_spill] sm:$0xff] }
 0x56d   :  { %v5583_v12 = vadd.f32 %v5407_v27, %v5259_v10  ;;  %v5551_v48 = vpop.f32.mrf.mxu3  ;;  %v5092_v1 = vpop.f32.mrf.mxu0 }
 0x56e   :  { %v5601_v33 = vadd.f32 %v5551_v48, %v5277_v20  ;;  %v5236_v60 = vpop.f32.mrf.mxu1  ;;  %v5262_v29 = vadd.f32 %v5092_v1, %v10586_v5 }
 0x56f   :  { %v5619_v19 = vmax.f32 %v5583_v12, %v11648_v61  ;;  %v5280_v14 = vadd.f32 %v5236_v60, %v10589_v52  ;;  %v11666_v60 = vld [vmem:[#allocation52_spill] sm:$0xff] }
 0x570   :  { %v5637_v63 = vmax.f32 %v5601_v33, %v11648_v61 }
 0x571   :  { %v5655_v24 = vmul.f32 %v5619_v19, %v11660_v56 }
 0x572   :  { %v5673_v44 = vmul.f32 %v5637_v63, %v11660_v56 }
 0x573   :  { %v5690_v54 = vadd.f32 %v5689_v18, %v5655_v24  ;;  %v11663_v18 = vld [vmem:[#allocation46_spill] sm:$0xff]  ;;  %v11664_v24 = vld [vmem:[#allocation15_spill] sm:$0xff] }
 0x574   :  { %v5713_v58 = vadd.f32 %v5712_v22, %v5673_v44  ;;  %v5410_v41 = vpop.f32.mrf.mxu2 }
 0x575   :  { %v5584_v16 = vadd.f32 %v5410_v41, %v5260_v21  ;;  %v5554_v30 = vpop.f32.mrf.mxu3  ;;  %v5095_v43 = vpop.f32.mrf.mxu0 }
 0x576   :  { %v5602_v53 = vadd.f32 %v5554_v30, %v5278_v34  ;;  %v5239_v6 = vpop.f32.mrf.mxu1  ;;  %v5263_v5 = vadd.f32 %v5095_v43, %v10604_v28 }
 0x577   :  { %v5620_v4 = vmax.f32 %v5584_v16, %v11648_v61  ;;  %v5281_v52 = vadd.f32 %v5239_v6, %v10607_v38 }
 0x578   :  { %v5638_v3 = vmax.f32 %v5602_v53, %v11648_v61 }
 0x579   :  { %v5656_v51 = vmul.f32 %v5620_v4, %v11661_v59 }
 0x57a   :  { %v5674_v46 = vmul.f32 %v5638_v3, %v11661_v59  ;;  %v6701_v59 = vld [vmem:[%s10825_s4 + $0x8] sm:$0xff] }
 0x57b   :  { %v5691_v26 = vadd.f32 %v5690_v54, %v5656_v51  ;;  %5821 = vmatpush.bf16.msrb.mxu0 %v6701_v59 }
 0x57c   :  { %v5714_v11 = vadd.f32 %v5713_v58, %v5674_v46  ;;  %v5413_v23 = vpop.f32.mrf.mxu2 }
 0x57d   :  { %v5585_v45 = vadd.f32 %v5413_v23, %v5261_v40  ;;  %v5557_v55 = vpop.f32.mrf.mxu3  ;;  %v5098_v19 = vpop.f32.mrf.mxu0  ;;  %v6700_v40 = vld [vmem:[%s10825_s4] sm:$0xff]  ;;  %v11667_v23 = vld [vmem:[#allocation74_spill] sm:$0xff] }
 0x57e   :  { %v5603_v9 = vadd.f32 %v5557_v55, %v5279_v50  ;;  %v5242_v63 = vpop.f32.mrf.mxu1  ;;  %v5264_v28 = vadd.f32 %v5098_v19, %v10622_v47  ;;  %v6715_v47 = vld [vmem:[%s10827_s6 + $0x38] sm:$0xff] }
 0x57f   :  { %v5621_v37 = vmax.f32 %v5585_v45, %v11648_v61  ;;  %v5282_v38 = vadd.f32 %v5242_v63, %v10625_v57  ;;  %v11665_v57 = vld [vmem:[#allocation71_spill] sm:$0xff]  ;;  %5898 = vmatpush.bf16.msrb.mxu1 %v6715_v47  ;;  %v2954_v45 = vrot.slane %v11667_v23, 4  ;;  %5822 = vmatpush.bf16.msrb.mxu0 %v6700_v40 }
 0x580   :  { %v5639_v0 = vmax.f32 %v5603_v9, %v11648_v61 }
 0x581   :  { %v5657_v8 = vmul.f32 %v5621_v37, %v11662_v42 }
 0x582   :  { %v5675_v35 = vmul.f32 %v5639_v0, %v11662_v42 }
 0x583   :  { %v5692_v31 = vadd.f32 %v5691_v26, %v5657_v8  ;;  %v2931_v26 = vrot.slane %v11666_v60, 4 }
 0x584   :  { %v5715_v62 = vadd.f32 %v5714_v11, %v5675_v35  ;;  %v5416_v25 = vpop.f32.mrf.mxu2 }
 0x585   :  { %v5586_v36 = vadd.f32 %v5416_v25, %v5262_v29  ;;  %v5560_v49 = vpop.f32.mrf.mxu3  ;;  %v5101_v4 = vpop.f32.mrf.mxu0  ;;  %v2932_v35 = vadd.f32 %v2931_v26, %v11666_v60 }
 0x586   :  { %v5604_v13 = vadd.f32 %v5560_v49, %v5280_v14  ;;  %v5245_v51 = vpop.f32.mrf.mxu1  ;;  %v5265_v50 = vadd.f32 %v5101_v4, %v10638_v39  ;;  %v11668_v39 = vld [vmem:[#allocation73_spill] sm:$0xff] }
 0x587   :  { %v5622_v15 = vmax.f32 %v5586_v36, %v11648_v61  ;;  %v5283_v55 = vadd.f32 %v5245_v51, %v10640_v2  ;;  %v6714_v2 = vld [vmem:[%s10827_s6 + $0x30] sm:$0xff]  ;;  %v2933_v25 = vrot.slane %v2932_v35, 2  ;;  %v6713_v36 = vld [vmem:[%s10827_s6 + $0x28] sm:$0xff] }
 0x588   :  { %v5640_v10 = vmax.f32 %v5604_v13, %v11648_v61  ;;  %5899 = vmatpush.bf16.msrb.mxu1 %v6714_v2 }
 0x589   :  { %v5658_v20 = vmul.f32 %v5622_v15, %v11663_v18 }
 0x58a   :  { %v5676_v22 = vmul.f32 %v5640_v10, %v11663_v18 }
 0x58b   :  { %v5693_v27 = vadd.f32 %v5692_v31, %v5658_v20  ;;  %v2955_v31 = vadd.f32 %v2954_v45, %v11667_v23  ;;  %v6712_v20 = vld [vmem:[%s10827_s6 + $0x20] sm:$0xff] }
 0x58c   :  { %v5716_v7 = vadd.f32 %v5715_v62, %v5676_v22  ;;  %v5419_v12 = vpop.f32.mrf.mxu2  ;;  %5900 = vmatpush.bf16.msrb.mxu1 %v6713_v36  ;;  %v6944_v23 = vld [vmem:[%s10828_s7] ss:$0 sm:$0xff] }
 0x58d   :  { %v5587_v48 = vadd.f32 %v5419_v12, %v5263_v5  ;;  %v5563_v33 = vpop.f32.mrf.mxu3  ;;  %v2956_v49 = vrot.slane %v2955_v31, 2 }
 0x58e   :  { %v5605_v17 = vadd.f32 %v5563_v33, %v5281_v52 }
 0x58f   :  { %v5623_v32 = vmax.f32 %v5587_v48, %v11648_v61  ;;  %v2957_v22 = vadd.f32 %v2956_v49, %v2955_v31  ;;  %v6711_v48 = vld [vmem:[%s10827_s6 + $0x18] sm:$0xff] }
 0x590   :  { %v5641_v56 = vmax.f32 %v5605_v17, %v11648_v61  ;;  %5901 = vmatpush.bf16.msrb.mxu1 %v6712_v20 }
 0x591   :  { %v5659_v44 = vmul.f32 %v5623_v32, %v11664_v24  ;;  %v2958_v33 = vrot.slane %v2957_v22, 1 }
 0x592   :  { %v5677_v21 = vmul.f32 %v5641_v56, %v11664_v24  ;;  %v6710_v24 = vld [vmem:[%s10827_s6 + $0x10] sm:$0xff] }
 0x593   :  { %v5694_v54 = vadd.f32 %v5693_v27, %v5659_v44  ;;  %v2959_v44 = vadd.f32 %v2958_v33, %v2957_v22 }
 0x594   :  { %v5717_v34 = vadd.f32 %v5716_v7, %v5677_v21  ;;  %v5422_v58 = vpop.f32.mrf.mxu2  ;;  %5902 = vmatpush.bf16.msrb.mxu1 %v6711_v48 }
 0x595   :  { %v5588_v41 = vadd.f32 %v5422_v58, %v5264_v28  ;;  %v5566_v16 = vpop.f32.mrf.mxu3  ;;  %v6709_v58 = vld [vmem:[%s10827_s6 + $0x8] sm:$0xff] }
 0x596   :  { %v5606_v30 = vadd.f32 %v5566_v16, %v5282_v38 }
 0x597   :  { %v5624_v53 = vmax.f32 %v5588_v41, %v11648_v61 }
 0x598   :  { %v5642_v3 = vmax.f32 %v5606_v30, %v11648_v61  ;;  %5903 = vmatpush.bf16.msrb.mxu1 %v6710_v24 }
 0x599   :  { %v5660_v1 = vmul.f32 %v5624_v53, %v11665_v57  ;;  %v6708_v53 = vld [vmem:[%s10827_s6] sm:$0xff] }
 0x59a   :  { %v5678_v46 = vmul.f32 %v5642_v3, %v11665_v57 }
 0x59b   :  { %v5695_v11 = vadd.f32 %v5694_v54, %v5660_v1  ;;  %v6942_v54 = vld [vmem:[%s10823_s2] ss:$0 sm:$0xff] }
 0x59c   :  { %v5718_v9 = vadd.f32 %v5717_v34, %v5678_v46  ;;  %v5425_v37 = vpop.f32.mrf.mxu2  ;;  %5904 = vmatpush.bf16.msrb.mxu1 %v6709_v58  ;;  %v6943_v46 = vld [vmem:[%s10826_s5] ss:$0 sm:$0xff]  ;;  %s6987_s5 = smov [#allocation2]  }
 0x59d   :  { %v5589_v0 = vadd.f32 %v5425_v37, %v5265_v50  ;;  %v5569_v42 = vpop.f32.mrf.mxu3  ;;  %s5933_s7 = sshll.u32 %s6987_s5, 4  ;;  %s5934_s7 = int_to_ptr.vmem [resolvable:$true] %s5933_s7 }
 0x59e   :  { %v5607_v8 = vadd.f32 %v5569_v42, %v5283_v55 }
 0x59f   :  { %v5625_v29 = vmax.f32 %v5589_v0, %v11648_v61 }
 0x5a0   :  { %v5643_v14 = vmax.f32 %v5607_v8, %v11648_v61  ;;  %v2934_v61 = vadd.f32 %v2933_v25, %v2932_v35  ;;  %5905 = vmatpush.bf16.msrb.mxu1 %v6708_v53 }
 0x5a1   :  { %v5661_v43 = vmul.f32 %v5625_v29, %v11668_v39 }
 0x5a2   :  { %v5679_v62 = vmul.f32 %v5643_v14, %v11668_v39  ;;  %v2935_v7 = vrot.slane %v2934_v61, 1 }
 0x5a3   :  { %v5696_v6 = vadd.f32 %v5695_v11, %v5661_v43 }
 0x5a4   :  { %v5719_v13 = vadd.f32 %v5718_v9, %v5679_v62  ;;  %v2936_v32 = vadd.f32 %v2935_v7, %v2934_v61 }
 0x5a5   :  { %v5697_v15 = vrot.slane %v5696_v6, 4 }
 0x5a6   :  { %v5720_v10 = vrot.slane %v5719_v13, 4 }
 0x5a7   :  { %v5698_v18 = vadd.f32 %v5697_v15, %v5696_v6 }
 0x5a8   :  { %v5721_v5 = vadd.f32 %v5720_v10, %v5719_v13 }
 0x5a9   :  { %v5699_v27 = vrot.slane %v5698_v18, 2 }
 0x5aa   :  { %v5722_v52 = vrot.slane %v5721_v5, 2 }
 0x5ab   :  { %v5700_v12 = vadd.f32 %v5699_v27, %v5698_v18 }
 0x5ac   :  { %v5723_v19 = vadd.f32 %v5722_v52, %v5721_v5 }
 0x5ad   :  { %v5701_v17 = vrot.slane %v5700_v12, 1 }
 0x5ae   :  { %v5724_v63 = vrot.slane %v5723_v19, 1 }
 0x5af   :  { %v5702_v56 = vadd.f32 %v5701_v17, %v5700_v12 }
 0x5b0   :  { %v5725_v21 = vadd.f32 %v5724_v63, %v5723_v19 }
 0x5b1   :  { %v5726_v28 = vadd.f32 %v5702_v56, %v2936_v32 }
 0x5b2   :  { %v5727_v38 = vadd.f32 %v5725_v21, %v2959_v44 }
 0x5b3   :  { %v5728_v34 = vmul.f32 0.00390625, %v5726_v28 }
 0x5b4   :  { %v5729_v41 = vmul.f32 0.00390625, %v5727_v38 }
 0x5b5   :  { %v5734_v16 = vadd.f32 %v6942_v54, %v5728_v34 }
 0x5b6   :  { %v5735_v30 = vadd.f32 %v6942_v54, %v5729_v41 }
 0x5b7   :  { %v5736_v3 = vpack.c.bf16 %v5734_v16, %v5734_v16 }
 0x5b8   :  { %v5737_v4 = vpack.c.bf16 %v5735_v30, %v5735_v30 }
 0x5b9   :  { %v5760_v47 = vunpack.c.l.b16 %v5736_v3 }
 0x5ba   :  { %v5761_v59 = vunpack.c.l.b16 %v5737_v4 }
 0x5bc   :  { %v5762_v51 = vrot.slane %v5761_v59, 7 }
 0x5be   :  { %v5764_v57 = vsel %vm5763_vm7, %v5762_v51, %v5760_v47 }
 0x5bf   :  { %v5765_v1 = vpack.c.b16 %v5764_v57, %v5764_v57 }
 0x5c1   :  { %5823 = vmatmul.bf16.vlgmr.msrb.gmra.mxu0 %v5765_v1 }
 0x63e   :  { %v5824_v40 = vpop.f32.mrf.mxu0 }
 0x63f   :  { %v5825_v60 = vadd.f32 %v6943_v46, %v5824_v40 }
 0x641   :  { %v5828_v26 = vmax.f32 %v5825_v60, 0.0 }
 0x643   :  { %v5829_v50 = vpack.c.bf16 %v5828_v26, %v5828_v26 }
 0x645   :  { %5906 = vmatmul.bf16.vlgmr.msrb.gmra.mxu1 %v5829_v50 }
 0x646   :  { %v5826_v11 = vpop.f32.mrf.mxu0 }
 0x6c2   :  { %v5907_v45 = vpop.f32.mrf.mxu1 }
 0x6c3   :  { %v5908_v55 = vadd.f32 %v6944_v23, %v5907_v45 }
 0x6c5   :  { %v5911_v9 = vmul.f32 %v5908_v55, %v5908_v55 }
 0x6c7   :  { %v5912_v37 = vsel %vm2421_vm6, %v5911_v9, 0.0 }
 0x6c8   :  { %5913 = vadd.xlane.f32.xlu0 %v5912_v37 }
 0x6ca   :  { %v5909_v0 = vpop.f32.mrf.mxu1 }
 0x73b   :  { %v5914_v42 = vpop.xlane.xlu0 %5913 }
 0x73c   :  { %v5915_v8 = vmax.f32 %v5914_v42, 1e-24 }
 0x73e   :  { %6945 = vrsqrt.f32 %v5915_v8  ;;  %vm5922_vm9 = vweird.f32 %v5915_v8 }
 0x744   :  { %v6946_v35 = vpop.eup %6945 }
 0x745   :  { %v5917_v29 = vmul.f32 %v6946_v35, %v5915_v8  ;;  %vm5923_vm8 = vweird.f32 %v6946_v35 }
 0x746   :  { %vm5924_vm10 = vmor %vm5922_vm9, %vm5923_vm8 }
 0x747   :  { %v5918_v31 = vmul.f32 %v6946_v35, %v5917_v29 }
 0x749   :  { %v5919_v14 = vmul.f32 0.5, %v5918_v31 }
 0x74b   :  { %v5920_v39 = vsub.f32 1.5, %v5919_v14 }
 0x74d   :  { %v5921_v43 = vmul.f32 %v6946_v35, %v5920_v39 }
 0x74f   :  { %v5925_v2 = vsel %vm5924_vm10, %v6946_v35, %v5921_v43 }
 0x750   :  { %v5926_v62 = vmul.f32 %v5925_v2, %v5908_v55 }
 0x752   :  { %5927 = vst [vmem:[#allocation2] sm:$0x3] %v5926_v62 }
 0x753   :  { %5938 = dma.vmem_to_hbm [thread:$0]  %s5934_s7, 32, %s5936_s15, [#allocation3]  }
 0x754   :  { %6984 = dma.done.wait [#allocation3], 32  }
 0x755   :  { %6985 = vsyncadd [#allocation3], 4294967264 }
 0x756   :  { %5943 = vsyncpa [#allocation3], 1 }

</bundles_post_ra>
